<compile_context>
chip_gen: v5e
topology: v5e:2x2
jax: 0.10.0
libtpu: 0.0.40
codegen_flags: <defaults>
</compile_context>

<pallas_src>
import functools

import numpy as np

import jax
import jax.numpy as jnp
from jax.experimental import pallas as pl
from jax.experimental.pallas import tpu as pltpu

_TILE = 128                       # row / neighbor tile; N is padded to this
_VMEM_LIMIT = 32 * 1024 * 1024    # explicit scoped-VMEM budget (safe on v5e/v6e/v7x)


def _round_up(n, m):
    return ((n + m - 1) // m) * m


# ---------------------------------------------------------------------------
# Kernel 1: fused multi-head projection  h = x @ W_all, f1 = h @ A1, f2 = h @ A2
# ---------------------------------------------------------------------------
def _project_kernel(x_ref, w_ref, a1_ref, a2_ref, h_ref, f1_ref, f2_ref):
    h = jnp.dot(x_ref[...].astype(jnp.bfloat16),
                w_ref[...].astype(jnp.bfloat16),
                preferred_element_type=jnp.float32)            # (TM, Dtot) f32
    h_ref[...] = h
    # Tiny (Dtot x H) matmuls, kept in f32 straight off the f32 accumulator.
    f1_ref[...] = jnp.dot(h, a1_ref[...], preferred_element_type=jnp.float32)
    f2_ref[...] = jnp.dot(h, a2_ref[...], preferred_element_type=jnp.float32)


def gat_project(x, w_all, a1, a2, *, tm=_TILE):
    n, fin = x.shape
    dtot = w_all.shape[1]
    nheads = a1.shape[1]
    return pl.pallas_call(
        _project_kernel,
        out_shape=(
            jax.ShapeDtypeStruct((n, dtot), jnp.float32),
            jax.ShapeDtypeStruct((n, nheads), jnp.float32),
            jax.ShapeDtypeStruct((n, nheads), jnp.float32),
        ),
        grid_spec=pltpu.PrefetchScalarGridSpec(
            num_scalar_prefetch=0,
            grid=(n // tm,),
            in_specs=[
                pl.BlockSpec((tm, fin), lambda i: (i, 0)),        # x row block
                pl.BlockSpec((fin, dtot), lambda i: (0, 0)),      # W_all
                pl.BlockSpec((dtot, nheads), lambda i: (0, 0)),   # A1 (blockdiag)
                pl.BlockSpec((dtot, nheads), lambda i: (0, 0)),   # A2 (blockdiag)
            ],
            out_specs=(
                pl.BlockSpec((tm, dtot), lambda i: (i, 0)),
                pl.BlockSpec((tm, nheads), lambda i: (i, 0)),
                pl.BlockSpec((tm, nheads), lambda i: (i, 0)),
            ),
        ),
        compiler_params=pltpu.CompilerParams(
            dimension_semantics=("parallel",),
            vmem_limit_bytes=_VMEM_LIMIT,
        ),
    )(x, w_all, a1, a2)


# ---------------------------------------------------------------------------
# Kernel 2: flash-style masked attention aggregation (all heads fused)
# ---------------------------------------------------------------------------
def _attn_kernel(f1_ref, f2t_ref, h_ref, mask_ref, out_ref, acc_ref, rs_ref,
                 *, alpha, nheads, fout):
    j = pl.program_id(1)

    @pl.when(j == 0)
    def _init():
        acc_ref[...] = jnp.zeros_like(acc_ref)
        rs_ref[...] = jnp.zeros_like(rs_ref)

    edge = mask_ref[...] != 0                        # (TM, TN) bool
    f1 = f1_ref[...]                                 # (TM, H)  f32
    f2t = f2t_ref[...]                               # (H, TN)  f32
    hn = h_ref[...].astype(jnp.bfloat16)             # (TN, H*fout)

    for hh in range(nheads):                         # static unroll (small H)
        z = f1[:, hh:hh + 1] + f2t[hh:hh + 1, :]            # (TM, TN)
        lrelu = jnp.where(z > 0, z, alpha * z)              # LeakyReLU(alpha)
        e = jnp.where(edge, jnp.exp(-lrelu), 0.0)           # masked edge_e (no inf*0)
        rs_ref[hh] += jnp.sum(e, axis=-1, keepdims=True)    # partial rowsum (TM,1)
        acc_ref[hh] += jnp.dot(e.astype(jnp.bfloat16),
                               hn[:, hh * fout:(hh + 1) * fout],
                               preferred_element_type=jnp.float32)

    @pl.when(j == pl.num_programs(1) - 1)
    def _finalize():
        for hh in range(nheads):
            # guard empty (e.g. padded) rows against 0/0
            inv = pl.reciprocal(jnp.maximum(rs_ref[hh], 1e-12), approx=True)
            hp = acc_ref[hh] * inv                            # (TM, fout)
            hp = jnp.where(hp > 0.0, hp, jnp.exp(hp) - 1.0)   # fused ELU
            out_ref[:, hh * fout:(hh + 1) * fout] = hp.astype(out_ref.dtype)


def gat_attention(f1, f2t, h, mask, *, nheads, fout, alpha, tm=_TILE, tn=_TILE):
    n = h.shape[0]
    dtot = nheads * fout
    kernel = functools.partial(_attn_kernel, alpha=alpha, nheads=nheads, fout=fout)
    cost = pl.CostEstimate(
        flops=2 * n * n * dtot + 8 * n * n * nheads,
        transcendentals=n * n * nheads,
        bytes_accessed=n * n + 2 * 4 * n * dtot + 3 * 4 * n * nheads,
    )
    return pl.pallas_call(
        kernel,
        out_shape=jax.ShapeDtypeStruct((n, dtot), jnp.float32),
        grid_spec=pltpu.PrefetchScalarGridSpec(
            num_scalar_prefetch=0,
            grid=(n // tm, n // tn),
            in_specs=[
                pl.BlockSpec((tm, nheads), lambda i, j: (i, 0)),   # f1 (row term)
                pl.BlockSpec((nheads, tn), lambda i, j: (0, j)),   # f2^T (col term)
                pl.BlockSpec((tn, dtot), lambda i, j: (j, 0)),     # neighbor h
                pl.BlockSpec((tm, tn), lambda i, j: (i, j)),       # int8 adj mask
            ],
            out_specs=pl.BlockSpec((tm, dtot), lambda i, j: (i, 0)),
            scratch_shapes=[
                pltpu.VMEM((nheads, tm, fout), jnp.float32),   # partial e @ h
                pltpu.VMEM((nheads, tm, 1), jnp.float32),      # partial rowsum
            ],
        ),
        compiler_params=pltpu.CompilerParams(
            dimension_semantics=("parallel", "arbitrary"),
            vmem_limit_bytes=_VMEM_LIMIT,
        ),
        cost_estimate=cost,
    )(f1, f2t, h, mask)


# ---------------------------------------------------------------------------
# Forward pass (eval mode: dropout == identity)
# ---------------------------------------------------------------------------
def gat_forward(x, adj, params, *, alpha=0.2):
    n = x.shape[0]
    npad = _round_up(n, _TILE)

    xp = jnp.pad(x, ((0, npad - n), (0, 0)))
    maskp = jnp.pad((adj != 0).astype(jnp.int8),
                    ((0, npad - n), (0, npad - n)))

    # --- multi-head attention layer (all heads fused, ELU fused in-kernel) ---
    w_all, a1, a2 = params["heads"]
    nheads = a1.shape[1]
    nhid = w_all.shape[1] // nheads
    h, f1, f2 = gat_project(xp, w_all, a1, a2)
    h1 = gat_attention(f1, f2.T, h, maskp, nheads=nheads, fout=nhid, alpha=alpha)

    # --- output attention layer (+ the trailing F.elu, fused in-kernel) ---
    wo, a1o, a2o = params["out"]
    nclass = wo.shape[1]
    h2, f1o, f2o = gat_project(h1, wo, a1o, a2o)
    out = gat_attention(f1o, f2o.T, h2, maskp, nheads=1, fout=nclass, alpha=alpha)
    return out[:n]


# ---------------------------------------------------------------------------
# Parameter init (matches pyGAT's xavier_normal_(gain=1.414) per head)
# ---------------------------------------------------------------------------
def _xavier_normal(key, shape, gain=1.414):
    fan_in, fan_out = shape[0], shape[1]
    std = gain * (2.0 / (fan_in + fan_out)) ** 0.5
    return std * jax.random.normal(key, shape, dtype=jnp.float32)


def init_gat_params(key, nfeat, nhid, nclass, nheads):
    keys = jax.random.split(key, 2 * nheads + 2)
    ws, a1c, a2c = [], [], []
    for i in range(nheads):
        w = _xavier_normal(keys[2 * i], (nfeat, nhid))
        a = _xavier_normal(keys[2 * i + 1], (1, 2 * nhid))
        ws.append(w)
        a1c.append(a[0, :nhid])
        a2c.append(a[0, nhid:])
    w_all = jnp.concatenate(ws, axis=1)                        # (nfeat, H*nhid)
    # block-diagonal stacks so f1/f2 for all heads come out of one matmul
    a1 = jnp.zeros((nheads * nhid, nheads), jnp.float32)
    a2 = jnp.zeros((nheads * nhid, nheads), jnp.float32)
    for i in range(nheads):
        a1 = a1.at[i * nhid:(i + 1) * nhid, i].set(a1c[i])
        a2 = a2.at[i * nhid:(i + 1) * nhid, i].set(a2c[i])

    wo = _xavier_normal(keys[-2], (nhid * nheads, nclass))
    ao = _xavier_normal(keys[-1], (1, 2 * nclass))
    a1o = ao[0, :nclass].reshape(nclass, 1)
    a2o = ao[0, nclass:].reshape(nclass, 1)
    return {"heads": (w_all, a1, a2), "out": (wo, a1o, a2o)}


# ---------------------------------------------------------------------------
# Pure-JAX f32 reference (for a loose numerical check)
# ---------------------------------------------------------------------------
def _gat_layer_ref(x, w, a1, a2, edge_mask, alpha):
    h = x @ w
    z = (h @ a1) + (h @ a2).T
    lrelu = jnp.where(z > 0, z, alpha * z)
    e = jnp.where(edge_mask, jnp.exp(-lrelu), 0.0)
    rowsum = jnp.maximum(e.sum(axis=1, keepdims=True), 1e-12)
    hp = (e @ h) / rowsum
    return jnp.where(hp > 0, hp, jnp.exp(hp) - 1.0)


def gat_forward_ref(x, adj, params, alpha=0.2):
    edge_mask = adj != 0
    w_all, a1, a2 = params["heads"]
    nheads = a1.shape[1]
    nhid = w_all.shape[1] // nheads
    outs = []
    for i in range(nheads):
        w = w_all[:, i * nhid:(i + 1) * nhid]
        a1h = a1[i * nhid:(i + 1) * nhid, i:i + 1]
        a2h = a2[i * nhid:(i + 1) * nhid, i:i + 1]
        outs.append(_gat_layer_ref(x, w, a1h, a2h, edge_mask, alpha))
    hcat = jnp.concatenate(outs, axis=1)
    wo, a1o, a2o = params["out"]
    return _gat_layer_ref(hcat, wo, a1o, a2o, edge_mask, alpha)


if __name__ == "__main__":
    N, nfeat, nhid, nclass, nheads = 200, 32, 16, 8, 3
    alpha = 0.2

    key = jax.random.PRNGKey(0)
    kx, kadj, kp = jax.random.split(key, 3)

    x = jax.random.normal(kx, (N, nfeat), dtype=jnp.float32)
    # random sparse adjacency + self-loops (no empty rows, as in the usual GAT
    # preprocessing)
    adj = (jax.random.uniform(kadj, (N, N)) < 0.05).astype(jnp.float32)
    adj = jnp.maximum(adj, jnp.eye(N, dtype=jnp.float32))

    params = init_gat_params(kp, nfeat, nhid, nclass, nheads)

    fwd = jax.jit(gat_forward)
    out = jax.block_until_ready(fwd(x, adj, params))

    assert out.shape == (N, nclass)
    assert bool(jnp.all(jnp.isfinite(out)))

    # Loose check against a pure-JAX f32 reference (the kernel uses bf16 MXU
    # operands and an approximate reciprocal, hence generous tolerances).
    ref = gat_forward_ref(x, adj, params, alpha)
    np.testing.assert_allclose(np.asarray(out), np.asarray(ref),
                               rtol=0.25, atol=0.15)

    print("KERNEL_OK")
</pallas_src>

<mosaic_0001>
module attributes {stable_mosaic.version = 11 : i64} {
  func.func @_project_kernel(%arg0: i32, %arg1: memref<128x32xf32, #tpu.memory_space<vmem>>, %arg2: memref<32x48xf32, #tpu.memory_space<vmem>>, %arg3: memref<48x3xf32, #tpu.memory_space<vmem>>, %arg4: memref<48x3xf32, #tpu.memory_space<vmem>>, %arg5: memref<128x48xf32, #tpu.memory_space<vmem>>, %arg6: memref<128x3xf32, #tpu.memory_space<vmem>>, %arg7: memref<128x3xf32, #tpu.memory_space<vmem>>) attributes {dimension_semantics = [#tpu.dimension_semantics<parallel>], iteration_bounds = array<i64: 2>, scalar_prefetch = 0 : i64, scratch_operands = 0 : i64, tpu.core_type = #tpu.core_type<tc>, window_params = [{transform_indices = @transform_0, window_bounds = array<i64: 128, 32>}, {pipeline_mode = #tpu.pipeline_mode<synchronous>, transform_indices = @transform_1, window_bounds = array<i64: 32, 48>}, {pipeline_mode = #tpu.pipeline_mode<synchronous>, transform_indices = @transform_2, window_bounds = array<i64: 48, 3>}, {pipeline_mode = #tpu.pipeline_mode<synchronous>, transform_indices = @transform_3, window_bounds = array<i64: 48, 3>}, {transform_indices = @transform_4, window_bounds = array<i64: 128, 48>}, {transform_indices = @transform_5, window_bounds = array<i64: 128, 3>}, {transform_indices = @transform_6, window_bounds = array<i64: 128, 3>}]} {
    %c0 = arith.constant 0 : index
    %c0_0 = arith.constant 0 : index
    %0 = vector.load %arg1[%c0, %c0_0] : memref<128x32xf32, #tpu.memory_space<vmem>>, vector<128x32xf32>
    %1 = arith.truncf %0 : vector<128x32xf32> to vector<128x32xbf16>
    %c0_1 = arith.constant 0 : index
    %c0_2 = arith.constant 0 : index
    %2 = vector.load %arg2[%c0_1, %c0_2] : memref<32x48xf32, #tpu.memory_space<vmem>>, vector<32x48xf32>
    %3 = arith.truncf %2 : vector<32x48xf32> to vector<32x48xbf16>
    %cst = arith.constant dense<0.000000e+00> : vector<128x48xf32>
    %4 = tpu.matmul %1, %3, %cst {dimension_numbers = #tpu.dot_dimension_numbers<[1], [0], [0], [1], [0, 0, 1, 1], [], []>} : vector<128x32xbf16>, vector<32x48xbf16>, vector<128x48xf32> -> vector<128x48xf32>
    %c0_3 = arith.constant 0 : index
    %c0_4 = arith.constant 0 : index
    %5 = vector.load %arg5[%c0_3, %c0_4] : memref<128x48xf32, #tpu.memory_space<vmem>>, vector<128x48xf32>
    tpu.vector_store %arg5[%c0_3, %c0_4], %4 {strides = array<i32>} : memref<128x48xf32, #tpu.memory_space<vmem>>, vector<128x48xf32>,
    %c0_5 = arith.constant 0 : index
    %c0_6 = arith.constant 0 : index
    %6 = vector.load %arg3[%c0_5, %c0_6] : memref<48x3xf32, #tpu.memory_space<vmem>>, vector<48x3xf32>
    %cst_7 = arith.constant dense<0.000000e+00> : vector<128x3xf32>
    %7 = tpu.matmul %4, %6, %cst_7 {dimension_numbers = #tpu.dot_dimension_numbers<[1], [0], [0], [1], [0, 0, 1, 1], [], []>} : vector<128x48xf32>, vector<48x3xf32>, vector<128x3xf32> -> vector<128x3xf32>
    %c0_8 = arith.constant 0 : index
    %c0_9 = arith.constant 0 : index
    %8 = vector.load %arg6[%c0_8, %c0_9] : memref<128x3xf32, #tpu.memory_space<vmem>>, vector<128x3xf32>
    tpu.vector_store %arg6[%c0_8, %c0_9], %7 {strides = array<i32>} : memref<128x3xf32, #tpu.memory_space<vmem>>, vector<128x3xf32>,
    %c0_10 = arith.constant 0 : index
    %c0_11 = arith.constant 0 : index
    %9 = vector.load %arg4[%c0_10, %c0_11] : memref<48x3xf32, #tpu.memory_space<vmem>>, vector<48x3xf32>
    %cst_12 = arith.constant dense<0.000000e+00> : vector<128x3xf32>
    %10 = tpu.matmul %4, %9, %cst_12 {dimension_numbers = #tpu.dot_dimension_numbers<[1], [0], [0], [1], [0, 0, 1, 1], [], []>} : vector<128x48xf32>, vector<48x3xf32>, vector<128x3xf32> -> vector<128x3xf32>
    %c0_13 = arith.constant 0 : index
    %c0_14 = arith.constant 0 : index
    %11 = vector.load %arg7[%c0_13, %c0_14] : memref<128x3xf32, #tpu.memory_space<vmem>>, vector<128x3xf32>
    tpu.vector_store %arg7[%c0_13, %c0_14], %10 {strides = array<i32>} : memref<128x3xf32, #tpu.memory_space<vmem>>, vector<128x3xf32>,
    return
  }
  func.func @transform_0(%arg0: i32) -> (i32, i32) {
    %c0_i32 = arith.constant 0 : i32
    %c0_i32_0 = arith.constant 0 : i32
    return %arg0, %c0_i32 : i32, i32
  }
  func.func @transform_1(%arg0: i32) -> (i32, i32) {
    %c0_i32 = arith.constant 0 : i32
    %c0_i32_0 = arith.constant 0 : i32
    %c0_i32_1 = arith.constant 0 : i32
    return %c0_i32, %c0_i32_0 : i32, i32
  }
  func.func @transform_2(%arg0: i32) -> (i32, i32) {
    %c0_i32 = arith.constant 0 : i32
    %c0_i32_0 = arith.constant 0 : i32
    %c0_i32_1 = arith.constant 0 : i32
    return %c0_i32, %c0_i32_0 : i32, i32
  }
  func.func @transform_3(%arg0: i32) -> (i32, i32) {
    %c0_i32 = arith.constant 0 : i32
    %c0_i32_0 = arith.constant 0 : i32
    %c0_i32_1 = arith.constant 0 : i32
    return %c0_i32, %c0_i32_0 : i32, i32
  }
  func.func @transform_4(%arg0: i32) -> (i32, i32) {
    %c0_i32 = arith.constant 0 : i32
    %c0_i32_0 = arith.constant 0 : i32
    return %arg0, %c0_i32 : i32, i32
  }
  func.func @transform_5(%arg0: i32) -> (i32, i32) {
    %c0_i32 = arith.constant 0 : i32
    %c0_i32_0 = arith.constant 0 : i32
    return %arg0, %c0_i32 : i32, i32
  }
  func.func @transform_6(%arg0: i32) -> (i32, i32) {
    %c0_i32 = arith.constant 0 : i32
    %c0_i32_0 = arith.constant 0 : i32
    return %arg0, %c0_i32 : i32, i32
  }
}

module attributes {stable_mosaic.version = 11 : i64} {
  func.func @_attn_kernel(%arg0: i32, %arg1: i32, %arg2: memref<128x3xf32, #tpu.memory_space<vmem>>, %arg3: memref<3x128xf32, #tpu.memory_space<vmem>>, %arg4: memref<128x48xf32, #tpu.memory_space<vmem>>, %arg5: memref<128x128xi8, #tpu.memory_space<vmem>>, %arg6: memref<128x48xf32, #tpu.memory_space<vmem>>, %arg7: memref<3x128x16xf32, #tpu.memory_space<vmem>>, %arg8: memref<3x128x1xf32, #tpu.memory_space<vmem>>) attributes {dimension_semantics = [#tpu.dimension_semantics<parallel>, #tpu.dimension_semantics<arbitrary>], iteration_bounds = array<i64: 2, 2>, scalar_prefetch = 0 : i64, scratch_operands = 2 : i64, tpu.core_type = #tpu.core_type<tc>, window_params = [{transform_indices = @transform_0, window_bounds = array<i64: 128, 3>}, {transform_indices = @transform_1, window_bounds = array<i64: 3, 128>}, {transform_indices = @transform_2, window_bounds = array<i64: 128, 48>}, {transform_indices = @transform_3, window_bounds = array<i64: 128, 128>}, {transform_indices = @transform_4, window_bounds = array<i64: 128, 48>}]} {
    %c0_i32 = arith.constant 0 : i32
    %0 = arith.cmpi eq, %arg1, %c0_i32 : i32
    %1 = arith.extui %0 : i1 to i32
    %c0_i32_0 = arith.constant 0 : i32
    %2 = arith.cmpi ne, %1, %c0_i32_0 : i32
    scf.if %2 {
      %cst_60 = arith.constant 0.000000e+00 : f32
      %109 = vector.broadcast %cst_60 : f32 to vector<3x128x16xf32>
      %c0_61 = arith.constant 0 : index
      %c0_62 = arith.constant 0 : index
      %c0_63 = arith.constant 0 : index
      %110 = vector.load %arg7[%c0_61, %c0_62, %c0_63] : memref<3x128x16xf32, #tpu.memory_space<vmem>>, vector<3x128x16xf32>
      tpu.vector_store %arg7[%c0_61, %c0_62, %c0_63], %109 {strides = array<i32>} : memref<3x128x16xf32, #tpu.memory_space<vmem>>, vector<3x128x16xf32>,
      %cst_64 = arith.constant 0.000000e+00 : f32
      %111 = vector.broadcast %cst_64 : f32 to vector<3x128x1xf32>
      %c0_65 = arith.constant 0 : index
      %c0_66 = arith.constant 0 : index
      %c0_67 = arith.constant 0 : index
      %112 = vector.load %arg8[%c0_65, %c0_66, %c0_67] : memref<3x128x1xf32, #tpu.memory_space<vmem>>, vector<3x128x1xf32>
      tpu.vector_store %arg8[%c0_65, %c0_66, %c0_67], %111 {strides = array<i32>} : memref<3x128x1xf32, #tpu.memory_space<vmem>>, vector<3x128x1xf32>,
    } else {
    }
    %c0 = arith.constant 0 : index
    %c0_1 = arith.constant 0 : index
    %3 = vector.load %arg5[%c0, %c0_1] : memref<128x128xi8, #tpu.memory_space<vmem>>, vector<128x128xi8>
    %c0_i8 = arith.constant 0 : i8
    %4 = vector.broadcast %c0_i8 : i8 to vector<128x128xi8>
    %5 = arith.cmpi ne, %3, %4 : vector<128x128xi8>
    %c0_2 = arith.constant 0 : index
    %c0_3 = arith.constant 0 : index
    %6 = vector.load %arg2[%c0_2, %c0_3] : memref<128x3xf32, #tpu.memory_space<vmem>>, vector<128x3xf32>
    %c0_4 = arith.constant 0 : index
    %c0_5 = arith.constant 0 : index
    %7 = vector.load %arg3[%c0_4, %c0_5] : memref<3x128xf32, #tpu.memory_space<vmem>>, vector<3x128xf32>
    %c0_6 = arith.constant 0 : index
    %c0_7 = arith.constant 0 : index
    %8 = vector.load %arg4[%c0_6, %c0_7] : memref<128x48xf32, #tpu.memory_space<vmem>>, vector<128x48xf32>
    %9 = arith.truncf %8 : vector<128x48xf32> to vector<128x48xbf16>
    %10 = vector.extract_strided_slice %6 {offsets = [0, 0], sizes = [128, 1], strides = [1, 1]} : vector<128x3xf32> to vector<128x1xf32>
    %11 = vector.extract_strided_slice %7 {offsets = [0, 0], sizes = [1, 128], strides = [1, 1]} : vector<3x128xf32> to vector<1x128xf32>
    %12 = vector.broadcast %10 : vector<128x1xf32> to vector<128x128xf32>
    %13 = vector.broadcast %11 : vector<1x128xf32> to vector<128x128xf32>
    %14 = arith.addf %12, %13 : vector<128x128xf32>
    %cst = arith.constant 0.000000e+00 : f32
    %15 = vector.broadcast %cst : f32 to vector<128x128xf32>
    %16 = arith.cmpf ogt, %14, %15 : vector<128x128xf32>
    %cst_8 = arith.constant 2.000000e-01 : f32
    %17 = vector.broadcast %cst_8 : f32 to vector<128x128xf32>
    %18 = arith.mulf %17, %14 : vector<128x128xf32>
    %19 = arith.select %16, %14, %18 : vector<128x128xi1>, vector<128x128xf32>
    %cst_9 = arith.constant 0.000000e+00 : f32
    %20 = vector.broadcast %cst_9 : f32 to vector<128x128xf32>
    %21 = arith.subf %20, %19 : vector<128x128xf32>
    %22 = math.exp %21 : vector<128x128xf32>
    %cst_10 = arith.constant 0.000000e+00 : f32
    %23 = vector.broadcast %cst_10 : f32 to vector<128x128xf32>
    %24 = arith.select %5, %22, %23 : vector<128x128xi1>, vector<128x128xf32>
    %c0_11 = arith.constant 0 : index
    %c0_12 = arith.constant 0 : index
    %c0_13 = arith.constant 0 : index
    %25 = vector.load %arg8[%c0_11, %c0_12, %c0_13] : memref<3x128x1xf32, #tpu.memory_space<vmem>>, vector<1x128x1xf32>
    %26 = vector.shape_cast %25 : vector<1x128x1xf32> to vector<128x1xf32>
    %cst_14 = arith.constant dense<0.000000e+00> : vector<128xf32>
    %27 = vector.multi_reduction <add>, %24, %cst_14 [1] : vector<128x128xf32> to vector<128xf32>
    %28 = vector.shape_cast %27 : vector<128xf32> to vector<128x1xf32>
    %29 = arith.addf %26, %28 : vector<128x1xf32>
    %c0_15 = arith.constant 0 : index
    %c0_16 = arith.constant 0 : index
    %c0_17 = arith.constant 0 : index
    %30 = vector.load %arg8[%c0_15, %c0_16, %c0_17] : memref<3x128x1xf32, #tpu.memory_space<vmem>>, vector<1x128x1xf32>
    %31 = vector.shape_cast %30 : vector<1x128x1xf32> to vector<128x1xf32>
    %32 = vector.shape_cast %29 : vector<128x1xf32> to vector<1x128x1xf32>
    tpu.vector_store %arg8[%c0_15, %c0_16, %c0_17], %32 {strides = array<i32>} : memref<3x128x1xf32, #tpu.memory_space<vmem>>, vector<1x128x1xf32>,
    %c0_18 = arith.constant 0 : index
    %c0_19 = arith.constant 0 : index
    %c0_20 = arith.constant 0 : index
    %33 = vector.load %arg7[%c0_18, %c0_19, %c0_20] : memref<3x128x16xf32, #tpu.memory_space<vmem>>, vector<1x128x16xf32>
    %34 = vector.shape_cast %33 : vector<1x128x16xf32> to vector<128x16xf32>
    %35 = arith.truncf %24 : vector<128x128xf32> to vector<128x128xbf16>
    %36 = vector.extract_strided_slice %9 {offsets = [0, 0], sizes = [128, 16], strides = [1, 1]} : vector<128x48xbf16> to vector<128x16xbf16>
    %cst_21 = arith.constant dense<0.000000e+00> : vector<128x16xf32>
    %37 = tpu.matmul %35, %36, %cst_21 {dimension_numbers = #tpu.dot_dimension_numbers<[1], [0], [0], [1], [0, 0, 1, 1], [], []>} : vector<128x128xbf16>, vector<128x16xbf16>, vector<128x16xf32> -> vector<128x16xf32>
    %38 = arith.addf %34, %37 : vector<128x16xf32>
    %c0_22 = arith.constant 0 : index
    %c0_23 = arith.constant 0 : index
    %c0_24 = arith.constant 0 : index
    %39 = vector.load %arg7[%c0_22, %c0_23, %c0_24] : memref<3x128x16xf32, #tpu.memory_space<vmem>>, vector<1x128x16xf32>
    %40 = vector.shape_cast %39 : vector<1x128x16xf32> to vector<128x16xf32>
    %41 = vector.shape_cast %38 : vector<128x16xf32> to vector<1x128x16xf32>
    tpu.vector_store %arg7[%c0_22, %c0_23, %c0_24], %41 {strides = array<i32>} : memref<3x128x16xf32, #tpu.memory_space<vmem>>, vector<1x128x16xf32>,
    %42 = vector.extract_strided_slice %6 {offsets = [0, 1], sizes = [128, 1], strides = [1, 1]} : vector<128x3xf32> to vector<128x1xf32>
    %43 = vector.extract_strided_slice %7 {offsets = [1, 0], sizes = [1, 128], strides = [1, 1]} : vector<3x128xf32> to vector<1x128xf32>
    %44 = vector.broadcast %42 : vector<128x1xf32> to vector<128x128xf32>
    %45 = vector.broadcast %43 : vector<1x128xf32> to vector<128x128xf32>
    %46 = arith.addf %44, %45 : vector<128x128xf32>
    %cst_25 = arith.constant 0.000000e+00 : f32
    %47 = vector.broadcast %cst_25 : f32 to vector<128x128xf32>
    %48 = arith.cmpf ogt, %46, %47 : vector<128x128xf32>
    %cst_26 = arith.constant 2.000000e-01 : f32
    %49 = vector.broadcast %cst_26 : f32 to vector<128x128xf32>
    %50 = arith.mulf %49, %46 : vector<128x128xf32>
    %51 = arith.select %48, %46, %50 : vector<128x128xi1>, vector<128x128xf32>
    %cst_27 = arith.constant 0.000000e+00 : f32
    %52 = vector.broadcast %cst_27 : f32 to vector<128x128xf32>
    %53 = arith.subf %52, %51 : vector<128x128xf32>
    %54 = math.exp %53 : vector<128x128xf32>
    %cst_28 = arith.constant 0.000000e+00 : f32
    %55 = vector.broadcast %cst_28 : f32 to vector<128x128xf32>
    %56 = arith.select %5, %54, %55 : vector<128x128xi1>, vector<128x128xf32>
    %c1 = arith.constant 1 : index
    %c0_29 = arith.constant 0 : index
    %c0_30 = arith.constant 0 : index
    %57 = vector.load %arg8[%c1, %c0_29, %c0_30] : memref<3x128x1xf32, #tpu.memory_space<vmem>>, vector<1x128x1xf32>
    %58 = vector.shape_cast %57 : vector<1x128x1xf32> to vector<128x1xf32>
    %cst_31 = arith.constant dense<0.000000e+00> : vector<128xf32>
    %59 = vector.multi_reduction <add>, %56, %cst_31 [1] : vector<128x128xf32> to vector<128xf32>
    %60 = vector.shape_cast %59 : vector<128xf32> to vector<128x1xf32>
    %61 = arith.addf %58, %60 : vector<128x1xf32>
    %c1_32 = arith.constant 1 : index
    %c0_33 = arith.constant 0 : index
    %c0_34 = arith.constant 0 : index
    %62 = vector.load %arg8[%c1_32, %c0_33, %c0_34] : memref<3x128x1xf32, #tpu.memory_space<vmem>>, vector<1x128x1xf32>
    %63 = vector.shape_cast %62 : vector<1x128x1xf32> to vector<128x1xf32>
    %64 = vector.shape_cast %61 : vector<128x1xf32> to vector<1x128x1xf32>
    tpu.vector_store %arg8[%c1_32, %c0_33, %c0_34], %64 {strides = array<i32>} : memref<3x128x1xf32, #tpu.memory_space<vmem>>, vector<1x128x1xf32>,
    %c1_35 = arith.constant 1 : index
    %c0_36 = arith.constant 0 : index
    %c0_37 = arith.constant 0 : index
    %65 = vector.load %arg7[%c1_35, %c0_36, %c0_37] : memref<3x128x16xf32, #tpu.memory_space<vmem>>, vector<1x128x16xf32>
    %66 = vector.shape_cast %65 : vector<1x128x16xf32> to vector<128x16xf32>
    %67 = arith.truncf %56 : vector<128x128xf32> to vector<128x128xbf16>
    %68 = vector.extract_strided_slice %9 {offsets = [0, 16], sizes = [128, 16], strides = [1, 1]} : vector<128x48xbf16> to vector<128x16xbf16>
    %cst_38 = arith.constant dense<0.000000e+00> : vector<128x16xf32>
    %69 = tpu.matmul %67, %68, %cst_38 {dimension_numbers = #tpu.dot_dimension_numbers<[1], [0], [0], [1], [0, 0, 1, 1], [], []>} : vector<128x128xbf16>, vector<128x16xbf16>, vector<128x16xf32> -> vector<128x16xf32>
    %70 = arith.addf %66, %69 : vector<128x16xf32>
    %c1_39 = arith.constant 1 : index
    %c0_40 = arith.constant 0 : index
    %c0_41 = arith.constant 0 : index
    %71 = vector.load %arg7[%c1_39, %c0_40, %c0_41] : memref<3x128x16xf32, #tpu.memory_space<vmem>>, vector<1x128x16xf32>
    %72 = vector.shape_cast %71 : vector<1x128x16xf32> to vector<128x16xf32>
    %73 = vector.shape_cast %70 : vector<128x16xf32> to vector<1x128x16xf32>
    tpu.vector_store %arg7[%c1_39, %c0_40, %c0_41], %73 {strides = array<i32>} : memref<3x128x16xf32, #tpu.memory_space<vmem>>, vector<1x128x16xf32>,
    %74 = vector.extract_strided_slice %6 {offsets = [0, 2], sizes = [128, 1], strides = [1, 1]} : vector<128x3xf32> to vector<128x1xf32>
    %75 = vector.extract_strided_slice %7 {offsets = [2, 0], sizes = [1, 128], strides = [1, 1]} : vector<3x128xf32> to vector<1x128xf32>
    %76 = vector.broadcast %74 : vector<128x1xf32> to vector<128x128xf32>
    %77 = vector.broadcast %75 : vector<1x128xf32> to vector<128x128xf32>
    %78 = arith.addf %76, %77 : vector<128x128xf32>
    %cst_42 = arith.constant 0.000000e+00 : f32
    %79 = vector.broadcast %cst_42 : f32 to vector<128x128xf32>
    %80 = arith.cmpf ogt, %78, %79 : vector<128x128xf32>
    %cst_43 = arith.constant 2.000000e-01 : f32
    %81 = vector.broadcast %cst_43 : f32 to vector<128x128xf32>
    %82 = arith.mulf %81, %78 : vector<128x128xf32>
    %83 = arith.select %80, %78, %82 : vector<128x128xi1>, vector<128x128xf32>
    %cst_44 = arith.constant 0.000000e+00 : f32
    %84 = vector.broadcast %cst_44 : f32 to vector<128x128xf32>
    %85 = arith.subf %84, %83 : vector<128x128xf32>
    %86 = math.exp %85 : vector<128x128xf32>
    %cst_45 = arith.constant 0.000000e+00 : f32
    %87 = vector.broadcast %cst_45 : f32 to vector<128x128xf32>
    %88 = arith.select %5, %86, %87 : vector<128x128xi1>, vector<128x128xf32>
    %c2 = arith.constant 2 : index
    %c0_46 = arith.constant 0 : index
    %c0_47 = arith.constant 0 : index
    %89 = vector.load %arg8[%c2, %c0_46, %c0_47] : memref<3x128x1xf32, #tpu.memory_space<vmem>>, vector<1x128x1xf32>
    %90 = vector.shape_cast %89 : vector<1x128x1xf32> to vector<128x1xf32>
    %cst_48 = arith.constant dense<0.000000e+00> : vector<128xf32>
    %91 = vector.multi_reduction <add>, %88, %cst_48 [1] : vector<128x128xf32> to vector<128xf32>
    %92 = vector.shape_cast %91 : vector<128xf32> to vector<128x1xf32>
    %93 = arith.addf %90, %92 : vector<128x1xf32>
    %c2_49 = arith.constant 2 : index
    %c0_50 = arith.constant 0 : index
    %c0_51 = arith.constant 0 : index
    %94 = vector.load %arg8[%c2_49, %c0_50, %c0_51] : memref<3x128x1xf32, #tpu.memory_space<vmem>>, vector<1x128x1xf32>
    %95 = vector.shape_cast %94 : vector<1x128x1xf32> to vector<128x1xf32>
    %96 = vector.shape_cast %93 : vector<128x1xf32> to vector<1x128x1xf32>
    tpu.vector_store %arg8[%c2_49, %c0_50, %c0_51], %96 {strides = array<i32>} : memref<3x128x1xf32, #tpu.memory_space<vmem>>, vector<1x128x1xf32>,
    %c2_52 = arith.constant 2 : index
    %c0_53 = arith.constant 0 : index
    %c0_54 = arith.constant 0 : index
    %97 = vector.load %arg7[%c2_52, %c0_53, %c0_54] : memref<3x128x16xf32, #tpu.memory_space<vmem>>, vector<1x128x16xf32>
    %98 = vector.shape_cast %97 : vector<1x128x16xf32> to vector<128x16xf32>
    %99 = arith.truncf %88 : vector<128x128xf32> to vector<128x128xbf16>
    %100 = vector.extract_strided_slice %9 {offsets = [0, 32], sizes = [128, 16], strides = [1, 1]} : vector<128x48xbf16> to vector<128x16xbf16>
    %cst_55 = arith.constant dense<0.000000e+00> : vector<128x16xf32>
    %101 = tpu.matmul %99, %100, %cst_55 {dimension_numbers = #tpu.dot_dimension_numbers<[1], [0], [0], [1], [0, 0, 1, 1], [], []>} : vector<128x128xbf16>, vector<128x16xbf16>, vector<128x16xf32> -> vector<128x16xf32>
    %102 = arith.addf %98, %101 : vector<128x16xf32>
    %c2_56 = arith.constant 2 : index
    %c0_57 = arith.constant 0 : index
    %c0_58 = arith.constant 0 : index
    %103 = vector.load %arg7[%c2_56, %c0_57, %c0_58] : memref<3x128x16xf32, #tpu.memory_space<vmem>>, vector<1x128x16xf32>
    %104 = vector.shape_cast %103 : vector<1x128x16xf32> to vector<128x16xf32>
    %105 = vector.shape_cast %102 : vector<128x16xf32> to vector<1x128x16xf32>
    tpu.vector_store %arg7[%c2_56, %c0_57, %c0_58], %105 {strides = array<i32>} : memref<3x128x16xf32, #tpu.memory_space<vmem>>, vector<1x128x16xf32>,
    %c1_i32 = arith.constant 1 : i32
    %106 = arith.cmpi eq, %arg1, %c1_i32 : i32
    %107 = arith.extui %106 : i1 to i32
    %c0_i32_59 = arith.constant 0 : i32
    %108 = arith.cmpi ne, %107, %c0_i32_59 : i32
    scf.if %108 {
      %c0_60 = arith.constant 0 : index
      %c0_61 = arith.constant 0 : index
      %c0_62 = arith.constant 0 : index
      %109 = vector.load %arg8[%c0_60, %c0_61, %c0_62] : memref<3x128x1xf32, #tpu.memory_space<vmem>>, vector<1x128x1xf32>
      %110 = vector.shape_cast %109 : vector<1x128x1xf32> to vector<128x1xf32>
      %cst_63 = arith.constant 9.99999996E-13 : f32
      %111 = vector.broadcast %cst_63 : f32 to vector<128x1xf32>
      %112 = arith.maximumf %110, %111 : vector<128x1xf32>
      %113 = tpu.reciprocal %112 {approx = true} : vector<128x1xf32> -> vector<128x1xf32>
      %c0_64 = arith.constant 0 : index
      %c0_65 = arith.constant 0 : index
      %c0_66 = arith.constant 0 : index
      %114 = vector.load %arg7[%c0_64, %c0_65, %c0_66] : memref<3x128x16xf32, #tpu.memory_space<vmem>>, vector<1x128x16xf32>
      %115 = vector.shape_cast %114 : vector<1x128x16xf32> to vector<128x16xf32>
      %116 = vector.broadcast %113 : vector<128x1xf32> to vector<128x16xf32>
      %117 = arith.mulf %115, %116 : vector<128x16xf32>
      %cst_67 = arith.constant 0.000000e+00 : f32
      %118 = vector.broadcast %cst_67 : f32 to vector<128x16xf32>
      %119 = arith.cmpf ogt, %117, %118 : vector<128x16xf32>
      %120 = math.exp %117 : vector<128x16xf32>
      %cst_68 = arith.constant 1.000000e+00 : f32
      %121 = vector.broadcast %cst_68 : f32 to vector<128x16xf32>
      %122 = arith.subf %120, %121 : vector<128x16xf32>
      %123 = arith.select %119, %117, %122 : vector<128x16xi1>, vector<128x16xf32>
      %c0_69 = arith.constant 0 : index
      %c0_70 = arith.constant 0 : index
      %124 = vector.load %arg6[%c0_69, %c0_70] : memref<128x48xf32, #tpu.memory_space<vmem>>, vector<128x16xf32>
      tpu.vector_store %arg6[%c0_69, %c0_70], %123 {strides = array<i32>} : memref<128x48xf32, #tpu.memory_space<vmem>>, vector<128x16xf32>,
      %c1_71 = arith.constant 1 : index
      %c0_72 = arith.constant 0 : index
      %c0_73 = arith.constant 0 : index
      %125 = vector.load %arg8[%c1_71, %c0_72, %c0_73] : memref<3x128x1xf32, #tpu.memory_space<vmem>>, vector<1x128x1xf32>
      %126 = vector.shape_cast %125 : vector<1x128x1xf32> to vector<128x1xf32>
      %cst_74 = arith.constant 9.99999996E-13 : f32
      %127 = vector.broadcast %cst_74 : f32 to vector<128x1xf32>
      %128 = arith.maximumf %126, %127 : vector<128x1xf32>
      %129 = tpu.reciprocal %128 {approx = true} : vector<128x1xf32> -> vector<128x1xf32>
      %c1_75 = arith.constant 1 : index
      %c0_76 = arith.constant 0 : index
      %c0_77 = arith.constant 0 : index
      %130 = vector.load %arg7[%c1_75, %c0_76, %c0_77] : memref<3x128x16xf32, #tpu.memory_space<vmem>>, vector<1x128x16xf32>
      %131 = vector.shape_cast %130 : vector<1x128x16xf32> to vector<128x16xf32>
      %132 = vector.broadcast %129 : vector<128x1xf32> to vector<128x16xf32>
      %133 = arith.mulf %131, %132 : vector<128x16xf32>
      %cst_78 = arith.constant 0.000000e+00 : f32
      %134 = vector.broadcast %cst_78 : f32 to vector<128x16xf32>
      %135 = arith.cmpf ogt, %133, %134 : vector<128x16xf32>
      %136 = math.exp %133 : vector<128x16xf32>
      %cst_79 = arith.constant 1.000000e+00 : f32
      %137 = vector.broadcast %cst_79 : f32 to vector<128x16xf32>
      %138 = arith.subf %136, %137 : vector<128x16xf32>
      %139 = arith.select %135, %133, %138 : vector<128x16xi1>, vector<128x16xf32>
      %c0_80 = arith.constant 0 : index
      %c16 = arith.constant 16 : index
      %140 = vector.load %arg6[%c0_80, %c16] : memref<128x48xf32, #tpu.memory_space<vmem>>, vector<128x16xf32>
      tpu.vector_store %arg6[%c0_80, %c16], %139 {strides = array<i32>} : memref<128x48xf32, #tpu.memory_space<vmem>>, vector<128x16xf32>,
      %c2_81 = arith.constant 2 : index
      %c0_82 = arith.constant 0 : index
      %c0_83 = arith.constant 0 : index
      %141 = vector.load %arg8[%c2_81, %c0_82, %c0_83] : memref<3x128x1xf32, #tpu.memory_space<vmem>>, vector<1x128x1xf32>
      %142 = vector.shape_cast %141 : vector<1x128x1xf32> to vector<128x1xf32>
      %cst_84 = arith.constant 9.99999996E-13 : f32
      %143 = vector.broadcast %cst_84 : f32 to vector<128x1xf32>
      %144 = arith.maximumf %142, %143 : vector<128x1xf32>
      %145 = tpu.reciprocal %144 {approx = true} : vector<128x1xf32> -> vector<128x1xf32>
      %c2_85 = arith.constant 2 : index
      %c0_86 = arith.constant 0 : index
      %c0_87 = arith.constant 0 : index
      %146 = vector.load %arg7[%c2_85, %c0_86, %c0_87] : memref<3x128x16xf32, #tpu.memory_space<vmem>>, vector<1x128x16xf32>
      %147 = vector.shape_cast %146 : vector<1x128x16xf32> to vector<128x16xf32>
      %148 = vector.broadcast %145 : vector<128x1xf32> to vector<128x16xf32>
      %149 = arith.mulf %147, %148 : vector<128x16xf32>
      %cst_88 = arith.constant 0.000000e+00 : f32
      %150 = vector.broadcast %cst_88 : f32 to vector<128x16xf32>
      %151 = arith.cmpf ogt, %149, %150 : vector<128x16xf32>
      %152 = math.exp %149 : vector<128x16xf32>
      %cst_89 = arith.constant 1.000000e+00 : f32
      %153 = vector.broadcast %cst_89 : f32 to vector<128x16xf32>
      %154 = arith.subf %152, %153 : vector<128x16xf32>
      %155 = arith.select %151, %149, %154 : vector<128x16xi1>, vector<128x16xf32>
      %c0_90 = arith.constant 0 : index
      %c32 = arith.constant 32 : index
      %156 = vector.load %arg6[%c0_90, %c32] : memref<128x48xf32, #tpu.memory_space<vmem>>, vector<128x16xf32>
      tpu.vector_store %arg6[%c0_90, %c32], %155 {strides = array<i32>} : memref<128x48xf32, #tpu.memory_space<vmem>>, vector<128x16xf32>,
    } else {
    }
    return
  }
  func.func @transform_0(%arg0: i32, %arg1: i32) -> (i32, i32) {
    %c0_i32 = arith.constant 0 : i32
    %c0_i32_0 = arith.constant 0 : i32
    return %arg0, %c0_i32 : i32, i32
  }
  func.func @transform_1(%arg0: i32, %arg1: i32) -> (i32, i32) {
    %c0_i32 = arith.constant 0 : i32
    %c0_i32_0 = arith.constant 0 : i32
    return %c0_i32, %arg1 : i32, i32
  }
  func.func @transform_2(%arg0: i32, %arg1: i32) -> (i32, i32) {
    %c0_i32 = arith.constant 0 : i32
    %c0_i32_0 = arith.constant 0 : i32
    return %arg1, %c0_i32 : i32, i32
  }
  func.func @transform_3(%arg0: i32, %arg1: i32) -> (i32, i32) {
    %c0_i32 = arith.constant 0 : i32
    return %arg0, %arg1 : i32, i32
  }
  func.func @transform_4(%arg0: i32, %arg1: i32) -> (i32, i32) {
    %c0_i32 = arith.constant 0 : i32
    %c0_i32_0 = arith.constant 0 : i32
    return %arg0, %c0_i32 : i32, i32
  }
}

module attributes {stable_mosaic.version = 11 : i64} {
  func.func @_project_kernel(%arg0: i32, %arg1: memref<128x48xf32, #tpu.memory_space<vmem>>, %arg2: memref<48x8xf32, #tpu.memory_space<vmem>>, %arg3: memref<8x1xf32, #tpu.memory_space<vmem>>, %arg4: memref<8x1xf32, #tpu.memory_space<vmem>>, %arg5: memref<128x8xf32, #tpu.memory_space<vmem>>, %arg6: memref<128x1xf32, #tpu.memory_space<vmem>>, %arg7: memref<128x1xf32, #tpu.memory_space<vmem>>) attributes {dimension_semantics = [#tpu.dimension_semantics<parallel>], iteration_bounds = array<i64: 2>, scalar_prefetch = 0 : i64, scratch_operands = 0 : i64, tpu.core_type = #tpu.core_type<tc>, window_params = [{transform_indices = @transform_0, window_bounds = array<i64: 128, 48>}, {pipeline_mode = #tpu.pipeline_mode<synchronous>, transform_indices = @transform_1, window_bounds = array<i64: 48, 8>}, {pipeline_mode = #tpu.pipeline_mode<synchronous>, transform_indices = @transform_2, window_bounds = array<i64: 8, 1>}, {pipeline_mode = #tpu.pipeline_mode<synchronous>, transform_indices = @transform_3, window_bounds = array<i64: 8, 1>}, {transform_indices = @transform_4, window_bounds = array<i64: 128, 8>}, {transform_indices = @transform_5, window_bounds = array<i64: 128, 1>}, {transform_indices = @transform_6, window_bounds = array<i64: 128, 1>}]} {
    %c0 = arith.constant 0 : index
    %c0_0 = arith.constant 0 : index
    %0 = vector.load %arg1[%c0, %c0_0] : memref<128x48xf32, #tpu.memory_space<vmem>>, vector<128x48xf32>
    %1 = arith.truncf %0 : vector<128x48xf32> to vector<128x48xbf16>
    %c0_1 = arith.constant 0 : index
    %c0_2 = arith.constant 0 : index
    %2 = vector.load %arg2[%c0_1, %c0_2] : memref<48x8xf32, #tpu.memory_space<vmem>>, vector<48x8xf32>
    %3 = arith.truncf %2 : vector<48x8xf32> to vector<48x8xbf16>
    %cst = arith.constant dense<0.000000e+00> : vector<128x8xf32>
    %4 = tpu.matmul %1, %3, %cst {dimension_numbers = #tpu.dot_dimension_numbers<[1], [0], [0], [1], [0, 0, 1, 1], [], []>} : vector<128x48xbf16>, vector<48x8xbf16>, vector<128x8xf32> -> vector<128x8xf32>
    %c0_3 = arith.constant 0 : index
    %c0_4 = arith.constant 0 : index
    %5 = vector.load %arg5[%c0_3, %c0_4] : memref<128x8xf32, #tpu.memory_space<vmem>>, vector<128x8xf32>
    tpu.vector_store %arg5[%c0_3, %c0_4], %4 {strides = array<i32>} : memref<128x8xf32, #tpu.memory_space<vmem>>, vector<128x8xf32>,
    %c0_5 = arith.constant 0 : index
    %c0_6 = arith.constant 0 : index
    %6 = vector.load %arg3[%c0_5, %c0_6] : memref<8x1xf32, #tpu.memory_space<vmem>>, vector<8x1xf32>
    %cst_7 = arith.constant dense<0.000000e+00> : vector<128x1xf32>
    %7 = tpu.matmul %4, %6, %cst_7 {dimension_numbers = #tpu.dot_dimension_numbers<[1], [0], [0], [1], [0, 0, 1, 1], [], []>} : vector<128x8xf32>, vector<8x1xf32>, vector<128x1xf32> -> vector<128x1xf32>
    %c0_8 = arith.constant 0 : index
    %c0_9 = arith.constant 0 : index
    %8 = vector.load %arg6[%c0_8, %c0_9] : memref<128x1xf32, #tpu.memory_space<vmem>>, vector<128x1xf32>
    tpu.vector_store %arg6[%c0_8, %c0_9], %7 {strides = array<i32>} : memref<128x1xf32, #tpu.memory_space<vmem>>, vector<128x1xf32>,
    %c0_10 = arith.constant 0 : index
    %c0_11 = arith.constant 0 : index
    %9 = vector.load %arg4[%c0_10, %c0_11] : memref<8x1xf32, #tpu.memory_space<vmem>>, vector<8x1xf32>
    %cst_12 = arith.constant dense<0.000000e+00> : vector<128x1xf32>
    %10 = tpu.matmul %4, %9, %cst_12 {dimension_numbers = #tpu.dot_dimension_numbers<[1], [0], [0], [1], [0, 0, 1, 1], [], []>} : vector<128x8xf32>, vector<8x1xf32>, vector<128x1xf32> -> vector<128x1xf32>
    %c0_13 = arith.constant 0 : index
    %c0_14 = arith.constant 0 : index
    %11 = vector.load %arg7[%c0_13, %c0_14] : memref<128x1xf32, #tpu.memory_space<vmem>>, vector<128x1xf32>
    tpu.vector_store %arg7[%c0_13, %c0_14], %10 {strides = array<i32>} : memref<128x1xf32, #tpu.memory_space<vmem>>, vector<128x1xf32>,
    return
  }
  func.func @transform_0(%arg0: i32) -> (i32, i32) {
    %c0_i32 = arith.constant 0 : i32
    %c0_i32_0 = arith.constant 0 : i32
    return %arg0, %c0_i32 : i32, i32
  }
  func.func @transform_1(%arg0: i32) -> (i32, i32) {
    %c0_i32 = arith.constant 0 : i32
    %c0_i32_0 = arith.constant 0 : i32
    %c0_i32_1 = arith.constant 0 : i32
    return %c0_i32, %c0_i32_0 : i32, i32
  }
  func.func @transform_2(%arg0: i32) -> (i32, i32) {
    %c0_i32 = arith.constant 0 : i32
    %c0_i32_0 = arith.constant 0 : i32
    %c0_i32_1 = arith.constant 0 : i32
    return %c0_i32, %c0_i32_0 : i32, i32
  }
  func.func @transform_3(%arg0: i32) -> (i32, i32) {
    %c0_i32 = arith.constant 0 : i32
    %c0_i32_0 = arith.constant 0 : i32
    %c0_i32_1 = arith.constant 0 : i32
    return %c0_i32, %c0_i32_0 : i32, i32
  }
  func.func @transform_4(%arg0: i32) -> (i32, i32) {
    %c0_i32 = arith.constant 0 : i32
    %c0_i32_0 = arith.constant 0 : i32
    return %arg0, %c0_i32 : i32, i32
  }
  func.func @transform_5(%arg0: i32) -> (i32, i32) {
    %c0_i32 = arith.constant 0 : i32
    %c0_i32_0 = arith.constant 0 : i32
    return %arg0, %c0_i32 : i32, i32
  }
  func.func @transform_6(%arg0: i32) -> (i32, i32) {
    %c0_i32 = arith.constant 0 : i32
    %c0_i32_0 = arith.constant 0 : i32
    return %arg0, %c0_i32 : i32, i32
  }
}

module attributes {stable_mosaic.version = 11 : i64} {
  func.func @_attn_kernel(%arg0: i32, %arg1: i32, %arg2: memref<128x1xf32, #tpu.memory_space<vmem>>, %arg3: memref<1x128xf32, #tpu.memory_space<vmem>>, %arg4: memref<128x8xf32, #tpu.memory_space<vmem>>, %arg5: memref<128x128xi8, #tpu.memory_space<vmem>>, %arg6: memref<128x8xf32, #tpu.memory_space<vmem>>, %arg7: memref<1x128x8xf32, #tpu.memory_space<vmem>>, %arg8: memref<1x128x1xf32, #tpu.memory_space<vmem>>) attributes {dimension_semantics = [#tpu.dimension_semantics<parallel>, #tpu.dimension_semantics<arbitrary>], iteration_bounds = array<i64: 2, 2>, scalar_prefetch = 0 : i64, scratch_operands = 2 : i64, tpu.core_type = #tpu.core_type<tc>, window_params = [{transform_indices = @transform_0, window_bounds = array<i64: 128, 1>}, {transform_indices = @transform_1, window_bounds = array<i64: 1, 128>}, {transform_indices = @transform_2, window_bounds = array<i64: 128, 8>}, {transform_indices = @transform_3, window_bounds = array<i64: 128, 128>}, {transform_indices = @transform_4, window_bounds = array<i64: 128, 8>}]} {
    %c0_i32 = arith.constant 0 : i32
    %0 = arith.cmpi eq, %arg1, %c0_i32 : i32
    %1 = arith.extui %0 : i1 to i32
    %c0_i32_0 = arith.constant 0 : i32
    %2 = arith.cmpi ne, %1, %c0_i32_0 : i32
    scf.if %2 {
      %cst_26 = arith.constant 0.000000e+00 : f32
      %42 = vector.broadcast %cst_26 : f32 to vector<1x128x8xf32>
      %c0_27 = arith.constant 0 : index
      %c0_28 = arith.constant 0 : index
      %c0_29 = arith.constant 0 : index
      %43 = vector.load %arg7[%c0_27, %c0_28, %c0_29] : memref<1x128x8xf32, #tpu.memory_space<vmem>>, vector<1x128x8xf32>
      tpu.vector_store %arg7[%c0_27, %c0_28, %c0_29], %42 {strides = array<i32>} : memref<1x128x8xf32, #tpu.memory_space<vmem>>, vector<1x128x8xf32>,
      %cst_30 = arith.constant 0.000000e+00 : f32
      %44 = vector.broadcast %cst_30 : f32 to vector<1x128x1xf32>
      %c0_31 = arith.constant 0 : index
      %c0_32 = arith.constant 0 : index
      %c0_33 = arith.constant 0 : index
      %45 = vector.load %arg8[%c0_31, %c0_32, %c0_33] : memref<1x128x1xf32, #tpu.memory_space<vmem>>, vector<1x128x1xf32>
      tpu.vector_store %arg8[%c0_31, %c0_32, %c0_33], %44 {strides = array<i32>} : memref<1x128x1xf32, #tpu.memory_space<vmem>>, vector<1x128x1xf32>,
    } else {
    }
    %c0 = arith.constant 0 : index
    %c0_1 = arith.constant 0 : index
    %3 = vector.load %arg5[%c0, %c0_1] : memref<128x128xi8, #tpu.memory_space<vmem>>, vector<128x128xi8>
    %c0_i8 = arith.constant 0 : i8
    %4 = vector.broadcast %c0_i8 : i8 to vector<128x128xi8>
    %5 = arith.cmpi ne, %3, %4 : vector<128x128xi8>
    %c0_2 = arith.constant 0 : index
    %c0_3 = arith.constant 0 : index
    %6 = vector.load %arg2[%c0_2, %c0_3] : memref<128x1xf32, #tpu.memory_space<vmem>>, vector<128x1xf32>
    %c0_4 = arith.constant 0 : index
    %c0_5 = arith.constant 0 : index
    %7 = vector.load %arg3[%c0_4, %c0_5] : memref<1x128xf32, #tpu.memory_space<vmem>>, vector<1x128xf32>
    %c0_6 = arith.constant 0 : index
    %c0_7 = arith.constant 0 : index
    %8 = vector.load %arg4[%c0_6, %c0_7] : memref<128x8xf32, #tpu.memory_space<vmem>>, vector<128x8xf32>
    %9 = arith.truncf %8 : vector<128x8xf32> to vector<128x8xbf16>
    %10 = vector.broadcast %6 : vector<128x1xf32> to vector<128x128xf32>
    %11 = vector.broadcast %7 : vector<1x128xf32> to vector<128x128xf32>
    %12 = arith.addf %10, %11 : vector<128x128xf32>
    %cst = arith.constant 0.000000e+00 : f32
    %13 = vector.broadcast %cst : f32 to vector<128x128xf32>
    %14 = arith.cmpf ogt, %12, %13 : vector<128x128xf32>
    %cst_8 = arith.constant 2.000000e-01 : f32
    %15 = vector.broadcast %cst_8 : f32 to vector<128x128xf32>
    %16 = arith.mulf %15, %12 : vector<128x128xf32>
    %17 = arith.select %14, %12, %16 : vector<128x128xi1>, vector<128x128xf32>
    %cst_9 = arith.constant 0.000000e+00 : f32
    %18 = vector.broadcast %cst_9 : f32 to vector<128x128xf32>
    %19 = arith.subf %18, %17 : vector<128x128xf32>
    %20 = math.exp %19 : vector<128x128xf32>
    %cst_10 = arith.constant 0.000000e+00 : f32
    %21 = vector.broadcast %cst_10 : f32 to vector<128x128xf32>
    %22 = arith.select %5, %20, %21 : vector<128x128xi1>, vector<128x128xf32>
    %c0_11 = arith.constant 0 : index
    %c0_12 = arith.constant 0 : index
    %c0_13 = arith.constant 0 : index
    %23 = vector.load %arg8[%c0_11, %c0_12, %c0_13] : memref<1x128x1xf32, #tpu.memory_space<vmem>>, vector<1x128x1xf32>
    %24 = vector.shape_cast %23 : vector<1x128x1xf32> to vector<128x1xf32>
    %cst_14 = arith.constant dense<0.000000e+00> : vector<128xf32>
    %25 = vector.multi_reduction <add>, %22, %cst_14 [1] : vector<128x128xf32> to vector<128xf32>
    %26 = vector.shape_cast %25 : vector<128xf32> to vector<128x1xf32>
    %27 = arith.addf %24, %26 : vector<128x1xf32>
    %c0_15 = arith.constant 0 : index
    %c0_16 = arith.constant 0 : index
    %c0_17 = arith.constant 0 : index
    %28 = vector.load %arg8[%c0_15, %c0_16, %c0_17] : memref<1x128x1xf32, #tpu.memory_space<vmem>>, vector<1x128x1xf32>
    %29 = vector.shape_cast %28 : vector<1x128x1xf32> to vector<128x1xf32>
    %30 = vector.shape_cast %27 : vector<128x1xf32> to vector<1x128x1xf32>
    tpu.vector_store %arg8[%c0_15, %c0_16, %c0_17], %30 {strides = array<i32>} : memref<1x128x1xf32, #tpu.memory_space<vmem>>, vector<1x128x1xf32>,
    %c0_18 = arith.constant 0 : index
    %c0_19 = arith.constant 0 : index
    %c0_20 = arith.constant 0 : index
    %31 = vector.load %arg7[%c0_18, %c0_19, %c0_20] : memref<1x128x8xf32, #tpu.memory_space<vmem>>, vector<1x128x8xf32>
    %32 = vector.shape_cast %31 : vector<1x128x8xf32> to vector<128x8xf32>
    %33 = arith.truncf %22 : vector<128x128xf32> to vector<128x128xbf16>
    %cst_21 = arith.constant dense<0.000000e+00> : vector<128x8xf32>
    %34 = tpu.matmul %33, %9, %cst_21 {dimension_numbers = #tpu.dot_dimension_numbers<[1], [0], [0], [1], [0, 0, 1, 1], [], []>} : vector<128x128xbf16>, vector<128x8xbf16>, vector<128x8xf32> -> vector<128x8xf32>
    %35 = arith.addf %32, %34 : vector<128x8xf32>
    %c0_22 = arith.constant 0 : index
    %c0_23 = arith.constant 0 : index
    %c0_24 = arith.constant 0 : index
    %36 = vector.load %arg7[%c0_22, %c0_23, %c0_24] : memref<1x128x8xf32, #tpu.memory_space<vmem>>, vector<1x128x8xf32>
    %37 = vector.shape_cast %36 : vector<1x128x8xf32> to vector<128x8xf32>
    %38 = vector.shape_cast %35 : vector<128x8xf32> to vector<1x128x8xf32>
    tpu.vector_store %arg7[%c0_22, %c0_23, %c0_24], %38 {strides = array<i32>} : memref<1x128x8xf32, #tpu.memory_space<vmem>>, vector<1x128x8xf32>,
    %c1_i32 = arith.constant 1 : i32
    %39 = arith.cmpi eq, %arg1, %c1_i32 : i32
    %40 = arith.extui %39 : i1 to i32
    %c0_i32_25 = arith.constant 0 : i32
    %41 = arith.cmpi ne, %40, %c0_i32_25 : i32
    scf.if %41 {
      %c0_26 = arith.constant 0 : index
      %c0_27 = arith.constant 0 : index
      %c0_28 = arith.constant 0 : index
      %42 = vector.load %arg8[%c0_26, %c0_27, %c0_28] : memref<1x128x1xf32, #tpu.memory_space<vmem>>, vector<1x128x1xf32>
      %43 = vector.shape_cast %42 : vector<1x128x1xf32> to vector<128x1xf32>
      %cst_29 = arith.constant 9.99999996E-13 : f32
      %44 = vector.broadcast %cst_29 : f32 to vector<128x1xf32>
      %45 = arith.maximumf %43, %44 : vector<128x1xf32>
      %46 = tpu.reciprocal %45 {approx = true} : vector<128x1xf32> -> vector<128x1xf32>
      %c0_30 = arith.constant 0 : index
      %c0_31 = arith.constant 0 : index
      %c0_32 = arith.constant 0 : index
      %47 = vector.load %arg7[%c0_30, %c0_31, %c0_32] : memref<1x128x8xf32, #tpu.memory_space<vmem>>, vector<1x128x8xf32>
      %48 = vector.shape_cast %47 : vector<1x128x8xf32> to vector<128x8xf32>
      %49 = vector.broadcast %46 : vector<128x1xf32> to vector<128x8xf32>
      %50 = arith.mulf %48, %49 : vector<128x8xf32>
      %cst_33 = arith.constant 0.000000e+00 : f32
      %51 = vector.broadcast %cst_33 : f32 to vector<128x8xf32>
      %52 = arith.cmpf ogt, %50, %51 : vector<128x8xf32>
      %53 = math.exp %50 : vector<128x8xf32>
      %cst_34 = arith.constant 1.000000e+00 : f32
      %54 = vector.broadcast %cst_34 : f32 to vector<128x8xf32>
      %55 = arith.subf %53, %54 : vector<128x8xf32>
      %56 = arith.select %52, %50, %55 : vector<128x8xi1>, vector<128x8xf32>
      %c0_35 = arith.constant 0 : index
      %c0_36 = arith.constant 0 : index
      %57 = vector.load %arg6[%c0_35, %c0_36] : memref<128x8xf32, #tpu.memory_space<vmem>>, vector<128x8xf32>
      tpu.vector_store %arg6[%c0_35, %c0_36], %56 {strides = array<i32>} : memref<128x8xf32, #tpu.memory_space<vmem>>, vector<128x8xf32>,
    } else {
    }
    return
  }
  func.func @transform_0(%arg0: i32, %arg1: i32) -> (i32, i32) {
    %c0_i32 = arith.constant 0 : i32
    %c0_i32_0 = arith.constant 0 : i32
    return %arg0, %c0_i32 : i32, i32
  }
  func.func @transform_1(%arg0: i32, %arg1: i32) -> (i32, i32) {
    %c0_i32 = arith.constant 0 : i32
    %c0_i32_0 = arith.constant 0 : i32
    return %c0_i32, %arg1 : i32, i32
  }
  func.func @transform_2(%arg0: i32, %arg1: i32) -> (i32, i32) {
    %c0_i32 = arith.constant 0 : i32
    %c0_i32_0 = arith.constant 0 : i32
    return %arg1, %c0_i32 : i32, i32
  }
  func.func @transform_3(%arg0: i32, %arg1: i32) -> (i32, i32) {
    %c0_i32 = arith.constant 0 : i32
    return %arg0, %arg1 : i32, i32
  }
  func.func @transform_4(%arg0: i32, %arg1: i32) -> (i32, i32) {
    %c0_i32 = arith.constant 0 : i32
    %c0_i32_0 = arith.constant 0 : i32
    return %arg0, %c0_i32 : i32, i32
  }
}

</mosaic_0001>

<bundles_post_ra>
// kernel: gat_forward.4
= control target key start
LH: loop header
LB: loop body
LE: loop exit
PB: predicated region body
PF: predicated region fallthrough
CT: control target
= control target key end

     0   :  { %s871_s21 = smov 0   ;;  %s1108_s0 = inlined_call_operand.vmem [shape: f32[256,32], index: 0, kind: input, shape index: {}]   ;;  %s1109_s1 = inlined_call_operand.vmem [shape: f32[32,48], index: 1, kind: input, shape index: {}]   ;;  %s1110_s2 = inlined_call_operand.vmem [shape: f32[48,3], index: 2, kind: input, shape index: {}]   ;;  %s1111_s3 = inlined_call_operand.vmem [shape: f32[48,3], index: 3, kind: input, shape index: {}]   ;;  %s1112_s4 = inlined_call_operand.vmem [shape: f32[256,48], index: 4, kind: output, shape index: {0}]   ;;  %s1113_s5 = inlined_call_operand.vmem [shape: f32[256,3], index: 5, kind: output, shape index: {1}]   ;;  %s1114_s6 = inlined_call_operand.vmem [shape: f32[256,3], index: 6, kind: output, shape index: {2}]  }
   0x1 LB: > { %s751_s22 = sadd.s32 4294967295, %s834_s21   ;;  %p755_p0 = scmp.ge.s32.totalorder %s834_s21, 1  ;;  %s834_s21 = sphi %s871_s21, %s17_s21  }
   0x2   : > { %p218_p1 = scmp.lt.s32.totalorder %s834_s21, 3 }
   0x4   : > { %p219_p2 = pnand %p755_p0, %p218_p1 }
   0x5   : > { %s756_s29 = sshll.u32 (!%p219_p2), %s751_s22, 4 }
   0x6   : > { %222 = sbr.rel (%p219_p2) target bundleno = 432 (0x1b0), region = 36  ;;  %p259_p3 = scmp.lt.s32.totalorder (!%p219_p2), %s756_s29, 31 }
   0xb   : > { %v309_v0 = vld [vmem:[%s1109_s1 + $0x10] sm:$0xff]  ;;  %v310_v1 = vld [vmem:[%s1109_s1 + $0x18] sm:$0xff]  ;;  %v307_v2 = vld [vmem:[%s1109_s1] sm:$0xff]  ;;  %s1116_s29 = smov (!%p259_p3, %s756_s29), 31  ;;  %vm313_vm0 = vcmask 261120   ;;  %vm387_vm1 = vcmask 392192  }
   0xc   : > { %v312_v3 = vpack.c.bf16 %v310_v1, %v309_v0  ;;  %v308_v4 = vld [vmem:[%s1109_s1 + $0x8] sm:$0xff]  ;;  %s891_s8 = sshll.u32 %s1116_s29, 3  ;;  %v408_v26 = vld [vmem:[%s1110_s2 + $0x20] sm:$0xff]  ;;  %v407_v28 = vld [vmem:[%s1110_s2 + $0x18] sm:$0xff]  ;;  %vm523_vm2 = vcmask 23552  }
   0xd   : > { %v311_v5 = vpack.c.bf16 %v308_v4, %v307_v2  ;;  %s897_s11 = scalar_lea.vmem %s1108_s0, %s891_s8  ;;  %v409_v24 = vld [vmem:[%s1110_s2 + $0x28] sm:$0xff]  ;;  %v544_v27 = vld [vmem:[%s1111_s3 + $0x20] sm:$0xff]  ;;  %v543_v29 = vld [vmem:[%s1111_s3 + $0x18] sm:$0xff]  ;;  %s963_s16 = scalar_lea.vmem %s1112_s4, %s891_s8 }
   0xe   : > { %344 = vmatpush.bf16.msra.mxu0 %v312_v3  ;;  %806 = vmatpush.bf16.msra.mxu3 %v312_v3  ;;  %v283_v6 = vld [vmem:[%s897_s11] sm:$0xff]  ;;  %v284_v7 = vld [vmem:[%s897_s11 + $0x8] sm:$0xff]  ;;  %v285_v9 = vld [vmem:[%s897_s11 + $0x10] sm:$0xff]  ;;  %s1029_s19 = scalar_lea.vmem %s1113_s5, %s891_s8  ;;  %s1038_s23 = scalar_lea.vmem %s1114_s6, %s891_s8 }
   0xf   : > { %v299_v8 = vpack.c.bf16 %v284_v7, %v283_v6  ;;  %v286_v10 = vld [vmem:[%s897_s11 + $0x18] sm:$0xff]  ;;  %v287_v12 = vld [vmem:[%s897_s11 + $0x20] sm:$0xff]  ;;  %v288_v13 = vld [vmem:[%s897_s11 + $0x28] sm:$0xff]  ;;  %468 = vmatpush.msra.mxu1 %v409_v24 }
  0x10   : > { %v300_v11 = vpack.c.bf16 %v286_v10, %v285_v9  ;;  %v301_v14 = vpack.c.bf16 %v288_v13, %v287_v12  ;;  %v289_v15 = vld [vmem:[%s897_s11 + $0x30] sm:$0xff]  ;;  %v290_v16 = vld [vmem:[%s897_s11 + $0x38] sm:$0xff]  ;;  %v291_v18 = vld [vmem:[%s897_s11 + $0x40] sm:$0xff] }
  0x11   : > { %v302_v17 = vpack.c.bf16 %v290_v16, %v289_v15  ;;  %v292_v19 = vld [vmem:[%s897_s11 + $0x48] sm:$0xff]  ;;  %v297_v21 = vld [vmem:[%s897_s11 + $0x70] sm:$0xff]  ;;  %v298_v22 = vld [vmem:[%s897_s11 + $0x78] sm:$0xff]  ;;  %469 = vmatpush.msra.mxu1 %v408_v26 }
  0x12   : > { %345 = vmatpush.bf16.msra.mxu0 %v311_v5  ;;  %807 = vmatpush.bf16.msra.mxu3 %v311_v5  ;;  %v303_v20 = vpack.c.bf16 %v292_v19, %v291_v18  ;;  %v306_v23 = vpack.c.bf16 %v298_v22, %v297_v21  ;;  %v545_v25 = vld [vmem:[%s1111_s3 + $0x28] sm:$0xff]  ;;  %v406_v30 = vld [vmem:[%s1110_s2 + $0x10] sm:$0xff]  ;;  %v294_v35 = vld [vmem:[%s897_s11 + $0x58] sm:$0xff] }
  0x13   : > { %556 = vmatpush.msra.mxu2 %v545_v25  ;;  %v542_v31 = vld [vmem:[%s1111_s3 + $0x10] sm:$0xff]  ;;  %470 = vmatpush.msra.mxu1 %v407_v28  ;;  %v405_v32 = vld [vmem:[%s1110_s2 + $0x8] sm:$0xff]  ;;  %v295_v37 = vld [vmem:[%s897_s11 + $0x60] sm:$0xff] }
  0x14   : > { %v541_v33 = vld [vmem:[%s1111_s3 + $0x8] sm:$0xff]  ;;  %v293_v34 = vld [vmem:[%s897_s11 + $0x50] sm:$0xff]  ;;  %v404_v40 = vld [vmem:[%s1110_s2] sm:$0xff] }
  0x15   : > { %764 = vmatmul.msk.bf16.vlgmr.msra.gmra.mxu0 %vm313_vm0, %v299_v8  ;;  %771 = vmatmul.msk.bf16.vlgmr.msra.gmra.mxu3 %vm313_vm0, %v306_v23  ;;  %v304_v36 = vpack.c.bf16 %v294_v35, %v293_v34  ;;  %v296_v38 = vld [vmem:[%s897_s11 + $0x68] sm:$0xff]  ;;  %v540_v41 = vld [vmem:[%s1111_s3] sm:$0xff] }
  0x16   : > { %557 = vmatpush.msra.mxu2 %v544_v27  ;;  %808 = vmatpush.msrb.mxu3 %v409_v24  ;;  %v305_v39 = vpack.c.bf16 %v296_v38, %v295_v37 }
  0x17   : > { %471 = vmatpush.msra.mxu1 %v406_v30 }
  0x18   : > { %558 = vmatpush.msra.mxu2 %v543_v29  ;;  %809 = vmatpush.msrb.mxu3 %v408_v26 }
  0x19   : > { %472 = vmatpush.msra.mxu1 %v405_v32 }
  0x1a   : > { %559 = vmatpush.msra.mxu2 %v542_v31  ;;  %810 = vmatpush.msrb.mxu3 %v407_v28 }
  0x1b   : > { %473 = vmatpush.msra.mxu1 %v404_v40 }
  0x1c   : > { %560 = vmatpush.msra.mxu2 %v541_v33  ;;  %811 = vmatpush.msrb.mxu3 %v406_v30 }
  0x1e   : > { %812 = vmatpush.msrb.mxu3 %v405_v32  ;;  %561 = vmatpush.msra.mxu2 %v540_v41 }
  0x20   : > { %813 = vmatpush.msrb.mxu3 %v404_v40 }
  0x22   : > { %814 = vmatpush.msra.mxu3 %v545_v25 }
  0x24   : > { %815 = vmatpush.msra.mxu3 %v544_v27 }
  0x25   : > { %765 = vmatmul.msk.bf16.gmra.mxu0 %vm313_vm0, %v300_v11 }
  0x26   : > { %816 = vmatpush.msra.mxu3 %v543_v29 }
  0x28   : > { %817 = vmatpush.msra.mxu3 %v542_v31 }
  0x2a   : > { %818 = vmatpush.msra.mxu3 %v541_v33 }
  0x2c   : > { %819 = vmatpush.msra.mxu3 %v540_v41 }
  0x35   : > { %766 = vmatmul.msk.bf16.gmra.mxu0 %vm313_vm0, %v301_v14 }
  0x45   : > { %767 = vmatmul.msk.bf16.gmra.mxu0 %vm313_vm0, %v302_v17 }
  0x55   : > { %768 = vmatmul.msk.bf16.gmra.mxu0 %vm313_vm0, %v303_v20 }
  0x65   : > { %769 = vmatmul.msk.bf16.gmra.mxu0 %vm313_vm0, %v304_v36 }
  0x75   : > { %770 = vmatmul.msk.bf16.gmra.mxu0 %vm313_vm0, %v305_v39 }
  0x92   : > { %v347_v42 = vpop.f32.mrf.mxu0 }
  0x93   : > { %388 = vst.msk [vmem:[%s963_s16] sm:$0xff] %vm387_vm1, %v347_v42  ;;  %772 = vmatmul.msk.f32.vlgmr.msra.gmra.mxu1 %vm387_vm1, %v347_v42  ;;  %788 = vmatmul.msk.f32.vlgmr.msra.gmra.mxu2 %vm387_vm1, %v347_v42 }
  0x98   : > { %v382_v52 = vpop.f32.mrf.mxu3 }
  0x99   : > { %402 = vst.msk [vmem:[%s963_s16 + $0x70] sm:$0xff] %vm387_vm1, %v382_v52 }
  0x9a   : > { %v349_v43 = vpop.f32.mrf.mxu0 }
  0x9b   : > { %389 = vst.msk [vmem:[%s963_s16 + $0x8] sm:$0xff] %vm387_vm1, %v349_v43  ;;  %773 = vmatmul.msk.f32.gmra.mxu1 %vm387_vm1, %v349_v43  ;;  %789 = vmatmul.msk.f32.gmra.mxu2 %vm387_vm1, %v349_v43 }
  0xa0   : > { %v384_v54 = vpop.f32.mrf.mxu3 }
  0xa1   : > { %403 = vst.msk [vmem:[%s963_s16 + $0x78] sm:$0xff] %vm387_vm1, %v384_v54 }
  0xa2   : > { %v352_v44 = vpop.f32.mrf.mxu0 }
  0xa3   : > { %390 = vst.msk [vmem:[%s963_s16 + $0x10] sm:$0xff] %vm387_vm1, %v352_v44  ;;  %774 = vmatmul.msk.f32.gmra.mxu1 %vm387_vm1, %v352_v44  ;;  %790 = vmatmul.msk.f32.gmra.mxu2 %vm387_vm1, %v352_v44 }
  0xaa   : > { %v354_v45 = vpop.f32.mrf.mxu0 }
  0xab   : > { %391 = vst.msk [vmem:[%s963_s16 + $0x18] sm:$0xff] %vm387_vm1, %v354_v45  ;;  %775 = vmatmul.msk.f32.gmra.mxu1 %vm387_vm1, %v354_v45  ;;  %791 = vmatmul.msk.f32.gmra.mxu2 %vm387_vm1, %v354_v45 }
  0xb2   : > { %v357_v46 = vpop.f32.mrf.mxu0 }
  0xb3   : > { %392 = vst.msk [vmem:[%s963_s16 + $0x20] sm:$0xff] %vm387_vm1, %v357_v46  ;;  %776 = vmatmul.msk.f32.gmra.mxu1 %vm387_vm1, %v357_v46  ;;  %792 = vmatmul.msk.f32.gmra.mxu2 %vm387_vm1, %v357_v46 }
  0xba   : > { %v359_v47 = vpop.f32.mrf.mxu0 }
  0xbb   : > { %393 = vst.msk [vmem:[%s963_s16 + $0x28] sm:$0xff] %vm387_vm1, %v359_v47  ;;  %777 = vmatmul.msk.f32.gmra.mxu1 %vm387_vm1, %v359_v47  ;;  %793 = vmatmul.msk.f32.gmra.mxu2 %vm387_vm1, %v359_v47 }
  0xc2   : > { %v362_v48 = vpop.f32.mrf.mxu0 }
  0xc3   : > { %394 = vst.msk [vmem:[%s963_s16 + $0x30] sm:$0xff] %vm387_vm1, %v362_v48  ;;  %778 = vmatmul.msk.f32.gmra.mxu1 %vm387_vm1, %v362_v48  ;;  %794 = vmatmul.msk.f32.gmra.mxu2 %vm387_vm1, %v362_v48 }
  0xca   : > { %v364_v49 = vpop.f32.mrf.mxu0 }
  0xcb   : > { %395 = vst.msk [vmem:[%s963_s16 + $0x38] sm:$0xff] %vm387_vm1, %v364_v49  ;;  %779 = vmatmul.msk.f32.gmra.mxu1 %vm387_vm1, %v364_v49  ;;  %795 = vmatmul.msk.f32.gmra.mxu2 %vm387_vm1, %v364_v49 }
  0xd2   : > { %v367_v50 = vpop.f32.mrf.mxu0 }
  0xd3   : > { %396 = vst.msk [vmem:[%s963_s16 + $0x40] sm:$0xff] %vm387_vm1, %v367_v50  ;;  %780 = vmatmul.msk.f32.gmra.mxu1 %vm387_vm1, %v367_v50  ;;  %796 = vmatmul.msk.f32.gmra.mxu2 %vm387_vm1, %v367_v50 }
  0xda   : > { %v369_v51 = vpop.f32.mrf.mxu0 }
  0xdb   : > { %397 = vst.msk [vmem:[%s963_s16 + $0x48] sm:$0xff] %vm387_vm1, %v369_v51  ;;  %781 = vmatmul.msk.f32.gmra.mxu1 %vm387_vm1, %v369_v51  ;;  %797 = vmatmul.msk.f32.gmra.mxu2 %vm387_vm1, %v369_v51 }
  0xe2   : > { %v372_v53 = vpop.f32.mrf.mxu0 }
  0xe3   : > { %398 = vst.msk [vmem:[%s963_s16 + $0x50] sm:$0xff] %vm387_vm1, %v372_v53  ;;  %782 = vmatmul.msk.f32.gmra.mxu1 %vm387_vm1, %v372_v53  ;;  %798 = vmatmul.msk.f32.gmra.mxu2 %vm387_vm1, %v372_v53 }
  0xea   : > { %v374_v55 = vpop.f32.mrf.mxu0 }
  0xeb   : > { %399 = vst.msk [vmem:[%s963_s16 + $0x58] sm:$0xff] %vm387_vm1, %v374_v55  ;;  %783 = vmatmul.msk.f32.gmra.mxu1 %vm387_vm1, %v374_v55  ;;  %799 = vmatmul.msk.f32.gmra.mxu2 %vm387_vm1, %v374_v55 }
  0xf2   : > { %v377_v56 = vpop.f32.mrf.mxu0 }
  0xf3   : > { %400 = vst.msk [vmem:[%s963_s16 + $0x60] sm:$0xff] %vm387_vm1, %v377_v56  ;;  %784 = vmatmul.msk.f32.vlgmr.msrb.gmra.mxu3 %vm387_vm1, %v377_v56 }
  0xfa   : > { %v379_v57 = vpop.f32.mrf.mxu0 }
  0xfb   : > { %401 = vst.msk [vmem:[%s963_s16 + $0x68] sm:$0xff] %vm387_vm1, %v379_v57  ;;  %785 = vmatmul.msk.f32.gmra.mxu3 %vm387_vm1, %v379_v57 }
 0x103   : > { %786 = vmatmul.msk.f32.gmra.mxu3 %vm387_vm1, %v382_v52 }
 0x10b   : > { %787 = vmatmul.msk.f32.gmra.mxu3 %vm387_vm1, %v384_v54 }
 0x110   : > { %v475_v58 = vpop.f32.mrf.mxu1 }
 0x111   : > { %524 = vst.msk [vmem:[%s1029_s19] sm:$0xff] %vm523_vm2, %v475_v58 }
 0x113   : > { %800 = vmatmul.msk.f32.vlgmr.msra.gmra.mxu3 %vm387_vm1, %v377_v56 }
 0x116   : > { %v563_v59 = vpop.f32.mrf.mxu2 }
 0x117   : > { %611 = vst.msk [vmem:[%s1038_s23] sm:$0xff] %vm523_vm2, %v563_v59 }
 0x118   : > { %v478_v60 = vpop.f32.mrf.mxu1 }
 0x119   : > { %525 = vst.msk [vmem:[%s1029_s19 + $0x8] sm:$0xff] %vm523_vm2, %v478_v60 }
 0x11b   : > { %801 = vmatmul.msk.f32.gmra.mxu3 %vm387_vm1, %v379_v57 }
 0x11e   : > { %v566_v61 = vpop.f32.mrf.mxu2 }
 0x11f   : > { %612 = vst.msk [vmem:[%s1038_s23 + $0x8] sm:$0xff] %vm523_vm2, %v566_v61 }
 0x120   : > { %v481_v62 = vpop.f32.mrf.mxu1 }
 0x121   : > { %526 = vst.msk [vmem:[%s1029_s19 + $0x10] sm:$0xff] %vm523_vm2, %v481_v62 }
 0x123   : > { %802 = vmatmul.msk.f32.gmra.mxu3 %vm387_vm1, %v382_v52 }
 0x126   : > { %v569_v63 = vpop.f32.mrf.mxu2 }
 0x127   : > { %613 = vst.msk [vmem:[%s1038_s23 + $0x10] sm:$0xff] %vm523_vm2, %v569_v63 }
 0x128   : > { %v484_v0 = vpop.f32.mrf.mxu1 }
 0x129   : > { %527 = vst.msk [vmem:[%s1029_s19 + $0x18] sm:$0xff] %vm523_vm2, %v484_v0 }
 0x12b   : > { %803 = vmatmul.msk.f32.gmra.mxu3 %vm387_vm1, %v384_v54 }
 0x12e   : > { %v572_v1 = vpop.f32.mrf.mxu2 }
 0x12f   : > { %614 = vst.msk [vmem:[%s1038_s23 + $0x18] sm:$0xff] %vm523_vm2, %v572_v1 }
 0x130   : > { %v487_v2 = vpop.f32.mrf.mxu1 }
 0x131   : > { %528 = vst.msk [vmem:[%s1029_s19 + $0x20] sm:$0xff] %vm523_vm2, %v487_v2 }
 0x136   : > { %v575_v3 = vpop.f32.mrf.mxu2 }
 0x137   : > { %615 = vst.msk [vmem:[%s1038_s23 + $0x20] sm:$0xff] %vm523_vm2, %v575_v3 }
 0x138   : > { %v490_v4 = vpop.f32.mrf.mxu1 }
 0x139   : > { %529 = vst.msk [vmem:[%s1029_s19 + $0x28] sm:$0xff] %vm523_vm2, %v490_v4 }
 0x13e   : > { %v578_v5 = vpop.f32.mrf.mxu2 }
 0x13f   : > { %616 = vst.msk [vmem:[%s1038_s23 + $0x28] sm:$0xff] %vm523_vm2, %v578_v5 }
 0x140   : > { %v493_v6 = vpop.f32.mrf.mxu1 }
 0x141   : > { %530 = vst.msk [vmem:[%s1029_s19 + $0x30] sm:$0xff] %vm523_vm2, %v493_v6 }
 0x146   : > { %v581_v7 = vpop.f32.mrf.mxu2 }
 0x147   : > { %617 = vst.msk [vmem:[%s1038_s23 + $0x30] sm:$0xff] %vm523_vm2, %v581_v7 }
 0x148   : > { %v496_v8 = vpop.f32.mrf.mxu1 }
 0x149   : > { %531 = vst.msk [vmem:[%s1029_s19 + $0x38] sm:$0xff] %vm523_vm2, %v496_v8 }
 0x14e   : > { %v584_v9 = vpop.f32.mrf.mxu2 }
 0x14f   : > { %618 = vst.msk [vmem:[%s1038_s23 + $0x38] sm:$0xff] %vm523_vm2, %v584_v9 }
 0x150   : > { %v499_v10 = vpop.f32.mrf.mxu1 }
 0x151   : > { %532 = vst.msk [vmem:[%s1029_s19 + $0x40] sm:$0xff] %vm523_vm2, %v499_v10 }
 0x156   : > { %v587_v11 = vpop.f32.mrf.mxu2 }
 0x157   : > { %619 = vst.msk [vmem:[%s1038_s23 + $0x40] sm:$0xff] %vm523_vm2, %v587_v11 }
 0x158   : > { %v502_v12 = vpop.f32.mrf.mxu1 }
 0x159   : > { %533 = vst.msk [vmem:[%s1029_s19 + $0x48] sm:$0xff] %vm523_vm2, %v502_v12 }
 0x15e   : > { %v590_v13 = vpop.f32.mrf.mxu2 }
 0x15f   : > { %620 = vst.msk [vmem:[%s1038_s23 + $0x48] sm:$0xff] %vm523_vm2, %v590_v13 }
 0x160   : > { %v505_v14 = vpop.f32.mrf.mxu1 }
 0x161   : > { %534 = vst.msk [vmem:[%s1029_s19 + $0x50] sm:$0xff] %vm523_vm2, %v505_v14 }
 0x166   : > { %v593_v15 = vpop.f32.mrf.mxu2 }
 0x167   : > { %621 = vst.msk [vmem:[%s1038_s23 + $0x50] sm:$0xff] %vm523_vm2, %v593_v15 }
 0x168   : > { %v508_v16 = vpop.f32.mrf.mxu1 }
 0x169   : > { %535 = vst.msk [vmem:[%s1029_s19 + $0x58] sm:$0xff] %vm523_vm2, %v508_v16 }
 0x16e   : > { %v596_v17 = vpop.f32.mrf.mxu2 }
 0x16f   : > { %622 = vst.msk [vmem:[%s1038_s23 + $0x58] sm:$0xff] %vm523_vm2, %v596_v17 }
 0x176   : > { %v511_v18 = vpop.f32.mrf.mxu3 }
 0x177   : > { %536 = vst.msk [vmem:[%s1029_s19 + $0x60] sm:$0xff] %vm523_vm2, %v511_v18 }
 0x17e   : > { %v514_v19 = vpop.f32.mrf.mxu3 }
 0x17f   : > { %537 = vst.msk [vmem:[%s1029_s19 + $0x68] sm:$0xff] %vm523_vm2, %v514_v19 }
 0x186   : > { %v517_v20 = vpop.f32.mrf.mxu3 }
 0x187   : > { %538 = vst.msk [vmem:[%s1029_s19 + $0x70] sm:$0xff] %vm523_vm2, %v517_v20 }
 0x18e   : > { %v520_v21 = vpop.f32.mrf.mxu3 }
 0x18f   : > { %539 = vst.msk [vmem:[%s1029_s19 + $0x78] sm:$0xff] %vm523_vm2, %v520_v21 }
 0x196   : > { %v599_v22 = vpop.f32.mrf.mxu3 }
 0x197   : > { %623 = vst.msk [vmem:[%s1038_s23 + $0x60] sm:$0xff] %vm523_vm2, %v599_v22 }
 0x19e   : > { %v602_v23 = vpop.f32.mrf.mxu3 }
 0x19f   : > { %624 = vst.msk [vmem:[%s1038_s23 + $0x68] sm:$0xff] %vm523_vm2, %v602_v23 }
 0x1a6   : > { %v605_v24 = vpop.f32.mrf.mxu3 }
 0x1a7   : > { %625 = vst.msk [vmem:[%s1038_s23 + $0x70] sm:$0xff] %vm523_vm2, %v605_v24 }
 0x1ae   : > { %v608_v25 = vpop.f32.mrf.mxu3 }
 0x1af   : > { %626 = vst.msk [vmem:[%s1038_s23 + $0x78] sm:$0xff] %vm523_vm2, %v608_v25 }
 0x1b0 PF: > { %s17_s21 = sadd.s32 1, %s834_s21  }
 0x1b1   : > { %p14_p4 = scmp.ge.s32.totalorder %s17_s21, 4  }
 0x1b3   :  { %16 = sbr.rel (!%p14_p4) target bundleno = 1 (0x1), region = 90 }

// kernel: gat_forward.6
= control target key start
LH: loop header
LB: loop body
LE: loop exit
PB: predicated region body
PF: predicated region fallthrough
CT: control target
= control target key end

     0   :  { %s855_s21 = smov 0   ;;  %s1068_s0 = inlined_call_operand.vmem [shape: f32[256,48], index: 0, kind: input, shape index: {}]   ;;  %s1069_s1 = inlined_call_operand.vmem [shape: f32[48,8], index: 1, kind: input, shape index: {}]   ;;  %s1070_s2 = inlined_call_operand.vmem [shape: f32[8,1], index: 2, kind: input, shape index: {}]   ;;  %s1071_s3 = inlined_call_operand.vmem [shape: f32[8,1], index: 3, kind: input, shape index: {}]   ;;  %s1072_s4 = inlined_call_operand.vmem [shape: f32[256,8], index: 4, kind: output, shape index: {0}]   ;;  %s1073_s5 = inlined_call_operand.vmem [shape: f32[256,1], index: 5, kind: output, shape index: {1}]   ;;  %s1074_s6 = inlined_call_operand.vmem [shape: f32[256,1], index: 6, kind: output, shape index: {2}]  }
   0x1 LB: > { %s744_s22 = sadd.s32 4294967295, %s818_s21   ;;  %p748_p0 = scmp.ge.s32.totalorder %s818_s21, 1  ;;  %s818_s21 = sphi %s855_s21, %s17_s21  }
   0x2   : > { %p218_p1 = scmp.lt.s32.totalorder %s818_s21, 3 }
   0x4   : > { %p219_p2 = pnand %p748_p0, %p218_p1 }
   0x5   : > { %s749_s29 = sshll.u32 (!%p219_p2), %s744_s22, 4 }
   0x6   : > { %222 = sbr.rel (%p219_p2) target bundleno = 380 (0x17c), region = 36  ;;  %p259_p3 = scmp.lt.s32.totalorder (!%p219_p2), %s749_s29, 31 }
   0xb   : > { %v311_v0 = vld [vmem:[%s1069_s1 + $0x20] sm:$0xff]  ;;  %v312_v1 = vld [vmem:[%s1069_s1 + $0x28] sm:$0xff]  ;;  %v309_v2 = vld [vmem:[%s1069_s1 + $0x10] sm:$0xff]  ;;  %s1076_s29 = smov (!%p259_p3, %s749_s29), 31  ;;  %vm316_vm0 = vcmask 392192   ;;  %vm390_vm1 = vcmask 64512  }
   0xc   : > { %v315_v3 = vpack.c.bf16 %v312_v1, %v311_v0  ;;  %v310_v4 = vld [vmem:[%s1069_s1 + $0x18] sm:$0xff]  ;;  %v307_v6 = vld [vmem:[%s1069_s1] sm:$0xff]  ;;  %v308_v7 = vld [vmem:[%s1069_s1 + $0x8] sm:$0xff]  ;;  %s881_s12 = sshll.u32 %s1076_s29, 3  ;;  %vm521_vm2 = vcmask 7168  }
   0xd   : > { %v314_v5 = vpack.c.bf16 %v310_v4, %v309_v2  ;;  %s887_s15 = scalar_lea.vmem %s1068_s0, %s881_s12  ;;  %v313_v8 = vpack.c.bf16 %v308_v7, %v307_v6  ;;  %v407_v33 = vld [vmem:[%s1070_s2] sm:$0xff]  ;;  %s923_s23 = scalar_lea.vmem %s1072_s4, %s881_s12 }
   0xe   : > { %346 = vmatpush.bf16.msra.mxu0 %v315_v3  ;;  %799 = vmatpush.bf16.msra.mxu3 %v315_v3  ;;  %v283_v9 = vld [vmem:[%s887_s15] sm:$0xff]  ;;  %v284_v10 = vld [vmem:[%s887_s15 + $0x8] sm:$0xff]  ;;  %v285_v15 = vld [vmem:[%s887_s15 + $0x10] sm:$0xff]  ;;  %s993_s26 = scalar_lea.vmem %s1073_s5, %s881_s12  ;;  %s1001_s29 = scalar_lea.vmem %s1074_s6, %s881_s12 }
   0xf   : > { %v295_v11 = vld [vmem:[%s887_s15 + $0x60] sm:$0xff]  ;;  %v296_v12 = vld [vmem:[%s887_s15 + $0x68] sm:$0xff]  ;;  %v299_v13 = vpack.c.bf16 %v284_v10, %v283_v9  ;;  %v286_v16 = vld [vmem:[%s887_s15 + $0x18] sm:$0xff]  ;;  %471 = vmatpush.msra.mxu1 %v407_v33 }
  0x10   : > { %v305_v14 = vpack.c.bf16 %v296_v12, %v295_v11  ;;  %v297_v17 = vld [vmem:[%s887_s15 + $0x70] sm:$0xff]  ;;  %v298_v18 = vld [vmem:[%s887_s15 + $0x78] sm:$0xff]  ;;  %v300_v19 = vpack.c.bf16 %v286_v16, %v285_v15  ;;  %v287_v21 = vld [vmem:[%s887_s15 + $0x20] sm:$0xff] }
  0x11   : > { %v306_v20 = vpack.c.bf16 %v298_v18, %v297_v17  ;;  %v288_v22 = vld [vmem:[%s887_s15 + $0x28] sm:$0xff]  ;;  %v289_v24 = vld [vmem:[%s887_s15 + $0x30] sm:$0xff]  ;;  %v290_v25 = vld [vmem:[%s887_s15 + $0x38] sm:$0xff] }
  0x12   : > { %347 = vmatpush.bf16.msra.mxu0 %v314_v5  ;;  %800 = vmatpush.bf16.msra.mxu3 %v314_v5  ;;  %v301_v23 = vpack.c.bf16 %v288_v22, %v287_v21  ;;  %v302_v26 = vpack.c.bf16 %v290_v25, %v289_v24  ;;  %v291_v27 = vld [vmem:[%s887_s15 + $0x40] sm:$0xff]  ;;  %v292_v28 = vld [vmem:[%s887_s15 + $0x48] sm:$0xff]  ;;  %v293_v30 = vld [vmem:[%s887_s15 + $0x50] sm:$0xff] }
  0x13   : > { %v303_v29 = vpack.c.bf16 %v292_v28, %v291_v27  ;;  %v294_v31 = vld [vmem:[%s887_s15 + $0x58] sm:$0xff]  ;;  %v538_v34 = vld [vmem:[%s1071_s3] sm:$0xff] }
  0x14   : > { %v304_v32 = vpack.c.bf16 %v294_v31, %v293_v30  ;;  %554 = vmatpush.msra.mxu2 %v538_v34 }
  0x16   : > { %348 = vmatpush.bf16.msra.mxu0 %v313_v8  ;;  %801 = vmatpush.bf16.msra.mxu3 %v313_v8 }
  0x19   : > { %757 = vmatmul.msk.bf16.vlgmr.msra.gmra.mxu0 %vm316_vm0, %v299_v13  ;;  %763 = vmatmul.msk.bf16.vlgmr.msra.gmra.mxu3 %vm316_vm0, %v305_v14 }
  0x1a   : > { %802 = vmatpush.msrb.mxu3 %v407_v33 }
  0x1c   : > { %803 = vmatpush.msra.mxu3 %v538_v34 }
  0x29   : > { %758 = vmatmul.msk.bf16.gmra.mxu0 %vm316_vm0, %v300_v19  ;;  %764 = vmatmul.msk.bf16.gmra.mxu3 %vm316_vm0, %v306_v20 }
  0x39   : > { %759 = vmatmul.msk.bf16.gmra.mxu0 %vm316_vm0, %v301_v23 }
  0x49   : > { %760 = vmatmul.msk.bf16.gmra.mxu0 %vm316_vm0, %v302_v26 }
  0x59   : > { %761 = vmatmul.msk.bf16.gmra.mxu0 %vm316_vm0, %v303_v29 }
  0x69   : > { %762 = vmatmul.msk.bf16.gmra.mxu0 %vm316_vm0, %v304_v32 }
  0x96   : > { %v350_v35 = vpop.f32.mrf.mxu0 }
  0x97   : > { %391 = vst.msk [vmem:[%s923_s23] sm:$0xff] %vm390_vm1, %v350_v35  ;;  %765 = vmatmul.msk.f32.vlgmr.msra.gmra.mxu1 %vm390_vm1, %v350_v35  ;;  %781 = vmatmul.msk.f32.vlgmr.msra.gmra.mxu2 %vm390_vm1, %v350_v35 }
  0x9c   : > { %v380_v36 = vpop.f32.mrf.mxu3 }
  0x9d   : > { %403 = vst.msk [vmem:[%s923_s23 + $0x60] sm:$0xff] %vm390_vm1, %v380_v36 }
  0x9e   : > { %v352_v37 = vpop.f32.mrf.mxu0 }
  0x9f   : > { %392 = vst.msk [vmem:[%s923_s23 + $0x8] sm:$0xff] %vm390_vm1, %v352_v37  ;;  %766 = vmatmul.msk.f32.gmra.mxu1 %vm390_vm1, %v352_v37  ;;  %782 = vmatmul.msk.f32.gmra.mxu2 %vm390_vm1, %v352_v37 }
  0xa4   : > { %v382_v38 = vpop.f32.mrf.mxu3 }
  0xa5   : > { %404 = vst.msk [vmem:[%s923_s23 + $0x68] sm:$0xff] %vm390_vm1, %v382_v38  ;;  %778 = vmatmul.msk.f32.vlgmr.msrb.gmra.mxu3 %vm390_vm1, %v382_v38 }
  0xa6   : > { %v355_v39 = vpop.f32.mrf.mxu0 }
  0xa7   : > { %393 = vst.msk [vmem:[%s923_s23 + $0x10] sm:$0xff] %vm390_vm1, %v355_v39  ;;  %767 = vmatmul.msk.f32.gmra.mxu1 %vm390_vm1, %v355_v39  ;;  %783 = vmatmul.msk.f32.gmra.mxu2 %vm390_vm1, %v355_v39 }
  0xac   : > { %v385_v40 = vpop.f32.mrf.mxu3 }
  0xad   : > { %405 = vst.msk [vmem:[%s923_s23 + $0x70] sm:$0xff] %vm390_vm1, %v385_v40  ;;  %779 = vmatmul.msk.f32.gmra.mxu3 %vm390_vm1, %v385_v40 }
  0xae   : > { %v357_v41 = vpop.f32.mrf.mxu0 }
  0xaf   : > { %394 = vst.msk [vmem:[%s923_s23 + $0x18] sm:$0xff] %vm390_vm1, %v357_v41  ;;  %768 = vmatmul.msk.f32.gmra.mxu1 %vm390_vm1, %v357_v41  ;;  %784 = vmatmul.msk.f32.gmra.mxu2 %vm390_vm1, %v357_v41 }
  0xb4   : > { %v387_v42 = vpop.f32.mrf.mxu3 }
  0xb5   : > { %406 = vst.msk [vmem:[%s923_s23 + $0x78] sm:$0xff] %vm390_vm1, %v387_v42  ;;  %780 = vmatmul.msk.f32.gmra.mxu3 %vm390_vm1, %v387_v42 }
  0xb6   : > { %v360_v43 = vpop.f32.mrf.mxu0 }
  0xb7   : > { %395 = vst.msk [vmem:[%s923_s23 + $0x20] sm:$0xff] %vm390_vm1, %v360_v43  ;;  %769 = vmatmul.msk.f32.gmra.mxu1 %vm390_vm1, %v360_v43  ;;  %785 = vmatmul.msk.f32.gmra.mxu2 %vm390_vm1, %v360_v43 }
  0xbd   : > { %794 = vmatmul.msk.f32.vlgmr.msra.gmra.mxu3 %vm390_vm1, %v382_v38 }
  0xbe   : > { %v362_v44 = vpop.f32.mrf.mxu0 }
  0xbf   : > { %396 = vst.msk [vmem:[%s923_s23 + $0x28] sm:$0xff] %vm390_vm1, %v362_v44  ;;  %770 = vmatmul.msk.f32.gmra.mxu1 %vm390_vm1, %v362_v44  ;;  %786 = vmatmul.msk.f32.gmra.mxu2 %vm390_vm1, %v362_v44 }
  0xc5   : > { %795 = vmatmul.msk.f32.gmra.mxu3 %vm390_vm1, %v385_v40 }
  0xc6   : > { %v365_v45 = vpop.f32.mrf.mxu0 }
  0xc7   : > { %397 = vst.msk [vmem:[%s923_s23 + $0x30] sm:$0xff] %vm390_vm1, %v365_v45  ;;  %771 = vmatmul.msk.f32.gmra.mxu1 %vm390_vm1, %v365_v45  ;;  %787 = vmatmul.msk.f32.gmra.mxu2 %vm390_vm1, %v365_v45 }
  0xcd   : > { %796 = vmatmul.msk.f32.gmra.mxu3 %vm390_vm1, %v387_v42 }
  0xce   : > { %v367_v46 = vpop.f32.mrf.mxu0 }
  0xcf   : > { %398 = vst.msk [vmem:[%s923_s23 + $0x38] sm:$0xff] %vm390_vm1, %v367_v46  ;;  %772 = vmatmul.msk.f32.gmra.mxu1 %vm390_vm1, %v367_v46  ;;  %788 = vmatmul.msk.f32.gmra.mxu2 %vm390_vm1, %v367_v46 }
  0xd6   : > { %v370_v47 = vpop.f32.mrf.mxu0 }
  0xd7   : > { %399 = vst.msk [vmem:[%s923_s23 + $0x40] sm:$0xff] %vm390_vm1, %v370_v47  ;;  %773 = vmatmul.msk.f32.gmra.mxu1 %vm390_vm1, %v370_v47  ;;  %789 = vmatmul.msk.f32.gmra.mxu2 %vm390_vm1, %v370_v47 }
  0xde   : > { %v372_v48 = vpop.f32.mrf.mxu0 }
  0xdf   : > { %400 = vst.msk [vmem:[%s923_s23 + $0x48] sm:$0xff] %vm390_vm1, %v372_v48  ;;  %774 = vmatmul.msk.f32.gmra.mxu1 %vm390_vm1, %v372_v48  ;;  %790 = vmatmul.msk.f32.gmra.mxu2 %vm390_vm1, %v372_v48 }
  0xe6   : > { %v375_v49 = vpop.f32.mrf.mxu0 }
  0xe7   : > { %401 = vst.msk [vmem:[%s923_s23 + $0x50] sm:$0xff] %vm390_vm1, %v375_v49  ;;  %775 = vmatmul.msk.f32.gmra.mxu1 %vm390_vm1, %v375_v49  ;;  %791 = vmatmul.msk.f32.gmra.mxu2 %vm390_vm1, %v375_v49 }
  0xee   : > { %v377_v50 = vpop.f32.mrf.mxu0 }
  0xef   : > { %402 = vst.msk [vmem:[%s923_s23 + $0x58] sm:$0xff] %vm390_vm1, %v377_v50  ;;  %776 = vmatmul.msk.f32.gmra.mxu1 %vm390_vm1, %v377_v50  ;;  %792 = vmatmul.msk.f32.gmra.mxu2 %vm390_vm1, %v377_v50 }
  0xf7   : > { %777 = vmatmul.msk.f32.gmra.mxu1 %vm390_vm1, %v380_v36  ;;  %793 = vmatmul.msk.f32.gmra.mxu2 %vm390_vm1, %v380_v36 }
 0x114   : > { %v473_v51 = vpop.f32.mrf.mxu1 }
 0x115   : > { %522 = vst.msk [vmem:[%s993_s26] sm:$0xff] %vm521_vm2, %v473_v51 }
 0x11a   : > { %v556_v52 = vpop.f32.mrf.mxu2 }
 0x11b   : > { %604 = vst.msk [vmem:[%s1001_s29] sm:$0xff] %vm521_vm2, %v556_v52 }
 0x11c   : > { %v476_v53 = vpop.f32.mrf.mxu1 }
 0x11d   : > { %523 = vst.msk [vmem:[%s993_s26 + $0x8] sm:$0xff] %vm521_vm2, %v476_v53 }
 0x122   : > { %v559_v54 = vpop.f32.mrf.mxu2 }
 0x123   : > { %605 = vst.msk [vmem:[%s1001_s29 + $0x8] sm:$0xff] %vm521_vm2, %v559_v54 }
 0x124   : > { %v479_v55 = vpop.f32.mrf.mxu1 }
 0x125   : > { %524 = vst.msk [vmem:[%s993_s26 + $0x10] sm:$0xff] %vm521_vm2, %v479_v55 }
 0x128   : > { %v512_v56 = vpop.f32.mrf.mxu3 }
 0x129   : > { %535 = vst.msk [vmem:[%s993_s26 + $0x68] sm:$0xff] %vm521_vm2, %v512_v56 }
 0x12a   : > { %v562_v57 = vpop.f32.mrf.mxu2 }
 0x12b   : > { %606 = vst.msk [vmem:[%s1001_s29 + $0x10] sm:$0xff] %vm521_vm2, %v562_v57 }
 0x12c   : > { %v482_v58 = vpop.f32.mrf.mxu1 }
 0x12d   : > { %525 = vst.msk [vmem:[%s993_s26 + $0x18] sm:$0xff] %vm521_vm2, %v482_v58 }
 0x130   : > { %v515_v59 = vpop.f32.mrf.mxu3 }
 0x131   : > { %536 = vst.msk [vmem:[%s993_s26 + $0x70] sm:$0xff] %vm521_vm2, %v515_v59 }
 0x132   : > { %v565_v60 = vpop.f32.mrf.mxu2 }
 0x133   : > { %607 = vst.msk [vmem:[%s1001_s29 + $0x18] sm:$0xff] %vm521_vm2, %v565_v60 }
 0x134   : > { %v485_v61 = vpop.f32.mrf.mxu1 }
 0x135   : > { %526 = vst.msk [vmem:[%s993_s26 + $0x20] sm:$0xff] %vm521_vm2, %v485_v61 }
 0x138   : > { %v518_v62 = vpop.f32.mrf.mxu3 }
 0x139   : > { %537 = vst.msk [vmem:[%s993_s26 + $0x78] sm:$0xff] %vm521_vm2, %v518_v62 }
 0x13a   : > { %v568_v63 = vpop.f32.mrf.mxu2 }
 0x13b   : > { %608 = vst.msk [vmem:[%s1001_s29 + $0x20] sm:$0xff] %vm521_vm2, %v568_v63 }
 0x13c   : > { %v488_v0 = vpop.f32.mrf.mxu1 }
 0x13d   : > { %527 = vst.msk [vmem:[%s993_s26 + $0x28] sm:$0xff] %vm521_vm2, %v488_v0 }
 0x140   : > { %v595_v1 = vpop.f32.mrf.mxu3 }
 0x141   : > { %617 = vst.msk [vmem:[%s1001_s29 + $0x68] sm:$0xff] %vm521_vm2, %v595_v1 }
 0x142   : > { %v571_v2 = vpop.f32.mrf.mxu2 }
 0x143   : > { %609 = vst.msk [vmem:[%s1001_s29 + $0x28] sm:$0xff] %vm521_vm2, %v571_v2 }
 0x144   : > { %v491_v3 = vpop.f32.mrf.mxu1 }
 0x145   : > { %528 = vst.msk [vmem:[%s993_s26 + $0x30] sm:$0xff] %vm521_vm2, %v491_v3 }
 0x148   : > { %v598_v4 = vpop.f32.mrf.mxu3 }
 0x149   : > { %618 = vst.msk [vmem:[%s1001_s29 + $0x70] sm:$0xff] %vm521_vm2, %v598_v4 }
 0x14a   : > { %v574_v5 = vpop.f32.mrf.mxu2 }
 0x14b   : > { %610 = vst.msk [vmem:[%s1001_s29 + $0x30] sm:$0xff] %vm521_vm2, %v574_v5 }
 0x14c   : > { %v494_v6 = vpop.f32.mrf.mxu1 }
 0x14d   : > { %529 = vst.msk [vmem:[%s993_s26 + $0x38] sm:$0xff] %vm521_vm2, %v494_v6 }
 0x150   : > { %v601_v7 = vpop.f32.mrf.mxu3 }
 0x151   : > { %619 = vst.msk [vmem:[%s1001_s29 + $0x78] sm:$0xff] %vm521_vm2, %v601_v7 }
 0x152   : > { %v577_v8 = vpop.f32.mrf.mxu2 }
 0x153   : > { %611 = vst.msk [vmem:[%s1001_s29 + $0x38] sm:$0xff] %vm521_vm2, %v577_v8 }
 0x154   : > { %v497_v9 = vpop.f32.mrf.mxu1 }
 0x155   : > { %530 = vst.msk [vmem:[%s993_s26 + $0x40] sm:$0xff] %vm521_vm2, %v497_v9 }
 0x15a   : > { %v580_v10 = vpop.f32.mrf.mxu2 }
 0x15b   : > { %612 = vst.msk [vmem:[%s1001_s29 + $0x40] sm:$0xff] %vm521_vm2, %v580_v10 }
 0x15c   : > { %v500_v11 = vpop.f32.mrf.mxu1 }
 0x15d   : > { %531 = vst.msk [vmem:[%s993_s26 + $0x48] sm:$0xff] %vm521_vm2, %v500_v11 }
 0x162   : > { %v583_v12 = vpop.f32.mrf.mxu2 }
 0x163   : > { %613 = vst.msk [vmem:[%s1001_s29 + $0x48] sm:$0xff] %vm521_vm2, %v583_v12 }
 0x164   : > { %v503_v13 = vpop.f32.mrf.mxu1 }
 0x165   : > { %532 = vst.msk [vmem:[%s993_s26 + $0x50] sm:$0xff] %vm521_vm2, %v503_v13 }
 0x16a   : > { %v586_v14 = vpop.f32.mrf.mxu2 }
 0x16b   : > { %614 = vst.msk [vmem:[%s1001_s29 + $0x50] sm:$0xff] %vm521_vm2, %v586_v14 }
 0x16c   : > { %v506_v15 = vpop.f32.mrf.mxu1 }
 0x16d   : > { %533 = vst.msk [vmem:[%s993_s26 + $0x58] sm:$0xff] %vm521_vm2, %v506_v15 }
 0x172   : > { %v589_v16 = vpop.f32.mrf.mxu2 }
 0x173   : > { %615 = vst.msk [vmem:[%s1001_s29 + $0x58] sm:$0xff] %vm521_vm2, %v589_v16 }
 0x174   : > { %v509_v17 = vpop.f32.mrf.mxu1 }
 0x175   : > { %534 = vst.msk [vmem:[%s993_s26 + $0x60] sm:$0xff] %vm521_vm2, %v509_v17 }
 0x17a   : > { %v592_v18 = vpop.f32.mrf.mxu2 }
 0x17b   : > { %616 = vst.msk [vmem:[%s1001_s29 + $0x60] sm:$0xff] %vm521_vm2, %v592_v18 }
 0x17c PF: > { %s17_s21 = sadd.s32 1, %s818_s21  }
 0x17d   : > { %p14_p4 = scmp.ge.s32.totalorder %s17_s21, 4  }
 0x17f   :  { %16 = sbr.rel (!%p14_p4) target bundleno = 1 (0x1), region = 90 }

// kernel: gat_forward.7
= control target key start
LH: loop header
LB: loop body
LE: loop exit
PB: predicated region body
PF: predicated region fallthrough
CT: control target
= control target key end

     0   :  { %s1625_s15 = smov 0   ;;  %s1627_s16 = smov 0   ;;  %s2151_s0 = inlined_call_operand.vmem [shape: f32[256,1], index: 0, kind: input, shape index: {}]   ;;  %s2152_s1 = inlined_call_operand.vmem [shape: f32[1,256], index: 1, kind: input, shape index: {}]   ;;  %s2153_s2 = inlined_call_operand.vmem [shape: f32[256,8], index: 2, kind: input, shape index: {}]   ;;  %s2154_s3 = inlined_call_operand.vmem [shape: s8[256,256], index: 3, kind: input, shape index: {}]   ;;  %s2155_s4 = inlined_call_operand.vmem [shape: f32[256,8], index: 4, kind: output, shape index: {}]  }
   0x1   :  { %s1629_s17 = smov 0   ;;  %s1631_s18 = smov 0  }
   0x2   :  { %s1633_s19 = smov 0   ;;  %s1635_s20 = smov 0  }
   0x3   :  { %s1637_s21 = smov 0  }
   0x4 LB: > { %s23_s22 = sadd.s32 1, %s1587_s19  ;;  %s26_s23 = sadd.s32 1, %s1591_s20  ;;  %s1595_s21 = sphi %s1637_s21, %s14_s21   ;;  %s1591_s20 = sphi %s1635_s20, %s2201_s20   ;;  %s1587_s19 = sphi %s1633_s19, %s2200_s19   ;;  %s1583_s18 = sphi %s1631_s18, %s2199_s18   ;;  %s1579_s17 = sphi %s1629_s17, %s2198_s17   ;;  %s1575_s16 = sphi %s1627_s16, %s2197_s16   ;;  %s1571_s15 = sphi %s1625_s15, %s2196_s15  }
   0x5   : > { %p24_p0 = scmp.ge.s32.totalorder %s23_s22, 2  ;;  %p120_p1 = scmp.ne.s32.totalorder %s1575_s16, %s1571_s15 }
   0x6   : > { %p121_p2 = scmp.eq.s32.totalorder %s1595_s21, 0  ;;  %s113_s27 = sadd.s32 1, %s1575_s16 }
   0x7   : > { %s2203_s22 = smov (%p24_p0, %s23_s22), 0  ;;  %s2205_s23 = smov (!%p24_p0, %s26_s23), %s1591_s20 }
   0x8   : > { %p122_p3 = por %p121_p2, %p120_p1  ;;  %p28_p4 = scmp.ge.s32.totalorder %s2205_s23, 2 }
   0x9   : > { %s109_s24 = ssub.s32 %s1587_s19, %s2203_s22  ;;  %p1297_p6 = scmp.ge.s32.totalorder %s1595_s21, 4 }
   0xa   : > { %s2207_s23 = smov (%p28_p4, %s2205_s23), 0 }
   0xb   : > { %s108_s25 = ssub.s32 %s1591_s20, %s2207_s23  ;;  %172 = sbr.rel (%p1297_p6) target bundleno = 26 (0x1a), region = 16 }
   0xc   : > { %s110_s26 = sor.u32 %s109_s24, %s108_s25 }
   0xd   : > { %p111_p5 = scmp.eq.s32.totalorder %s110_s26, 0 }
   0xf   : > { %s1676_s28 = scalar_select %p111_p5, %s1575_s16, %s113_s27  }
  0x10   : > { %199 = sbr.rel (!%p122_p3) target bundleno = 26 (0x1a), region = 32  ;;  %s201_s29 = sand.u32 (%p122_p3), 1, %s1575_s16  }
  0x11   : > { %s1354_s30 = sshll.u32 (%p122_p3), %s1591_s20, 3  ;;  %s1298_s5 = sshll.u32 (%p122_p3), %s201_s29, 5 }
  0x12   : > { %s206_s6 = sadd.s32 (%p122_p3), %s1587_s19, %s1354_s30  ;;  %s203_s11 = scalar_lea.vmem (%p122_p3), [#allocation4], %s1298_s5 }
  0x13   : > { %s1301_s7 = sshll.u32 (%p122_p3), %s206_s6, 3 }
  0x14   : > { %s208_s10 = scalar_lea.vmem (%p122_p3), %s2154_s3, %s1301_s7 }
  0x15   : > { %v243_v0 = vld [vmem:[%s208_s10] sm:$0xff]  ;;  %v245_v1 = vld [vmem:[%s208_s10 + $0x10] sm:$0xff] }
  0x16   : > { %v247_v2 = vld [vmem:[%s208_s10 + $0x20] sm:$0xff]  ;;  %244 = vst [vmem:[%s203_s11] sm:$0xff] %v243_v0  ;;  %v249_v3 = vld [vmem:[%s208_s10 + $0x30] sm:$0xff] }
  0x17   : > { %246 = vst [vmem:[%s203_s11 + $0x8] sm:$0xff] %v245_v1 }
  0x18   : > { %248 = vst [vmem:[%s203_s11 + $0x10] sm:$0xff] %v247_v2 }
  0x19   : > { %250 = vst [vmem:[%s203_s11 + $0x18] sm:$0xff] %v249_v3 }
  0x1a PF: > { %p1302_p7 = scmp.ge.s32.totalorder %s1595_s21, 1  ;;  %p255_p8 = scmp.lt.s32.totalorder %s1595_s21, 5 }
  0x1c   : > { %p256_p9 = pnand %p1302_p7, %p255_p8 }
  0x1d   : > { %s262_s12 = sand.u32 (!%p256_p9), 1, %s1571_s15   ;;  %s1304_s13 = sshll.u32 (!%p256_p9), %s1583_s18, 4 }
  0x1e   : > { %259 = sbr.rel (%p256_p9) target bundleno = 578 (0x242), region = 70  ;;  %s1303_s14 = sshll.u32 (!%p256_p9), %s262_s12, 5 }
  0x1f   : > { %p301_p10 = scmp.lt.s32.totalorder (!%p256_p9), %s1304_s13, 31  ;;  %p306_p11 = scmp.lt.s32.totalorder (!%p256_p9), %s1579_s17, 1 }
  0x20   : > { %s1306_s26 = sshll.u32 (!%p256_p9), %s1579_s17, 4  ;;  %p1310_p13 = scmp.ne.s32.totalorder (!%p256_p9), %s1579_s17, 0 }
  0x21   : > { %p310_p12 = scmp.lt.s32.totalorder (!%p256_p9), %s1306_s26, 31 }
  0x23   : > { %s2209_s13 = smov (!%p301_p10, %s1304_s13), 31  ;;  %s2211_s26 = smov (!%p310_p12, %s1306_s26), 31 }
  0x24   : > { %s1691_s24 = scalar_select %p306_p11, %s1579_s17, 1 }
  0x25   : > { %s1305_s25 = sshll.u32 %s2209_s13, 3  ;;  %s1307_s9 = sshll.u32 %s2211_s26, 3 }
  0x26   : > { %s1697_s30 = scalar_lea.vmem %s2151_s0, %s1305_s25  ;;  %s308_s7 = scalar_lea.vmem %s2152_s1, %s1691_s24 }
  0x27   : > { %s1706_s8 = scalar_lea.vmem %s2155_s4, %s1305_s25  ;;  %s1711_s12 = scalar_lea.vmem %s2153_s2, %s1307_s9 }
  0x28   : > { %s1713_s13 = scalar_lea.vmem [#allocation4], %s1303_s14  ;;  %327 = sbr.rel (%p1310_p13) target bundleno = 78 (0x4e), region = 78 }
  0x2d   : > { %vm328_vm0 = vcmask 64512   ;;  %v1597_v4 = vmov 0.0   ;;  %vm345_vm1 = vcmask 7168  }
  0x2e   : > { %329 = vst.msk [vmem:[#allocation2] sm:$0xff] %vm328_vm0, %v1597_v4 }
  0x2f   : > { %330 = vst.msk [vmem:[#allocation2 + $0x8] sm:$0xff] %vm328_vm0, %v1597_v4 }
  0x30   : > { %331 = vst.msk [vmem:[#allocation2 + $0x10] sm:$0xff] %vm328_vm0, %v1597_v4 }
  0x31   : > { %332 = vst.msk [vmem:[#allocation2 + $0x18] sm:$0xff] %vm328_vm0, %v1597_v4 }
  0x32   : > { %333 = vst.msk [vmem:[#allocation2 + $0x20] sm:$0xff] %vm328_vm0, %v1597_v4 }
  0x33   : > { %334 = vst.msk [vmem:[#allocation2 + $0x28] sm:$0xff] %vm328_vm0, %v1597_v4 }
  0x34   : > { %335 = vst.msk [vmem:[#allocation2 + $0x30] sm:$0xff] %vm328_vm0, %v1597_v4 }
  0x35   : > { %336 = vst.msk [vmem:[#allocation2 + $0x38] sm:$0xff] %vm328_vm0, %v1597_v4 }
  0x36   : > { %337 = vst.msk [vmem:[#allocation2 + $0x40] sm:$0xff] %vm328_vm0, %v1597_v4 }
  0x37   : > { %338 = vst.msk [vmem:[#allocation2 + $0x48] sm:$0xff] %vm328_vm0, %v1597_v4 }
  0x38   : > { %339 = vst.msk [vmem:[#allocation2 + $0x50] sm:$0xff] %vm328_vm0, %v1597_v4 }
  0x39   : > { %340 = vst.msk [vmem:[#allocation2 + $0x58] sm:$0xff] %vm328_vm0, %v1597_v4 }
  0x3a   : > { %341 = vst.msk [vmem:[#allocation2 + $0x60] sm:$0xff] %vm328_vm0, %v1597_v4 }
  0x3b   : > { %342 = vst.msk [vmem:[#allocation2 + $0x68] sm:$0xff] %vm328_vm0, %v1597_v4 }
  0x3c   : > { %343 = vst.msk [vmem:[#allocation2 + $0x70] sm:$0xff] %vm328_vm0, %v1597_v4 }
  0x3d   : > { %344 = vst.msk [vmem:[#allocation2 + $0x78] sm:$0xff] %vm328_vm0, %v1597_v4 }
  0x3e   : > { %346 = vst.msk [vmem:[#allocation3] sm:$0xff] %vm345_vm1, %v1597_v4 }
  0x3f   : > { %347 = vst.msk [vmem:[#allocation3 + $0x8] sm:$0xff] %vm345_vm1, %v1597_v4 }
  0x40   : > { %348 = vst.msk [vmem:[#allocation3 + $0x10] sm:$0xff] %vm345_vm1, %v1597_v4 }
  0x41   : > { %349 = vst.msk [vmem:[#allocation3 + $0x18] sm:$0xff] %vm345_vm1, %v1597_v4 }
  0x42   : > { %350 = vst.msk [vmem:[#allocation3 + $0x20] sm:$0xff] %vm345_vm1, %v1597_v4 }
  0x43   : > { %351 = vst.msk [vmem:[#allocation3 + $0x28] sm:$0xff] %vm345_vm1, %v1597_v4 }
  0x44   : > { %352 = vst.msk [vmem:[#allocation3 + $0x30] sm:$0xff] %vm345_vm1, %v1597_v4 }
  0x45   : > { %353 = vst.msk [vmem:[#allocation3 + $0x38] sm:$0xff] %vm345_vm1, %v1597_v4 }
  0x46   : > { %354 = vst.msk [vmem:[#allocation3 + $0x40] sm:$0xff] %vm345_vm1, %v1597_v4 }
  0x47   : > { %355 = vst.msk [vmem:[#allocation3 + $0x48] sm:$0xff] %vm345_vm1, %v1597_v4 }
  0x48   : > { %356 = vst.msk [vmem:[#allocation3 + $0x50] sm:$0xff] %vm345_vm1, %v1597_v4 }
  0x49   : > { %357 = vst.msk [vmem:[#allocation3 + $0x58] sm:$0xff] %vm345_vm1, %v1597_v4 }
  0x4a   : > { %358 = vst.msk [vmem:[#allocation3 + $0x60] sm:$0xff] %vm345_vm1, %v1597_v4 }
  0x4b   : > { %359 = vst.msk [vmem:[#allocation3 + $0x68] sm:$0xff] %vm345_vm1, %v1597_v4 }
  0x4c   : > { %360 = vst.msk [vmem:[#allocation3 + $0x70] sm:$0xff] %vm345_vm1, %v1597_v4 }
  0x4d   : > { %361 = vst.msk [vmem:[#allocation3 + $0x78] sm:$0xff] %vm345_vm1, %v1597_v4 }
  0x4e PF: > { %v382_v5 = vld [vmem:[%s1697_s30 + $0x60] sm:$0xff]  ;;  %v1598_v8 = vmov 0   ;;  %v383_v9 = vld [vmem:[%s1697_s30 + $0x68] sm:$0xff]  ;;  %v380_v14 = vld [vmem:[%s1697_s30 + $0x50] sm:$0xff]  ;;  %p1335_p0 = scmp.ne.s32.totalorder %s1579_s17, 1 }
  0x4f   : > { %v378_v6 = vld [vmem:[%s1697_s30 + $0x40] sm:$0xff]  ;;  %1440 = vset.pattern.permute.xlu2 %v1598_v8  ;;  %1439 = vset.pattern.permute.xlu1 %v1598_v8  ;;  %v379_v10 = vld [vmem:[%s1697_s30 + $0x48] sm:$0xff]  ;;  %v384_v15 = vld [vmem:[%s1697_s30 + $0x70] sm:$0xff] }
  0x50   : > { %v370_v7 = vld [vmem:[%s1697_s30] sm:$0xff]  ;;  %1438 = vset.pattern.permute.xlu0 %v1598_v8  ;;  %473 = vperm.xlu1 %1439, %v382_v5   ;;  %v371_v11 = vld [vmem:[%s1697_s30 + $0x8] sm:$0xff]  ;;  %v381_v16 = vld [vmem:[%s1697_s30 + $0x58] sm:$0xff] }
  0x51   : > { %453 = vperm.xlu0 %1438, %v378_v6   ;;  %413 = vperm.xlu2 %1440, %v370_v7   ;;  %v375_v12 = vld [vmem:[%s1697_s30 + $0x28] sm:$0xff]  ;;  %v374_v13 = vld [vmem:[%s1697_s30 + $0x20] sm:$0xff]  ;;  %v385_v17 = vld [vmem:[%s1697_s30 + $0x78] sm:$0xff] }
  0x52   : > { %v373_v18 = vld [vmem:[%s1697_s30 + $0x18] sm:$0xff]  ;;  %v372_v19 = vld [vmem:[%s1697_s30 + $0x10] sm:$0xff]  ;;  %v399_v25 = vld [vmem:[%s1711_s12 + $0x60] sm:$0xff] }
  0x53   : > { %v376_v20 = vld [vmem:[%s1697_s30 + $0x30] sm:$0xff]  ;;  %v377_v21 = vld [vmem:[%s1697_s30 + $0x38] sm:$0xff]  ;;  %v400_v26 = vld [vmem:[%s1711_s12 + $0x68] sm:$0xff] }
  0x54   : > { %v401_v22 = vld [vmem:[%s1711_s12 + $0x70] sm:$0xff]  ;;  %v402_v23 = vld [vmem:[%s1711_s12 + $0x78] sm:$0xff]  ;;  %v409_v27 = vpack.c.bf16 %v400_v26, %v399_v25  ;;  %v395_v31 = vld [vmem:[%s1711_s12 + $0x40] sm:$0xff] }
  0x55   : > { %v410_v24 = vpack.c.bf16 %v402_v23, %v401_v22  ;;  %v397_v28 = vld [vmem:[%s1711_s12 + $0x50] sm:$0xff]  ;;  %v398_v29 = vld [vmem:[%s1711_s12 + $0x58] sm:$0xff]  ;;  %v396_v32 = vld [vmem:[%s1711_s12 + $0x48] sm:$0xff] }
  0x56   : > { %v408_v30 = vpack.c.bf16 %v398_v29, %v397_v28  ;;  %v407_v33 = vpack.c.bf16 %v396_v32, %v395_v31  ;;  %v393_v34 = vld [vmem:[%s1711_s12 + $0x30] sm:$0xff]  ;;  %v394_v35 = vld [vmem:[%s1711_s12 + $0x38] sm:$0xff]  ;;  %v391_v37 = vld [vmem:[%s1711_s12 + $0x20] sm:$0xff] }
  0x57   : > { %843 = vmatpush.bf16.msra.mxu0 %v410_v24  ;;  %1356 = vmatpush.bf16.msra.mxu2 %v410_v24  ;;  %v406_v36 = vpack.c.bf16 %v394_v35, %v393_v34  ;;  %v392_v38 = vld [vmem:[%s1711_s12 + $0x28] sm:$0xff]  ;;  %v362_v39 = vld [vmem:[%s1713_s13] sm:$0xff]  ;;  %v364_v44 = vld [vmem:[%s1713_s13 + $0x10] sm:$0xff] }
  0x58   : > { %478 = vperm.xlu1 %1439, %v383_v9   ;;  %1357 = vmatpush.bf16.msra.mxu3 %v410_v24  ;;  %v405_v40 = vpack.c.bf16 %v392_v38, %v391_v37  ;;  %vm366_vm2 = vnez %v362_v39  ;;  %v1785_v41 = vld [vmem:[%s308_s7] ss:$0 sm:$0xff]  ;;  %v389_v47 = vld [vmem:[%s1711_s12 + $0x10] sm:$0xff]  ;;  %v390_v48 = vld [vmem:[%s1711_s12 + $0x18] sm:$0xff]  ;;  %vm368_vm3 = vnez %v364_v44 }
  0x59   : > { %458 = vperm.xlu0 %1438, %v379_v10   ;;  %418 = vperm.xlu2 %1440, %v371_v11   ;;  %v1788_v42 = vsel %vm366_vm2, 16843009, %v1598_v8  ;;  %v404_v51 = vpack.c.bf16 %v390_v48, %v389_v47  ;;  %v365_v52 = vld [vmem:[%s1713_s13 + $0x18] sm:$0xff]  ;;  %v387_v56 = vld [vmem:[%s1711_s12] sm:$0xff]  ;;  %v388_v57 = vld [vmem:[%s1711_s12 + $0x8] sm:$0xff] }
  0x5a   : > { %1355 = vmatpush.bf16.msra.mxu1 %v410_v24  ;;  %v610_v43 = vunpack.c.0.s8 %v1788_v42  ;;  %v611_v45 = vunpack.c.1.s8 %v1788_v42  ;;  %v1800_v58 = vsel %vm368_vm3, 16843009, %v1598_v8  ;;  %vm369_vm5 = vnez %v365_v52  ;;  %v363_v24 = vld [vmem:[%s1713_s13 + $0x8] sm:$0xff] }
  0x5b   : > { %844 = vmatpush.bf16.msra.mxu0 %v409_v27  ;;  %1359 = vmatpush.bf16.msra.mxu2 %v409_v27  ;;  %v403_v60 = vpack.c.bf16 %v388_v57, %v387_v56  ;;  %v618_v63 = vunpack.c.0.s8 %v1800_v58  ;;  %v1804_v0 = vsel %vm369_vm5, 16843009, %v1598_v8  ;;  %v619_v10 = vunpack.c.1.s8 %v1800_v58 }
  0x5c   : > { %1360 = vmatpush.bf16.msra.mxu3 %v409_v27  ;;  %v626_v49 = vpack.c.b16 %v610_v43, %v610_v43  ;;  %v628_v55 = vpack.c.b16 %v611_v45, %v611_v45  ;;  %v622_v5 = vunpack.c.0.s8 %v1804_v0  ;;  %v623_v11 = vunpack.c.1.s8 %v1804_v0 }
  0x5d   : > { %v642_v7 = vpack.c.b16 %v618_v63, %v618_v63  ;;  %vm367_vm11 = vnez %v363_v24  ;;  %v620_v28 = vunpack.c.2.s8 %v1800_v58  ;;  %v625_v35 = vunpack.c.3.s8 %v1804_v0 }
  0x5e   : > { %1358 = vmatpush.bf16.msra.mxu1 %v409_v27  ;;  %v627_v53 = vpack.c.b8 %v626_v49, %v626_v49  ;;  %v629_v62 = vpack.c.b8 %v628_v55, %v628_v55  ;;  %v1832_v34 = vsel %vm367_vm11, 16843009, %v1598_v8 }
  0x5f   : > { %845 = vmatpush.bf16.msra.mxu0 %v408_v30  ;;  %1362 = vmatpush.bf16.msra.mxu2 %v408_v30  ;;  %v646_v43 = vpack.c.b16 %v620_v28, %v620_v28  ;;  %v614_v47 = vunpack.c.0.s8 %v1832_v34  ;;  %v616_v56 = vunpack.c.2.s8 %v1832_v34 }
  0x60   : > { %438 = vperm.xlu1 %1439, %v375_v12   ;;  %1363 = vmatpush.bf16.msra.mxu3 %v408_v30  ;;  %vm658_vm6 = vnez %v627_v53  ;;  %vm659_vm8 = vnez %v629_v62 }
  0x61   : > { %433 = vperm.xlu0 %1438, %v374_v13   ;;  %463 = vperm.xlu2 %1440, %v380_v14   ;;  %v674_v4 = vsel %vm658_vm6, 16843009, %v1598_v8  ;;  %v675_v14 = vsel %vm659_vm8, 16843009, %v1598_v8 }
  0x62   : > { %1361 = vmatpush.bf16.msra.mxu1 %v408_v30  ;;  %v690_v9 = vunpack.c.0.s8 %v674_v4  ;;  %v691_v22 = vunpack.c.0.s8 %v675_v14  ;;  %v624_v30 = vunpack.c.2.s8 %v1804_v0 }
  0x63   : > { %846 = vmatpush.bf16.msra.mxu0 %v407_v33  ;;  %1365 = vmatpush.bf16.msra.mxu2 %v407_v33 }
  0x64   : > { %1366 = vmatpush.bf16.msra.mxu3 %v407_v33  ;;  %vm1812_vm9 = vcmp.ne.s32.totalorder %v690_v9, 0  ;;  %vm1820_vm12 = vcmp.ne.s32.totalorder %v691_v22, 0  ;;  %v621_v22 = vunpack.c.3.s8 %v1800_v58 }
  0x65   : > { %vm1311_vm14 = vmpackc.low %vm1820_vm12, %vm1812_vm9 }
  0x66   : > { %1364 = vmatpush.bf16.msra.mxu1 %v407_v33  ;;  %v648_v0 = vpack.c.b16 %v621_v22, %v621_v22 }
  0x67   : > { %847 = vmatpush.bf16.msra.mxu0 %v406_v36  ;;  %1368 = vmatpush.bf16.msra.mxu2 %v406_v36 }
  0x68   : > { %483 = vperm.xlu1 %1439, %v384_v15   ;;  %1369 = vmatpush.bf16.msra.mxu3 %v406_v36  ;;  %v643_v15 = vpack.c.b8 %v642_v7, %v642_v7 }
  0x69   : > { %468 = vperm.xlu0 %1438, %v381_v16   ;;  %488 = vperm.xlu2 %1440, %v385_v17   ;;  %v650_v16 = vpack.c.b16 %v622_v5, %v622_v5 }
  0x6a   : > { %1367 = vmatpush.bf16.msra.mxu1 %v406_v36  ;;  %vm666_vm10 = vnez %v643_v15 }
  0x6b   : > { %848 = vmatpush.bf16.msra.mxu0 %v405_v40  ;;  %1371 = vmatpush.bf16.msra.mxu2 %v405_v40  ;;  %v651_v25 = vpack.c.b8 %v650_v16, %v650_v16  ;;  %v1825_v32 = vsel %vm666_vm10, 16843009, %v1598_v8 }
  0x6c   : > { %1372 = vmatpush.bf16.msra.mxu3 %v405_v40  ;;  %v698_v63 = vunpack.c.0.s8 %v1825_v32 }
  0x6d   : > { %vm1827_vm13 = vnez %v651_v25 }
  0x6e   : > { %1370 = vmatpush.bf16.msra.mxu1 %v405_v40  ;;  %v686_v52 = vsel %vm1827_vm13, 16843009, %v1598_v8 }
  0x6f   : > { %849 = vmatpush.bf16.msra.mxu0 %v404_v51  ;;  %1374 = vmatpush.bf16.msra.mxu2 %v404_v51 }
  0x70   : > { %428 = vperm.xlu1 %1439, %v373_v18   ;;  %1375 = vmatpush.bf16.msra.mxu3 %v404_v51 }
  0x71   : > { %423 = vperm.xlu0 %1438, %v372_v19   ;;  %443 = vperm.xlu2 %1440, %v376_v20   ;;  %v644_v20 = vpack.c.b16 %v619_v10, %v619_v10 }
  0x72   : > { %1373 = vmatpush.bf16.msra.mxu1 %v404_v51 }
  0x73   : > { %850 = vmatpush.bf16.msra.mxu0 %v403_v60  ;;  %1377 = vmatpush.bf16.msra.mxu2 %v403_v60  ;;  %v645_v26 = vpack.c.b8 %v644_v20, %v644_v20 }
  0x74   : > { %1378 = vmatpush.bf16.msra.mxu3 %v403_v60 }
  0x75   : > { %vm1840_vm15 = vnez %v645_v26 }
  0x76   : > { %1376 = vmatpush.bf16.msra.mxu1 %v403_v60  ;;  %v647_v60 = vpack.c.b8 %v646_v43, %v646_v43 }
  0x79   : > { %448 = vperm.xlu0 %1438, %v377_v21   ;;  %v652_v21 = vpack.c.b16 %v623_v11, %v623_v11 }
  0x7b   : > { %v653_v27 = vpack.c.b8 %v652_v21, %v652_v21 }
  0x7d   : > { %vm1844_vm0 = vnez %v653_v27 }
  0x7e   : > { %v1863_v55 = vsel %vm1844_vm0, 16843009, %v1598_v8 }
  0x7f   : > { %v703_v7 = vunpack.c.0.s8 %v1863_v55 }
  0x81   : > { %vm1899_vm0 = vcmp.ne.s32.totalorder %v703_v7, 0 }
  0xab   : > { %v414_v46 = vpop.permute.xlu2 %413 }
  0xac   : > { %v494_v50 = vadd.f32 %v1785_v41, %v414_v46 }
  0xae   : > { %vm510_vm4 = vcmp.gt.f32.partialorder %v494_v50, 0.0  ;;  %v526_v54 = vmul.f32 0.2, %v494_v50 }
  0xb0   : > { %v542_v59 = vsel %vm510_vm4, %v494_v50, %v526_v54  ;;  %v615_v50 = vunpack.c.1.s8 %v1832_v34  ;;  %v683_v54 = vsel %vm1840_vm15, 16843009, %v1598_v8  ;;  %vm668_vm4 = vnez %v647_v60 }
  0xb1   : > { %v558_v61 = vsub.f32 0.0, %v542_v59  ;;  %v634_v59 = vpack.c.b16 %v614_v47, %v614_v47  ;;  %v1875_v26 = vsel %vm668_vm4, 16843009, %v1598_v8 }
  0xb2   : > { %v700_v55 = vunpack.c.0.s8 %v1875_v26 }
  0xb3   : > { %v574_v1 = vmul.f32 1.442695, %v558_v61  ;;  %v419_v2 = vpop.permute.xlu2 %418  ;;  %v656_v61 = vpack.c.b16 %v625_v35, %v625_v35  ;;  %v635_v15 = vpack.c.b8 %v634_v59, %v634_v59 }
  0xb4   : > { %v495_v3 = vadd.f32 %v1785_v41, %v419_v2  ;;  %v636_v2 = vpack.c.b16 %v615_v50, %v615_v50 }
  0xb5   : > { %1442 = vpow2.f32 %v574_v1  ;;  %v702_v1 = vunpack.c.0.s8 %v686_v52  ;;  %v657_v16 = vpack.c.b8 %v656_v61, %v656_v61  ;;  %vm662_vm10 = vnez %v635_v15 }
  0xb6   : > { %vm511_vm7 = vcmp.gt.f32.partialorder %v495_v3, 0.0  ;;  %v527_v6 = vmul.f32 0.2, %v495_v3  ;;  %v637_v19 = vpack.c.b8 %v636_v2, %v636_v2 }
  0xb7   : > { %vm1886_vm11 = vnez %v657_v16 }
  0xb8   : > { %v543_v12 = vsel %vm511_vm7, %v495_v3, %v527_v6  ;;  %v699_v6 = vunpack.c.0.s8 %v683_v54  ;;  %vm663_vm13 = vnez %v637_v19  ;;  %v739_v54 = vld [vmem:[#allocation3 + $0x8] sm:$0xff] }
  0xb9   : > { %v559_v13 = vsub.f32 0.0, %v543_v12 }
  0xba   : > { %vm1877_vm8 = vcmp.ne.s32.totalorder %v699_v6, 0 }
  0xbb   : > { %v1443_v17 = vpop.eup %1442  ;;  %v576_v18 = vmul.f32 1.442695, %v559_v13  ;;  %v464_v29 = vpop.permute.xlu2 %463  ;;  %v1870_v13 = vpack.c.b16 %v616_v56, %v616_v56 }
  0xbc   : > { %v722_v23 = vsel %vm1812_vm9, %v1443_v17, 0.0  ;;  %v504_v48 = vadd.f32 %v1785_v41, %v464_v29  ;;  %vm1882_vm9 = vcmp.ne.s32.totalorder %v702_v1, 0 }
  0xbd   : > { %1444 = vpow2.f32 %v576_v18  ;;  %754 = vadd.xlane.f32.xlu1 %v722_v23 }
  0xbe   : > { %v536_v62 = vmul.f32 0.2, %v504_v48  ;;  %vm520_vm3 = vcmp.gt.f32.partialorder %v504_v48, 0.0 }
  0xc2   : > { %v474_v31 = vpop.permute.xlu1 %473 }
  0xc3   : > { %v1445_v36 = vpop.eup %1444  ;;  %v506_v37 = vadd.f32 %v1785_v41, %v474_v31  ;;  %v454_v38 = vpop.permute.xlu0 %453 }
  0xc4   : > { %v502_v44 = vadd.f32 %v1785_v41, %v454_v38  ;;  %v1312_v45 = vpack.c.bf16 %v1445_v36, %v1443_v17  ;;  %v723_v46 = vsel %vm1820_vm12, %v1445_v36, 0.0  ;;  %v489_v4 = vpop.permute.xlu2 %488  ;;  %v552_v17 = vsel %vm520_vm3, %v504_v48, %v536_v62 }
  0xc5   : > { %vm522_vm1 = vcmp.gt.f32.partialorder %v506_v37, 0.0  ;;  %v538_v49 = vmul.f32 0.2, %v506_v37  ;;  %756 = vadd.xlane.f32.xlu2 %v723_v46  ;;  %v509_v10 = vadd.f32 %v1785_v41, %v489_v4  ;;  %v568_v31 = vsub.f32 0.0, %v552_v17 }
  0xc6   : > { %vm518_vm2 = vcmp.gt.f32.partialorder %v502_v44, 0.0  ;;  %v534_v51 = vmul.f32 0.2, %v502_v44  ;;  %1313 = vmatmul.msk.bf16.vlgmr.msra.gmra.mxu0 %vm1311_vm14, %v1312_v45  ;;  %vm1890_vm12 = vcmp.ne.s32.totalorder %v698_v63, 0  ;;  %v678_v45 = vsel %vm662_vm10, 16843009, %v1598_v8 }
  0xc7   : > { %v554_v53 = vsel %vm522_vm1, %v506_v37, %v538_v49  ;;  %v541_v24 = vmul.f32 0.2, %v509_v10  ;;  %vm525_vm7 = vcmp.gt.f32.partialorder %v509_v10, 0.0  ;;  %v654_v46 = vpack.c.b16 %v624_v30, %v624_v30  ;;  %vm1329_vm1 = vmpackc.low %vm1899_vm0, %vm1882_vm9 }
  0xc8   : > { %v550_v57 = vsel %vm518_vm2, %v502_v44, %v534_v51  ;;  %v570_v3 = vsub.f32 0.0, %v554_v53  ;;  %v679_v48 = vsel %vm663_vm13, 16843009, %v1598_v8  ;;  %v649_v51 = vpack.c.b8 %v648_v0, %v648_v0  ;;  %vm1323_vm3 = vmpackc.low %vm1877_vm8, %vm1890_vm12 }
  0xc9   : > { %v566_v9 = vsub.f32 0.0, %v550_v57  ;;  %v557_v38 = vsel %vm525_vm7, %v509_v10, %v541_v24  ;;  %v594_v52 = vmul.f32 1.442695, %v568_v31  ;;  %v694_v61 = vunpack.c.0.s8 %v678_v45 }
  0xca   : > { %v479_v5 = vpop.permute.xlu1 %478  ;;  %v598_v20 = vmul.f32 1.442695, %v570_v3  ;;  %v573_v49 = vsub.f32 0.0, %v557_v38  ;;  %v655_v62 = vpack.c.b8 %v654_v46, %v654_v46  ;;  %v695_v2 = vunpack.c.0.s8 %v679_v48 }
  0xcb   : > { %v507_v11 = vadd.f32 %v1785_v41, %v479_v5  ;;  %v459_v12 = vpop.permute.xlu0 %458  ;;  %v590_v23 = vmul.f32 1.442695, %v566_v9  ;;  %v1911_v3 = vsel %vm1886_vm11, 16843009, %v1598_v8  ;;  %v612_v4 = vunpack.c.2.s8 %v1788_v42 }
  0xcc   : > { %v503_v14 = vadd.f32 %v1785_v41, %v459_v12  ;;  %1446 = vpow2.f32 %v598_v20  ;;  %v444_v57 = vpop.permute.xlu2 %443  ;;  %v604_v6 = vmul.f32 1.442695, %v573_v49  ;;  %vm1920_vm2 = vnez %v649_v51 }
  0xcd   : > { %vm523_vm5 = vcmp.gt.f32.partialorder %v507_v11, 0.0  ;;  %v539_v18 = vmul.f32 0.2, %v507_v11  ;;  %1448 = vpow2.f32 %v590_v23  ;;  %vm1940_vm4 = vnez %v655_v62 }
  0xce   : > { %vm519_vm6 = vcmp.gt.f32.partialorder %v503_v14, 0.0  ;;  %v535_v21 = vmul.f32 0.2, %v503_v14  ;;  %v630_v22 = vpack.c.b16 %v612_v4, %v612_v4  ;;  %v685_v24 = vsel %vm1920_vm2, 16843009, %v1598_v8 }
  0xcf   : > { %v555_v25 = vsel %vm523_vm5, %v507_v11, %v539_v18  ;;  %v613_v11 = vunpack.c.3.s8 %v1788_v42  ;;  %vm1952_vm7 = vcmp.ne.s32.totalorder %v694_v61, 0  ;;  %vm1956_vm10 = vcmp.ne.s32.totalorder %v695_v2, 0 }
  0xd0   : > { %v571_v27 = vsub.f32 0.0, %v555_v25  ;;  %v551_v28 = vsel %vm519_vm6, %v503_v14, %v535_v21  ;;  %v1928_v14 = vadd.f32 %v1785_v41, %v444_v57  ;;  %v688_v58 = vsel %vm1940_vm4, 16843009, %v1598_v8  ;;  %vm1317_vm13 = vmpackc.low %vm1956_vm10, %vm1952_vm7 }
  0xd1   : > { %v567_v32 = vsub.f32 0.0, %v551_v28  ;;  %v632_v25 = vpack.c.b16 %v613_v11, %v613_v11  ;;  %v701_v0 = vunpack.c.0.s8 %v685_v24  ;;  %v631_v38 = vpack.c.b8 %v630_v22, %v630_v22 }
  0xd2   : > { %v600_v35 = vmul.f32 1.442695, %v571_v27  ;;  %v439_v36 = vpop.permute.xlu1 %438  ;;  %v1904_v56 = vpop.eup %1446  ;;  %vm516_vm11 = vcmp.gt.f32.partialorder %v1928_v14, 0.0  ;;  %v617_v45 = vunpack.c.3.s8 %v1832_v34  ;;  %v704_v51 = vunpack.c.0.s8 %v688_v58 }
  0xd3   : > { %v592_v39 = vmul.f32 1.442695, %v567_v32  ;;  %v499_v40 = vadd.f32 %v1785_v41, %v439_v36  ;;  %v434_v43 = vpop.permute.xlu0 %433  ;;  %v1906_v63 = vpop.eup %1448 }
  0xd4   : > { %1450 = vpow2.f32 %v600_v35  ;;  %v498_v44 = vadd.f32 %v1785_v41, %v434_v43  ;;  %v705_v35 = vunpack.c.0.s8 %v1911_v3  ;;  %v640_v61 = vpack.c.b16 %v617_v45, %v617_v45  ;;  %v742_v3 = vld [vmem:[#allocation3 + $0x20] sm:$0xff] }
  0xd5   : > { %1452 = vpow2.f32 %v592_v39  ;;  %vm515_vm14 = vcmp.gt.f32.partialorder %v499_v40, 0.0  ;;  %v531_v47 = vmul.f32 0.2, %v499_v40  ;;  %vm1986_vm4 = vcmp.ne.s32.totalorder %v704_v51, 0 }
  0xd6   : > { %vm514_vm15 = vcmp.gt.f32.partialorder %v498_v44, 0.0  ;;  %v530_v50 = vmul.f32 0.2, %v498_v44 }
  0xd7   : > { %v547_v53 = vsel %vm515_vm14, %v499_v40, %v531_v47  ;;  %v532_v47 = vmul.f32 0.2, %v1928_v14 }
  0xd8   : > { %v563_v59 = vsub.f32 0.0, %v547_v53  ;;  %v546_v60 = vsel %vm514_vm15, %v498_v44, %v530_v50  ;;  %v633_v44 = vpack.c.b8 %v632_v25, %v632_v25  ;;  %vm660_vm15 = vnez %v631_v38 }
  0xd9   : > { %v562_v1 = vsub.f32 0.0, %v546_v60  ;;  %v548_v4 = vsel %vm516_vm11, %v1928_v14, %v532_v47  ;;  %v639_v14 = vpack.c.b8 %v1870_v13, %v1870_v13 }
  0xda   : > { %v1914_v5 = vpop.eup %1450  ;;  %v584_v7 = vmul.f32 1.442695, %v563_v59  ;;  %v484_v9 = vpop.permute.xlu1 %483  ;;  %vm661_vm2 = vnez %v633_v44  ;;  %v564_v20 = vsub.f32 0.0, %v548_v4 }
  0xdb   : > { %v1925_v12 = vpop.eup %1452  ;;  %v582_v15 = vmul.f32 1.442695, %v562_v1  ;;  %v508_v16 = vadd.f32 %v1785_v41, %v484_v9  ;;  %v469_v17 = vpop.permute.xlu0 %468  ;;  %v1330_v18 = vpack.c.bf16 %v1914_v5, %v1904_v56  ;;  %v676_v9 = vsel %vm660_vm15, 16843009, %v1598_v8 }
  0xdc   : > { %1454 = vpow2.f32 %v584_v7  ;;  %v505_v42 = vadd.f32 %v1785_v41, %v469_v17  ;;  %v1324_v19 = vpack.c.bf16 %v1925_v12, %v1906_v63  ;;  %vm664_vm15 = vnez %v639_v14 }
  0xdd   : > { %1456 = vpow2.f32 %v582_v15  ;;  %vm524_vm5 = vcmp.gt.f32.partialorder %v508_v16, 0.0  ;;  %v540_v21 = vmul.f32 0.2, %v508_v16  ;;  %1331 = vmatmul.msk.bf16.vlgmr.msra.gmra.mxu3 %vm1329_vm1, %v1330_v18  ;;  %v677_v15 = vsel %vm661_vm2, 16843009, %v1598_v8 }
  0xde   : > { %vm521_vm6 = vcmp.gt.f32.partialorder %v505_v42, 0.0  ;;  %v537_v23 = vmul.f32 0.2, %v505_v42  ;;  %1325 = vmatmul.msk.bf16.vlgmr.msra.gmra.mxu2 %vm1323_vm3, %v1324_v19  ;;  %1458 = vpow2.f32 %v594_v52  ;;  %vm1982_vm3 = vcmp.ne.s32.totalorder %v701_v0, 0 }
  0xdf   : > { %v556_v27 = vsel %vm524_vm5, %v508_v16, %v540_v21  ;;  %1460 = vpow2.f32 %v604_v6  ;;  %vm1994_vm5 = vcmp.ne.s32.totalorder %v705_v35, 0  ;;  %v693_v13 = vunpack.c.0.s8 %v677_v15 }
  0xe0   : > { %v572_v31 = vsub.f32 0.0, %v556_v27  ;;  %v553_v32 = vsel %vm521_vm6, %v505_v42, %v537_v23  ;;  %vm2003_vm6 = vcmp.ne.s32.totalorder %v700_v55, 0  ;;  %v641_v42 = vpack.c.b8 %v640_v61, %v640_v61 }
  0xe1   : > { %v569_v36 = vsub.f32 0.0, %v553_v32  ;;  %vm1326_vm11 = vmpackc.low %vm1982_vm3, %vm2003_vm6  ;;  %v692_v55 = vunpack.c.0.s8 %v676_v9  ;;  %v586_v27 = vmul.f32 1.442695, %v564_v20  ;;  %vm2025_vm2 = vcmp.ne.s32.totalorder %v693_v13, 0  ;;  %v827_v9 = vld [vmem:[#allocation2 + $0x40] sm:$0xff]  ;;  %v832_v20 = vld [vmem:[#allocation2 + $0x68] sm:$0xff] }
  0xe2   : > { %v1964_v39 = vpop.eup %1454  ;;  %v602_v40 = vmul.f32 1.442695, %v572_v31  ;;  %v429_v43 = vpop.permute.xlu1 %428  ;;  %v735_v29 = vsel %vm1899_vm0, %v1914_v5, 0.0 }
  0xe3   : > { %v1457_v46 = vpop.eup %1456  ;;  %v596_v48 = vmul.f32 1.442695, %v569_v36  ;;  %v497_v49 = vadd.f32 %v1785_v41, %v429_v43  ;;  %v424_v50 = vpop.permute.xlu0 %423  ;;  %v680_v36 = vsel %vm664_vm15, 16843009, %v1598_v8 }
  0xe4   : > { %1462 = vpow2.f32 %v602_v40  ;;  %v496_v52 = vadd.f32 %v1785_v41, %v424_v50  ;;  %v726_v53 = vsel %vm1952_vm7, %v1457_v46, 0.0  ;;  %v1318_v34 = vpack.c.bf16 %v1964_v39, %v1457_v46  ;;  %v1978_v57 = vpop.eup %1458  ;;  %vm1332_vm7 = vmpackc.low %vm1994_vm5, %vm1986_vm4 }
  0xe5   : > { %1464 = vpow2.f32 %v596_v48  ;;  %vm513_vm14 = vcmp.gt.f32.partialorder %v497_v49, 0.0  ;;  %v529_v59 = vmul.f32 0.2, %v497_v49  ;;  %762 = vadd.xlane.f32.xlu1 %v726_v53  ;;  %v1980_v62 = vpop.eup %1460  ;;  %v727_v48 = vsel %vm1956_vm10, %v1964_v39, 0.0 }
  0xe6   : > { %vm512_vm1 = vcmp.gt.f32.partialorder %v496_v52, 0.0  ;;  %v528_v60 = vmul.f32 0.2, %v496_v52  ;;  %1319 = vmatmul.msk.bf16.vlgmr.msra.gmra.mxu1 %vm1317_vm13, %v1318_v34  ;;  %v731_v53 = vsel %vm1877_vm8, %v1925_v12, 0.0  ;;  %v732_v30 = vsel %vm2003_vm6, %v1978_v57, 0.0  ;;  %v738_v12 = vld [vmem:[#allocation3] sm:$0xff] }
  0xe7   : > { %v545_v1 = vsel %vm513_vm14, %v497_v49, %v529_v59  ;;  %vm665_vm14 = vnez %v641_v42  ;;  %v734_v34 = vsel %vm1882_vm9, %v1904_v56, 0.0  ;;  %vm802_vm8 = vcmask 7168   ;;  %v819_v59 = vld [vmem:[#allocation2] sm:$0xff]  ;;  %v741_v42 = vld [vmem:[#allocation3 + $0x18] sm:$0xff] }
  0xe8   : > { %v561_v6 = vsub.f32 0.0, %v545_v1  ;;  %v544_v7 = vsel %vm512_vm1, %v496_v52, %v528_v60  ;;  %vm2021_vm1 = vcmp.ne.s32.totalorder %v692_v55, 0  ;;  %v681_v58 = vsel %vm665_vm14, 16843009, %v1598_v8 }
  0xe9   : > { %v560_v10 = vsub.f32 0.0, %v544_v7  ;;  %v697_v45 = vunpack.c.0.s8 %v681_v58  ;;  %v696_v8 = vunpack.c.0.s8 %v680_v36  ;;  %v730_v52 = vsel %vm1890_vm12, %v1906_v63, 0.0  ;;  %v831_v7 = vld [vmem:[#allocation2 + $0x60] sm:$0xff]  ;;  %v744_v58 = vld [vmem:[#allocation3 + $0x30] sm:$0xff] }
  0xea   : > { %v1999_v16 = vpop.eup %1462  ;;  %v580_v17 = vmul.f32 1.442695, %v561_v6  ;;  %v737_v63 = vsel %vm1994_vm5, %v1980_v62, 0.0  ;;  %vm908_vm9 = vcmask 64512  }
  0xeb   : > { %v1465_v19 = vpop.eup %1464  ;;  %v578_v21 = vmul.f32 1.442695, %v560_v10  ;;  %v449_v22 = vpop.permute.xlu0 %448  ;;  %v1333_v26 = vpack.c.bf16 %v1980_v62, %v1999_v16  ;;  %v736_v37 = vsel %vm1986_vm4, %v1999_v16, 0.0  ;;  %v820_v62 = vld [vmem:[#allocation2 + $0x8] sm:$0xff]  ;;  %v823_v16 = vld [vmem:[#allocation2 + $0x20] sm:$0xff] }
  0xec   : > { %1466 = vpow2.f32 %v580_v17  ;;  %v501_v23 = vadd.f32 %v1785_v41, %v449_v22  ;;  %v1327_v24 = vpack.c.bf16 %v1465_v19, %v1978_v57  ;;  %v733_v39 = vsel %vm1982_vm3, %v1465_v19, 0.0  ;;  %v740_v19 = vld [vmem:[#allocation3 + $0x10] sm:$0xff]  ;;  %v828_v22 = vld [vmem:[#allocation2 + $0x48] sm:$0xff] }
  0xed   : > { %1468 = vpow2.f32 %v578_v21  ;;  %1334 = vmatmul.msk.bf16.gmra.mxu3 %vm1332_vm7, %v1333_v26  ;;  %vm1314_vm7 = vmpackc.low %vm2025_vm2, %vm2021_vm1 }
  0xee   : > { %vm517_vm13 = vcmp.gt.f32.partialorder %v501_v23, 0.0  ;;  %v533_v25 = vmul.f32 0.2, %v501_v23  ;;  %1328 = vmatmul.msk.bf16.gmra.mxu2 %vm1326_vm11, %v1327_v24  ;;  %1470 = vpow2.f32 %v586_v27  ;;  %vm713_vm11 = vcmp.ne.s32.totalorder %v697_v45, 0  ;;  %v824_v27 = vld [vmem:[#allocation2 + $0x28] sm:$0xff] }
  0xf0   : > { %v549_v28 = vsel %vm517_vm13, %v501_v23, %v533_v25  ;;  %vm712_vm13 = vcmp.ne.s32.totalorder %v696_v8, 0 }
  0xf1   : > { %v565_v41 = vsub.f32 0.0, %v549_v28  ;;  %vm1320_vm14 = vmpackc.low %vm713_vm11, %vm712_vm13 }
  0xf2   : > { %v1467_v35 = vpop.eup %1466 }
  0xf3   : > { %v1469_v0 = vpop.eup %1468  ;;  %v588_v38 = vmul.f32 1.442695, %v565_v41  ;;  %v725_v40 = vsel %vm2025_vm2, %v1467_v35, 0.0  ;;  %v743_v41 = vld [vmem:[#allocation3 + $0x28] sm:$0xff] }
  0xf4   : > { %v724_v43 = vsel %vm2021_vm1, %v1469_v0, 0.0  ;;  %760 = vadd.xlane.f32.xlu2 %v725_v40  ;;  %v1315_v44 = vpack.c.bf16 %v1467_v35, %v1469_v0  ;;  %v1471_v46 = vpop.eup %1470  ;;  %v745_v35 = vld [vmem:[#allocation3 + $0x38] sm:$0xff]  ;;  %v829_v0 = vld [vmem:[#allocation2 + $0x50] sm:$0xff] }
  0xf5   : > { %1472 = vpow2.f32 %v588_v38  ;;  %758 = vadd.xlane.f32.xlu0 %v724_v43  ;;  %v728_v49 = vsel %vm712_vm13, %v1471_v46, 0.0  ;;  %v833_v38 = vld [vmem:[#allocation2 + $0x70] sm:$0xff] }
  0xf6   : > { %1316 = vmatmul.msk.bf16.gmra.mxu0 %vm1314_vm7, %v1315_v44 }
  0xfb   : > { %v1473_v47 = vpop.eup %1472 }
  0xfc   : > { %764 = vadd.xlane.f32.xlu2 %v727_v48  ;;  %v729_v50 = vsel %vm713_vm11, %v1473_v47, 0.0  ;;  %v1321_v51 = vpack.c.bf16 %v1473_v47, %v1471_v46  ;;  %v821_v48 = vld [vmem:[#allocation2 + $0x10] sm:$0xff] }
  0xfd   : > { %766 = vadd.xlane.f32.xlu0 %v728_v49  ;;  %768 = vadd.xlane.f32.xlu1 %v729_v50 }
  0xfe   : > { %1322 = vmatmul.msk.bf16.gmra.mxu1 %vm1320_vm14, %v1321_v51 }
 0x104   : > { %770 = vadd.xlane.f32.xlu2 %v730_v52 }
 0x105   : > { %772 = vadd.xlane.f32.xlu0 %v731_v53  ;;  %774 = vadd.xlane.f32.xlu1 %v732_v30  ;;  %v746_v53 = vld [vmem:[#allocation3 + $0x40] sm:$0xff]  ;;  %v747_v30 = vld [vmem:[#allocation3 + $0x48] sm:$0xff] }
 0x10c   : > { %776 = vadd.xlane.f32.xlu2 %v733_v39  ;;  %v748_v39 = vld [vmem:[#allocation3 + $0x50] sm:$0xff] }
 0x10d   : > { %778 = vadd.xlane.f32.xlu0 %v734_v34  ;;  %780 = vadd.xlane.f32.xlu1 %v735_v29  ;;  %v830_v29 = vld [vmem:[#allocation2 + $0x58] sm:$0xff] }
 0x114   : > { %782 = vadd.xlane.f32.xlu2 %v736_v37  ;;  %v834_v37 = vld [vmem:[#allocation2 + $0x78] sm:$0xff] }
 0x115   : > { %784 = vadd.xlane.f32.xlu0 %v737_v63 }
 0x130   : > { %v755_v33 = vpop.xlane.xlu1 %754 }
 0x131   : > { %v786_v56 = vadd.f32 %v755_v33, %v738_v12 }
 0x133   : > { %803 = vst.msk [vmem:[#allocation3] sm:$0xff] %vm802_vm8, %v786_v56 }
 0x138   : > { %v757_v5 = vpop.xlane.xlu2 %756 }
 0x139   : > { %v787_v57 = vadd.f32 %v757_v5, %v739_v54 }
 0x13b   : > { %804 = vst.msk [vmem:[#allocation3 + $0x8] sm:$0xff] %vm802_vm8, %v787_v57 }
 0x143   : > { %v852_v60 = vpop.f32.mrf.mxu0 }
 0x144   : > { %v892_v61 = vadd.f32 %v852_v60, %v819_v59  ;;  %v822_v59 = vld [vmem:[#allocation2 + $0x18] sm:$0xff]  ;;  %v825_v60 = vld [vmem:[#allocation2 + $0x30] sm:$0xff] }
 0x146   : > { %909 = vst.msk [vmem:[#allocation2] sm:$0xff] %vm908_vm9, %v892_v61 }
 0x14b   : > { %v854_v1 = vpop.f32.mrf.mxu0 }
 0x14c   : > { %v893_v2 = vadd.f32 %v854_v1, %v820_v62 }
 0x14e   : > { %910 = vst.msk [vmem:[#allocation2 + $0x8] sm:$0xff] %vm908_vm9, %v893_v2 }
 0x158   : > { %v763_v4 = vpop.xlane.xlu1 %762 }
 0x159   : > { %v790_v6 = vadd.f32 %v763_v4, %v742_v3 }
 0x15b   : > { %807 = vst.msk [vmem:[#allocation3 + $0x20] sm:$0xff] %vm802_vm8, %v790_v6  ;;  %v749_v6 = vld [vmem:[#allocation3 + $0x58] sm:$0xff] }
 0x160   : > { %v882_v10 = vpop.f32.mrf.mxu3 }
 0x161   : > { %v872_v11 = vpop.f32.mrf.mxu2  ;;  %v904_v15 = vadd.f32 %v882_v10, %v831_v7  ;;  %v750_v7 = vld [vmem:[#allocation3 + $0x60] sm:$0xff] }
 0x162   : > { %v900_v17 = vadd.f32 %v872_v11, %v827_v9  ;;  %v751_v9 = vld [vmem:[#allocation3 + $0x68] sm:$0xff] }
 0x163   : > { %921 = vst.msk [vmem:[#allocation2 + $0x60] sm:$0xff] %vm908_vm9, %v904_v15  ;;  %v862_v18 = vpop.f32.mrf.mxu1 }
 0x164   : > { %917 = vst.msk [vmem:[#allocation2 + $0x40] sm:$0xff] %vm908_vm9, %v900_v17  ;;  %v896_v14 = vadd.f32 %v862_v18, %v823_v16 }
 0x166   : > { %913 = vst.msk [vmem:[#allocation2 + $0x20] sm:$0xff] %vm908_vm9, %v896_v14  ;;  %v826_v14 = vld [vmem:[#allocation2 + $0x38] sm:$0xff] }
 0x167   : > { %v761_v21 = vpop.xlane.xlu2 %760 }
 0x168   : > { %v759_v26 = vpop.xlane.xlu0 %758  ;;  %v789_v55 = vadd.f32 %v761_v21, %v741_v42  ;;  %v884_v23 = vpop.f32.mrf.mxu3  ;;  %v753_v21 = vld [vmem:[#allocation3 + $0x78] sm:$0xff] }
 0x169   : > { %v788_v24 = vadd.f32 %v759_v26, %v740_v19  ;;  %v874_v13 = vpop.f32.mrf.mxu2  ;;  %v905_v25 = vadd.f32 %v884_v23, %v832_v20  ;;  %v752_v20 = vld [vmem:[#allocation3 + $0x70] sm:$0xff] }
 0x16a   : > { %806 = vst.msk [vmem:[#allocation3 + $0x18] sm:$0xff] %vm802_vm8, %v789_v55  ;;  %v901_v28 = vadd.f32 %v874_v13, %v828_v22 }
 0x16b   : > { %805 = vst.msk [vmem:[#allocation3 + $0x10] sm:$0xff] %vm802_vm8, %v788_v24  ;;  %v864_v31 = vpop.f32.mrf.mxu1 }
 0x16c   : > { %918 = vst.msk [vmem:[#allocation2 + $0x48] sm:$0xff] %vm908_vm9, %v901_v28  ;;  %v897_v32 = vadd.f32 %v864_v31, %v824_v27 }
 0x16d   : > { %922 = vst.msk [vmem:[#allocation2 + $0x68] sm:$0xff] %vm908_vm9, %v905_v25 }
 0x16e   : > { %914 = vst.msk [vmem:[#allocation2 + $0x28] sm:$0xff] %vm908_vm9, %v897_v32 }
 0x16f   : > { %v765_v36 = vpop.xlane.xlu2 %764 }
 0x170   : > { %v767_v40 = vpop.xlane.xlu0 %766  ;;  %v791_v43 = vadd.f32 %v765_v36, %v743_v41  ;;  %v769_v44 = vpop.xlane.xlu1 %768 }
 0x171   : > { %v792_v45 = vadd.f32 %v767_v40, %v744_v58  ;;  %v793_v8 = vadd.f32 %v769_v44, %v745_v35  ;;  %v877_v46 = vpop.f32.mrf.mxu2  ;;  %v887_v47 = vpop.f32.mrf.mxu3 }
 0x172   : > { %808 = vst.msk [vmem:[#allocation3 + $0x28] sm:$0xff] %vm802_vm8, %v791_v43  ;;  %v902_v49 = vadd.f32 %v877_v46, %v829_v0  ;;  %v906_v50 = vadd.f32 %v887_v47, %v833_v38 }
 0x173   : > { %809 = vst.msk [vmem:[#allocation3 + $0x30] sm:$0xff] %vm802_vm8, %v792_v45  ;;  %v857_v51 = vpop.f32.mrf.mxu0 }
 0x174   : > { %810 = vst.msk [vmem:[#allocation3 + $0x38] sm:$0xff] %vm802_vm8, %v793_v8  ;;  %v894_v52 = vadd.f32 %v857_v51, %v821_v48 }
 0x175   : > { %919 = vst.msk [vmem:[#allocation2 + $0x50] sm:$0xff] %vm908_vm9, %v902_v49 }
 0x176   : > { %923 = vst.msk [vmem:[#allocation2 + $0x70] sm:$0xff] %vm908_vm9, %v906_v50 }
 0x177   : > { %911 = vst.msk [vmem:[#allocation2 + $0x10] sm:$0xff] %vm908_vm9, %v894_v52  ;;  %v771_v34 = vpop.xlane.xlu2 %770 }
 0x178   : > { %v773_v63 = vpop.xlane.xlu0 %772  ;;  %v794_v12 = vadd.f32 %v771_v34, %v746_v53  ;;  %v775_v33 = vpop.xlane.xlu1 %774 }
 0x179   : > { %v795_v56 = vadd.f32 %v773_v63, %v747_v30  ;;  %v796_v54 = vadd.f32 %v775_v33, %v748_v39  ;;  %v879_v5 = vpop.f32.mrf.mxu2  ;;  %v889_v57 = vpop.f32.mrf.mxu3 }
 0x17a   : > { %811 = vst.msk [vmem:[#allocation3 + $0x40] sm:$0xff] %vm802_vm8, %v794_v12  ;;  %v903_v61 = vadd.f32 %v879_v5, %v830_v29  ;;  %v907_v62 = vadd.f32 %v889_v57, %v834_v37 }
 0x17b   : > { %812 = vst.msk [vmem:[#allocation3 + $0x48] sm:$0xff] %vm802_vm8, %v795_v56  ;;  %v859_v1 = vpop.f32.mrf.mxu0  ;;  %v867_v2 = vpop.f32.mrf.mxu1 }
 0x17c   : > { %813 = vst.msk [vmem:[#allocation3 + $0x50] sm:$0xff] %vm802_vm8, %v796_v54  ;;  %v895_v3 = vadd.f32 %v859_v1, %v822_v59  ;;  %v898_v4 = vadd.f32 %v867_v2, %v825_v60 }
 0x17d   : > { %920 = vst.msk [vmem:[#allocation2 + $0x58] sm:$0xff] %vm908_vm9, %v903_v61 }
 0x17e   : > { %924 = vst.msk [vmem:[#allocation2 + $0x78] sm:$0xff] %vm908_vm9, %v907_v62 }
 0x17f   : > { %912 = vst.msk [vmem:[#allocation2 + $0x18] sm:$0xff] %vm908_vm9, %v895_v3  ;;  %v777_v10 = vpop.xlane.xlu2 %776 }
 0x180   : > { %915 = vst.msk [vmem:[#allocation2 + $0x30] sm:$0xff] %vm908_vm9, %v898_v4  ;;  %v779_v11 = vpop.xlane.xlu0 %778  ;;  %v797_v15 = vadd.f32 %v777_v10, %v749_v6  ;;  %v781_v16 = vpop.xlane.xlu1 %780 }
 0x181   : > { %v798_v17 = vadd.f32 %v779_v11, %v750_v7  ;;  %v799_v18 = vadd.f32 %v781_v16, %v751_v9 }
 0x182   : > { %814 = vst.msk [vmem:[#allocation3 + $0x58] sm:$0xff] %vm802_vm8, %v797_v15 }
 0x183   : > { %815 = vst.msk [vmem:[#allocation3 + $0x60] sm:$0xff] %vm802_vm8, %v798_v17  ;;  %v869_v42 = vpop.f32.mrf.mxu1 }
 0x184   : > { %816 = vst.msk [vmem:[#allocation3 + $0x68] sm:$0xff] %vm802_vm8, %v799_v18  ;;  %v899_v19 = vadd.f32 %v869_v42, %v826_v14 }
 0x186   : > { %916 = vst.msk [vmem:[#allocation2 + $0x38] sm:$0xff] %vm908_vm9, %v899_v19 }
 0x187   : > { %v783_v22 = vpop.xlane.xlu2 %782  ;;  %928 = sbr.rel (%p1335_p0) target bundleno = 578 (0x242), region = 82 }
 0x188   : > { %v785_v26 = vpop.xlane.xlu0 %784  ;;  %v800_v55 = vadd.f32 %v783_v22, %v752_v20 }
 0x189   : > { %v801_v23 = vadd.f32 %v785_v26, %v753_v21 }
 0x18a   : > { %817 = vst.msk [vmem:[#allocation3 + $0x70] sm:$0xff] %vm802_vm8, %v800_v55 }
 0x18b   : > { %818 = vst.msk [vmem:[#allocation3 + $0x78] sm:$0xff] %vm802_vm8, %v801_v23 }
 0x18c   : > { %v933_v24 = vld [vmem:[#allocation3 + $0x20] sm:$0xff]  ;;  %v931_v13 = vld [vmem:[#allocation3 + $0x10] sm:$0xff]  ;;  %v1599_v27 = vmov 0   ;;  %v934_v41 = vld [vmem:[#allocation3 + $0x28] sm:$0xff] }
 0x18d   : > { %v929_v25 = vld [vmem:[#allocation3] sm:$0xff]  ;;  %1476 = vset.pattern.permute.xlu2 %v1599_v27  ;;  %1475 = vset.pattern.permute.xlu1 %v1599_v27  ;;  %v949_v28 = vmax.f32 %v933_v24, 1e-12  ;;  %v947_v31 = vmax.f32 %v931_v13, 1e-12  ;;  %v932_v58 = vld [vmem:[#allocation3 + $0x18] sm:$0xff] }
 0x18e   : > { %v945_v32 = vmax.f32 %v929_v25, 1e-12  ;;  %1474 = vset.pattern.permute.xlu0 %v1599_v27  ;;  %v930_v35 = vld [vmem:[#allocation3 + $0x8] sm:$0xff]  ;;  %v950_v36 = vmax.f32 %v934_v41, 1e-12  ;;  %v937_v44 = vld [vmem:[#allocation3 + $0x40] sm:$0xff] }
 0x18f   : > { %1477 = vrcp.f32 %v949_v28  ;;  %v948_v0 = vmax.f32 %v932_v58, 1e-12  ;;  %v946_v38 = vmax.f32 %v930_v35, 1e-12  ;;  %v936_v8 = vld [vmem:[#allocation3 + $0x38] sm:$0xff]  ;;  %v935_v46 = vld [vmem:[#allocation3 + $0x30] sm:$0xff] }
 0x190   : > { %1479 = vrcp.f32 %v947_v31  ;;  %v953_v47 = vmax.f32 %v937_v44, 1e-12  ;;  %v952_v48 = vmax.f32 %v936_v8, 1e-12  ;;  %v951_v50 = vmax.f32 %v935_v46, 1e-12 }
 0x191   : > { %1481 = vrcp.f32 %v945_v32  ;;  %v940_v53 = vld [vmem:[#allocation3 + $0x58] sm:$0xff]  ;;  %v939_v30 = vld [vmem:[#allocation3 + $0x50] sm:$0xff]  ;;  %v938_v39 = vld [vmem:[#allocation3 + $0x48] sm:$0xff] }
 0x192   : > { %1483 = vrcp.f32 %v950_v36  ;;  %v956_v34 = vmax.f32 %v940_v53, 1e-12  ;;  %v955_v29 = vmax.f32 %v939_v30, 1e-12  ;;  %v954_v63 = vmax.f32 %v938_v39, 1e-12 }
 0x193   : > { %1485 = vrcp.f32 %v948_v0  ;;  %v943_v56 = vld [vmem:[#allocation3 + $0x70] sm:$0xff]  ;;  %v942_v54 = vld [vmem:[#allocation3 + $0x68] sm:$0xff]  ;;  %v941_v5 = vld [vmem:[#allocation3 + $0x60] sm:$0xff] }
 0x194   : > { %1487 = vrcp.f32 %v946_v38  ;;  %v959_v57 = vmax.f32 %v943_v56, 1e-12  ;;  %v958_v59 = vmax.f32 %v942_v54, 1e-12  ;;  %v957_v61 = vmax.f32 %v941_v5, 1e-12 }
 0x195   : > { %v1478_v40 = vpop.eup %1477  ;;  %1489 = vrcp.f32 %v953_v47  ;;  %v944_v2 = vld [vmem:[#allocation3 + $0x78] sm:$0xff]  ;;  %v981_v10 = vld [vmem:[#allocation2 + $0x20] sm:$0xff]  ;;  %v982_v17 = vld [vmem:[#allocation2 + $0x28] sm:$0xff] }
 0x196   : > { %v1480_v43 = vpop.eup %1479  ;;  %1015 = vperm.xlu2 %1476, %v1478_v40   ;;  %1491 = vrcp.f32 %v952_v48  ;;  %v960_v4 = vmax.f32 %v944_v2, 1e-12  ;;  %v985_v22 = vld [vmem:[#allocation2 + $0x40] sm:$0xff]  ;;  %v988_v27 = vld [vmem:[#allocation2 + $0x58] sm:$0xff]  ;;  %v979_v28 = vld [vmem:[#allocation2 + $0x10] sm:$0xff] }
 0x197   : > { %v1482_v45 = vpop.eup %1481  ;;  %1005 = vperm.xlu1 %1475, %v1480_v43   ;;  %1493 = vrcp.f32 %v951_v50  ;;  %v977_v32 = vld [vmem:[#allocation2] sm:$0xff]  ;;  %v991_v46 = vld [vmem:[#allocation2 + $0x70] sm:$0xff]  ;;  %v980_v47 = vld [vmem:[#allocation2 + $0x18] sm:$0xff] }
 0x198   : > { %995 = vperm.xlu0 %1474, %v1482_v45   ;;  %v1484_v49 = vpop.eup %1483  ;;  %1495 = vrcp.f32 %v956_v34 }
 0x199   : > { %v1486_v51 = vpop.eup %1485  ;;  %1497 = vrcp.f32 %v955_v29 }
 0x19a   : > { %v1488_v52 = vpop.eup %1487  ;;  %1499 = vrcp.f32 %v954_v63 }
 0x19b   : > { %v1490_v37 = vpop.eup %1489  ;;  %1501 = vrcp.f32 %v959_v57 }
 0x19c   : > { %v1492_v12 = vpop.eup %1491  ;;  %1503 = vrcp.f32 %v958_v59  ;;  %v984_v59 = vld [vmem:[#allocation2 + $0x38] sm:$0xff] }
 0x19d   : > { %v1494_v33 = vpop.eup %1493  ;;  %1505 = vrcp.f32 %v957_v61  ;;  %v983_v61 = vld [vmem:[#allocation2 + $0x30] sm:$0xff] }
 0x19e   : > { %1020 = vperm.xlu2 %1476, %v1484_v49   ;;  %v1496_v60 = vpop.eup %1495  ;;  %1507 = vrcp.f32 %v960_v4  ;;  %v978_v49 = vld [vmem:[#allocation2 + $0x8] sm:$0xff] }
 0x19f   : > { %1010 = vperm.xlu1 %1475, %v1486_v51   ;;  %v1498_v62 = vpop.eup %1497 }
 0x1a0   : > { %1000 = vperm.xlu0 %1474, %v1488_v52   ;;  %v1500_v1 = vpop.eup %1499 }
 0x1a1   : > { %v1502_v3 = vpop.eup %1501 }
 0x1a2   : > { %v1504_v6 = vpop.eup %1503 }
 0x1a3   : > { %v1506_v7 = vpop.eup %1505 }
 0x1a4   : > { %v1508_v9 = vpop.eup %1507 }
 0x1a6   : > { %1035 = vperm.xlu2 %1476, %v1490_v37  }
 0x1a7   : > { %1030 = vperm.xlu1 %1475, %v1492_v12  }
 0x1a8   : > { %1025 = vperm.xlu0 %1474, %v1494_v33  }
 0x1ae   : > { %1050 = vperm.xlu2 %1476, %v1496_v60  }
 0x1af   : > { %1045 = vperm.xlu1 %1475, %v1498_v62  }
 0x1b0   : > { %1040 = vperm.xlu0 %1474, %v1500_v1  }
 0x1b6   : > { %1065 = vperm.xlu2 %1476, %v1502_v3  }
 0x1b7   : > { %1060 = vperm.xlu1 %1475, %v1504_v6  }
 0x1b8   : > { %1055 = vperm.xlu0 %1474, %v1506_v7  }
 0x1c0   : > { %1070 = vperm.xlu0 %1474, %v1508_v9  }
 0x1f0   : > { %v1016_v11 = vpop.permute.xlu2 %1015 }
 0x1f1   : > { %v1077_v15 = vmul.f32 %v1016_v11, %v981_v10 }
 0x1f3   : > { %v1113_v16 = vmul.f32 1.442695, %v1077_v15  ;;  %vm1093_vm12 = vcmp.gt.f32.partialorder %v1077_v15, 0.0 }
 0x1f5   : > { %1509 = vpow2.f32 %v1113_v16 }
 0x1f8   : > { %v1021_v18 = vpop.permute.xlu2 %1020 }
 0x1f9   : > { %v1078_v14 = vmul.f32 %v1021_v18, %v982_v17 }
 0x1fb   : > { %v1510_v42 = vpop.eup %1509  ;;  %v1115_v19 = vmul.f32 1.442695, %v1078_v14  ;;  %vm1094_vm0 = vcmp.gt.f32.partialorder %v1078_v14, 0.0 }
 0x1fc   : > { %v1340_v20 = vadd.f32 -1.0, %v1510_v42 }
 0x1fd   : > { %1511 = vpow2.f32 %v1115_v19  ;;  %v986_v19 = vld [vmem:[#allocation2 + $0x48] sm:$0xff] }
 0x1fe   : > { %v1157_v21 = vsel %vm1093_vm12, %v1077_v15, %v1340_v20 }
 0x1ff   : > { %1173 = vst.msk [vmem:[%s1706_s8 + $0x20] sm:$0xff] %vm908_vm9, %v1157_v21 }
 0x200   : > { %v1036_v26 = vpop.permute.xlu2 %1035 }
 0x201   : > { %v1081_v55 = vmul.f32 %v1036_v26, %v985_v22 }
 0x203   : > { %v1512_v23 = vpop.eup %1511  ;;  %v1121_v24 = vmul.f32 1.442695, %v1081_v55  ;;  %vm1097_vm10 = vcmp.gt.f32.partialorder %v1081_v55, 0.0 }
 0x204   : > { %v1341_v13 = vadd.f32 -1.0, %v1512_v23 }
 0x205   : > { %1513 = vpow2.f32 %v1121_v24 }
 0x206   : > { %v1158_v25 = vsel %vm1094_vm0, %v1078_v14, %v1341_v13  ;;  %v987_v14 = vld [vmem:[#allocation2 + $0x50] sm:$0xff] }
 0x207   : > { %1174 = vst.msk [vmem:[%s1706_s8 + $0x28] sm:$0xff] %vm908_vm9, %v1158_v25 }
 0x208   : > { %v1051_v31 = vpop.permute.xlu2 %1050 }
 0x209   : > { %v1084_v41 = vmul.f32 %v1051_v31, %v988_v27  ;;  %v1006_v58 = vpop.permute.xlu1 %1005  ;;  %v990_v31 = vld [vmem:[#allocation2 + $0x68] sm:$0xff] }
 0x20a   : > { %v1075_v35 = vmul.f32 %v1006_v58, %v979_v28  ;;  %v996_v36 = vpop.permute.xlu0 %995 }
 0x20b   : > { %v1514_v0 = vpop.eup %1513  ;;  %v1127_v38 = vmul.f32 1.442695, %v1084_v41  ;;  %v1073_v40 = vmul.f32 %v996_v36, %v977_v32  ;;  %vm1100_vm3 = vcmp.gt.f32.partialorder %v1084_v41, 0.0 }
 0x20c   : > { %v1344_v43 = vadd.f32 -1.0, %v1514_v0  ;;  %v1109_v44 = vmul.f32 1.442695, %v1075_v35  ;;  %vm1091_vm4 = vcmp.gt.f32.partialorder %v1075_v35, 0.0 }
 0x20d   : > { %1515 = vpow2.f32 %v1127_v38  ;;  %v1105_v45 = vmul.f32 1.442695, %v1073_v40  ;;  %vm1089_vm5 = vcmp.gt.f32.partialorder %v1073_v40, 0.0 }
 0x20e   : > { %v1161_v8 = vsel %vm1097_vm10, %v1081_v55, %v1344_v43  ;;  %1517 = vpow2.f32 %v1109_v44 }
 0x20f   : > { %1177 = vst.msk [vmem:[%s1706_s8 + $0x40] sm:$0xff] %vm908_vm9, %v1161_v8  ;;  %1519 = vpow2.f32 %v1105_v45 }
 0x210   : > { %v1066_v48 = vpop.permute.xlu2 %1065 }
 0x211   : > { %v1087_v50 = vmul.f32 %v1066_v48, %v991_v46  ;;  %v1011_v51 = vpop.permute.xlu1 %1010  ;;  %v992_v48 = vld [vmem:[#allocation2 + $0x78] sm:$0xff] }
 0x212   : > { %v1076_v52 = vmul.f32 %v1011_v51, %v980_v47  ;;  %v1001_v53 = vpop.permute.xlu0 %1000 }
 0x213   : > { %v1516_v30 = vpop.eup %1515  ;;  %v1133_v39 = vmul.f32 1.442695, %v1087_v50  ;;  %v1074_v34 = vmul.f32 %v1001_v53, %v978_v49  ;;  %vm1103_vm6 = vcmp.gt.f32.partialorder %v1087_v50, 0.0 }
 0x214   : > { %v1518_v29 = vpop.eup %1517  ;;  %v1347_v37 = vadd.f32 -1.0, %v1516_v30  ;;  %v1111_v63 = vmul.f32 1.442695, %v1076_v52  ;;  %vm1092_vm15 = vcmp.gt.f32.partialorder %v1076_v52, 0.0 }
 0x215   : > { %v1520_v12 = vpop.eup %1519  ;;  %v1338_v33 = vadd.f32 -1.0, %v1518_v29  ;;  %1521 = vpow2.f32 %v1133_v39  ;;  %v1107_v56 = vmul.f32 1.442695, %v1074_v34  ;;  %vm1090_vm1 = vcmp.gt.f32.partialorder %v1074_v34, 0.0 }
 0x216   : > { %v1164_v54 = vsel %vm1100_vm3, %v1084_v41, %v1347_v37  ;;  %v1336_v5 = vadd.f32 -1.0, %v1520_v12  ;;  %1523 = vpow2.f32 %v1111_v63  ;;  %v989_v41 = vld [vmem:[#allocation2 + $0x60] sm:$0xff] }
 0x217   : > { %1180 = vst.msk [vmem:[%s1706_s8 + $0x58] sm:$0xff] %vm908_vm9, %v1164_v54  ;;  %v1155_v57 = vsel %vm1091_vm4, %v1075_v35, %v1338_v33  ;;  %1525 = vpow2.f32 %v1107_v56 }
 0x218   : > { %1171 = vst.msk [vmem:[%s1706_s8 + $0x10] sm:$0xff] %vm908_vm9, %v1155_v57  ;;  %v1153_v60 = vsel %vm1089_vm5, %v1073_v40, %v1336_v5 }
 0x219   : > { %1169 = vst.msk [vmem:[%s1706_s8] sm:$0xff] %vm908_vm9, %v1153_v60  ;;  %v1031_v62 = vpop.permute.xlu1 %1030 }
 0x21a   : > { %v1080_v1 = vmul.f32 %v1031_v62, %v984_v59  ;;  %v1026_v2 = vpop.permute.xlu0 %1025 }
 0x21b   : > { %v1522_v3 = vpop.eup %1521  ;;  %v1079_v4 = vmul.f32 %v1026_v2, %v983_v61 }
 0x21c   : > { %v1524_v6 = vpop.eup %1523  ;;  %v1350_v7 = vadd.f32 -1.0, %v1522_v3  ;;  %v1119_v9 = vmul.f32 1.442695, %v1080_v1  ;;  %vm1096_vm2 = vcmp.gt.f32.partialorder %v1080_v1, 0.0 }
 0x21d   : > { %v1526_v10 = vpop.eup %1525  ;;  %v1339_v11 = vadd.f32 -1.0, %v1524_v6  ;;  %v1117_v15 = vmul.f32 1.442695, %v1079_v4  ;;  %vm1095_vm7 = vcmp.gt.f32.partialorder %v1079_v4, 0.0 }
 0x21e   : > { %v1167_v16 = vsel %vm1103_vm6, %v1087_v50, %v1350_v7  ;;  %v1337_v17 = vadd.f32 -1.0, %v1526_v10  ;;  %1527 = vpow2.f32 %v1119_v9 }
 0x21f   : > { %1183 = vst.msk [vmem:[%s1706_s8 + $0x70] sm:$0xff] %vm908_vm9, %v1167_v16  ;;  %v1156_v18 = vsel %vm1092_vm15, %v1076_v52, %v1339_v11  ;;  %1529 = vpow2.f32 %v1117_v15 }
 0x220   : > { %1172 = vst.msk [vmem:[%s1706_s8 + $0x18] sm:$0xff] %vm908_vm9, %v1156_v18  ;;  %v1154_v42 = vsel %vm1090_vm1, %v1074_v34, %v1337_v17 }
 0x221   : > { %1170 = vst.msk [vmem:[%s1706_s8 + $0x8] sm:$0xff] %vm908_vm9, %v1154_v42  ;;  %v1046_v20 = vpop.permute.xlu1 %1045 }
 0x222   : > { %v1083_v21 = vmul.f32 %v1046_v20, %v987_v14  ;;  %v1041_v22 = vpop.permute.xlu0 %1040 }
 0x223   : > { %v1082_v26 = vmul.f32 %v1041_v22, %v986_v19 }
 0x224   : > { %v1528_v55 = vpop.eup %1527  ;;  %v1125_v23 = vmul.f32 1.442695, %v1083_v21  ;;  %vm1099_vm11 = vcmp.gt.f32.partialorder %v1083_v21, 0.0 }
 0x225   : > { %v1530_v24 = vpop.eup %1529  ;;  %v1343_v13 = vadd.f32 -1.0, %v1528_v55  ;;  %v1123_v25 = vmul.f32 1.442695, %v1082_v26  ;;  %vm1098_vm13 = vcmp.gt.f32.partialorder %v1082_v26, 0.0 }
 0x226   : > { %v1342_v27 = vadd.f32 -1.0, %v1530_v24  ;;  %1531 = vpow2.f32 %v1125_v23 }
 0x227   : > { %v1160_v28 = vsel %vm1096_vm2, %v1080_v1, %v1343_v13  ;;  %1533 = vpow2.f32 %v1123_v25 }
 0x228   : > { %1176 = vst.msk [vmem:[%s1706_s8 + $0x38] sm:$0xff] %vm908_vm9, %v1160_v28  ;;  %v1159_v32 = vsel %vm1095_vm7, %v1079_v4, %v1342_v27 }
 0x229   : > { %1175 = vst.msk [vmem:[%s1706_s8 + $0x30] sm:$0xff] %vm908_vm9, %v1159_v32  ;;  %v1061_v58 = vpop.permute.xlu1 %1060 }
 0x22a   : > { %v1086_v35 = vmul.f32 %v1061_v58, %v990_v31  ;;  %v1056_v36 = vpop.permute.xlu0 %1055 }
 0x22b   : > { %v1085_v0 = vmul.f32 %v1056_v36, %v989_v41 }
 0x22c   : > { %v1532_v38 = vpop.eup %1531  ;;  %v1131_v40 = vmul.f32 1.442695, %v1086_v35  ;;  %vm1102_vm14 = vcmp.gt.f32.partialorder %v1086_v35, 0.0 }
 0x22d   : > { %v1534_v43 = vpop.eup %1533  ;;  %v1346_v44 = vadd.f32 -1.0, %v1532_v38  ;;  %v1129_v45 = vmul.f32 1.442695, %v1085_v0  ;;  %vm1101_vm8 = vcmp.gt.f32.partialorder %v1085_v0, 0.0 }
 0x22e   : > { %v1345_v8 = vadd.f32 -1.0, %v1534_v43  ;;  %1535 = vpow2.f32 %v1131_v40 }
 0x22f   : > { %v1163_v46 = vsel %vm1099_vm11, %v1083_v21, %v1346_v44  ;;  %1537 = vpow2.f32 %v1129_v45 }
 0x230   : > { %1179 = vst.msk [vmem:[%s1706_s8 + $0x50] sm:$0xff] %vm908_vm9, %v1163_v46  ;;  %v1162_v47 = vsel %vm1098_vm13, %v1082_v26, %v1345_v8 }
 0x231   : > { %1178 = vst.msk [vmem:[%s1706_s8 + $0x48] sm:$0xff] %vm908_vm9, %v1162_v47 }
 0x232   : > { %v1071_v49 = vpop.permute.xlu0 %1070 }
 0x233   : > { %v1088_v50 = vmul.f32 %v1071_v49, %v992_v48 }
 0x234   : > { %v1536_v51 = vpop.eup %1535 }
 0x235   : > { %v1538_v52 = vpop.eup %1537  ;;  %v1349_v53 = vadd.f32 -1.0, %v1536_v51  ;;  %v1135_v30 = vmul.f32 1.442695, %v1088_v50  ;;  %vm1104_vm12 = vcmp.gt.f32.partialorder %v1088_v50, 0.0 }
 0x236   : > { %v1348_v39 = vadd.f32 -1.0, %v1538_v52 }
 0x237   : > { %v1166_v34 = vsel %vm1102_vm14, %v1086_v35, %v1349_v53  ;;  %1539 = vpow2.f32 %v1135_v30 }
 0x238   : > { %1182 = vst.msk [vmem:[%s1706_s8 + $0x68] sm:$0xff] %vm908_vm9, %v1166_v34  ;;  %v1165_v29 = vsel %vm1101_vm8, %v1085_v0, %v1348_v39 }
 0x239   : > { %1181 = vst.msk [vmem:[%s1706_s8 + $0x60] sm:$0xff] %vm908_vm9, %v1165_v29 }
 0x23d   : > { %v1540_v37 = vpop.eup %1539 }
 0x23e   : > { %v1351_v63 = vadd.f32 -1.0, %v1540_v37 }
 0x240   : > { %v1168_v12 = vsel %vm1104_vm12, %v1088_v50, %v1351_v63 }
 0x241   : > { %1184 = vst.msk [vmem:[%s1706_s8 + $0x78] sm:$0xff] %vm908_vm9, %v1168_v12 }
 0x242 PF: > { %s14_s21 = sadd.s32 1, %s1595_s21   ;;  %s2196_s15 = smov %s1575_s16 }
 0x243   : > { %p11_p1 = scmp.ge.s32.totalorder %s14_s21, 6   ;;  %s2197_s16 = smov %s1676_s28 }
 0x244   : > { %s2198_s17 = smov %s1587_s19  ;;  %s2199_s18 = smov %s1591_s20 }
 0x245   : > { %s2200_s19 = smov %s2203_s22  ;;  %s2201_s20 = smov %s2207_s23 }
 0x246   :  { %13 = sbr.rel (!%p11_p1) target bundleno = 4 (0x4), region = 126 }

// kernel: gat_forward.5
= control target key start
LH: loop header
LB: loop body
LE: loop exit
PB: predicated region body
PF: predicated region fallthrough
CT: control target
= control target key end

     0   :  { %s3505_s15 = smov 0   ;;  %s3507_s16 = smov 0   ;;  %s4834_s0 = inlined_call_operand.vmem [shape: f32[256,3], index: 0, kind: input, shape index: {}]   ;;  %s4835_s1 = inlined_call_operand.vmem [shape: f32[3,256], index: 1, kind: input, shape index: {}]   ;;  %s4836_s2 = inlined_call_operand.vmem [shape: f32[256,48], index: 2, kind: input, shape index: {}]   ;;  %s4837_s3 = inlined_call_operand.vmem [shape: s8[256,256], index: 3, kind: input, shape index: {}]   ;;  %s4838_s4 = inlined_call_operand.vmem [shape: f32[256,48], index: 4, kind: output, shape index: {}]  }
   0x1   :  { %s3509_s17 = smov 0   ;;  %s3511_s18 = smov 0  }
   0x2   :  { %s3513_s19 = smov 0   ;;  %s3515_s20 = smov 0  }
   0x3   :  { %s3517_s21 = smov 0  }
   0x4 LB: > { %s23_s22 = sadd.s32 1, %s3461_s19  ;;  %s26_s23 = sadd.s32 1, %s3465_s20  ;;  %s3469_s21 = sphi %s3517_s21, %s14_s21   ;;  %s3465_s20 = sphi %s3515_s20, %s5043_s20   ;;  %s3461_s19 = sphi %s3513_s19, %s5042_s19   ;;  %s3457_s18 = sphi %s3511_s18, %s5041_s18   ;;  %s3453_s17 = sphi %s3509_s17, %s5040_s17   ;;  %s3449_s16 = sphi %s3507_s16, %s5039_s16   ;;  %s3445_s15 = sphi %s3505_s15, %s5038_s15  }
   0x5   : > { %p24_p0 = scmp.ge.s32.totalorder %s23_s22, 2  ;;  %p120_p1 = scmp.ne.s32.totalorder %s3449_s16, %s3445_s15 }
   0x6   : > { %p121_p2 = scmp.eq.s32.totalorder %s3469_s21, 0  ;;  %s113_s27 = sadd.s32 1, %s3449_s16 }
   0x7   : > { %s5045_s22 = smov (%p24_p0, %s23_s22), 0  ;;  %s5047_s23 = smov (!%p24_p0, %s26_s23), %s3465_s20 }
   0x8   : > { %p122_p3 = por %p121_p2, %p120_p1  ;;  %p28_p4 = scmp.ge.s32.totalorder %s5047_s23, 2 }
   0x9   : > { %s109_s24 = ssub.s32 %s3461_s19, %s5045_s22  ;;  %p2871_p6 = scmp.ge.s32.totalorder %s3469_s21, 4 }
   0xa   : > { %s5049_s23 = smov (%p28_p4, %s5047_s23), 0 }
   0xb   : > { %s108_s25 = ssub.s32 %s3465_s20, %s5049_s23  ;;  %172 = sbr.rel (%p2871_p6) target bundleno = 26 (0x1a), region = 16 }
   0xc   : > { %s110_s26 = sor.u32 %s109_s24, %s108_s25 }
   0xd   : > { %p111_p5 = scmp.eq.s32.totalorder %s110_s26, 0 }
   0xf   : > { %s3556_s28 = scalar_select %p111_p5, %s3449_s16, %s113_s27  }
  0x10   : > { %200 = sbr.rel (!%p122_p3) target bundleno = 26 (0x1a), region = 32  ;;  %s202_s29 = sand.u32 (%p122_p3), 1, %s3449_s16  }
  0x11   : > { %s3009_s30 = sshll.u32 (%p122_p3), %s3465_s20, 3  ;;  %s2872_s5 = sshll.u32 (%p122_p3), %s202_s29, 5 }
  0x12   : > { %s207_s6 = sadd.s32 (%p122_p3), %s3461_s19, %s3009_s30  ;;  %s204_s11 = scalar_lea.vmem (%p122_p3), [#allocation4], %s2872_s5 }
  0x13   : > { %s2875_s7 = sshll.u32 (%p122_p3), %s207_s6, 3 }
  0x14   : > { %s209_s10 = scalar_lea.vmem (%p122_p3), %s4837_s3, %s2875_s7 }
  0x15   : > { %v244_v0 = vld [vmem:[%s209_s10] sm:$0xff]  ;;  %v246_v1 = vld [vmem:[%s209_s10 + $0x10] sm:$0xff] }
  0x16   : > { %v248_v2 = vld [vmem:[%s209_s10 + $0x20] sm:$0xff]  ;;  %245 = vst [vmem:[%s204_s11] sm:$0xff] %v244_v0  ;;  %v250_v3 = vld [vmem:[%s209_s10 + $0x30] sm:$0xff] }
  0x17   : > { %247 = vst [vmem:[%s204_s11 + $0x8] sm:$0xff] %v246_v1 }
  0x18   : > { %249 = vst [vmem:[%s204_s11 + $0x10] sm:$0xff] %v248_v2 }
  0x19   : > { %251 = vst [vmem:[%s204_s11 + $0x18] sm:$0xff] %v250_v3 }
  0x1a PF: > { %p2876_p7 = scmp.ge.s32.totalorder %s3469_s21, 1  ;;  %p256_p8 = scmp.lt.s32.totalorder %s3469_s21, 5 }
  0x1c   : > { %p257_p9 = pnand %p2876_p7, %p256_p8 }
  0x1e   : > { %260 = sbr.rel (%p257_p9) target bundleno = 1229 (0x4cd), region = 70 }
  0x23   : > { %s263_s12 = sand.u32 1, %s3445_s15   ;;  %s2878_s13 = sshll.u32 %s3457_s18, 4 }
  0x24   : > { %s2877_s14 = sshll.u32 %s263_s12, 5  ;;  %p303_p10 = scmp.lt.s32.totalorder %s2878_s13, 31 }
  0x25   : > { %p308_p11 = scmp.lt.s32.totalorder %s3453_s17, 1  ;;  %s2881_s26 = sshll.u32 %s3453_s17, 4 }
  0x26   : > { %s5051_s13 = smov (!%p303_p10, %s2878_s13), 31  ;;  %p313_p12 = scmp.lt.s32.totalorder %s2881_s26, 31 }
  0x27   : > { %s309_s24 = scalar_select %p308_p11, %s3453_s17, 1 }
  0x28   : > { %s2879_s25 = sshll.u32 %s5051_s13, 3  ;;  %s5053_s26 = smov (!%p313_p12, %s2881_s26), 31 }
  0x29   : > { %s3575_s30 = scalar_lea.vmem %s4834_s0, %s2879_s25  ;;  %s2880_s5 = sshll.u32 %s309_s24, 2 }
  0x2a   : > { %s3580_s8 = scalar_lea.vmem %s4835_s1, %s2880_s5  ;;  %s3585_s9 = scalar_lea.vmem %s4838_s4, %s2879_s25 }
  0x2b   : > { %s2882_s10 = sshll.u32 %s5053_s26, 3  ;;  %s3592_s27 = scalar_lea.vmem [#allocation4], %s2877_s14 }
  0x2c   : > { %s3590_s13 = scalar_lea.vmem %s4836_s2, %s2882_s10  ;;  %p2885_p13 = scmp.ne.s32.totalorder %s3453_s17, 0 }
  0x2e   : > { %330 = sbr.rel (%p2885_p13) target bundleno = 148 (0x94), region = 78 }
  0x33   : > { %vm331_vm0 = vcmask 130048   ;;  %v3471_v4 = vmov 0.0   ;;  %vm380_vm1 = vcmask 7168  }
  0x34   : > { %332 = vst.msk [vmem:[#allocation2] sm:$0xff] %vm331_vm0, %v3471_v4 }
  0x35   : > { %333 = vst.msk [vmem:[#allocation2 + $0x8] sm:$0xff] %vm331_vm0, %v3471_v4 }
  0x36   : > { %334 = vst.msk [vmem:[#allocation2 + $0x10] sm:$0xff] %vm331_vm0, %v3471_v4 }
  0x37   : > { %335 = vst.msk [vmem:[#allocation2 + $0x18] sm:$0xff] %vm331_vm0, %v3471_v4 }
  0x38   : > { %336 = vst.msk [vmem:[#allocation2 + $0x20] sm:$0xff] %vm331_vm0, %v3471_v4 }
  0x39   : > { %337 = vst.msk [vmem:[#allocation2 + $0x28] sm:$0xff] %vm331_vm0, %v3471_v4 }
  0x3a   : > { %338 = vst.msk [vmem:[#allocation2 + $0x30] sm:$0xff] %vm331_vm0, %v3471_v4 }
  0x3b   : > { %339 = vst.msk [vmem:[#allocation2 + $0x38] sm:$0xff] %vm331_vm0, %v3471_v4 }
  0x3c   : > { %340 = vst.msk [vmem:[#allocation2 + $0x40] sm:$0xff] %vm331_vm0, %v3471_v4 }
  0x3d   : > { %341 = vst.msk [vmem:[#allocation2 + $0x48] sm:$0xff] %vm331_vm0, %v3471_v4 }
  0x3e   : > { %342 = vst.msk [vmem:[#allocation2 + $0x50] sm:$0xff] %vm331_vm0, %v3471_v4 }
  0x3f   : > { %343 = vst.msk [vmem:[#allocation2 + $0x58] sm:$0xff] %vm331_vm0, %v3471_v4 }
  0x40   : > { %344 = vst.msk [vmem:[#allocation2 + $0x60] sm:$0xff] %vm331_vm0, %v3471_v4 }
  0x41   : > { %345 = vst.msk [vmem:[#allocation2 + $0x68] sm:$0xff] %vm331_vm0, %v3471_v4 }
  0x42   : > { %346 = vst.msk [vmem:[#allocation2 + $0x70] sm:$0xff] %vm331_vm0, %v3471_v4 }
  0x43   : > { %347 = vst.msk [vmem:[#allocation2 + $0x78] sm:$0xff] %vm331_vm0, %v3471_v4 }
  0x44   : > { %348 = vst.msk [vmem:[#allocation2 + $0x80] sm:$0xff] %vm331_vm0, %v3471_v4 }
  0x45   : > { %349 = vst.msk [vmem:[#allocation2 + $0x88] sm:$0xff] %vm331_vm0, %v3471_v4 }
  0x46   : > { %350 = vst.msk [vmem:[#allocation2 + $0x90] sm:$0xff] %vm331_vm0, %v3471_v4 }
  0x47   : > { %351 = vst.msk [vmem:[#allocation2 + $0x98] sm:$0xff] %vm331_vm0, %v3471_v4 }
  0x48   : > { %352 = vst.msk [vmem:[#allocation2 + $0xa0] sm:$0xff] %vm331_vm0, %v3471_v4 }
  0x49   : > { %353 = vst.msk [vmem:[#allocation2 + $0xa8] sm:$0xff] %vm331_vm0, %v3471_v4 }
  0x4a   : > { %354 = vst.msk [vmem:[#allocation2 + $0xb0] sm:$0xff] %vm331_vm0, %v3471_v4 }
  0x4b   : > { %355 = vst.msk [vmem:[#allocation2 + $0xb8] sm:$0xff] %vm331_vm0, %v3471_v4 }
  0x4c   : > { %356 = vst.msk [vmem:[#allocation2 + $0xc0] sm:$0xff] %vm331_vm0, %v3471_v4 }
  0x4d   : > { %357 = vst.msk [vmem:[#allocation2 + $0xc8] sm:$0xff] %vm331_vm0, %v3471_v4 }
  0x4e   : > { %358 = vst.msk [vmem:[#allocation2 + $0xd0] sm:$0xff] %vm331_vm0, %v3471_v4 }
  0x4f   : > { %359 = vst.msk [vmem:[#allocation2 + $0xd8] sm:$0xff] %vm331_vm0, %v3471_v4 }
  0x50   : > { %360 = vst.msk [vmem:[#allocation2 + $0xe0] sm:$0xff] %vm331_vm0, %v3471_v4 }
  0x51   : > { %361 = vst.msk [vmem:[#allocation2 + $0xe8] sm:$0xff] %vm331_vm0, %v3471_v4 }
  0x52   : > { %362 = vst.msk [vmem:[#allocation2 + $0xf0] sm:$0xff] %vm331_vm0, %v3471_v4 }
  0x53   : > { %363 = vst.msk [vmem:[#allocation2 + $0xf8] sm:$0xff] %vm331_vm0, %v3471_v4 }
  0x54   : > { %364 = vst.msk [vmem:[#allocation2 + $0x100] sm:$0xff] %vm331_vm0, %v3471_v4 }
  0x55   : > { %365 = vst.msk [vmem:[#allocation2 + $0x108] sm:$0xff] %vm331_vm0, %v3471_v4 }
  0x56   : > { %366 = vst.msk [vmem:[#allocation2 + $0x110] sm:$0xff] %vm331_vm0, %v3471_v4 }
  0x57   : > { %367 = vst.msk [vmem:[#allocation2 + $0x118] sm:$0xff] %vm331_vm0, %v3471_v4 }
  0x58   : > { %368 = vst.msk [vmem:[#allocation2 + $0x120] sm:$0xff] %vm331_vm0, %v3471_v4 }
  0x59   : > { %369 = vst.msk [vmem:[#allocation2 + $0x128] sm:$0xff] %vm331_vm0, %v3471_v4 }
  0x5a   : > { %370 = vst.msk [vmem:[#allocation2 + $0x130] sm:$0xff] %vm331_vm0, %v3471_v4 }
  0x5b   : > { %371 = vst.msk [vmem:[#allocation2 + $0x138] sm:$0xff] %vm331_vm0, %v3471_v4 }
  0x5c   : > { %372 = vst.msk [vmem:[#allocation2 + $0x140] sm:$0xff] %vm331_vm0, %v3471_v4 }
  0x5d   : > { %373 = vst.msk [vmem:[#allocation2 + $0x148] sm:$0xff] %vm331_vm0, %v3471_v4 }
  0x5e   : > { %374 = vst.msk [vmem:[#allocation2 + $0x150] sm:$0xff] %vm331_vm0, %v3471_v4 }
  0x5f   : > { %375 = vst.msk [vmem:[#allocation2 + $0x158] sm:$0xff] %vm331_vm0, %v3471_v4 }
  0x60   : > { %376 = vst.msk [vmem:[#allocation2 + $0x160] sm:$0xff] %vm331_vm0, %v3471_v4 }
  0x61   : > { %377 = vst.msk [vmem:[#allocation2 + $0x168] sm:$0xff] %vm331_vm0, %v3471_v4 }
  0x62   : > { %378 = vst.msk [vmem:[#allocation2 + $0x170] sm:$0xff] %vm331_vm0, %v3471_v4 }
  0x63   : > { %379 = vst.msk [vmem:[#allocation2 + $0x178] sm:$0xff] %vm331_vm0, %v3471_v4 }
  0x64   : > { %381 = vst.msk [vmem:[#allocation3] sm:$0xff] %vm380_vm1, %v3471_v4 }
  0x65   : > { %382 = vst.msk [vmem:[#allocation3 + $0x8] sm:$0xff] %vm380_vm1, %v3471_v4 }
  0x66   : > { %383 = vst.msk [vmem:[#allocation3 + $0x10] sm:$0xff] %vm380_vm1, %v3471_v4 }
  0x67   : > { %384 = vst.msk [vmem:[#allocation3 + $0x18] sm:$0xff] %vm380_vm1, %v3471_v4 }
  0x68   : > { %385 = vst.msk [vmem:[#allocation3 + $0x20] sm:$0xff] %vm380_vm1, %v3471_v4 }
  0x69   : > { %386 = vst.msk [vmem:[#allocation3 + $0x28] sm:$0xff] %vm380_vm1, %v3471_v4 }
  0x6a   : > { %387 = vst.msk [vmem:[#allocation3 + $0x30] sm:$0xff] %vm380_vm1, %v3471_v4 }
  0x6b   : > { %388 = vst.msk [vmem:[#allocation3 + $0x38] sm:$0xff] %vm380_vm1, %v3471_v4 }
  0x6c   : > { %389 = vst.msk [vmem:[#allocation3 + $0x40] sm:$0xff] %vm380_vm1, %v3471_v4 }
  0x6d   : > { %390 = vst.msk [vmem:[#allocation3 + $0x48] sm:$0xff] %vm380_vm1, %v3471_v4 }
  0x6e   : > { %391 = vst.msk [vmem:[#allocation3 + $0x50] sm:$0xff] %vm380_vm1, %v3471_v4 }
  0x6f   : > { %392 = vst.msk [vmem:[#allocation3 + $0x58] sm:$0xff] %vm380_vm1, %v3471_v4 }
  0x70   : > { %393 = vst.msk [vmem:[#allocation3 + $0x60] sm:$0xff] %vm380_vm1, %v3471_v4 }
  0x71   : > { %394 = vst.msk [vmem:[#allocation3 + $0x68] sm:$0xff] %vm380_vm1, %v3471_v4 }
  0x72   : > { %395 = vst.msk [vmem:[#allocation3 + $0x70] sm:$0xff] %vm380_vm1, %v3471_v4 }
  0x73   : > { %396 = vst.msk [vmem:[#allocation3 + $0x78] sm:$0xff] %vm380_vm1, %v3471_v4 }
  0x74   : > { %397 = vst.msk [vmem:[#allocation3 + $0x80] sm:$0xff] %vm380_vm1, %v3471_v4 }
  0x75   : > { %398 = vst.msk [vmem:[#allocation3 + $0x88] sm:$0xff] %vm380_vm1, %v3471_v4 }
  0x76   : > { %399 = vst.msk [vmem:[#allocation3 + $0x90] sm:$0xff] %vm380_vm1, %v3471_v4 }
  0x77   : > { %400 = vst.msk [vmem:[#allocation3 + $0x98] sm:$0xff] %vm380_vm1, %v3471_v4 }
  0x78   : > { %401 = vst.msk [vmem:[#allocation3 + $0xa0] sm:$0xff] %vm380_vm1, %v3471_v4 }
  0x79   : > { %402 = vst.msk [vmem:[#allocation3 + $0xa8] sm:$0xff] %vm380_vm1, %v3471_v4 }
  0x7a   : > { %403 = vst.msk [vmem:[#allocation3 + $0xb0] sm:$0xff] %vm380_vm1, %v3471_v4 }
  0x7b   : > { %404 = vst.msk [vmem:[#allocation3 + $0xb8] sm:$0xff] %vm380_vm1, %v3471_v4 }
  0x7c   : > { %405 = vst.msk [vmem:[#allocation3 + $0xc0] sm:$0xff] %vm380_vm1, %v3471_v4 }
  0x7d   : > { %406 = vst.msk [vmem:[#allocation3 + $0xc8] sm:$0xff] %vm380_vm1, %v3471_v4 }
  0x7e   : > { %407 = vst.msk [vmem:[#allocation3 + $0xd0] sm:$0xff] %vm380_vm1, %v3471_v4 }
  0x7f   : > { %408 = vst.msk [vmem:[#allocation3 + $0xd8] sm:$0xff] %vm380_vm1, %v3471_v4 }
  0x80   : > { %409 = vst.msk [vmem:[#allocation3 + $0xe0] sm:$0xff] %vm380_vm1, %v3471_v4 }
  0x81   : > { %410 = vst.msk [vmem:[#allocation3 + $0xe8] sm:$0xff] %vm380_vm1, %v3471_v4 }
  0x82   : > { %411 = vst.msk [vmem:[#allocation3 + $0xf0] sm:$0xff] %vm380_vm1, %v3471_v4 }
  0x83   : > { %412 = vst.msk [vmem:[#allocation3 + $0xf8] sm:$0xff] %vm380_vm1, %v3471_v4 }
  0x84   : > { %413 = vst.msk [vmem:[#allocation3 + $0x100] sm:$0xff] %vm380_vm1, %v3471_v4 }
  0x85   : > { %414 = vst.msk [vmem:[#allocation3 + $0x108] sm:$0xff] %vm380_vm1, %v3471_v4 }
  0x86   : > { %415 = vst.msk [vmem:[#allocation3 + $0x110] sm:$0xff] %vm380_vm1, %v3471_v4 }
  0x87   : > { %416 = vst.msk [vmem:[#allocation3 + $0x118] sm:$0xff] %vm380_vm1, %v3471_v4 }
  0x88   : > { %417 = vst.msk [vmem:[#allocation3 + $0x120] sm:$0xff] %vm380_vm1, %v3471_v4 }
  0x89   : > { %418 = vst.msk [vmem:[#allocation3 + $0x128] sm:$0xff] %vm380_vm1, %v3471_v4 }
  0x8a   : > { %419 = vst.msk [vmem:[#allocation3 + $0x130] sm:$0xff] %vm380_vm1, %v3471_v4 }
  0x8b   : > { %420 = vst.msk [vmem:[#allocation3 + $0x138] sm:$0xff] %vm380_vm1, %v3471_v4 }
  0x8c   : > { %421 = vst.msk [vmem:[#allocation3 + $0x140] sm:$0xff] %vm380_vm1, %v3471_v4 }
  0x8d   : > { %422 = vst.msk [vmem:[#allocation3 + $0x148] sm:$0xff] %vm380_vm1, %v3471_v4 }
  0x8e   : > { %423 = vst.msk [vmem:[#allocation3 + $0x150] sm:$0xff] %vm380_vm1, %v3471_v4 }
  0x8f   : > { %424 = vst.msk [vmem:[#allocation3 + $0x158] sm:$0xff] %vm380_vm1, %v3471_v4 }
  0x90   : > { %425 = vst.msk [vmem:[#allocation3 + $0x160] sm:$0xff] %vm380_vm1, %v3471_v4 }
  0x91   : > { %426 = vst.msk [vmem:[#allocation3 + $0x168] sm:$0xff] %vm380_vm1, %v3471_v4 }
  0x92   : > { %427 = vst.msk [vmem:[#allocation3 + $0x170] sm:$0xff] %vm380_vm1, %v3471_v4 }
  0x93   : > { %428 = vst.msk [vmem:[#allocation3 + $0x178] sm:$0xff] %vm380_vm1, %v3471_v4 }
  0x94 PF: > { %v3788_v5 = vld [vmem:[%s3575_s30 + $0x10] sm:$0xff]  ;;  %v3791_v6 = vld [vmem:[%s3575_s30] sm:$0xff]  ;;  %v3472_v7 = vmov 0   ;;  %v3803_v9 = vld [vmem:[%s3575_s30 + $0x18] sm:$0xff]  ;;  %v4839_v22 = vmov 1   ;;  %s3474_s14 = smov 112  }
  0x95   : > { %3100 = vset.pattern.permute.xlu1 %v3472_v7  ;;  %3099 = vset.pattern.permute.xlu0 %v3472_v7  ;;  %v3796_v8 = vld [vmem:[%s3575_s30 + $0x20] sm:$0xff]  ;;  %v3806_v10 = vld [vmem:[%s3575_s30 + $0x8] sm:$0xff]  ;;  %v3815_v12 = vld [vmem:[%s3575_s30 + $0x38] sm:$0xff]  ;;  %s3476_s24 = smov 96   ;;  %p2958_p0 = scmp.ne.s32.totalorder %s3453_s17, 1 }
  0x96   : > { %498 = vperm.xlu1 %3100, %v3788_v5   ;;  %488 = vperm.xlu0 %3099, %v3791_v6   ;;  %v3809_v11 = vld [vmem:[%s3575_s30 + $0x28] sm:$0xff]  ;;  %v3818_v13 = vld [vmem:[%s3575_s30 + $0x30] sm:$0xff]  ;;  %v3821_v14 = vld [vmem:[%s3575_s30 + $0x40] sm:$0xff]  ;;  %s3478_s17 = smov (!%p2958_p0), 16   ;;  %s3479_s25 = smov (!%p2958_p0), 32  }
  0x97   : > { %3101 = vset.pattern.permute.xlu2 %v3472_v7  ;;  %v3827_v15 = vld [vmem:[%s3575_s30 + $0x50] sm:$0xff]  ;;  %v3830_v16 = vld [vmem:[%s3575_s30 + $0x48] sm:$0xff]  ;;  %v3833_v17 = vld [vmem:[%s3575_s30 + $0x58] sm:$0xff] }
  0x98   : > { %508 = vperm.xlu2 %3101, %v3796_v8   ;;  %v3839_v18 = vld [vmem:[%s3575_s30 + $0x68] sm:$0xff]  ;;  %v3842_v19 = vld [vmem:[%s3575_s30 + $0x60] sm:$0xff]  ;;  %v451_v20 = vld [vmem:[%s3575_s30 + $0x70] sm:$0xff] }
  0x99   : > { %v452_v21 = vld [vmem:[%s3575_s30 + $0x78] sm:$0xff]  ;;  %v468_v23 = vld [vmem:[%s3590_s13 + $0x70] sm:$0xff]  ;;  %v466_v29 = vld [vmem:[%s3590_s13 + $0x60] sm:$0xff] }
  0x9a   : > { %v469_v24 = vld [vmem:[%s3590_s13 + $0x78] sm:$0xff]  ;;  %v484_v25 = vpack.c.bf16 %v468_v23, %v468_v23  ;;  %v467_v30 = vld [vmem:[%s3590_s13 + $0x68] sm:$0xff]  ;;  %v482_v32 = vpack.c.bf16 %v466_v29, %v466_v29  ;;  %v464_v37 = vld [vmem:[%s3590_s13 + $0x50] sm:$0xff] }
  0x9b   : > { %v485_v26 = vpack.c.bf16 %v469_v24, %v469_v24  ;;  %v483_v33 = vpack.c.bf16 %v467_v30, %v467_v30  ;;  %v465_v38 = vld [vmem:[%s3590_s13 + $0x58] sm:$0xff]  ;;  %v480_v39 = vpack.c.bf16 %v464_v37, %v464_v37  ;;  %v462_v43 = vld [vmem:[%s3590_s13 + $0x40] sm:$0xff]  ;;  %v463_v44 = vld [vmem:[%s3590_s13 + $0x48] sm:$0xff] }
  0x9c   : > { %v946_v27 = vunpack.c.l.b16 %v484_v25  ;;  %v944_v34 = vunpack.c.l.b16 %v482_v32  ;;  %v481_v40 = vpack.c.bf16 %v465_v38, %v465_v38  ;;  %v478_v46 = vpack.c.bf16 %v462_v43, %v462_v43  ;;  %v429_v48 = vld [vmem:[%s3592_s27] sm:$0xff]  ;;  %v460_v51 = vld [vmem:[%s3590_s13 + $0x30] sm:$0xff]  ;;  %v461_v52 = vld [vmem:[%s3590_s13 + $0x38] sm:$0xff] }
  0x9d   : > { %v947_v28 = vunpack.c.l.b16 %v485_v26  ;;  %v945_v35 = vunpack.c.l.b16 %v483_v33  ;;  %v942_v41 = vunpack.c.l.b16 %v480_v39  ;;  %v479_v47 = vpack.c.bf16 %v463_v44, %v463_v44  ;;  %v458_v60 = vld [vmem:[%s3590_s13 + $0x20] sm:$0xff]  ;;  %v459_v61 = vld [vmem:[%s3590_s13 + $0x28] sm:$0xff]  ;;  %v457_v23 = vld [vmem:[%s3590_s13 + $0x18] sm:$0xff] }
  0x9e   : > { %503 = vperm.xlu1 %3100, %v3803_v9   ;;  %493 = vperm.xlu0 %3099, %v3806_v10   ;;  %v943_v42 = vunpack.c.l.b16 %v481_v40  ;;  %v940_v49 = vunpack.c.l.b16 %v478_v46  ;;  %vm433_vm2 = vnez %v429_v48  ;;  %v476_v54 = vpack.c.bf16 %v460_v51, %v460_v51  ;;  %v3887_v1 = vld [vmem:[%s3580_s8] sm:$0x7]  ;;  %v430_v3 = vld [vmem:[%s3592_s27 + $0x8] sm:$0xff] }
  0x9f   : > { %v3856_v31 = vpack.c.b16 %v947_v28, %v946_v27  ;;  %v3860_v36 = vpack.c.b16 %v945_v35, %v944_v34  ;;  %v941_v50 = vunpack.c.l.b16 %v479_v47  ;;  %v477_v55 = vpack.c.bf16 %v461_v52, %v461_v52  ;;  %v454_v37 = vld [vmem:[%s3590_s13] sm:$0xff]  ;;  %v455_v38 = vld [vmem:[%s3590_s13 + $0x8] sm:$0xff] }
  0xa0   : > { %513 = vperm.xlu2 %3101, %v3809_v11   ;;  %v3868_v45 = vpack.c.b16 %v943_v42, %v942_v41  ;;  %v938_v56 = vunpack.c.l.b16 %v476_v54  ;;  %v3879_v58 = vsel %vm433_vm2, 16843009, %v3472_v7  ;;  %v474_v63 = vpack.c.bf16 %v458_v60, %v458_v60 }
  0xa1   : > { %964 = vmatpush.bf16.msra.mxu0 %v3856_v31  ;;  %3010 = vmatpush.bf16.msra.mxu3 %v3856_v31  ;;  %v3875_v53 = vpack.c.b16 %v941_v50, %v940_v49  ;;  %v939_v57 = vunpack.c.l.b16 %v477_v55  ;;  %v475_v0 = vpack.c.bf16 %v459_v61, %v459_v61  ;;  %v683_v2 = vunpack.c.0.s8 %v3879_v58 }
  0xa2   : > { %v936_v4 = vunpack.c.l.b16 %v474_v63  ;;  %v685_v24 = vunpack.c.2.s8 %v3879_v58  ;;  %vm434_vm3 = vnez %v430_v3  ;;  %v3897_v25 = vperm.slane %v3887_v1, 0  ;;  %v431_v63 = vld [vmem:[%s3592_s27 + $0x10] sm:$0xff] }
  0xa3   : > { %v3884_v62 = vpack.c.b16 %v939_v57, %v938_v56  ;;  %v699_v28 = vpack.c.b16 %v683_v2, %v683_v2  ;;  %v473_v29 = vpack.c.bf16 %v457_v23, %v457_v23  ;;  %v3904_v33 = vsel %vm434_vm3, 16843009, %v3472_v7 }
  0xa4   : > { %v703_v35 = vpack.c.b16 %v685_v24, %v685_v24  ;;  %v470_v39 = vpack.c.bf16 %v454_v37, %v454_v37  ;;  %v471_v40 = vpack.c.bf16 %v455_v38, %v455_v38  ;;  %v684_v44 = vunpack.c.1.s8 %v3879_v58 }
  0xa5   : > { %965 = vmatpush.bf16.msra.mxu0 %v3860_v36  ;;  %3011 = vmatpush.bf16.msra.mxu3 %v3860_v36  ;;  %v935_v34 = vunpack.c.l.b16 %v473_v29  ;;  %v700_v42 = vpack.c.b8 %v699_v28, %v699_v28  ;;  %v687_v46 = vunpack.c.0.s8 %v3904_v33  ;;  %v686_v60 = vunpack.c.3.s8 %v3879_v58 }
  0xa6   : > { %523 = vperm.xlu1 %3100, %v3815_v12   ;;  %518 = vperm.xlu0 %3099, %v3818_v13   ;;  %v932_v49 = vunpack.c.l.b16 %v470_v39  ;;  %v933_v50 = vunpack.c.l.b16 %v471_v40  ;;  %v704_v51 = vpack.c.b8 %v703_v35, %v703_v35  ;;  %v701_v55 = vpack.c.b16 %v684_v44, %v684_v44 }
  0xa7   : > { %v707_v54 = vpack.c.b16 %v687_v46, %v687_v46  ;;  %vm731_vm5 = vnez %v700_v42  ;;  %v705_v24 = vpack.c.b16 %v686_v60, %v686_v60  ;;  %vm435_vm8 = vnez %v431_v63 }
  0xa8   : > { %528 = vperm.xlu2 %3101, %v3821_v14   ;;  %v3916_v52 = vpack.c.b16 %v933_v50, %v932_v49  ;;  %vm733_vm7 = vnez %v704_v51  ;;  %v747_v2 = vsel %vm731_vm5, 16843009, %v3472_v7  ;;  %v702_v3 = vpack.c.b8 %v701_v55, %v701_v55 }
  0xa9   : > { %966 = vmatpush.bf16.msra.mxu0 %v3868_v45  ;;  %3012 = vmatpush.bf16.msra.mxu3 %v3868_v45  ;;  %v708_v61 = vpack.c.b8 %v707_v54, %v707_v54  ;;  %v3929_v39 = vsel %vm435_vm8, 16843009, %v3472_v7  ;;  %v706_v44 = vpack.c.b8 %v705_v24, %v705_v24  ;;  %v688_v60 = vunpack.c.1.s8 %v3904_v33 }
  0xaa   : > { %vm732_vm10 = vnez %v702_v3  ;;  %v692_v49 = vunpack.c.1.s8 %v3929_v39 }
  0xab   : > { %vm735_vm9 = vnez %v708_v61  ;;  %vm3935_vm13 = vnez %v706_v44 }
  0xac   : > { %v717_v24 = vpack.c.b16 %v692_v49, %v692_v49 }
  0xad   : > { %967 = vmatpush.bf16.msra.mxu0 %v3875_v53  ;;  %3013 = vmatpush.bf16.msra.mxu3 %v3875_v53 }
  0xae   : > { %538 = vperm.xlu1 %3100, %v3827_v15   ;;  %533 = vperm.xlu0 %3099, %v3830_v16  }
  0xb0   : > { %543 = vperm.xlu2 %3101, %v3833_v17  }
  0xb1   : > { %968 = vmatpush.bf16.msra.mxu0 %v3884_v62  ;;  %3014 = vmatpush.bf16.msra.mxu3 %v3884_v62 }
  0xb6   : > { %553 = vperm.xlu1 %3100, %v3839_v18   ;;  %548 = vperm.xlu0 %3099, %v3842_v19  }
  0xb8   : > { %558 = vperm.xlu2 %3101, %v451_v20   ;;  %v937_v20 = vunpack.c.l.b16 %v475_v0 }
  0xba   : > { %v3899_v26 = vpack.c.b16 %v937_v20, %v936_v4  ;;  %v749_v20 = vsel %vm733_vm7, 16843009, %v3472_v7 }
  0xbc   : > { %969 = vmatpush.bf16.msra.mxu0 %v3899_v26  ;;  %3015 = vmatpush.bf16.msra.mxu3 %v3899_v26 }
  0xbe   : > { %563 = vperm.xlu0 %3099, %v452_v21   ;;  %3102 = vset.pattern.permute.xlu1 %v4839_v22  ;;  %v456_v21 = vld [vmem:[%s3590_s13 + $0x10] sm:$0xff] }
  0xbf   : > { %1047 = vperm.xlu1 %3102, %v3791_v6   ;;  %v472_v27 = vpack.c.bf16 %v456_v21, %v456_v21  ;;  %v690_v21 = vunpack.c.3.s8 %v3904_v33 }
  0xc0   : > { %3103 = vset.pattern.permute.xlu2 %v4839_v22 }
  0xc1   : > { %v934_v32 = vunpack.c.l.b16 %v472_v27  ;;  %v763_v27 = vunpack.c.0.s8 %v747_v2  ;;  %v713_v38 = vpack.c.b16 %v690_v21, %v690_v21 }
  0xc3   : > { %v3909_v43 = vpack.c.b16 %v935_v34, %v934_v32  ;;  %v765_v32 = vunpack.c.0.s8 %v749_v20  ;;  %v714_v55 = vpack.c.b8 %v713_v38, %v713_v38  ;;  %vm3940_vm15 = vcmp.ne.s32.totalorder %v763_v27, 0 }
  0xc5   : > { %970 = vmatpush.bf16.msra.mxu0 %v3909_v43  ;;  %3016 = vmatpush.bf16.msra.mxu3 %v3909_v43  ;;  %vm3944_vm0 = vcmp.ne.s32.totalorder %v765_v32, 0  ;;  %vm3964_vm3 = vnez %v714_v55 }
  0xc6   : > { %3104 = vset.pattern.permute.xlu0 %v4839_v22 }
  0xc9   : > { %971 = vmatpush.bf16.msra.mxu0 %v3916_v52  ;;  %3017 = vmatpush.bf16.msra.mxu3 %v3916_v52 }
  0xf2   : > { %v509_v59 = vpop.permute.xlu2 %508 }
  0xf3   : > { %v571_v30 = vadd.f32 %v3897_v25, %v509_v59  ;;  %v689_v59 = vunpack.c.2.s8 %v3904_v33 }
  0xf5   : > { %v603_v47 = vmul.f32 0.2, %v571_v30  ;;  %vm587_vm4 = vcmp.gt.f32.partialorder %v571_v30, 0.0  ;;  %v711_v23 = vpack.c.b16 %v689_v59, %v689_v59 }
  0xf7   : > { %v619_v56 = vsel %vm587_vm4, %v571_v30, %v603_v47  ;;  %v712_v42 = vpack.c.b8 %v711_v23, %v711_v23 }
  0xf8   : > { %v635_v0 = vsub.f32 0.0, %v619_v56 }
  0xf9   : > { %vm737_vm1 = vnez %v712_v42 }
  0xfa   : > { %v514_v41 = vpop.permute.xlu2 %513  ;;  %v655_v28 = vmul.f32 1.442695, %v635_v0 }
  0xfb   : > { %v572_v48 = vadd.f32 %v3897_v25, %v514_v41  ;;  %v751_v41 = vsel %vm735_vm9, 16843009, %v3472_v7 }
  0xfc   : > { %3112 = vpow2.f32 %v655_v28  ;;  %v767_v54 = vunpack.c.0.s8 %v751_v41  ;;  %v693_v41 = vunpack.c.2.s8 %v3929_v39 }
  0xfd   : > { %v604_v57 = vmul.f32 0.2, %v572_v48  ;;  %vm588_vm6 = vcmp.gt.f32.partialorder %v572_v48, 0.0 }
  0xfe   : > { %vm3950_vm2 = vcmp.ne.s32.totalorder %v767_v54, 0  ;;  %v719_v59 = vpack.c.b16 %v693_v41, %v693_v41 }
  0xff   : > { %v620_v4 = vsel %vm588_vm6, %v572_v48, %v604_v57  ;;  %v748_v48 = vsel %vm732_vm10, 16843009, %v3472_v7 }
 0x100   : > { %v636_v58 = vsub.f32 0.0, %v620_v4  ;;  %v764_v2 = vunpack.c.0.s8 %v748_v48  ;;  %v720_v41 = vpack.c.b8 %v719_v59, %v719_v59 }
 0x102   : > { %v529_v34 = vpop.permute.xlu2 %528  ;;  %v657_v61 = vmul.f32 1.442695, %v636_v58  ;;  %v3957_v58 = vsel %vm3935_vm13, 16843009, %v3472_v7  ;;  %vm3973_vm7 = vcmp.ne.s32.totalorder %v764_v2, 0 }
 0x103   : > { %v575_v40 = vadd.f32 %v3897_v25, %v529_v34  ;;  %v709_v34 = vpack.c.b16 %v688_v60, %v688_v60  ;;  %v766_v48 = vunpack.c.0.s8 %v3957_v58 }
 0x105   : > { %vm591_vm14 = vcmp.gt.f32.partialorder %v575_v40, 0.0  ;;  %v607_v3 = vmul.f32 0.2, %v575_v40  ;;  %v710_v55 = vpack.c.b8 %v709_v34, %v709_v34 }
 0x107   : > { %vm4003_vm9 = vnez %v710_v55 }
 0x108   : > { %v499_v29 = vpop.permute.xlu1 %498  ;;  %v489_v30 = vpop.permute.xlu0 %488  ;;  %v752_v55 = vsel %vm4003_vm9, 16843009, %v3472_v7 }
 0x109   : > { %v569_v35 = vadd.f32 %v3897_v25, %v499_v29  ;;  %v567_v37 = vadd.f32 %v3897_v25, %v489_v30  ;;  %v3959_v29 = vpop.eup %3112  ;;  %v3962_v30 = vsel %vm737_vm1, 16843009, %v3472_v7  ;;  %vm4027_vm1 = vnez %v720_v41 }
 0x10a   : > { %v799_v54 = vsel %vm3950_vm2, %v3959_v29, 0.0  ;;  %v768_v34 = vunpack.c.0.s8 %v752_v55  ;;  %v4898_v41 = vmov 0 }
 0x10b   : > { %vm585_vm11 = vcmp.gt.f32.partialorder %v569_v35, 0.0  ;;  %v601_v46 = vmul.f32 0.2, %v569_v35  ;;  %vm583_vm12 = vcmp.gt.f32.partialorder %v567_v37, 0.0  ;;  %v599_v47 = vmul.f32 0.2, %v567_v37 }
 0x10c   : > { %vm4069_vm9 = vcmp.ne.s32.totalorder %v768_v34, 0 }
 0x10d   : > { %v617_v50 = vsel %vm585_vm11, %v569_v35, %v601_v46  ;;  %v615_v51 = vsel %vm583_vm12, %v567_v37, %v599_v47  ;;  %v432_v35 = vld [vmem:[%s3592_s27 + $0x18] sm:$0xff]  ;;  %v544_v37 = vpop.permute.xlu2 %543  ;;  %v718_v46 = vpack.c.b8 %v717_v24, %v717_v24  ;;  %v623_v47 = vsel %vm591_vm14, %v575_v40, %v607_v3 }
 0x10e   : > { %v633_v56 = vsub.f32 0.0, %v617_v50  ;;  %v631_v57 = vsub.f32 0.0, %v615_v51  ;;  %v578_v42 = vadd.f32 %v3897_v25, %v544_v37  ;;  %vm436_vm6 = vnez %v432_v35 }
 0x10f   : > { %v4885_v51 = vmov 0  ;;  %v3984_v40 = vsel %vm3964_vm3, 16843009, %v3472_v7  ;;  %vm3988_vm8 = vnez %v718_v46  ;;  %vm4023_vm14 = vcmp.ne.s32.totalorder %v766_v48, 0  ;;  %vm4039_vm3 = vmpackc.low %vm3973_vm7, %vm3940_vm15 }
 0x110   : > { %v651_v4 = vmul.f32 1.442695, %v633_v56  ;;  %v647_v20 = vmul.f32 1.442695, %v631_v57  ;;  %v504_v21 = vpop.permute.xlu1 %503  ;;  %v494_v23 = vpop.permute.xlu0 %493  ;;  %v4886_v51 = vsel %vm3973_vm7, 4294967295, %v4885_v51  ;;  %v769_v57 = vunpack.c.0.s8 %v3962_v30 }
 0x111   : > { %v570_v33 = vadd.f32 %v3897_v25, %v504_v21  ;;  %v568_v27 = vadd.f32 %v3897_v25, %v494_v23  ;;  %4887 = vst [vmem:[#allocation5_spill] sm:$0xff] %v4886_v51  ;;  %v610_v2 = vmul.f32 0.2, %v578_v42  ;;  %v3994_v21 = vsel %vm436_vm6, 16843009, %v3472_v7 }
 0x112   : > { %3114 = vpow2.f32 %v651_v4  ;;  %v695_v35 = vunpack.c.0.s8 %v3994_v21  ;;  %vm594_vm11 = vcmp.gt.f32.partialorder %v578_v42, 0.0  ;;  %v756_v46 = vsel %vm3988_vm8, 16843009, %v3472_v7 }
 0x113   : > { %3116 = vpow2.f32 %v647_v20  ;;  %vm586_vm4 = vcmp.gt.f32.partialorder %v570_v33, 0.0  ;;  %v602_v38 = vmul.f32 0.2, %v570_v33  ;;  %vm584_vm5 = vcmp.gt.f32.partialorder %v568_v27, 0.0 }
 0x114   : > { %v600_v44 = vmul.f32 0.2, %v568_v27  ;;  %3118 = vpow2.f32 %v657_v61  ;;  %v639_v61 = vsub.f32 0.0, %v623_v47  ;;  %v4017_v59 = vsel %vm594_vm11, %v578_v42, %v610_v2 }
 0x115   : > { %v618_v49 = vsel %vm586_vm4, %v570_v33, %v602_v38  ;;  %vm4019_vm13 = vcmp.ne.s32.totalorder %v769_v57, 0  ;;  %v4894_v20 = vmov 0  ;;  %v691_v42 = vunpack.c.0.s8 %v3929_v39 }
 0x116   : > { %v616_v50 = vsel %vm584_vm5, %v568_v27, %v600_v44  ;;  %v634_v24 = vsub.f32 0.0, %v618_v49  ;;  %v4895_v20 = vsel %vm4023_vm14, 4294967295, %v4894_v20  ;;  %v696_v57 = vunpack.c.1.s8 %v3994_v21 }
 0x117   : > { %v632_v56 = vsub.f32 0.0, %v616_v50  ;;  %v770_v50 = vunpack.c.0.s8 %v3984_v40  ;;  %v772_v40 = vunpack.c.0.s8 %v756_v46  ;;  %v4899_v41 = vsel %vm4039_vm3, 4294967295, %v4898_v41 }
 0x118   : > { %v3986_v60 = vpop.eup %3114  ;;  %v524_v3 = vpop.permute.xlu1 %523  ;;  %v653_v47 = vmul.f32 1.442695, %v634_v24  ;;  %4900 = vst [vmem:[#allocation6_spill] sm:$0xff] %v4899_v41 }
 0x119   : > { %v519_v4 = vpop.permute.xlu0 %518  ;;  %v3117_v23 = vpop.eup %3116  ;;  %v649_v33 = vmul.f32 1.442695, %v632_v56  ;;  %v574_v27 = vadd.f32 %v3897_v25, %v524_v3  ;;  %v797_v32 = vsel %vm3944_vm0, %v3986_v60, 0.0  ;;  %v663_v56 = vmul.f32 1.442695, %v639_v61 }
 0x11a   : > { %v573_v58 = vadd.f32 %v3897_v25, %v519_v4  ;;  %v795_v30 = vsel %vm3940_vm15, %v3117_v23, 0.0  ;;  %v4008_v37 = vpop.eup %3118  ;;  %831 = vadd.xlane.f32.xlu0 %v797_v32  ;;  %vm4055_vm6 = vcmp.ne.s32.totalorder %v770_v50, 0  ;;  %vm4065_vm8 = vcmp.ne.s32.totalorder %v772_v40, 0 }
 0x11b   : > { %3120 = vpow2.f32 %v649_v33  ;;  %vm590_vm10 = vcmp.gt.f32.partialorder %v574_v27, 0.0  ;;  %v606_v38 = vmul.f32 0.2, %v574_v27  ;;  %827 = vadd.xlane.f32.xlu1 %v795_v30  ;;  %v723_v33 = vpack.c.b16 %v695_v35, %v695_v35 }
 0x11c   : > { %vm589_vm12 = vcmp.gt.f32.partialorder %v573_v58, 0.0  ;;  %v605_v44 = vmul.f32 0.2, %v573_v58  ;;  %3122 = vpow2.f32 %v653_v47  ;;  %v559_v47 = vpop.permute.xlu2 %558  ;;  %v694_v40 = vunpack.c.3.s8 %v3929_v39 }
 0x11d   : > { %v622_v49 = vsel %vm590_vm10, %v574_v27, %v606_v38 }
 0x11e   : > { %v638_v3 = vsub.f32 0.0, %v622_v49  ;;  %v621_v4 = vsel %vm589_vm12, %v573_v58, %v605_v44  ;;  %v724_v49 = vpack.c.b8 %v723_v33, %v723_v33  ;;  %v725_v33 = vpack.c.b16 %v696_v57, %v696_v57 }
 0x11f   : > { %v637_v30 = vsub.f32 0.0, %v621_v4  ;;  %v715_v4 = vpack.c.b16 %v691_v42, %v691_v42 }
 0x120   : > { %v661_v61 = vmul.f32 1.442695, %v638_v3  ;;  %v539_v27 = vpop.permute.xlu1 %538  ;;  %vm4073_vm10 = vnez %v724_v49 }
 0x121   : > { %v534_v58 = vpop.permute.xlu0 %533  ;;  %v3121_v2 = vpop.eup %3120  ;;  %v659_v35 = vmul.f32 1.442695, %v637_v30  ;;  %v577_v48 = vadd.f32 %v3897_v25, %v539_v27 }
 0x122   : > { %v576_v38 = vadd.f32 %v3897_v25, %v534_v58  ;;  %3124 = vpow2.f32 %v661_v61  ;;  %v796_v44 = vsel %vm3973_vm7, %v3121_v2, 0.0  ;;  %v2887_v46 = vpack.c.bf16 %v3121_v2, %v3117_v23 }
 0x123   : > { %3126 = vpow2.f32 %v659_v35  ;;  %vm593_vm4 = vcmp.gt.f32.partialorder %v577_v48, 0.0  ;;  %v609_v55 = vmul.f32 0.2, %v577_v48  ;;  %829 = vadd.xlane.f32.xlu2 %v796_v44  ;;  %835 = vadd.xlane.f32.xlu1 %v799_v54  ;;  %v757_v23 = vsel %vm4027_vm1, 16843009, %v3472_v7  ;;  %v4063_v44 = vpop.eup %3122 }
 0x124   : > { %vm592_vm5 = vcmp.gt.f32.partialorder %v576_v38, 0.0  ;;  %v608_v3 = vmul.f32 0.2, %v576_v38  ;;  %2888 = vmatmul.msk.bf16.vlgmr.msra.gmra.mxu0 %vm4039_vm3, %v2887_v46  ;;  %3128 = vpow2.f32 %v663_v56  ;;  %v4060_v54 = vadd.f32 %v3897_v25, %v559_v47 }
 0x125   : > { %v625_v61 = vsel %vm593_vm4, %v577_v48, %v609_v55  ;;  %v698_v35 = vunpack.c.3.s8 %v3994_v21  ;;  %v773_v50 = vunpack.c.0.s8 %v757_v23  ;;  %v716_v55 = vpack.c.b8 %v715_v4, %v715_v4 }
 0x126   : > { %v641_v58 = vsub.f32 0.0, %v625_v61  ;;  %v624_v2 = vsel %vm592_vm5, %v576_v38, %v608_v3  ;;  %v726_v3 = vpack.c.b8 %v725_v33, %v725_v33  ;;  %v798_v39 = vsel %vm4023_vm14, %v4063_v44, 0.0 }
 0x127   : > { %v640_v24 = vsub.f32 0.0, %v624_v2  ;;  %v729_v4 = vpack.c.b16 %v698_v35, %v698_v35  ;;  %vm739_vm1 = vnez %v716_v55  ;;  %vm597_vm5 = vcmp.gt.f32.partialorder %v4060_v54, 0.0 }
 0x128   : > { %v4077_v48 = vpop.eup %3124  ;;  %v667_v38 = vmul.f32 1.442695, %v641_v58  ;;  %v554_v46 = vpop.permute.xlu1 %553  ;;  %vm744_vm4 = vnez %v726_v3  ;;  %v759_v35 = vsel %vm4073_vm10, 16843009, %v3472_v7  ;;  %vm4103_vm3 = vcmp.ne.s32.totalorder %v773_v50, 0  ;;  %vm4123_vm10 = vmpackc.low %vm4023_vm14, %vm3944_vm0 }
 0x129   : > { %v549_v47 = vpop.permute.xlu0 %548  ;;  %v4080_v61 = vpop.eup %3126  ;;  %v665_v34 = vmul.f32 1.442695, %v640_v24  ;;  %v580_v2 = vadd.f32 %v3897_v25, %v554_v46  ;;  %v802_v49 = vsel %vm4055_vm6, %v4077_v48, 0.0  ;;  %v2890_v3 = vpack.c.bf16 %v4063_v44, %v3986_v60 }
 0x12a   : > { %v579_v23 = vadd.f32 %v3897_v25, %v549_v47  ;;  %3130 = vpow2.f32 %v667_v38  ;;  %v801_v58 = vsel %vm4019_vm13, %v4080_v61, 0.0  ;;  %v4093_v33 = vpop.eup %3128  ;;  %v721_v38 = vpack.c.b16 %v694_v40, %v694_v40 }
 0x12b   : > { %3132 = vpow2.f32 %v665_v34  ;;  %vm596_vm11 = vcmp.gt.f32.partialorder %v580_v2, 0.0  ;;  %v612_v24 = vmul.f32 0.2, %v580_v2  ;;  %839 = vadd.xlane.f32.xlu0 %v801_v58  ;;  %833 = vadd.xlane.f32.xlu2 %v798_v39  ;;  %v613_v47 = vmul.f32 0.2, %v4060_v54 }
 0x12c   : > { %vm595_vm12 = vcmp.gt.f32.partialorder %v579_v23, 0.0  ;;  %v611_v46 = vmul.f32 0.2, %v579_v23  ;;  %841 = vadd.xlane.f32.xlu1 %v802_v49  ;;  %v800_v58 = vsel %vm4069_vm9, %v4008_v37, 0.0  ;;  %v755_v40 = vsel %vm739_vm1, 16843009, %v3472_v7 }
 0x12d   : > { %v628_v22 = vsel %vm596_vm11, %v580_v2, %v612_v24  ;;  %v760_v2 = vsel %vm744_vm4, 16843009, %v3472_v7  ;;  %v775_v39 = vunpack.c.0.s8 %v759_v35  ;;  %v730_v24 = vpack.c.b8 %v729_v4, %v729_v4 }
 0x12e   : > { %v644_v34 = vsub.f32 0.0, %v628_v22  ;;  %v627_v30 = vsel %vm595_vm12, %v579_v23, %v611_v46  ;;  %v722_v46 = vpack.c.b8 %v721_v38, %v721_v38  ;;  %v697_v44 = vunpack.c.2.s8 %v3994_v21 }
 0x12f   : > { %v643_v55 = vsub.f32 0.0, %v627_v30  ;;  %v4911_v30 = vmov 0  ;;  %v776_v38 = vunpack.c.0.s8 %v760_v2  ;;  %vm746_vm12 = vnez %v730_v24 }
 0x130   : > { %v4111_v57 = vpop.eup %3130  ;;  %v673_v22 = vmul.f32 1.442695, %v644_v34  ;;  %v4912_v30 = vsel %vm4123_vm10, 4294967295, %v4911_v30  ;;  %v4913_v34 = vsub.f32 0.0, %v4017_v59  ;;  %v629_v21 = vsel %vm597_vm5, %v4060_v54, %v613_v47 }
 0x131   : > { %v564_v23 = vpop.permute.xlu0 %563  ;;  %v4113_v41 = vpop.eup %3132  ;;  %v671_v50 = vmul.f32 1.442695, %v643_v55  ;;  %v805_v60 = vsel %vm4103_vm3, %v4111_v57, 0.0  ;;  %vm742_vm1 = vnez %v722_v46  ;;  %vm4138_vm4 = vcmp.ne.s32.totalorder %v775_v39, 0 }
 0x132   : > { %v582_v51 = vadd.f32 %v3897_v25, %v564_v23  ;;  %3134 = vpow2.f32 %v673_v22  ;;  %v804_v4 = vsel %vm4065_vm8, %v4113_v41, 0.0  ;;  %v771_v25 = vunpack.c.0.s8 %v755_v40 }
 0x133   : > { %3136 = vpow2.f32 %v671_v50  ;;  %845 = vadd.xlane.f32.xlu0 %v804_v4  ;;  %837 = vadd.xlane.f32.xlu2 %v800_v58  ;;  %v669_v55 = vmul.f32 1.442695, %v4913_v34  ;;  %v727_v40 = vpack.c.b16 %v697_v44, %v697_v44  ;;  %v4914_v23 = vmov 0 }
 0x134   : > { %vm598_vm11 = vcmp.gt.f32.partialorder %v582_v51, 0.0  ;;  %v614_v35 = vmul.f32 0.2, %v582_v51  ;;  %847 = vadd.xlane.f32.xlu1 %v805_v60  ;;  %2891 = vmatmul.msk.bf16.gmra.mxu0 %vm4123_vm10, %v2890_v3  ;;  %v4915_v23 = vsel %vm4138_vm4, 4294967295, %v4914_v23  ;;  %vm4142_vm7 = vcmp.ne.s32.totalorder %v771_v25, 0 }
 0x135   : > { %vm4146_vm14 = vcmp.ne.s32.totalorder %v776_v38, 0  ;;  %v4918_v58 = vmov 0  ;;  %v762_v3 = vsel %vm746_vm12, 16843009, %v3472_v7  ;;  %3138 = vpow2.f32 %v669_v55 }
 0x136   : > { %v630_v22 = vsel %vm598_vm11, %v582_v51, %v614_v35  ;;  %v4919_v58 = vsel %vm4146_vm14, 4294967295, %v4918_v58  ;;  %v758_v54 = vsel %vm742_vm1, 16843009, %v3472_v7  ;;  %v645_v39 = vsub.f32 0.0, %v629_v21  ;;  %vm4161_vm5 = vmpackc.low %vm4146_vm14, %vm4138_vm4 }
 0x137   : > { %v646_v2 = vsub.f32 0.0, %v630_v22  ;;  %v803_v46 = vsel %vm4142_vm7, %v4093_v33, 0.0  ;;  %v4920_v60 = vmov 0  ;;  %v728_v44 = vpack.c.b8 %v727_v40, %v727_v40 }
 0x138   : > { %v3135_v24 = vpop.eup %3134  ;;  %v4921_v60 = vsel %vm4161_vm5, 4294967295, %v4920_v60  ;;  %v778_v38 = vunpack.c.0.s8 %v762_v3  ;;  %v774_v35 = vunpack.c.0.s8 %v758_v54  ;;  %v675_v34 = vmul.f32 1.442695, %v645_v39 }
 0x139   : > { %v677_v51 = vmul.f32 1.442695, %v646_v2  ;;  %v3137_v47 = vpop.eup %3136  ;;  %v808_v50 = vsel %vm4146_vm14, %v3135_v24, 0.0  ;;  %vm745_vm11 = vnez %v728_v44  ;;  %v4922_v21 = vmov 0 }
 0x13a   : > { %v807_v4 = vsel %vm4138_vm4, %v3137_v47, 0.0  ;;  %v2905_v25 = vpack.c.bf16 %v3135_v24, %v3137_v47  ;;  %vm4169_vm12 = vcmp.ne.s32.totalorder %v778_v38, 0  ;;  %vm4173_vm1 = vcmp.ne.s32.totalorder %v774_v35, 0  ;;  %v814_v35 = vld [vmem:[#allocation3 + $0x18] sm:$0xff] }
 0x13b   : > { %3140 = vpow2.f32 %v677_v51  ;;  %851 = vadd.xlane.f32.xlu0 %v807_v4  ;;  %843 = vadd.xlane.f32.xlu2 %v803_v46  ;;  %v3139_v55 = vpop.eup %3138  ;;  %v4923_v21 = vsel %vm4169_vm12, 4294967295, %v4922_v21  ;;  %v4924_v22 = vmov 0  ;;  %v761_v2 = vsel %vm745_vm11, 16843009, %v3472_v7 }
 0x13c   : > { %853 = vadd.xlane.f32.xlu1 %v808_v50  ;;  %2906 = vmatmul.msk.bf16.vlgmr.msra.gmra.mxu3 %vm4161_vm5, %v2905_v25  ;;  %v4925_v22 = vsel %vm4173_vm1, 4294967295, %v4924_v22  ;;  %3142 = vpow2.f32 %v675_v34  ;;  %vm4184_vm5 = vmpackc.low %vm4069_vm9, %vm3950_vm2  ;;  %v4926_v24 = vmov 0  ;;  %v806_v51 = vsel %vm4173_vm1, %v3139_v55, 0.0 }
 0x13d   : > { %v4927_v24 = vsel %vm4184_vm5, 4294967295, %v4926_v24  ;;  %v2893_v54 = vpack.c.bf16 %v4008_v37, %v3959_v29  ;;  %v777_v7 = vunpack.c.0.s8 %v761_v2  ;;  %v4928_v39 = vmov 0 }
 0x13e   : > { %v4930_v46 = vmov 0  ;;  %v4932_v50 = vmov 0  ;;  %v2896_v44 = vpack.c.bf16 %v4077_v48, %v4080_v61  ;;  %v4934_v4 = vmov 0  ;;  %v815_v61 = vld [vmem:[#allocation3 + $0x20] sm:$0xff] }
 0x13f   : > { %vm4194_vm11 = vcmp.ne.s32.totalorder %v777_v7, 0  ;;  %v2899_v48 = vpack.c.bf16 %v4113_v41, %v4093_v33  ;;  %v812_v41 = vld [vmem:[#allocation3 + $0x8] sm:$0xff] }
 0x140   : > { %v4929_v39 = vsel %vm4194_vm11, 4294967295, %v4928_v39  ;;  %vm4202_vm14 = vmpackc.low %vm4169_vm12, %vm4194_vm11  ;;  %v816_v7 = vld [vmem:[#allocation3 + $0x28] sm:$0xff] }
 0x141   : > { %v3141_v40 = vpop.eup %3140  ;;  %v4931_v46 = vsel %vm4202_vm14, 4294967295, %v4930_v46 }
 0x142   : > { %v810_v3 = vsel %vm4169_vm12, %v3141_v40, 0.0  ;;  %v3143_v47 = vpop.eup %3142 }
 0x143   : > { %857 = vadd.xlane.f32.xlu0 %v810_v3  ;;  %849 = vadd.xlane.f32.xlu2 %v806_v51  ;;  %v809_v29 = vsel %vm4194_vm11, %v3143_v47, 0.0  ;;  %v2908_v37 = vpack.c.bf16 %v3141_v40, %v3143_v47 }
 0x144   : > { %2894 = vmatmul.msk.bf16.gmra.mxu0 %vm4184_vm5, %v2893_v54  ;;  %vm4214_vm5 = vmpackc.low %vm4055_vm6, %vm4019_vm13  ;;  %v820_v54 = vld [vmem:[#allocation3 + $0x48] sm:$0xff] }
 0x145   : > { %v4933_v50 = vsel %vm4214_vm5, 4294967295, %v4932_v50 }
 0x14b   : > { %855 = vadd.xlane.f32.xlu2 %v809_v29 }
 0x14c   : > { %2909 = vmatmul.msk.bf16.gmra.mxu3 %vm4202_vm14, %v2908_v37  ;;  %vm4230_vm14 = vmpackc.low %vm4065_vm8, %vm4142_vm7 }
 0x14d   : > { %v4935_v4 = vsel %vm4230_vm14, 4294967295, %v4934_v4 }
 0x154   : > { %2897 = vmatmul.msk.bf16.gmra.mxu0 %vm4214_vm5, %v2896_v44  ;;  %vm4872_vm5 = vcmask 130048  }
 0x155   : > { %1059 = vperm.xlu1 %3102, %v3803_v9  }
 0x157   : > { %1055 = vperm.xlu0 %3104, %v3788_v5   ;;  %v3475_v5 = vmov 2  }
 0x15d   : > { %1067 = vperm.xlu1 %3102, %v3809_v11  }
 0x15f   : > { %1083 = vperm.xlu0 %3104, %v3830_v16   ;;  %v4936_v16 = vmov 0 }
 0x163   : > { %1051 = vperm.xlu2 %3103, %v3806_v10  }
 0x164   : > { %2900 = vmatmul.msk.bf16.gmra.mxu0 %vm4230_vm14, %v2899_v48  ;;  %vm4250_vm14 = vmpackc.low %vm4173_vm1, %vm4103_vm3 }
 0x165   : > { %1075 = vperm.xlu1 %3102, %v3815_v12   ;;  %v4937_v16 = vsel %vm4250_vm14, 4294967295, %v4936_v16  ;;  %v2902_v12 = vpack.c.bf16 %v3139_v55, %v4111_v57 }
 0x167   : > { %1095 = vperm.xlu0 %3104, %v3842_v19  }
 0x16b   : > { %1063 = vperm.xlu2 %3103, %v3796_v8   ;;  %v4270_v8 = vpop.permute.xlu1 %1047 }
 0x16d   : > { %1087 = vperm.xlu1 %3102, %v3827_v15   ;;  %v811_v15 = vld [vmem:[#allocation3] sm:$0xff] }
 0x16f   : > { %1359 = vrot.lane.b32.xlu0 %v3856_v31, %s3474_s14 }
 0x170   : > { %3107 = vset.pattern.permute.xlu0 %v3475_v5 }
 0x173   : > { %1071 = vperm.xlu2 %3103, %v3818_v13  }
 0x174   : > { %2903 = vmatmul.msk.bf16.gmra.mxu0 %vm4250_vm14, %v2902_v12  ;;  %vm4865_vm14 = vcmask 7168   ;;  %v893_v12 = vld [vmem:[#allocation2 + $0x8] sm:$0xff] }
 0x175   : > { %1763 = vrot.lane.b32.xlu1 %v3856_v31, %s3476_s24  ;;  %v4938_v31 = vmov 1  }
 0x176   : > { %3105 = vset.pattern.permute.xlu1 %v3475_v5 }
 0x177   : > { %1757 = vrot.lane.b32.xlu0 %v3875_v53, %s3476_s24 }
 0x17b   : > { %1079 = vperm.xlu2 %3103, %v3821_v14   ;;  %v813_v14 = vld [vmem:[#allocation3 + $0x10] sm:$0xff] }
 0x17d   : > { %1759 = vrot.lane.b32.xlu1 %v3868_v45, %s3476_s24 }
 0x17f   : > { %1355 = vrot.lane.b32.xlu0 %v3868_v45, %s3474_s14 }
 0x183   : > { %1091 = vperm.xlu2 %3103, %v3833_v17  }
 0x185   : > { %1451 = vperm.xlu1 %3105, %v3791_v6  }
 0x187   : > { %1753 = vrot.lane.b32.xlu0 %v3899_v26, %s3476_s24 }
 0x18b   : > { %1761 = vrot.lane.b32.xlu2 %v3860_v36, %s3476_s24 }
 0x18c   : > { %3106 = vset.pattern.permute.xlu2 %v3475_v5 }
 0x18d   : > { %1755 = vrot.lane.b32.xlu1 %v3884_v62, %s3476_s24  ;;  %v832_v17 = vpop.xlane.xlu0 %831 }
 0x18e   : > { %v828_v19 = vpop.xlane.xlu1 %827  ;;  %3108 = vset.pattern.permute.xlu1 %v4938_v31  ;;  %v861_v45 = vadd.f32 %v832_v17, %v813_v14  ;;  %v819_v17 = vld [vmem:[#allocation3 + $0x40] sm:$0xff] }
 0x18f   : > { %v859_v6 = vadd.f32 %v828_v19, %v811_v15  ;;  %1349 = vrot.lane.b32.xlu0 %v3899_v26, %s3474_s14  ;;  %v817_v26 = vld [vmem:[#allocation3 + $0x30] sm:$0xff]  ;;  %v823_v19 = vld [vmem:[#allocation3 + $0x60] sm:$0xff] }
 0x190   : > { %878 = vst.msk [vmem:[#allocation3 + $0x10] sm:$0xff] %vm4865_vm14, %v861_v45 }
 0x191   : > { %876 = vst.msk [vmem:[#allocation3] sm:$0xff] %vm4865_vm14, %v859_v6 }
 0x193   : > { %1357 = vrot.lane.b32.xlu2 %v3860_v36, %s3474_s14  ;;  %v818_v36 = vld [vmem:[#allocation3 + $0x38] sm:$0xff] }
 0x195   : > { %1351 = vrot.lane.b32.xlu1 %v3884_v62, %s3474_s14 }
 0x196   : > { %v830_v33 = vpop.xlane.xlu2 %829  ;;  %v836_v57 = vpop.xlane.xlu1 %835 }
 0x197   : > { %v860_v25 = vadd.f32 %v830_v33, %v812_v41  ;;  %v863_v38 = vadd.f32 %v836_v57, %v815_v61  ;;  %1463 = vperm.xlu0 %3107, %v3803_v9   ;;  %v892_v9 = vld [vmem:[#allocation2] sm:$0xff]  ;;  %v3208_v57 = vld [vmem:[%s3575_s30 + $0x48] sm:$0xff] }
 0x199   : > { %877 = vst.msk [vmem:[#allocation3 + $0x8] sm:$0xff] %vm4865_vm14, %v860_v25  ;;  %v894_v25 = vld [vmem:[#allocation2 + $0x10] sm:$0xff] }
 0x19a   : > { %880 = vst.msk [vmem:[#allocation3 + $0x20] sm:$0xff] %vm4865_vm14, %v863_v38 }
 0x19b   : > { %1455 = vperm.xlu2 %3106, %v3806_v10  }
 0x19d   : > { %1749 = vrot.lane.b32.xlu1 %v3916_v52, %s3476_s24 }
 0x19e   : > { %v840_v34 = vpop.xlane.xlu0 %839  ;;  %v834_v62 = vpop.xlane.xlu2 %833 }
 0x19f   : > { %v865_v55 = vadd.f32 %v840_v34, %v817_v26  ;;  %v862_v40 = vadd.f32 %v834_v62, %v814_v35  ;;  %v842_v2 = vpop.xlane.xlu1 %841  ;;  %1471 = vperm.xlu0 %3107, %v3809_v11   ;;  %v821_v11 = vld [vmem:[#allocation3 + $0x50] sm:$0xff]  ;;  %v826_v35 = vld [vmem:[#allocation3 + $0x78] sm:$0xff] }
 0x1a0   : > { %v866_v3 = vadd.f32 %v842_v2, %v818_v36  ;;  %v822_v36 = vld [vmem:[#allocation3 + $0x58] sm:$0xff]  ;;  %v4318_v34 = vld [vmem:[%s3575_s30 + $0x70] sm:$0xff] }
 0x1a1   : > { %882 = vst.msk [vmem:[#allocation3 + $0x30] sm:$0xff] %vm4865_vm14, %v865_v55  ;;  %v973_v51 = vpop.f32.mrf.mxu0 }
 0x1a2   : > { %879 = vst.msk [vmem:[#allocation3 + $0x18] sm:$0xff] %vm4865_vm14, %v862_v40  ;;  %v1013_v10 = vadd.f32 %v973_v51, %v892_v9  ;;  %v3211_v9 = vld [vmem:[%s3575_s30 + $0x50] sm:$0xff] }
 0x1a3   : > { %883 = vst.msk [vmem:[#allocation3 + $0x38] sm:$0xff] %vm4865_vm14, %v866_v3  ;;  %1353 = vrot.lane.b32.xlu2 %v3875_v53, %s3474_s14  ;;  %v895_v3 = vld [vmem:[#allocation2 + $0x18] sm:$0xff] }
 0x1a4   : > { %1030 = vst.msk [vmem:[#allocation2] sm:$0xff] %vm4872_vm5, %v1013_v10 }
 0x1a5   : > { %1347 = vrot.lane.b32.xlu1 %v3909_v43, %s3474_s14 }
 0x1a6   : > { %v846_v47 = vpop.xlane.xlu0 %845  ;;  %v838_v29 = vpop.xlane.xlu2 %837 }
 0x1a7   : > { %v868_v37 = vadd.f32 %v846_v47, %v820_v54  ;;  %v864_v44 = vadd.f32 %v838_v29, %v816_v7  ;;  %v848_v48 = vpop.xlane.xlu1 %847  ;;  %1475 = vperm.xlu0 %3107, %v3818_v13   ;;  %v824_v13 = vld [vmem:[#allocation3 + $0x68] sm:$0xff]  ;;  %v825_v54 = vld [vmem:[#allocation3 + $0x70] sm:$0xff]  ;;  %v904_v7 = vld [vmem:[#allocation2 + $0x60] sm:$0xff] }
 0x1a8   : > { %v869_v15 = vadd.f32 %v848_v48, %v821_v11  ;;  %v3212_v11 = vld [vmem:[%s3575_s30 + $0x38] sm:$0xff]  ;;  %v896_v48 = vld [vmem:[#allocation2 + $0x20] sm:$0xff] }
 0x1a9   : > { %885 = vst.msk [vmem:[#allocation3 + $0x48] sm:$0xff] %vm4865_vm14, %v868_v37  ;;  %v975_v53 = vpop.f32.mrf.mxu0 }
 0x1aa   : > { %881 = vst.msk [vmem:[#allocation3 + $0x28] sm:$0xff] %vm4865_vm14, %v864_v44  ;;  %v1014_v14 = vadd.f32 %v975_v53, %v893_v12  ;;  %v3213_v44 = vld [vmem:[%s3575_s30 + $0x78] sm:$0xff]  ;;  %v3214_v53 = vld [vmem:[%s3575_s30 + $0x20] sm:$0xff] }
 0x1ab   : > { %886 = vst.msk [vmem:[#allocation3 + $0x50] sm:$0xff] %vm4865_vm14, %v869_v15  ;;  %1751 = vrot.lane.b32.xlu2 %v3909_v43, %s3476_s24 }
 0x1ac   : > { %1031 = vst.msk [vmem:[#allocation2 + $0x8] sm:$0xff] %vm4872_vm5, %v1014_v14  ;;  %v905_v14 = vld [vmem:[#allocation2 + $0x68] sm:$0xff] }
 0x1ad   : > { %1099 = vperm.xlu1 %3108, %v3839_v18   ;;  %v3209_v18 = vld [vmem:[%s3575_s30 + $0x10] sm:$0xff] }
 0x1ae   : > { %v852_v6 = vpop.xlane.xlu0 %851  ;;  %v844_v45 = vpop.xlane.xlu2 %843 }
 0x1af   : > { %v871_v41 = vadd.f32 %v852_v6, %v823_v19  ;;  %v867_v61 = vadd.f32 %v844_v45, %v819_v17  ;;  %v854_v33 = vpop.xlane.xlu1 %853  ;;  %1487 = vperm.xlu0 %3107, %v3208_v57   ;;  %v3215_v19 = vld [vmem:[%s3575_s30 + $0x60] sm:$0xff]  ;;  %v897_v45 = vld [vmem:[#allocation2 + $0x28] sm:$0xff]  ;;  %v4340_v57 = vperm.slane %v3887_v1, 1  ;;  %v898_v1 = vld [vmem:[#allocation2 + $0x30] sm:$0xff] }
 0x1b0   : > { %v872_v38 = vadd.f32 %v854_v33, %v824_v13 }
 0x1b1   : > { %888 = vst.msk [vmem:[#allocation3 + $0x60] sm:$0xff] %vm4865_vm14, %v871_v41  ;;  %v978_v43 = vpop.f32.mrf.mxu0 }
 0x1b2   : > { %884 = vst.msk [vmem:[#allocation3 + $0x40] sm:$0xff] %vm4865_vm14, %v867_v61  ;;  %v1015_v26 = vadd.f32 %v978_v43, %v894_v25  ;;  %v906_v43 = vld [vmem:[#allocation2 + $0x70] sm:$0xff] }
 0x1b3   : > { %889 = vst.msk [vmem:[#allocation3 + $0x68] sm:$0xff] %vm4865_vm14, %v872_v38  ;;  %1459 = vperm.xlu2 %3106, %v3209_v18  }
 0x1b4   : > { %1032 = vst.msk [vmem:[#allocation2 + $0x10] sm:$0xff] %vm4872_vm5, %v1015_v26  ;;  %v3216_v26 = vld [vmem:[%s3575_s30 + $0x58] sm:$0xff] }
 0x1b5   : > { %1103 = vperm.xlu1 %3108, %v4318_v34  }
 0x1b6   : > { %v858_v62 = vpop.xlane.xlu0 %857  ;;  %v850_v55 = vpop.xlane.xlu2 %849 }
 0x1b7   : > { %v874_v40 = vadd.f32 %v858_v62, %v826_v35  ;;  %v870_v2 = vadd.f32 %v850_v55, %v822_v36  ;;  %1491 = vperm.xlu0 %3107, %v3211_v9  }
 0x1b9   : > { %891 = vst.msk [vmem:[#allocation3 + $0x78] sm:$0xff] %vm4865_vm14, %v874_v40  ;;  %v980_v51 = vpop.f32.mrf.mxu0 }
 0x1ba   : > { %887 = vst.msk [vmem:[#allocation3 + $0x58] sm:$0xff] %vm4865_vm14, %v870_v2  ;;  %v1016_v10 = vadd.f32 %v980_v51, %v895_v3 }
 0x1bb   : > { %1345 = vrot.lane.b32.xlu2 %v3916_v52, %s3474_s14 }
 0x1bc   : > { %1033 = vst.msk [vmem:[#allocation2 + $0x18] sm:$0xff] %vm4872_vm5, %v1016_v10  ;;  %v3217_v10 = vld [vmem:[%s3575_s30 + $0x40] sm:$0xff] }
 0x1bd   : > { %3110 = vset.pattern.permute.xlu1 %v3475_v5 }
 0x1be   : > { %1479 = vperm.xlu1 %3110, %v3212_v11   ;;  %v856_v47 = vpop.xlane.xlu2 %855 }
 0x1bf   : > { %v873_v29 = vadd.f32 %v856_v47, %v825_v54  ;;  %v1003_v37 = vpop.f32.mrf.mxu3  ;;  %1511 = vperm.xlu0 %3107, %v3213_v44   ;;  %v907_v54 = vld [vmem:[#allocation2 + $0x78] sm:$0xff] }
 0x1c0   : > { %v1025_v12 = vadd.f32 %v1003_v37, %v904_v7 }
 0x1c1   : > { %890 = vst.msk [vmem:[#allocation3 + $0x70] sm:$0xff] %vm4865_vm14, %v873_v29  ;;  %v983_v52 = vpop.f32.mrf.mxu0 }
 0x1c2   : > { %1042 = vst.msk [vmem:[#allocation2 + $0x60] sm:$0xff] %vm4872_vm5, %v1025_v12  ;;  %v1017_v15 = vadd.f32 %v983_v52, %v896_v48 }
 0x1c3   : > { %1467 = vperm.xlu2 %3106, %v3214_v53   ;;  %v1111_v53 = vadd.f32 %v4340_v57, %v4270_v8 }
 0x1c4   : > { %1034 = vst.msk [vmem:[#allocation2 + $0x20] sm:$0xff] %vm4872_vm5, %v1017_v15 }
 0x1c5   : > { %vm1127_vm11 = vcmp.gt.f32.partialorder %v1111_v53, 0.0 }
 0x1c6   : > { %1499 = vperm.xlu1 %3110, %v3215_v19   ;;  %v4335_v17 = vpop.permute.xlu2 %1051 }
 0x1c7   : > { %v4337_v13 = vpop.permute.xlu1 %1059  ;;  %v1005_v6 = vpop.f32.mrf.mxu3 }
 0x1c8   : > { %v1026_v41 = vadd.f32 %v1005_v6, %v905_v14 }
 0x1c9   : > { %v1056_v61 = vpop.permute.xlu0 %1055  ;;  %v985_v33 = vpop.f32.mrf.mxu0 }
 0x1ca   : > { %1043 = vst.msk [vmem:[#allocation2 + $0x68] sm:$0xff] %vm4872_vm5, %v1026_v41  ;;  %v1018_v25 = vadd.f32 %v985_v33, %v897_v45  ;;  %v1113_v38 = vadd.f32 %v4340_v57, %v1056_v61  ;;  %v3218_v45 = vld [vmem:[%s3575_s30 + $0x68] sm:$0xff]  ;;  %v1143_v33 = vmul.f32 0.2, %v1111_v53 }
 0x1cb   : > { %3109 = vset.pattern.permute.xlu2 %v4938_v31 }
 0x1cc   : > { %1035 = vst.msk [vmem:[#allocation2 + $0x28] sm:$0xff] %vm4872_vm5, %v1018_v25  ;;  %1107 = vperm.xlu2 %3109, %v3213_v44   ;;  %v1145_v62 = vmul.f32 0.2, %v1113_v38  ;;  %vm1129_vm14 = vcmp.gt.f32.partialorder %v1113_v38, 0.0  ;;  %v899_v44 = vld [vmem:[#allocation2 + $0x38] sm:$0xff] }
 0x1ce   : > { %1495 = vperm.xlu1 %3110, %v3216_v26   ;;  %v4347_v18 = vpop.permute.xlu2 %1063  ;;  %v1161_v3 = vsel %vm1129_vm14, %v1113_v38, %v1145_v62  ;;  %v900_v26 = vld [vmem:[#allocation2 + $0x40] sm:$0xff] }
 0x1cf   : > { %v1068_v35 = vpop.permute.xlu1 %1067  ;;  %v1008_v36 = vpop.f32.mrf.mxu3  ;;  %v1177_v11 = vsub.f32 0.0, %v1161_v3 }
 0x1d0   : > { %v1027_v55 = vadd.f32 %v1008_v36, %v906_v43  ;;  %v1116_v9 = vadd.f32 %v4340_v57, %v1068_v35 }
 0x1d1   : > { %v1084_v40 = vpop.permute.xlu0 %1083  ;;  %v988_v2 = vpop.f32.mrf.mxu0  ;;  %v1195_v14 = vmul.f32 1.442695, %v1177_v11 }
 0x1d2   : > { %1044 = vst.msk [vmem:[#allocation2 + $0x70] sm:$0xff] %vm4872_vm5, %v1027_v55  ;;  %v1019_v31 = vadd.f32 %v988_v2, %v898_v1  ;;  %v1120_v51 = vadd.f32 %v4340_v57, %v1084_v40  ;;  %v1148_v47 = vmul.f32 0.2, %v1116_v9  ;;  %vm1132_vm12 = vcmp.gt.f32.partialorder %v1116_v9, 0.0 }
 0x1d3   : > { %3144 = vpow2.f32 %v1195_v14  ;;  %v1159_v2 = vsel %vm1127_vm11, %v1111_v53, %v1143_v33 }
 0x1d4   : > { %1036 = vst.msk [vmem:[#allocation2 + $0x30] sm:$0xff] %vm4872_vm5, %v1019_v31  ;;  %3111 = vset.pattern.permute.xlu2 %v3475_v5  ;;  %v1152_v48 = vmul.f32 0.2, %v1120_v51  ;;  %vm1136_vm14 = vcmp.gt.f32.partialorder %v1120_v51, 0.0  ;;  %v1164_v19 = vsel %vm1132_vm12, %v1116_v9, %v1148_v47  ;;  %v1114_v31 = vadd.f32 %v4340_v57, %v4337_v13 }
 0x1d5   : > { %1483 = vperm.xlu2 %3111, %v3217_v10   ;;  %v1180_v41 = vsub.f32 0.0, %v1164_v19  ;;  %v1175_v11 = vsub.f32 0.0, %v1159_v2  ;;  %v1112_v2 = vadd.f32 %v4340_v57, %v4335_v17 }
 0x1d6   : > { %v4355_v7 = vpop.permute.xlu2 %1071  ;;  %v1168_v6 = vsel %vm1136_vm14, %v1120_v51, %v1152_v48  ;;  %v1146_v48 = vmul.f32 0.2, %v1114_v31 }
 0x1d7   : > { %v4357_v29 = vpop.permute.xlu1 %1075  ;;  %v1010_v37 = vpop.f32.mrf.mxu3  ;;  %v1184_v25 = vsub.f32 0.0, %v1168_v6  ;;  %v1201_v62 = vmul.f32 1.442695, %v1180_v41  ;;  %v1191_v19 = vmul.f32 1.442695, %v1175_v11  ;;  %v1117_v41 = vadd.f32 %v4340_v57, %v4355_v7  ;;  %v902_v7 = vld [vmem:[#allocation2 + $0x50] sm:$0xff] }
 0x1d8   : > { %v1028_v12 = vadd.f32 %v1010_v37, %v907_v54 }
 0x1d9   : > { %v4359_v52 = vpop.permute.xlu0 %1095  ;;  %v990_v15 = vpop.f32.mrf.mxu0  ;;  %v1209_v9 = vmul.f32 1.442695, %v1184_v25  ;;  %3146 = vpow2.f32 %v1201_v62  ;;  %vm1133_vm14 = vcmp.gt.f32.partialorder %v1117_v41, 0.0 }
 0x1da   : > { %1045 = vst.msk [vmem:[#allocation2 + $0x78] sm:$0xff] %vm4872_vm5, %v1028_v12  ;;  %v1020_v5 = vadd.f32 %v990_v15, %v899_v44  ;;  %v4371_v54 = vpop.eup %3144 }
 0x1db   : > { %v1225_v44 = vsel %vm3944_vm0, %v4371_v54, 0.0  ;;  %3148 = vpow2.f32 %v1209_v9 }
 0x1dc   : > { %1037 = vst.msk [vmem:[#allocation2 + $0x38] sm:$0xff] %vm4872_vm5, %v1020_v5  ;;  %v901_v5 = vld [vmem:[#allocation2 + $0x48] sm:$0xff] }
 0x1dd   : > { %1503 = vperm.xlu2 %3111, %v3218_v45  }
 0x1de   : > { %v1080_v61 = vpop.permute.xlu2 %1079 }
 0x1df   : > { %v1119_v38 = vadd.f32 %v4340_v57, %v1080_v61  ;;  %v1088_v43 = vpop.permute.xlu1 %1087  ;;  %v4385_v25 = vpop.eup %3146 }
 0x1e0   : > { %v1121_v35 = vadd.f32 %v4340_v57, %v1088_v43 }
 0x1e1   : > { %vm1135_vm10 = vcmp.gt.f32.partialorder %v1119_v38, 0.0  ;;  %v1151_v8 = vmul.f32 0.2, %v1119_v38  ;;  %v1360_v36 = vpop.permute.xlu0 %1359  ;;  %v993_v1 = vpop.f32.mrf.mxu0 }
 0x1e2   : > { %vm1137_vm12 = vcmp.gt.f32.partialorder %v1121_v35, 0.0  ;;  %v1153_v55 = vmul.f32 0.2, %v1121_v35  ;;  %v1021_v40 = vadd.f32 %v993_v1, %v900_v26  ;;  %1369 = vmatpush.bf16.msra.mxu1 %v1360_v36  ;;  %3018 = vmatpush.bf16.msrb.mxu3 %v1360_v36  ;;  %v4388_v43 = vpop.eup %3148  ;;  %v1149_v1 = vmul.f32 0.2, %v1117_v41 }
 0x1e3   : > { %v1167_v3 = vsel %vm1135_vm10, %v1119_v38, %v1151_v8  ;;  %vm1130_vm10 = vcmp.gt.f32.partialorder %v1114_v31, 0.0 }
 0x1e4   : > { %v1183_v51 = vsub.f32 0.0, %v1167_v3  ;;  %v1169_v10 = vsel %vm1137_vm12, %v1121_v35, %v1153_v55  ;;  %1038 = vst.msk [vmem:[#allocation2 + $0x40] sm:$0xff] %vm4872_vm5, %v1021_v40  ;;  %v1162_v45 = vsel %vm1130_vm10, %v1114_v31, %v1146_v48  ;;  %v1228_v40 = vsel %vm4069_vm9, %v4385_v25, 0.0 }
 0x1e5   : > { %1507 = vperm.xlu2 %3111, %v4318_v34   ;;  %v1185_v13 = vsub.f32 0.0, %v1169_v10  ;;  %v1178_v35 = vsub.f32 0.0, %v1162_v45  ;;  %v1165_v10 = vsel %vm1133_vm14, %v1117_v41, %v1149_v1  ;;  %vm1128_vm12 = vcmp.gt.f32.partialorder %v1112_v2, 0.0 }
 0x1e6   : > { %v1207_v47 = vmul.f32 1.442695, %v1183_v51  ;;  %v1092_v37 = vpop.permute.xlu2 %1091  ;;  %v1181_v17 = vsub.f32 0.0, %v1165_v10  ;;  %v1115_v41 = vadd.f32 %v4340_v57, %v4347_v18  ;;  %v1123_v1 = vadd.f32 %v4340_v57, %v4359_v52 }
 0x1e7   : > { %v1122_v12 = vadd.f32 %v4340_v57, %v1092_v37  ;;  %v4378_v15 = vpop.permute.xlu1 %1763  ;;  %v1211_v61 = vmul.f32 1.442695, %v1185_v13  ;;  %v1197_v3 = vmul.f32 1.442695, %v1178_v35  ;;  %v1144_v37 = vmul.f32 0.2, %v1112_v2 }
 0x1e8   : > { %3150 = vpow2.f32 %v1207_v47  ;;  %1773 = vmatpush.bf16.msra.mxu2 %v4378_v15  ;;  %v3219_v13 = vld [vmem:[%s3580_s8] sm:$0x7]  ;;  %vm1131_vm10 = vcmp.gt.f32.partialorder %v1115_v41, 0.0  ;;  %vm4939_vm14 = vnez %v4895_v20 }
 0x1e9   : > { %vm1138_vm11 = vcmp.gt.f32.partialorder %v1122_v12, 0.0  ;;  %v1154_v34 = vmul.f32 0.2, %v1122_v12  ;;  %1260 = vadd.xlane.f32.xlu0 %v1225_v44  ;;  %v4381_v53 = vpop.permute.xlu0 %1757  ;;  %v995_v14 = vpop.f32.mrf.mxu0  ;;  %3152 = vpow2.f32 %v1191_v19  ;;  %v1160_v45 = vsel %vm1128_vm12, %v1112_v2, %v1144_v37 }
 0x1ea   : > { %v1022_v6 = vadd.f32 %v995_v14, %v901_v5  ;;  %3154 = vpow2.f32 %v1211_v61  ;;  %v903_v14 = vld [vmem:[#allocation2 + $0x58] sm:$0xff]  ;;  %v1147_v2 = vmul.f32 0.2, %v1115_v41  ;;  %vm1139_vm12 = vcmp.gt.f32.partialorder %v1123_v1, 0.0 }
 0x1eb   : > { %v1170_v33 = vsel %vm1138_vm11, %v1122_v12, %v1154_v34  ;;  %v4413_v12 = vperm.slane %v3219_v13, 2 }
 0x1ec   : > { %v1186_v38 = vsub.f32 0.0, %v1170_v33  ;;  %1039 = vst.msk [vmem:[#allocation2 + $0x48] sm:$0xff] %vm4872_vm5, %v1022_v6 }
 0x1ee   : > { %v4390_v26 = vpop.eup %3150  ;;  %v1213_v8 = vmul.f32 1.442695, %v1186_v38  ;;  %v4392_v36 = vpop.permute.xlu2 %1761  ;;  %v1203_v38 = vmul.f32 1.442695, %v1181_v17  ;;  %v1163_v17 = vsel %vm1131_vm10, %v1115_v41, %v1147_v2 }
 0x1ef   : > { %v4394_v62 = vpop.permute.xlu1 %1759  ;;  %1774 = vmatpush.bf16.msra.mxu2 %v4392_v36  ;;  %v4405_v11 = vpop.eup %3152  ;;  %v1231_v6 = vsel %vm4142_vm7, %v4390_v26, 0.0 }
 0x1f0   : > { %3156 = vpow2.f32 %v1213_v8  ;;  %v4408_v47 = vpop.eup %3154  ;;  %v1223_v34 = vsel %vm3940_vm15, %v4405_v11, 0.0 }
 0x1f1   : > { %v1356_v31 = vpop.permute.xlu0 %1355  ;;  %v998_v9 = vpop.f32.mrf.mxu0  ;;  %1266 = vadd.xlane.f32.xlu0 %v1228_v40  ;;  %3158 = vpow2.f32 %v1197_v3  ;;  %v1176_v40 = vsub.f32 0.0, %v1160_v45  ;;  %v1155_v3 = vmul.f32 0.2, %v1123_v1 }
 0x1f2   : > { %v1023_v51 = vadd.f32 %v998_v9, %v902_v7  ;;  %3160 = vpow2.f32 %v1203_v38 }
 0x1f3   : > { %1775 = vmatpush.bf16.msra.mxu2 %v4394_v62 }
 0x1f4   : > { %1040 = vst.msk [vmem:[#allocation2 + $0x50] sm:$0xff] %vm4872_vm5, %v1023_v51 }
 0x1f6   : > { %v4410_v44 = vpop.eup %3156  ;;  %v1358_v48 = vpop.permute.xlu2 %1357 }
 0x1f7   : > { %v1452_v5 = vpop.permute.xlu1 %1451  ;;  %1370 = vmatpush.bf16.msra.mxu1 %v1358_v48  ;;  %3019 = vmatpush.bf16.msrb.mxu3 %v1358_v48  ;;  %v4431_v7 = vpop.eup %3158  ;;  %v1234_v37 = vsel %vm4173_vm1, %v4410_v44, 0.0  ;;  %v1118_v48 = vadd.f32 %v4340_v57, %v4357_v29 }
 0x1f8   : > { %1256 = vadd.xlane.f32.xlu1 %v1223_v34  ;;  %1776 = vmatpush.bf16.msra.mxu2 %v4381_v53  ;;  %v1515_v35 = vadd.f32 %v4413_v12, %v1452_v5  ;;  %v1226_v52 = vsel %vm4939_vm14, %v4431_v7, 0.0  ;;  %v4446_v45 = vpop.eup %3160 }
 0x1f9   : > { %v4426_v61 = vpop.permute.xlu0 %1753  ;;  %v1000_v33 = vpop.f32.mrf.mxu0  ;;  %1272 = vadd.xlane.f32.xlu0 %v1231_v6  ;;  %vm1134_vm10 = vcmp.gt.f32.partialorder %v1118_v48, 0.0 }
 0x1fa   : > { %v1024_v8 = vadd.f32 %v1000_v33, %v903_v14  ;;  %v1547_v18 = vmul.f32 0.2, %v1515_v35  ;;  %vm1531_vm11 = vcmp.gt.f32.partialorder %v1515_v35, 0.0  ;;  %v1171_v14 = vsel %vm1139_vm12, %v1123_v1, %v1155_v3 }
 0x1fb   : > { %1371 = vmatpush.bf16.msra.mxu1 %v1356_v31  ;;  %3020 = vmatpush.bf16.msrb.mxu3 %v1356_v31  ;;  %v1193_v31 = vmul.f32 1.442695, %v1176_v40  ;;  %v1179_v33 = vsub.f32 0.0, %v1163_v17  ;;  %v1187_v41 = vsub.f32 0.0, %v1171_v14 }
 0x1fc   : > { %1041 = vst.msk [vmem:[#allocation2 + $0x58] sm:$0xff] %vm4872_vm5, %v1024_v8  ;;  %v1563_v34 = vsel %vm1531_vm11, %v1515_v35, %v1547_v18  ;;  %v1150_v8 = vmul.f32 0.2, %v1118_v48  ;;  %v1229_v35 = vsel %vm4019_vm13, %v4446_v45, 0.0 }
 0x1fd   : > { %3162 = vpow2.f32 %v1193_v31  ;;  %v1579_v40 = vsub.f32 0.0, %v1563_v34  ;;  %v1199_v1 = vmul.f32 1.442695, %v1179_v33  ;;  %v1232_v33 = vsel %vm4065_vm8, %v4388_v43, 0.0 }
 0x1fe   : > { %v1456_v9 = vpop.permute.xlu2 %1455  ;;  %v1166_v18 = vsel %vm1134_vm10, %v1118_v48, %v1150_v8 }
 0x1ff   : > { %v1516_v51 = vadd.f32 %v4413_v12, %v1456_v9  ;;  %v4435_v10 = vpop.permute.xlu1 %1755  ;;  %v1595_v3 = vmul.f32 1.442695, %v1579_v40  ;;  %v1182_v17 = vsub.f32 0.0, %v1166_v18  ;;  %v4942_v18 = vld [vmem:[#allocation6_spill] sm:$0xff] }
 0x200   : > { %1262 = vadd.xlane.f32.xlu1 %v1226_v52  ;;  %1777 = vmatpush.bf16.msra.mxu2 %v4435_v10  ;;  %v1215_v52 = vmul.f32 1.442695, %v1187_v41  ;;  %vm4943_vm12 = vnez %v4942_v18 }
 0x201   : > { %vm1532_vm5 = vcmp.gt.f32.partialorder %v1516_v51, 0.0  ;;  %v1548_v13 = vmul.f32 0.2, %v1516_v51  ;;  %v1350_v5 = vpop.permute.xlu0 %1349  ;;  %1278 = vadd.xlane.f32.xlu0 %v1234_v37 }
 0x203   : > { %v1564_v6 = vsel %vm1532_vm5, %v1516_v51, %v1548_v13  ;;  %v4452_v51 = vpop.eup %3162  ;;  %v4940_v13 = vld [vmem:[#allocation5_spill] sm:$0xff] }
 0x204   : > { %v1580_v38 = vsub.f32 0.0, %v1564_v6  ;;  %1778 = vmatpush.bf16.msra.mxu2 %v4426_v61  ;;  %vm4941_vm5 = vnez %v4940_v13 }
 0x205   : > { %v1224_v34 = vsel %vm4941_vm5, %v4452_v51, 0.0 }
 0x206   : > { %v1354_v2 = vpop.permute.xlu2 %1353  ;;  %v1597_v29 = vmul.f32 1.442695, %v1580_v38  ;;  %v1205_v38 = vmul.f32 1.442695, %v1182_v17 }
 0x207   : > { %v1352_v9 = vpop.permute.xlu1 %1351  ;;  %1372 = vmatpush.bf16.msra.mxu1 %v1354_v2  ;;  %3021 = vmatpush.bf16.msrb.mxu3 %v1354_v2 }
 0x208   : > { %1268 = vadd.xlane.f32.xlu1 %v1229_v35  ;;  %3164 = vpow2.f32 %v1597_v29 }
 0x209   : > { %v1464_v31 = vpop.permute.xlu0 %1463  ;;  %3166 = vpow2.f32 %v1199_v1 }
 0x20a   : > { %v1518_v37 = vadd.f32 %v4413_v12, %v1464_v31  ;;  %3168 = vpow2.f32 %v1595_v3 }
 0x20b   : > { %1373 = vmatpush.bf16.msra.mxu1 %v1352_v9  ;;  %3022 = vmatpush.bf16.msrb.mxu3 %v1352_v9  ;;  %3170 = vpow2.f32 %v1215_v52 }
 0x20c   : > { %v1550_v14 = vmul.f32 0.2, %v1518_v37  ;;  %vm1534_vm11 = vcmp.gt.f32.partialorder %v1518_v37, 0.0  ;;  %3172 = vpow2.f32 %v1205_v38 }
 0x20e   : > { %1258 = vadd.xlane.f32.xlu2 %v1224_v34  ;;  %v4458_v48 = vpop.permute.xlu2 %1751  ;;  %v4466_v8 = vpop.eup %3164  ;;  %v1566_v2 = vsel %vm1534_vm11, %v1518_v37, %v1550_v14 }
 0x20f   : > { %v4460_v6 = vpop.permute.xlu1 %1749  ;;  %1779 = vmatpush.bf16.msra.mxu2 %v4458_v48  ;;  %1374 = vmatpush.bf16.msra.mxu1 %v1350_v5  ;;  %v4468_v40 = vpop.eup %3166 }
 0x210   : > { %1274 = vadd.xlane.f32.xlu1 %v1232_v33  ;;  %3023 = vmatpush.bf16.msrb.mxu3 %v1350_v5  ;;  %v4470_v41 = vpop.eup %3168  ;;  %v1227_v35 = vsel %vm3950_vm2, %v4468_v40, 0.0  ;;  %v1582_v5 = vsub.f32 0.0, %v1566_v2 }
 0x211   : > { %v4473_v29 = vpop.eup %3170  ;;  %v2935_v9 = vpack.c.bf16 %v4466_v8, %v4470_v41  ;;  %v1472_v3 = vpop.permute.xlu0 %1471 }
 0x212   : > { %v1235_v37 = vsel %vm4138_vm4, %v4473_v29, 0.0  ;;  %v4486_v34 = vpop.eup %3172  ;;  %v1601_v14 = vmul.f32 1.442695, %v1582_v5  ;;  %v1520_v38 = vadd.f32 %v4413_v12, %v1472_v3  ;;  %v2911_v5 = vpack.c.bf16 %v4452_v51, %v4405_v11 }
 0x213   : > { %1780 = vmatpush.bf16.msra.mxu2 %v4460_v6  ;;  %vm4946_vm4 = vnez %v4921_v60 }
 0x214   : > { %3174 = vpow2.f32 %v1601_v14  ;;  %v1552_v19 = vmul.f32 0.2, %v1520_v38  ;;  %vm1536_vm11 = vcmp.gt.f32.partialorder %v1520_v38, 0.0 }
 0x216   : > { %1264 = vadd.xlane.f32.xlu2 %v1227_v35  ;;  %v1460_v1 = vpop.permute.xlu2 %1459  ;;  %2936 = vmatmul.msk.bf16.vlgmr.msra.gmra.mxu2 %vm4943_vm12, %v2935_v9  ;;  %v1230_v9 = vsel %vm4055_vm6, %v4486_v34, 0.0  ;;  %v1568_v14 = vsel %vm1536_vm11, %v1520_v38, %v1552_v19  ;;  %vm4944_vm11 = vnez %v4912_v30 }
 0x217   : > { %v1517_v52 = vadd.f32 %v4413_v12, %v1460_v1  ;;  %v1348_v31 = vpop.permute.xlu1 %1347  ;;  %v1584_v51 = vsub.f32 0.0, %v1568_v14 }
 0x218   : > { %1280 = vadd.xlane.f32.xlu1 %v1235_v37  ;;  %1375 = vmatpush.bf16.msra.mxu1 %v1348_v31 }
 0x219   : > { %vm1533_vm10 = vcmp.gt.f32.partialorder %v1517_v52, 0.0  ;;  %v1549_v17 = vmul.f32 0.2, %v1517_v52  ;;  %3024 = vmatpush.bf16.msrb.mxu3 %v1348_v31  ;;  %v1476_v3 = vpop.permute.xlu0 %1475 }
 0x21b   : > { %v1565_v33 = vsel %vm1533_vm10, %v1517_v52, %v1549_v17  ;;  %v4498_v17 = vpop.eup %3174 }
 0x21c   : > { %v1581_v2 = vsub.f32 0.0, %v1565_v33 }
 0x21e   : > { %v1599_v35 = vmul.f32 1.442695, %v1581_v2  ;;  %v1346_v1 = vpop.permute.xlu2 %1345  ;;  %1270 = vadd.xlane.f32.xlu2 %v1230_v9 }
 0x21f   : > { %v1100_v37 = vpop.permute.xlu1 %1099  ;;  %1376 = vmatpush.bf16.msra.mxu1 %v1346_v1  ;;  %3025 = vmatpush.bf16.msrb.mxu3 %v1346_v1 }
 0x220   : > { %3176 = vpow2.f32 %v1599_v35  ;;  %v1124_v31 = vadd.f32 %v4340_v57, %v1100_v37 }
 0x222   : > { %vm1140_vm10 = vcmp.gt.f32.partialorder %v1124_v31, 0.0  ;;  %v1156_v52 = vmul.f32 0.2, %v1124_v31  ;;  %2912 = vmatmul.msk.bf16.vlgmr.msra.gmra.mxu1 %vm4943_vm12, %v2911_v5  ;;  %v1605_v5 = vmul.f32 1.442695, %v1584_v51 }
 0x223   : > { %3026 = vmatpush.bf16.msra.mxu3 %v4378_v15  ;;  %v1233_v15 = vsel %vm4103_vm3, %v4408_v47, 0.0 }
 0x224   : > { %v1172_v33 = vsel %vm1140_vm10, %v1124_v31, %v1156_v52  ;;  %v1488_v52 = vpop.permute.xlu0 %1487 }
 0x225   : > { %v1188_v2 = vsub.f32 0.0, %v1172_v33 }
 0x226   : > { %v4504_v9 = vpop.eup %3176  ;;  %v1468_v11 = vpop.permute.xlu2 %1467  ;;  %1276 = vadd.xlane.f32.xlu2 %v1233_v15 }
 0x227   : > { %3027 = vmatpush.bf16.msra.mxu3 %v4392_v36  ;;  %v1217_v35 = vmul.f32 1.442695, %v1188_v2  ;;  %v1519_v18 = vadd.f32 %v4413_v12, %v1468_v11  ;;  %v1104_v1 = vpop.permute.xlu1 %1103  ;;  %v2938_v19 = vpack.c.bf16 %v4498_v17, %v4504_v9  ;;  %v1521_v36 = vadd.f32 %v4413_v12, %v1476_v3 }
 0x228   : > { %v1125_v38 = vadd.f32 %v4340_v57, %v1104_v1 }
 0x229   : > { %3178 = vpow2.f32 %v1217_v35  ;;  %vm1535_vm12 = vcmp.gt.f32.partialorder %v1519_v18, 0.0  ;;  %v1551_v37 = vmul.f32 0.2, %v1519_v18  ;;  %2939 = vmatmul.msk.bf16.gmra.mxu2 %vm4944_vm11, %v2938_v19  ;;  %v1553_v15 = vmul.f32 0.2, %v1521_v36 }
 0x22a   : > { %vm1141_vm10 = vcmp.gt.f32.partialorder %v1125_v38, 0.0  ;;  %v1157_v31 = vmul.f32 0.2, %v1125_v38  ;;  %vm1537_vm1 = vcmp.gt.f32.partialorder %v1521_v36, 0.0  ;;  %3180 = vpow2.f32 %v1605_v5 }
 0x22b   : > { %3028 = vmatpush.bf16.msra.mxu3 %v4394_v62  ;;  %v1567_v14 = vsel %vm1535_vm12, %v1519_v18, %v1551_v37  ;;  %vm4945_vm12 = vnez %v4919_v58 }
 0x22c   : > { %v1583_v33 = vsub.f32 0.0, %v1567_v14  ;;  %v1173_v2 = vsel %vm1141_vm10, %v1125_v38, %v1157_v31  ;;  %v1569_v38 = vsel %vm1537_vm1, %v1521_v36, %v1553_v15  ;;  %v1524_v31 = vadd.f32 %v4413_v12, %v1488_v52  ;;  %v1492_v36 = vpop.permute.xlu0 %1491 }
 0x22d   : > { %v1189_v11 = vsub.f32 0.0, %v1173_v2 }
 0x22e   : > { %v1603_v62 = vmul.f32 1.442695, %v1583_v33  ;;  %v1108_v3 = vpop.permute.xlu2 %1107  ;;  %v1556_v52 = vmul.f32 0.2, %v1524_v31  ;;  %vm1540_vm1 = vcmp.gt.f32.partialorder %v1524_v31, 0.0 }
 0x22f   : > { %3029 = vmatpush.bf16.msra.mxu3 %v4381_v53  ;;  %v3179_v35 = vpop.eup %3178  ;;  %v1219_v1 = vmul.f32 1.442695, %v1189_v11  ;;  %v1126_v55 = vadd.f32 %v4340_v57, %v1108_v3  ;;  %v2914_v53 = vpack.c.bf16 %v4431_v7, %v4371_v54 }
 0x230   : > { %3182 = vpow2.f32 %v1603_v62  ;;  %v1480_v19 = vpop.permute.xlu1 %1479  ;;  %v1236_v51 = vsel %vm4945_vm12, %v3179_v35, 0.0  ;;  %v2929_v18 = vpack.c.bf16 %v3179_v35, %v4473_v29  ;;  %v1585_v29 = vsub.f32 0.0, %v1569_v38  ;;  %v4529_v7 = vpop.eup %3180 }
 0x231   : > { %3184 = vpow2.f32 %v1219_v1  ;;  %vm1142_vm10 = vcmp.gt.f32.partialorder %v1126_v55, 0.0  ;;  %v1158_v37 = vmul.f32 0.2, %v1126_v55  ;;  %1282 = vadd.xlane.f32.xlu2 %v1236_v51  ;;  %v1522_v57 = vadd.f32 %v4413_v12, %v1480_v19 }
 0x232   : > { %2930 = vmatmul.msk.bf16.vlgmr.msrb.gmra.mxu3 %vm4946_vm4, %v2929_v18  ;;  %2915 = vmatmul.msk.bf16.gmra.mxu1 %vm4944_vm11, %v2914_v53  ;;  %v1607_v62 = vmul.f32 1.442695, %v1585_v29  ;;  %vm4947_vm11 = vnez %v4929_v39  ;;  %v1572_v19 = vsel %vm1540_vm1, %v1524_v31, %v1556_v52  ;;  %v1525_v51 = vadd.f32 %v4413_v12, %v1492_v36 }
 0x233   : > { %3030 = vmatpush.bf16.msra.mxu3 %v4435_v10  ;;  %v1174_v10 = vsel %vm1142_vm10, %v1126_v55, %v1158_v37  ;;  %vm1538_vm12 = vcmp.gt.f32.partialorder %v1522_v57, 0.0  ;;  %v1554_v54 = vmul.f32 0.2, %v1522_v57  ;;  %v2917_v31 = vpack.c.bf16 %v4385_v25, %v4468_v40 }
 0x234   : > { %v1190_v5 = vsub.f32 0.0, %v1174_v10  ;;  %v1557_v37 = vmul.f32 0.2, %v1525_v51  ;;  %v1512_v10 = vpop.permute.xlu0 %1511  ;;  %v1628_v25 = vsel %vm4941_vm5, %v4466_v8, 0.0  ;;  %vm4950_vm1 = vnez %v4931_v46  ;;  %v1248_v46 = vld [vmem:[#allocation3 + $0xc0] sm:$0xff] }
 0x235   : > { %v1570_v2 = vsel %vm1538_vm12, %v1522_v57, %v1554_v54  ;;  %vm4948_vm12 = vnez %v4927_v24 }
 0x236   : > { %v4531_v14 = vpop.eup %3182  ;;  %v1221_v33 = vmul.f32 1.442695, %v1190_v5  ;;  %v1484_v15 = vpop.permute.xlu2 %1483  ;;  %v1586_v30 = vsub.f32 0.0, %v1570_v2 }
 0x237   : > { %3031 = vmatpush.bf16.msra.mxu3 %v4426_v61  ;;  %v3185_v11 = vpop.eup %3184  ;;  %v2941_v55 = vpack.c.bf16 %v4529_v7, %v4531_v14  ;;  %v1627_v61 = vsel %vm3940_vm15, %v4470_v41, 0.0  ;;  %v1523_v63 = vadd.f32 %v4413_v12, %v1484_v15  ;;  %v1588_v41 = vsub.f32 0.0, %v1572_v19 }
 0x238   : > { %3186 = vpow2.f32 %v1221_v33  ;;  %v1500_v3 = vpop.permute.xlu1 %1499  ;;  %v1237_v35 = vsel %vm4947_vm11, %v3185_v11, 0.0  ;;  %v1609_v18 = vmul.f32 1.442695, %v1586_v30  ;;  %vm4949_vm15 = vnez %v4923_v21 }
 0x239   : > { %v1527_v1 = vadd.f32 %v4413_v12, %v1500_v3  ;;  %1660 = vadd.xlane.f32.xlu2 %v1627_v61  ;;  %1284 = vadd.xlane.f32.xlu0 %v1237_v35  ;;  %3188 = vpow2.f32 %v1607_v62  ;;  %v1555_v52 = vmul.f32 0.2, %v1523_v63  ;;  %v1630_v33 = vsel %vm4939_vm14, %v4498_v17, 0.0 }
 0x23a   : > { %2942 = vmatmul.msk.bf16.gmra.mxu2 %vm4948_vm12, %v2941_v55  ;;  %3190 = vpow2.f32 %v1609_v18  ;;  %v1613_v40 = vmul.f32 1.442695, %v1588_v41  ;;  %vm4951_vm14 = vcmp.gt.f32.partialorder %v1525_v51, 0.0  ;;  %v1629_v3 = vsel %vm3944_vm0, %v4504_v9, 0.0 }
 0x23b   : > { %3032 = vmatpush.bf16.msra.mxu3 %v4458_v48  ;;  %vm1543_vm10 = vcmp.gt.f32.partialorder %v1527_v1, 0.0  ;;  %v1559_v48 = vmul.f32 0.2, %v1527_v1  ;;  %v1573_v20 = vsel %vm4951_vm14, %v1525_v51, %v1557_v37  ;;  %v1631_v0 = vsel %vm3950_vm2, %v4531_v14, 0.0 }
 0x23c   : > { %3192 = vpow2.f32 %v1613_v40  ;;  %v1589_v35 = vsub.f32 0.0, %v1573_v20  ;;  %vm4953_vm2 = vnez %v4915_v23 }
 0x23d   : > { %v1575_v53 = vsel %vm1543_vm10, %v1527_v1, %v1559_v48  ;;  %vm1539_vm10 = vcmp.gt.f32.partialorder %v1523_v63, 0.0 }
 0x23e   : > { %v3187_v38 = vpop.eup %3186  ;;  %v1504_v57 = vpop.permute.xlu2 %1503  ;;  %v1591_v29 = vsub.f32 0.0, %v1575_v53  ;;  %v1571_v55 = vsel %vm1539_vm10, %v1523_v63, %v1555_v52  ;;  %v1615_v63 = vmul.f32 1.442695, %v1589_v35  ;;  %v2920_v52 = vpack.c.bf16 %v4486_v34, %v4446_v45 }
 0x23f   : > { %3033 = vmatpush.bf16.msra.mxu3 %v4460_v6  ;;  %v1528_v5 = vadd.f32 %v4413_v12, %v1504_v57  ;;  %v1238_v54 = vsel %vm4949_vm15, %v3187_v38, 0.0  ;;  %v2932_v36 = vpack.c.bf16 %v3187_v38, %v3185_v11  ;;  %v3189_v15 = vpop.eup %3188  ;;  %v1530_v11 = vadd.f32 %v4413_v12, %v1512_v10 }
 0x240   : > { %v1496_v6 = vpop.permute.xlu1 %1495  ;;  %1286 = vadd.xlane.f32.xlu1 %v1238_v54  ;;  %v1619_v17 = vmul.f32 1.442695, %v1591_v29  ;;  %v3191_v30 = vpop.eup %3190  ;;  %v1633_v61 = vsel %vm4019_vm13, %v3189_v15, 0.0  ;;  %v1587_v51 = vsub.f32 0.0, %v1571_v55  ;;  %vm4952_vm13 = vnez %v4933_v50  ;;  %v1242_v50 = vld [vmem:[#allocation3 + $0x90] sm:$0xff] }
 0x241   : > { %vm1544_vm11 = vcmp.gt.f32.partialorder %v1528_v5, 0.0  ;;  %v1560_v2 = vmul.f32 0.2, %v1528_v5  ;;  %1666 = vadd.xlane.f32.xlu2 %v1630_v33  ;;  %1662 = vadd.xlane.f32.xlu0 %v1628_v25  ;;  %v1526_v8 = vadd.f32 %v4413_v12, %v1496_v6  ;;  %vm1546_vm5 = vcmp.gt.f32.partialorder %v1530_v11, 0.0 }
 0x242   : > { %2933 = vmatmul.msk.bf16.gmra.mxu3 %vm4950_vm1, %v2932_v36  ;;  %2918 = vmatmul.msk.bf16.gmra.mxu1 %vm4948_vm12, %v2917_v31  ;;  %v1562_v24 = vmul.f32 0.2, %v1530_v11  ;;  %3194 = vpow2.f32 %v1619_v17  ;;  %v2944_v9 = vpack.c.bf16 %v3191_v30, %v3189_v15  ;;  %v3193_v53 = vpop.eup %3192  ;;  %v1632_v29 = vsel %vm4069_vm9, %v4529_v7, 0.0 }
 0x243   : > { %v1576_v13 = vsel %vm1544_vm11, %v1528_v5, %v1560_v2  ;;  %v1558_v18 = vmul.f32 0.2, %v1526_v8  ;;  %vm1542_vm11 = vcmp.gt.f32.partialorder %v1526_v8, 0.0  ;;  %v1636_v54 = vsel %vm4065_vm8, %v3193_v53, 0.0 }
 0x244   : > { %v1592_v62 = vsub.f32 0.0, %v1576_v13  ;;  %v1578_v41 = vsel %vm1546_vm5, %v1530_v11, %v1562_v24  ;;  %v1634_v36 = vsel %vm4055_vm6, %v3191_v30, 0.0  ;;  %vm4954_vm6 = vnez %v4935_v4  ;;  %v1240_v30 = vld [vmem:[#allocation3 + $0x80] sm:$0xff] }
 0x245   : > { %v1574_v38 = vsel %vm1542_vm11, %v1526_v8, %v1558_v18  ;;  %v1594_v31 = vsub.f32 0.0, %v1578_v41  ;;  %vm4956_vm8 = vnez %v4925_v22  ;;  %v4958_v17 = vpack.c.bf16 %v4388_v43, %v4390_v26  ;;  %v1245_v22 = vld [vmem:[#allocation3 + $0xa8] sm:$0xff]  ;;  %v1252_v41 = vld [vmem:[#allocation3 + $0xe0] sm:$0xff] }
 0x246   : > { %v1621_v1 = vmul.f32 1.442695, %v1592_v62  ;;  %v1508_v19 = vpop.permute.xlu2 %1507  ;;  %v1590_v28 = vsub.f32 0.0, %v1574_v38  ;;  %vm4961_vm12 = vnez %v4937_v16  ;;  %v1243_v62 = vld [vmem:[#allocation3 + $0x98] sm:$0xff] }
 0x247   : > { %v1529_v48 = vadd.f32 %v4413_v12, %v1508_v19  ;;  %v1611_v12 = vmul.f32 1.442695, %v1587_v51  ;;  %v1625_v6 = vmul.f32 1.442695, %v1594_v31  ;;  %v1246_v19 = vld [vmem:[#allocation3 + $0xb0] sm:$0xff] }
 0x248   : > { %3196 = vpow2.f32 %v1621_v1  ;;  %1664 = vadd.xlane.f32.xlu1 %v1629_v3  ;;  %v3195_v57 = vpop.eup %3194  ;;  %v1617_v33 = vmul.f32 1.442695, %v1590_v28  ;;  %v1251_v3 = vld [vmem:[#allocation3 + $0xd8] sm:$0xff]  ;;  %v1725_v28 = vld [vmem:[#allocation2 + $0x100] sm:$0xff] }
 0x249   : > { %vm1545_vm0 = vcmp.gt.f32.partialorder %v1529_v48, 0.0  ;;  %v1561_v32 = vmul.f32 0.2, %v1529_v48  ;;  %1672 = vadd.xlane.f32.xlu2 %v1633_v61  ;;  %1668 = vadd.xlane.f32.xlu0 %v1631_v0  ;;  %3198 = vpow2.f32 %v1615_v63  ;;  %v1639_v60 = vsel %vm4953_vm2, %v3195_v57, 0.0 }
 0x24a   : > { %2945 = vmatmul.msk.bf16.gmra.mxu2 %vm4952_vm13, %v2944_v9  ;;  %3200 = vpow2.f32 %v1611_v12 }
 0x24b   : > { %v1577_v37 = vsel %vm1545_vm0, %v1529_v48, %v1561_v32  ;;  %3202 = vpow2.f32 %v1625_v6  ;;  %v1241_v48 = vld [vmem:[#allocation3 + $0x88] sm:$0xff]  ;;  %v1244_v32 = vld [vmem:[#allocation3 + $0xa0] sm:$0xff] }
 0x24c   : > { %v1593_v14 = vsub.f32 0.0, %v1577_v37  ;;  %3204 = vpow2.f32 %v1617_v33  ;;  %v1247_v37 = vld [vmem:[#allocation3 + $0xb8] sm:$0xff]  ;;  %v1726_v6 = vld [vmem:[#allocation2 + $0x108] sm:$0xff] }
 0x24e   : > { %v3197_v10 = vpop.eup %3196  ;;  %v1623_v56 = vmul.f32 1.442695, %v1593_v14 }
 0x24f   : > { %v2953_v5 = vpack.c.bf16 %v3197_v10, %v3195_v57  ;;  %v3199_v7 = vpop.eup %3198 }
 0x250   : > { %1670 = vadd.xlane.f32.xlu1 %v1632_v29  ;;  %v3201_v42 = vpop.eup %3200  ;;  %3206 = vpow2.f32 %v1623_v56  ;;  %v1637_v45 = vsel %vm4103_vm3, %v3199_v7, 0.0  ;;  %vm4957_vm3 = vnez %v4919_v58 }
 0x251   : > { %1678 = vadd.xlane.f32.xlu2 %v1636_v54  ;;  %1674 = vadd.xlane.f32.xlu0 %v1634_v36  ;;  %v1635_v27 = vsel %vm4142_vm7, %v3201_v42, 0.0  ;;  %v2947_v34 = vpack.c.bf16 %v3193_v53, %v3201_v42  ;;  %v3203_v25 = vpop.eup %3202  ;;  %vm4955_vm7 = vcmask 7168   ;;  %v1640_v23 = vsel %vm4957_vm3, %v3197_v10, 0.0  ;;  %v1250_v10 = vld [vmem:[#allocation3 + $0xd0] sm:$0xff]  ;;  %v1321_v36 = vld [vmem:[#allocation2 + $0x80] sm:$0xff]  ;;  %v1253_v42 = vld [vmem:[#allocation3 + $0xe8] sm:$0xff] }
 0x252   : > { %2954 = vmatmul.msk.bf16.vlgmr.msra.gmra.mxu3 %vm4946_vm4, %v2953_v5  ;;  %2921 = vmatmul.msk.bf16.gmra.mxu1 %vm4952_vm13, %v2920_v52  ;;  %v3205_v40 = vpop.eup %3204  ;;  %v1642_v11 = vsel %vm4949_vm15, %v3203_v25, 0.0  ;;  %vm4959_vm9 = vmmov %vm4955_vm7  ;;  %vm4960_vm4 = vnez %v4929_v39  ;;  %v4964_v39 = vpack.c.bf16 %v4410_v44, %v4408_v47  ;;  %v1249_v47 = vld [vmem:[#allocation3 + $0xc8] sm:$0xff] }
 0x253   : > { %v1638_v49 = vsel %vm4956_vm8, %v3205_v40, 0.0  ;;  %v2950_v8 = vpack.c.bf16 %v3205_v40, %v3199_v7  ;;  %vm4962_vm15 = vmmov %vm4955_vm7  ;;  %vm4974_vm8 = vcmask 130048   ;;  %v1254_v40 = vld [vmem:[#allocation3 + $0xf0] sm:$0xff] }
 0x254   : > { %vm4975_vm3 = vmmov %vm4974_vm8 }
 0x256   : > { %v3207_v15 = vpop.eup %3206 }
 0x257   : > { %v2956_v20 = vpack.c.bf16 %v3203_v25, %v3207_v15  ;;  %v1641_v21 = vsel %vm4960_vm4, %v3207_v15, 0.0  ;;  %v1644_v25 = vld [vmem:[#allocation3 + $0x100] sm:$0xff] }
 0x258   : > { %1676 = vadd.xlane.f32.xlu1 %v1635_v27 }
 0x259   : > { %1680 = vadd.xlane.f32.xlu0 %v1637_v45  ;;  %1684 = vadd.xlane.f32.xlu2 %v1639_v60  ;;  %v1322_v60 = vld [vmem:[#allocation2 + $0x88] sm:$0xff] }
 0x25a   : > { %2948 = vmatmul.msk.bf16.gmra.mxu2 %vm4954_vm6, %v2947_v34 }
 0x25c   : > { %v1261_v2 = vpop.xlane.xlu0 %1260 }
 0x25d   : > { %v1290_v59 = vadd.f32 %v1261_v2, %v1242_v50  ;;  %v1727_v2 = vld [vmem:[#allocation2 + $0x110] sm:$0xff] }
 0x25f   : > { %1306 = vst.msk [vmem:[#allocation3 + $0x90] sm:$0xff] %vm4955_vm7, %v1290_v59 }
 0x260   : > { %1682 = vadd.xlane.f32.xlu1 %v1638_v49 }
 0x261   : > { %1686 = vadd.xlane.f32.xlu0 %v1640_v23  ;;  %1690 = vadd.xlane.f32.xlu2 %v1642_v11 }
 0x262   : > { %2957 = vmatmul.msk.bf16.gmra.mxu3 %vm4950_vm1, %v2956_v20  ;;  %2924 = vmatmul.msk.bf16.gmra.mxu1 %vm4954_vm6, %v4958_v17  ;;  %vm4963_vm1 = vmmov %vm4955_vm7  ;;  %v1323_v20 = vld [vmem:[#allocation2 + $0x90] sm:$0xff] }
 0x263   : > { %vm4965_vm10 = vmmov %vm4963_vm1 }
 0x264   : > { %v1267_v13 = vpop.xlane.xlu0 %1266  ;;  %vm4966_vm14 = vmmov %vm4963_vm1 }
 0x265   : > { %v1293_v58 = vadd.f32 %v1267_v13, %v1245_v22  ;;  %vm4967_vm5 = vmmov %vm4963_vm1 }
 0x266   : > { %vm4968_vm11 = vmmov %vm4963_vm1 }
 0x267   : > { %1309 = vst.msk [vmem:[#allocation3 + $0xa8] sm:$0xff] %vm4959_vm9, %v1293_v58  ;;  %vm4969_vm0 = vmmov %vm4963_vm1  ;;  %v1255_v58 = vld [vmem:[#allocation3 + $0xf8] sm:$0xff] }
 0x268   : > { %1688 = vadd.xlane.f32.xlu1 %v1641_v21  ;;  %vm4970_vm13 = vmmov %vm4969_vm0  ;;  %v1647_v21 = vld [vmem:[#allocation3 + $0x118] sm:$0xff] }
 0x269   : > { %vm4971_vm2 = vmmov %vm4969_vm0 }
 0x26a   : > { %2951 = vmatmul.msk.bf16.gmra.mxu2 %vm4961_vm12, %v2950_v8  ;;  %vm4972_vm6 = vmmov %vm4969_vm0  ;;  %v1645_v8 = vld [vmem:[#allocation3 + $0x108] sm:$0xff] }
 0x26b   : > { %v1257_v55 = vpop.xlane.xlu1 %1256  ;;  %vm4973_vm7 = vmmov %vm4969_vm0 }
 0x26c   : > { %v1288_v43 = vadd.f32 %v1257_v55, %v1240_v30  ;;  %v1273_v26 = vpop.xlane.xlu0 %1272  ;;  %vm4976_vm9 = vmmov %vm4975_vm3  ;;  %v1728_v55 = vld [vmem:[#allocation2 + $0x118] sm:$0xff] }
 0x26d   : > { %v1296_v4 = vadd.f32 %v1273_v26, %v1248_v46  ;;  %vm4977_vm4 = vmmov %vm4969_vm0  ;;  %v1333_v46 = vld [vmem:[#allocation2 + $0xe0] sm:$0xff] }
 0x26e   : > { %1304 = vst.msk [vmem:[#allocation3 + $0x80] sm:$0xff] %vm4962_vm15, %v1288_v43  ;;  %vm4979_vm15 = vmmov %vm4969_vm0 }
 0x26f   : > { %1312 = vst.msk [vmem:[#allocation3 + $0xc0] sm:$0xff] %vm4963_vm1, %v1296_v4  ;;  %vm4980_vm1 = vmmov %vm4969_vm0 }
 0x272   : > { %2927 = vmatmul.msk.bf16.gmra.mxu1 %vm4961_vm12, %v4964_v39  ;;  %vm4978_vm12 = vmmov %vm4975_vm3 }
 0x273   : > { %v1263_v61 = vpop.xlane.xlu1 %1262 }
 0x274   : > { %v1291_v35 = vadd.f32 %v1263_v61, %v1243_v62  ;;  %v1279_v24 = vpop.xlane.xlu0 %1278 }
 0x275   : > { %v1299_v1 = vadd.f32 %v1279_v24, %v1251_v3 }
 0x276   : > { %1307 = vst.msk [vmem:[#allocation3 + $0x98] sm:$0xff] %vm4965_vm10, %v1291_v35  ;;  %vm4981_vm10 = vmmov %vm4975_vm3  ;;  %v1324_v35 = vld [vmem:[#allocation2 + $0x98] sm:$0xff] }
 0x277   : > { %1315 = vst.msk [vmem:[#allocation3 + $0xd8] sm:$0xff] %vm4966_vm14, %v1299_v1  ;;  %vm4982_vm14 = vmmov %vm4975_vm3 }
 0x27b   : > { %v1269_v51 = vpop.xlane.xlu1 %1268 }
 0x27c   : > { %v1294_v18 = vadd.f32 %v1269_v51, %v1246_v19 }
 0x27e   : > { %1310 = vst.msk [vmem:[#allocation3 + $0xb0] sm:$0xff] %vm4967_vm5, %v1294_v18  ;;  %vm4983_vm5 = vmmov %vm4969_vm0  ;;  %v1646_v18 = vld [vmem:[#allocation3 + $0x110] sm:$0xff] }
 0x281   : > { %v1259_v0 = vpop.xlane.xlu2 %1258 }
 0x282   : > { %v1289_v44 = vadd.f32 %v1259_v0, %v1241_v48  ;;  %v1650_v48 = vld [vmem:[#allocation3 + $0x130] sm:$0xff]  ;;  %v1648_v0 = vld [vmem:[#allocation3 + $0x120] sm:$0xff] }
 0x283   : > { %v1275_v16 = vpop.xlane.xlu1 %1274 }
 0x284   : > { %1305 = vst.msk [vmem:[#allocation3 + $0x88] sm:$0xff] %vm4968_vm11, %v1289_v44  ;;  %v1297_v9 = vadd.f32 %v1275_v16, %v1249_v47  ;;  %vm4984_vm11 = vmmov %vm4969_vm0  ;;  %v1334_v44 = vld [vmem:[#allocation2 + $0xe8] sm:$0xff]  ;;  %v1729_v16 = vld [vmem:[#allocation2 + $0x120] sm:$0xff] }
 0x286   : > { %1313 = vst.msk [vmem:[#allocation3 + $0xc8] sm:$0xff] %vm4969_vm0, %v1297_v9 }
 0x289   : > { %v1265_v63 = vpop.xlane.xlu2 %1264 }
 0x28a   : > { %v1292_v53 = vadd.f32 %v1265_v63, %v1244_v32 }
 0x28b   : > { %v1281_v12 = vpop.xlane.xlu1 %1280 }
 0x28c   : > { %1308 = vst.msk [vmem:[#allocation3 + $0xa0] sm:$0xff] %vm4970_vm13, %v1292_v53  ;;  %v1300_v38 = vadd.f32 %v1281_v12, %v1252_v41  ;;  %vm4985_vm13 = vmmov %vm4975_vm3 }
 0x28e   : > { %1316 = vst.msk [vmem:[#allocation3 + $0xe0] sm:$0xff] %vm4971_vm2, %v1300_v38  ;;  %vm4986_vm2 = vmmov %vm4975_vm3 }
 0x291   : > { %v1271_v57 = vpop.xlane.xlu2 %1270 }
 0x292   : > { %v1295_v31 = vadd.f32 %v1271_v57, %v1247_v37  ;;  %v1325_v37 = vld [vmem:[#allocation2 + $0xa0] sm:$0xff] }
 0x294   : > { %1311 = vst.msk [vmem:[#allocation3 + $0xb8] sm:$0xff] %vm4972_vm6, %v1295_v31  ;;  %vm4987_vm6 = vmmov %vm4986_vm2 }
 0x299   : > { %v1277_v14 = vpop.xlane.xlu2 %1276  ;;  %v1782_v29 = vpop.f32.mrf.mxu2 }
 0x29a   : > { %v1298_v5 = vadd.f32 %v1277_v14, %v1250_v10  ;;  %v1822_v54 = vadd.f32 %v1782_v29, %v1725_v28  ;;  %v1649_v14 = vld [vmem:[#allocation3 + $0x128] sm:$0xff] }
 0x29b   : > { %v1653_v29 = vld [vmem:[#allocation3 + $0x148] sm:$0xff] }
 0x29c   : > { %1314 = vst.msk [vmem:[#allocation3 + $0xd0] sm:$0xff] %vm4973_vm7, %v1298_v5  ;;  %vm4988_vm7 = vmmov %vm4969_vm0  ;;  %v1651_v5 = vld [vmem:[#allocation3 + $0x138] sm:$0xff] }
 0x29d   : > { %1838 = vst.msk [vmem:[#allocation2 + $0x100] sm:$0xff] %vm4974_vm8, %v1822_v54  ;;  %vm4989_vm8 = vmmov %vm4969_vm0 }
 0x29f   : > { %v1378_v52 = vpop.f32.mrf.mxu1 }
 0x2a0   : > { %v1418_v33 = vadd.f32 %v1378_v52, %v1321_v36  ;;  %v1335_v36 = vld [vmem:[#allocation2 + $0xf0] sm:$0xff]  ;;  %v1730_v52 = vld [vmem:[#allocation2 + $0x128] sm:$0xff] }
 0x2a1   : > { %v1784_v56 = vpop.f32.mrf.mxu2 }
 0x2a2   : > { %1434 = vst.msk [vmem:[#allocation2 + $0x80] sm:$0xff] %vm4975_vm3, %v1418_v33  ;;  %v1823_v7 = vadd.f32 %v1784_v56, %v1726_v6  ;;  %vm4990_vm3 = vmmov %vm4969_vm0 }
 0x2a4   : > { %1839 = vst.msk [vmem:[#allocation2 + $0x108] sm:$0xff] %vm4976_vm9, %v1823_v7  ;;  %v1283_v27 = vpop.xlane.xlu2 %1282  ;;  %vm4991_vm9 = vmmov %vm4986_vm2 }
 0x2a5   : > { %v1301_v45 = vadd.f32 %v1283_v27, %v1253_v42 }
 0x2a7   : > { %1317 = vst.msk [vmem:[#allocation3 + $0xe8] sm:$0xff] %vm4977_vm4, %v1301_v45  ;;  %v1380_v34 = vpop.f32.mrf.mxu1  ;;  %vm4992_vm4 = vmmov %vm4986_vm2 }
 0x2a8   : > { %v1419_v50 = vadd.f32 %v1380_v34, %v1322_v60  ;;  %v1326_v60 = vld [vmem:[#allocation2 + $0xa8] sm:$0xff] }
 0x2aa   : > { %1435 = vst.msk [vmem:[#allocation2 + $0x88] sm:$0xff] %vm4978_vm12, %v1419_v50  ;;  %vm4993_vm12 = vmmov %vm4986_vm2 }
 0x2ac   : > { %v1661_v15 = vpop.xlane.xlu2 %1660  ;;  %v1285_v59 = vpop.xlane.xlu0 %1284 }
 0x2ad   : > { %v1692_v49 = vadd.f32 %v1661_v15, %v1644_v25  ;;  %v1302_v23 = vadd.f32 %v1285_v59, %v1254_v40  ;;  %v1787_v11 = vpop.f32.mrf.mxu2  ;;  %v1654_v15 = vld [vmem:[#allocation3 + $0x150] sm:$0xff]  ;;  %v1656_v59 = vld [vmem:[#allocation3 + $0x160] sm:$0xff] }
 0x2ae   : > { %v1824_v17 = vadd.f32 %v1787_v11, %v1727_v2  ;;  %v1652_v2 = vld [vmem:[#allocation3 + $0x140] sm:$0xff]  ;;  %v1731_v11 = vld [vmem:[#allocation2 + $0x130] sm:$0xff] }
 0x2af   : > { %1708 = vst.msk [vmem:[#allocation3 + $0x100] sm:$0xff] %vm4979_vm15, %v1692_v49  ;;  %v1383_v22 = vpop.f32.mrf.mxu1  ;;  %vm4994_vm15 = vmmov %vm4969_vm0 }
 0x2b0   : > { %1318 = vst.msk [vmem:[#allocation3 + $0xf0] sm:$0xff] %vm4980_vm1, %v1302_v23  ;;  %v1420_v13 = vadd.f32 %v1383_v22, %v1323_v20  ;;  %vm4995_vm1 = vmmov %vm4969_vm0  ;;  %v1336_v23 = vld [vmem:[#allocation2 + $0xf8] sm:$0xff] }
 0x2b1   : > { %1840 = vst.msk [vmem:[#allocation2 + $0x110] sm:$0xff] %vm4981_vm10, %v1824_v17  ;;  %vm4996_vm10 = vmmov %vm4969_vm0 }
 0x2b2   : > { %1436 = vst.msk [vmem:[#allocation2 + $0x90] sm:$0xff] %vm4982_vm14, %v1420_v13  ;;  %vm4997_vm14 = vmmov %vm4986_vm2 }
 0x2b3   : > { %v1287_v30 = vpop.xlane.xlu1 %1286 }
 0x2b4   : > { %v1667_v43 = vpop.xlane.xlu2 %1666  ;;  %v1663_v26 = vpop.xlane.xlu0 %1662  ;;  %v1303_v4 = vadd.f32 %v1287_v30, %v1255_v58  ;;  %v1327_v30 = vld [vmem:[#allocation2 + $0xb0] sm:$0xff] }
 0x2b5   : > { %v1695_v62 = vadd.f32 %v1667_v43, %v1647_v21  ;;  %v1693_v39 = vadd.f32 %v1663_v26, %v1645_v8  ;;  %v1408_v3 = vpop.f32.mrf.mxu3  ;;  %v1789_v61 = vpop.f32.mrf.mxu2 }
 0x2b6   : > { %1319 = vst.msk [vmem:[#allocation3 + $0xf8] sm:$0xff] %vm4983_vm5, %v1303_v4  ;;  %v1430_v24 = vadd.f32 %v1408_v3, %v1333_v46  ;;  %v1825_v1 = vadd.f32 %v1789_v61, %v1728_v55  ;;  %vm4998_vm5 = vmmov %vm4986_vm2  ;;  %v1655_v4 = vld [vmem:[#allocation3 + $0x158] sm:$0xff] }
 0x2b7   : > { %1711 = vst.msk [vmem:[#allocation3 + $0x118] sm:$0xff] %vm4984_vm11, %v1695_v62  ;;  %v1385_v19 = vpop.f32.mrf.mxu1  ;;  %vm4999_vm11 = vmmov %vm4986_vm2  ;;  %v1657_v62 = vld [vmem:[#allocation3 + $0x168] sm:$0xff]  ;;  %v1732_v61 = vld [vmem:[#allocation2 + $0x138] sm:$0xff] }
 0x2b8   : > { %1709 = vst.msk [vmem:[#allocation3 + $0x108] sm:$0xff] %vm4969_vm0, %v1693_v39  ;;  %v1421_v51 = vadd.f32 %v1385_v19, %v1324_v35  ;;  %v1659_v39 = vld [vmem:[#allocation3 + $0x178] sm:$0xff]  ;;  %v1737_v35 = vld [vmem:[#allocation2 + $0x160] sm:$0xff] }
 0x2b9   : > { %1446 = vst.msk [vmem:[#allocation2 + $0xe0] sm:$0xff] %vm4985_vm13, %v1430_v24  ;;  %vm5000_vm13 = vmmov %vm4969_vm0 }
 0x2ba   : > { %1841 = vst.msk [vmem:[#allocation2 + $0x118] sm:$0xff] %vm4986_vm2, %v1825_v1  ;;  %vm5001_vm2 = vmmov %vm4969_vm0 }
 0x2bb   : > { %1437 = vst.msk [vmem:[#allocation2 + $0x98] sm:$0xff] %vm4987_vm6, %v1421_v51  ;;  %v1665_v47 = vpop.xlane.xlu1 %1664  ;;  %vm5002_vm6 = vmmov %vm4992_vm4 }
 0x2bc   : > { %v1673_v9 = vpop.xlane.xlu2 %1672  ;;  %v1669_v32 = vpop.xlane.xlu0 %1668  ;;  %v1694_v63 = vadd.f32 %v1665_v47, %v1646_v18  ;;  %v1328_v47 = vld [vmem:[#allocation2 + $0xb8] sm:$0xff] }
 0x2bd   : > { %v1698_v41 = vadd.f32 %v1673_v9, %v1650_v48  ;;  %v1696_v53 = vadd.f32 %v1669_v32, %v1648_v0  ;;  %v1410_v12 = vpop.f32.mrf.mxu3  ;;  %v1792_v38 = vpop.f32.mrf.mxu2 }
 0x2be   : > { %1710 = vst.msk [vmem:[#allocation3 + $0x110] sm:$0xff] %vm4988_vm7, %v1694_v63  ;;  %v1431_v57 = vadd.f32 %v1410_v12, %v1334_v44  ;;  %v1826_v31 = vadd.f32 %v1792_v38, %v1729_v16  ;;  %vm5003_vm7 = vmmov %vm4992_vm4  ;;  %v1658_v63 = vld [vmem:[#allocation3 + $0x170] sm:$0xff]  ;;  %v1738_v12 = vld [vmem:[#allocation2 + $0x168] sm:$0xff] }
 0x2bf   : > { %1714 = vst.msk [vmem:[#allocation3 + $0x130] sm:$0xff] %vm4989_vm8, %v1698_v41  ;;  %v1388_v10 = vpop.f32.mrf.mxu1  ;;  %vm5004_vm8 = vmmov %vm4992_vm4 }
 0x2c0   : > { %1712 = vst.msk [vmem:[#allocation3 + $0x120] sm:$0xff] %vm4990_vm3, %v1696_v53  ;;  %v1422_v28 = vadd.f32 %v1388_v10, %v1325_v37  ;;  %vm5005_vm3 = vmmov %vm4969_vm0  ;;  %v1733_v53 = vld [vmem:[#allocation2 + $0x140] sm:$0xff] }
 0x2c1   : > { %1447 = vst.msk [vmem:[#allocation2 + $0xe8] sm:$0xff] %vm4991_vm9, %v1431_v57  ;;  %vm5006_vm9 = vmmov %vm4969_vm0 }
 0x2c2   : > { %1842 = vst.msk [vmem:[#allocation2 + $0x120] sm:$0xff] %vm4992_vm4, %v1826_v31  ;;  %vm5007_vm4 = vmmov %vm4969_vm0  ;;  %v1329_v31 = vld [vmem:[#allocation2 + $0xc0] sm:$0xff] }
 0x2c3   : > { %1438 = vst.msk [vmem:[#allocation2 + $0xa0] sm:$0xff] %vm4993_vm12, %v1422_v28  ;;  %v1671_v54 = vpop.xlane.xlu1 %1670  ;;  %vm5008_vm12 = vmmov %vm4998_vm5 }
 0x2c4   : > { %v1679_v6 = vpop.xlane.xlu2 %1678  ;;  %v1675_v33 = vpop.xlane.xlu0 %1674  ;;  %v1697_v56 = vadd.f32 %v1671_v54, %v1649_v14  ;;  %v1739_v54 = vld [vmem:[#allocation2 + $0x170] sm:$0xff] }
 0x2c5   : > { %v1701_v7 = vadd.f32 %v1679_v6, %v1653_v29  ;;  %v1699_v42 = vadd.f32 %v1675_v33, %v1651_v5  ;;  %v1413_v27 = vpop.f32.mrf.mxu3  ;;  %v1794_v45 = vpop.f32.mrf.mxu2  ;;  %v1734_v5 = vld [vmem:[#allocation2 + $0x148] sm:$0xff] }
 0x2c6   : > { %1713 = vst.msk [vmem:[#allocation3 + $0x128] sm:$0xff] %vm4994_vm15, %v1697_v56  ;;  %v1432_v34 = vadd.f32 %v1413_v27, %v1335_v36  ;;  %v1827_v50 = vadd.f32 %v1794_v45, %v1730_v52  ;;  %vm5009_vm15 = vmmov %vm4998_vm5  ;;  %v1330_v6 = vld [vmem:[#allocation2 + $0xc8] sm:$0xff]  ;;  %v1735_v27 = vld [vmem:[#allocation2 + $0x150] sm:$0xff] }
 0x2c7   : > { %1717 = vst.msk [vmem:[#allocation3 + $0x148] sm:$0xff] %vm4995_vm1, %v1701_v7  ;;  %v1390_v25 = vpop.f32.mrf.mxu1  ;;  %vm5010_vm1 = vmmov %vm4998_vm5  ;;  %v1740_v45 = vld [vmem:[#allocation2 + $0x178] sm:$0xff] }
 0x2c8   : > { %1715 = vst.msk [vmem:[#allocation3 + $0x138] sm:$0xff] %vm4996_vm10, %v1699_v42  ;;  %v1423_v40 = vadd.f32 %v1390_v25, %v1326_v60  ;;  %vm5011_vm10 = vmmov %vm4969_vm0 }
 0x2c9   : > { %1448 = vst.msk [vmem:[#allocation2 + $0xf0] sm:$0xff] %vm4997_vm14, %v1432_v34  ;;  %vm5012_vm14 = vmmov %vm5010_vm1 }
 0x2ca   : > { %1843 = vst.msk [vmem:[#allocation2 + $0x128] sm:$0xff] %vm4998_vm5, %v1827_v50  ;;  %vm5013_vm5 = vmmov %vm5010_vm1  ;;  %v1331_v50 = vld [vmem:[#allocation2 + $0xd0] sm:$0xff] }
 0x2cb   : > { %1439 = vst.msk [vmem:[#allocation2 + $0xa8] sm:$0xff] %vm4999_vm11, %v1423_v40  ;;  %v1677_v49 = vpop.xlane.xlu1 %1676  ;;  %vm5014_vm11 = vmmov %vm5010_vm1 }
 0x2cc   : > { %v1681_v20 = vpop.xlane.xlu0 %1680  ;;  %v1685_v17 = vpop.xlane.xlu2 %1684  ;;  %v1700_v22 = vadd.f32 %v1677_v49, %v1652_v2 }
 0x2cd   : > { %v1702_v13 = vadd.f32 %v1681_v20, %v1654_v15  ;;  %v1704_v58 = vadd.f32 %v1685_v17, %v1656_v59  ;;  %v1415_v21 = vpop.f32.mrf.mxu3  ;;  %v1797_v8 = vpop.f32.mrf.mxu2  ;;  %v1736_v59 = vld [vmem:[#allocation2 + $0x158] sm:$0xff] }
 0x2ce   : > { %1716 = vst.msk [vmem:[#allocation3 + $0x140] sm:$0xff] %vm4969_vm0, %v1700_v22  ;;  %v1433_v46 = vadd.f32 %v1415_v21, %v1336_v23  ;;  %v1828_v55 = vadd.f32 %v1797_v8, %v1731_v11  ;;  %vm5015_vm0 = vmmov %vm5010_vm1  ;;  %v1332_v23 = vld [vmem:[#allocation2 + $0xd8] sm:$0xff] }
 0x2cf   : > { %1718 = vst.msk [vmem:[#allocation3 + $0x150] sm:$0xff] %vm5000_vm13, %v1702_v13  ;;  %v1393_v43 = vpop.f32.mrf.mxu1  ;;  %vm5016_vm13 = vmmov %vm5015_vm0 }
 0x2d0   : > { %1720 = vst.msk [vmem:[#allocation3 + $0x160] sm:$0xff] %vm5001_vm2, %v1704_v58  ;;  %v1424_v26 = vadd.f32 %v1393_v43, %v1327_v30  ;;  %vm5017_vm2 = vmmov %vm5015_vm0 }
 0x2d1   : > { %1449 = vst.msk [vmem:[#allocation2 + $0xf8] sm:$0xff] %vm5002_vm6, %v1433_v46  ;;  %vm5018_vm6 = vmmov %vm5015_vm0 }
 0x2d2   : > { %1844 = vst.msk [vmem:[#allocation2 + $0x130] sm:$0xff] %vm5003_vm7, %v1828_v55  ;;  %vm5019_vm7 = vmmov %vm5015_vm0 }
 0x2d3   : > { %1440 = vst.msk [vmem:[#allocation2 + $0xb0] sm:$0xff] %vm5004_vm8, %v1424_v26  ;;  %v1683_v3 = vpop.xlane.xlu1 %1682  ;;  %vm5020_vm8 = vmmov %vm5015_vm0 }
 0x2d4   : > { %v1687_v24 = vpop.xlane.xlu0 %1686  ;;  %v1691_v1 = vpop.xlane.xlu2 %1690  ;;  %v1703_v19 = vadd.f32 %v1683_v3, %v1655_v4 }
 0x2d5   : > { %v1705_v51 = vadd.f32 %v1687_v24, %v1657_v62  ;;  %v1707_v18 = vadd.f32 %v1691_v1, %v1659_v39  ;;  %v1799_v48 = vpop.f32.mrf.mxu2  ;;  %v1812_v0 = vpop.f32.mrf.mxu3 }
 0x2d6   : > { %1719 = vst.msk [vmem:[#allocation3 + $0x158] sm:$0xff] %vm5005_vm3, %v1703_v19  ;;  %v1829_v44 = vadd.f32 %v1799_v48, %v1732_v61  ;;  %v1834_v16 = vadd.f32 %v1812_v0, %v1737_v35  ;;  %vm5021_vm3 = vmmov %vm5015_vm0 }
 0x2d7   : > { %1721 = vst.msk [vmem:[#allocation3 + $0x168] sm:$0xff] %vm5006_vm9, %v1705_v51  ;;  %v1395_v9 = vpop.f32.mrf.mxu1  ;;  %vm5022_vm9 = vmmov %vm5015_vm0 }
 0x2d8   : > { %1723 = vst.msk [vmem:[#allocation3 + $0x178] sm:$0xff] %vm5007_vm4, %v1707_v18  ;;  %v1425_v32 = vadd.f32 %v1395_v9, %v1328_v47 }
 0x2d9   : > { %1845 = vst.msk [vmem:[#allocation2 + $0x138] sm:$0xff] %vm5008_vm12, %v1829_v44 }
 0x2da   : > { %1850 = vst.msk [vmem:[#allocation2 + $0x160] sm:$0xff] %vm5009_vm15, %v1834_v16 }
 0x2db   : > { %1441 = vst.msk [vmem:[#allocation2 + $0xb8] sm:$0xff] %vm5010_vm1, %v1425_v32  ;;  %v1689_v41 = vpop.xlane.xlu1 %1688 }
 0x2dc   : > { %v1706_v38 = vadd.f32 %v1689_v41, %v1658_v63 }
 0x2dd   : > { %v1802_v37 = vpop.f32.mrf.mxu2  ;;  %v1814_v57 = vpop.f32.mrf.mxu3 }
 0x2de   : > { %1722 = vst.msk [vmem:[#allocation3 + $0x170] sm:$0xff] %vm5011_vm10, %v1706_v38  ;;  %v1830_v10 = vadd.f32 %v1802_v37, %v1733_v53  ;;  %v1835_v28 = vadd.f32 %v1814_v57, %v1738_v12 }
 0x2df   : > { %v1398_v14 = vpop.f32.mrf.mxu1 }
 0x2e0   : > { %1846 = vst.msk [vmem:[#allocation2 + $0x140] sm:$0xff] %vm5012_vm14, %v1830_v10  ;;  %v1426_v29 = vadd.f32 %v1398_v14, %v1329_v31 }
 0x2e1   : > { %1851 = vst.msk [vmem:[#allocation2 + $0x168] sm:$0xff] %vm5013_vm5, %v1835_v28 }
 0x2e2   : > { %1442 = vst.msk [vmem:[#allocation2 + $0xc0] sm:$0xff] %vm5014_vm11, %v1426_v29 }
 0x2e5   : > { %v1804_v36 = vpop.f32.mrf.mxu2  ;;  %v1817_v52 = vpop.f32.mrf.mxu3 }
 0x2e6   : > { %v1831_v33 = vadd.f32 %v1804_v36, %v1734_v5  ;;  %v1836_v56 = vadd.f32 %v1817_v52, %v1739_v54 }
 0x2e7   : > { %v1400_v7 = vpop.f32.mrf.mxu1 }
 0x2e8   : > { %1847 = vst.msk [vmem:[#allocation2 + $0x148] sm:$0xff] %vm5015_vm0, %v1831_v33  ;;  %v1427_v42 = vadd.f32 %v1400_v7, %v1330_v6 }
 0x2e9   : > { %1852 = vst.msk [vmem:[#allocation2 + $0x170] sm:$0xff] %vm5016_vm13, %v1836_v56 }
 0x2ea   : > { %1443 = vst.msk [vmem:[#allocation2 + $0xc8] sm:$0xff] %vm5017_vm2, %v1427_v42 }
 0x2ed   : > { %v1807_v60 = vpop.f32.mrf.mxu2  ;;  %v1819_v34 = vpop.f32.mrf.mxu3 }
 0x2ee   : > { %v1832_v25 = vadd.f32 %v1807_v60, %v1735_v27  ;;  %v1837_v40 = vadd.f32 %v1819_v34, %v1740_v45 }
 0x2ef   : > { %v1403_v2 = vpop.f32.mrf.mxu1 }
 0x2f0   : > { %1848 = vst.msk [vmem:[#allocation2 + $0x150] sm:$0xff] %vm5018_vm6, %v1832_v25  ;;  %v1428_v15 = vadd.f32 %v1403_v2, %v1331_v50 }
 0x2f1   : > { %1853 = vst.msk [vmem:[#allocation2 + $0x178] sm:$0xff] %vm5019_vm7, %v1837_v40 }
 0x2f2   : > { %1444 = vst.msk [vmem:[#allocation2 + $0xd0] sm:$0xff] %vm5020_vm8, %v1428_v15 }
 0x2f5   : > { %v1809_v49 = vpop.f32.mrf.mxu2 }
 0x2f6   : > { %v1833_v11 = vadd.f32 %v1809_v49, %v1736_v59  ;;  %1857 = sbr.rel (%p2958_p0) target bundleno = 1229 (0x4cd), region = 82 }
 0x2f7   : > { %v1405_v20 = vpop.f32.mrf.mxu1 }
 0x2f8   : > { %1849 = vst.msk [vmem:[#allocation2 + $0x158] sm:$0xff] %vm5021_vm3, %v1833_v11  ;;  %v1429_v17 = vadd.f32 %v1405_v20, %v1332_v23 }
 0x2fa   : > { %1445 = vst.msk [vmem:[#allocation2 + $0xd8] sm:$0xff] %vm5022_vm9, %v1429_v17 }
 0x2fb   : > { %v1862_v22 = vld [vmem:[#allocation3 + $0x20] sm:$0xff]  ;;  %v1860_v13 = vld [vmem:[#allocation3 + $0x10] sm:$0xff]  ;;  %v3477_v21 = vmov 0   ;;  %v1863_v55 = vld [vmem:[#allocation3 + $0x28] sm:$0xff]  ;;  %vm5023_vm12 = vcmask 130048  }
 0x2fc   : > { %v1858_v58 = vld [vmem:[#allocation3] sm:$0xff]  ;;  %3222 = vset.pattern.permute.xlu2 %v3477_v21  ;;  %3221 = vset.pattern.permute.xlu1 %v3477_v21  ;;  %v1878_v8 = vmax.f32 %v1862_v22, 1e-12  ;;  %v1876_v30 = vmax.f32 %v1860_v13, 1e-12  ;;  %v1861_v43 = vld [vmem:[#allocation3 + $0x18] sm:$0xff]  ;;  %vm5024_vm1 = vmmov %vm5023_vm12 }
 0x2fd   : > { %v1874_v46 = vmax.f32 %v1858_v58, 1e-12  ;;  %3220 = vset.pattern.permute.xlu0 %v3477_v21  ;;  %v1859_v26 = vld [vmem:[#allocation3 + $0x8] sm:$0xff]  ;;  %v1879_v4 = vmax.f32 %v1863_v55, 1e-12  ;;  %v1866_v35 = vld [vmem:[#allocation3 + $0x40] sm:$0xff]  ;;  %vm5025_vm14 = vmmov %vm5024_vm1 }
 0x2fe   : > { %3223 = vrcp.f32 %v1878_v8  ;;  %v1877_v62 = vmax.f32 %v1861_v43, 1e-12  ;;  %v1875_v39 = vmax.f32 %v1859_v26, 1e-12  ;;  %v1865_v1 = vld [vmem:[#allocation3 + $0x38] sm:$0xff]  ;;  %v1864_v19 = vld [vmem:[#allocation3 + $0x30] sm:$0xff]  ;;  %vm5026_vm13 = vmmov %vm5024_vm1 }
 0x2ff   : > { %3225 = vrcp.f32 %v1876_v30  ;;  %v1882_v51 = vmax.f32 %v1866_v35, 1e-12  ;;  %v1881_v18 = vmax.f32 %v1865_v1, 1e-12  ;;  %v1880_v0 = vmax.f32 %v1864_v19, 1e-12  ;;  %vm5027_vm2 = vmmov %vm5024_vm1 }
 0x300   : > { %3227 = vrcp.f32 %v1874_v46  ;;  %v1869_v16 = vld [vmem:[#allocation3 + $0x58] sm:$0xff]  ;;  %v1868_v9 = vld [vmem:[#allocation3 + $0x50] sm:$0xff]  ;;  %v1867_v32 = vld [vmem:[#allocation3 + $0x48] sm:$0xff] }
 0x301   : > { %3229 = vrcp.f32 %v1879_v4  ;;  %v1885_v63 = vmax.f32 %v1869_v16, 1e-12  ;;  %v1884_v41 = vmax.f32 %v1868_v9, 1e-12  ;;  %v1883_v12 = vmax.f32 %v1867_v32, 1e-12  ;;  %vm5028_vm6 = vmmov %vm5024_vm1 }
 0x302   : > { %3231 = vrcp.f32 %v1877_v62  ;;  %v1872_v57 = vld [vmem:[#allocation3 + $0x70] sm:$0xff]  ;;  %v1871_v31 = vld [vmem:[#allocation3 + $0x68] sm:$0xff]  ;;  %v1870_v10 = vld [vmem:[#allocation3 + $0x60] sm:$0xff] }
 0x303   : > { %3233 = vrcp.f32 %v1875_v39  ;;  %v1888_v28 = vmax.f32 %v1872_v57, 1e-12  ;;  %v1887_v14 = vmax.f32 %v1871_v31, 1e-12  ;;  %v1886_v5 = vmax.f32 %v1870_v10, 1e-12  ;;  %vm5029_vm9 = vmmov %vm5024_vm1 }
 0x304   : > { %v3224_v3 = vpop.eup %3223  ;;  %3235 = vrcp.f32 %v1882_v51  ;;  %v2115_v52 = vld [vmem:[#allocation3 + $0x88] sm:$0xff]  ;;  %v2114_v6 = vld [vmem:[#allocation3 + $0x80] sm:$0xff]  ;;  %v1873_v33 = vld [vmem:[#allocation3 + $0x78] sm:$0xff] }
 0x305   : > { %v3226_v61 = vpop.eup %3225  ;;  %1944 = vperm.xlu2 %3222, %v3224_v3   ;;  %3237 = vrcp.f32 %v1881_v18  ;;  %v2131_v56 = vmax.f32 %v2115_v52, 1e-12  ;;  %v2130_v7 = vmax.f32 %v2114_v6, 1e-12  ;;  %v1889_v27 = vmax.f32 %v1873_v33, 1e-12 }
 0x306   : > { %v3228_v24 = vpop.eup %3227  ;;  %1934 = vperm.xlu1 %3221, %v3226_v61   ;;  %3239 = vrcp.f32 %v1880_v0  ;;  %v2118_v34 = vld [vmem:[#allocation3 + $0xa0] sm:$0xff]  ;;  %v2117_v50 = vld [vmem:[#allocation3 + $0x98] sm:$0xff]  ;;  %v2116_v25 = vld [vmem:[#allocation3 + $0x90] sm:$0xff] }
 0x307   : > { %1924 = vperm.xlu0 %3220, %v3228_v24   ;;  %v3230_v48 = vpop.eup %3229  ;;  %3241 = vrcp.f32 %v1885_v63  ;;  %v2134_v40 = vmax.f32 %v2118_v34, 1e-12  ;;  %v2133_v2 = vmax.f32 %v2117_v50, 1e-12  ;;  %v2132_v59 = vmax.f32 %v2116_v25, 1e-12 }
 0x308   : > { %v3232_v47 = vpop.eup %3231  ;;  %3243 = vrcp.f32 %v1884_v41  ;;  %v2121_v11 = vld [vmem:[#allocation3 + $0xb8] sm:$0xff]  ;;  %v2120_v20 = vld [vmem:[#allocation3 + $0xb0] sm:$0xff]  ;;  %v2119_v17 = vld [vmem:[#allocation3 + $0xa8] sm:$0xff] }
 0x309   : > { %v3234_v44 = vpop.eup %3233  ;;  %3245 = vrcp.f32 %v1883_v12  ;;  %v2137_v22 = vmax.f32 %v2121_v11, 1e-12  ;;  %v2136_v13 = vmax.f32 %v2120_v20, 1e-12  ;;  %v2135_v21 = vmax.f32 %v2119_v17, 1e-12 }
 0x30a   : > { %v3236_v53 = vpop.eup %3235  ;;  %3247 = vrcp.f32 %v1888_v28  ;;  %v2124_v46 = vld [vmem:[#allocation3 + $0xd0] sm:$0xff]  ;;  %v2123_v55 = vld [vmem:[#allocation3 + $0xc8] sm:$0xff]  ;;  %v2122_v43 = vld [vmem:[#allocation3 + $0xc0] sm:$0xff] }
 0x30b   : > { %v3238_v38 = vpop.eup %3237  ;;  %3249 = vrcp.f32 %v1887_v14  ;;  %v2140_v26 = vmax.f32 %v2124_v46, 1e-12  ;;  %v2139_v4 = vmax.f32 %v2123_v55, 1e-12  ;;  %v2138_v39 = vmax.f32 %v2122_v43, 1e-12 }
 0x30c   : > { %v3240_v37 = vpop.eup %3239  ;;  %3251 = vrcp.f32 %v1886_v5  ;;  %v2127_v35 = vld [vmem:[#allocation3 + $0xe8] sm:$0xff]  ;;  %v2126_v24 = vld [vmem:[#allocation3 + $0xe0] sm:$0xff]  ;;  %v2125_v1 = vld [vmem:[#allocation3 + $0xd8] sm:$0xff] }
 0x30d   : > { %1949 = vperm.xlu2 %3222, %v3230_v48   ;;  %v3242_v29 = vpop.eup %3241  ;;  %3253 = vrcp.f32 %v2131_v56  ;;  %v2143_v19 = vmax.f32 %v2127_v35, 1e-12  ;;  %v2142_v51 = vmax.f32 %v2126_v24, 1e-12  ;;  %v2141_v48 = vmax.f32 %v2125_v1, 1e-12 }
 0x30e   : > { %1939 = vperm.xlu1 %3221, %v3232_v47   ;;  %v3244_v54 = vpop.eup %3243  ;;  %3255 = vrcp.f32 %v2130_v7  ;;  %v2129_v16 = vld [vmem:[#allocation3 + $0xf8] sm:$0xff]  ;;  %v2128_v9 = vld [vmem:[#allocation3 + $0xf0] sm:$0xff]  ;;  %v2436_v57 = vld [vmem:[#allocation3 + $0x108] sm:$0xff] }
 0x30f   : > { %1929 = vperm.xlu0 %3220, %v3234_v44   ;;  %v3246_v36 = vpop.eup %3245  ;;  %3257 = vrcp.f32 %v1889_v27  ;;  %v2437_v44 = vld [vmem:[#allocation3 + $0x110] sm:$0xff]  ;;  %v2145_v63 = vmax.f32 %v2129_v16, 1e-12  ;;  %v2435_v31 = vld [vmem:[#allocation3 + $0x100] sm:$0xff]  ;;  %v2452_v28 = vmax.f32 %v2436_v57, 1e-12 }
 0x310   : > { %v3248_v42 = vpop.eup %3247  ;;  %3259 = vrcp.f32 %v2134_v40  ;;  %v2453_v32 = vmax.f32 %v2437_v44, 1e-12  ;;  %v2438_v52 = vld [vmem:[#allocation3 + $0x118] sm:$0xff]  ;;  %v1910_v27 = vld [vmem:[#allocation2 + $0x20] sm:$0xff]  ;;  %v1911_v40 = vld [vmem:[#allocation2 + $0x28] sm:$0xff] }
 0x311   : > { %v3250_v45 = vpop.eup %3249  ;;  %3261 = vrcp.f32 %v2133_v2  ;;  %v2454_v56 = vmax.f32 %v2438_v52, 1e-12  ;;  %v1914_v11 = vld [vmem:[#allocation2 + $0x40] sm:$0xff]  ;;  %v1908_v46 = vld [vmem:[#allocation2 + $0x10] sm:$0xff] }
 0x312   : > { %v3252_v60 = vpop.eup %3251  ;;  %3263 = vrcp.f32 %v2132_v59  ;;  %v1906_v43 = vld [vmem:[#allocation2] sm:$0xff]  ;;  %v1912_v52 = vld [vmem:[#allocation2 + $0x30] sm:$0xff] }
 0x313   : > { %v3254_v15 = vpop.eup %3253  ;;  %3265 = vrcp.f32 %v2137_v22 }
 0x314   : > { %v3256_v49 = vpop.eup %3255  ;;  %3267 = vrcp.f32 %v2136_v13 }
 0x315   : > { %1964 = vperm.xlu2 %3222, %v3236_v53   ;;  %v3258_v23 = vpop.eup %3257  ;;  %3269 = vrcp.f32 %v2135_v21  ;;  %v2144_v53 = vmax.f32 %v2128_v9, 1e-12 }
 0x316   : > { %1959 = vperm.xlu1 %3221, %v3238_v38   ;;  %v3260_v58 = vpop.eup %3259  ;;  %3271 = vrcp.f32 %v2140_v26 }
 0x317   : > { %1954 = vperm.xlu0 %3220, %v3240_v37   ;;  %v3262_v8 = vpop.eup %3261  ;;  %3273 = vrcp.f32 %v2139_v4  ;;  %v2440_v37 = vld [vmem:[#allocation3 + $0x128] sm:$0xff] }
 0x318   : > { %v3264_v30 = vpop.eup %3263  ;;  %3275 = vrcp.f32 %v2138_v39  ;;  %v2456_v10 = vmax.f32 %v2440_v37, 1e-12 }
 0x319   : > { %v3266_v62 = vpop.eup %3265  ;;  %3277 = vrcp.f32 %v2143_v19 }
 0x31a   : > { %v3268_v3 = vpop.eup %3267  ;;  %3279 = vrcp.f32 %v2142_v51  ;;  %v1920_v51 = vld [vmem:[#allocation2 + $0x70] sm:$0xff] }
 0x31b   : > { %v3270_v61 = vpop.eup %3269  ;;  %3281 = vrcp.f32 %v2141_v48  ;;  %v1909_v48 = vld [vmem:[#allocation2 + $0x18] sm:$0xff] }
 0x31c   : > { %v3272_v18 = vpop.eup %3271  ;;  %3283 = vrcp.f32 %v2453_v32 }
 0x31d   : > { %1979 = vperm.xlu2 %3222, %v3242_v29   ;;  %v3274_v0 = vpop.eup %3273  ;;  %3285 = vrcp.f32 %v2145_v63  ;;  %v2451_v29 = vmax.f32 %v2435_v31, 1e-12 }
 0x31e   : > { %1974 = vperm.xlu1 %3221, %v3244_v54   ;;  %v3276_v47 = vpop.eup %3275  ;;  %3287 = vrcp.f32 %v2144_v53 }
 0x31f   : > { %1969 = vperm.xlu0 %3220, %v3246_v36   ;;  %v3278_v41 = vpop.eup %3277  ;;  %3289 = vrcp.f32 %v2456_v10  ;;  %v2439_v36 = vld [vmem:[#allocation3 + $0x120] sm:$0xff] }
 0x320   : > { %v3280_v12 = vpop.eup %3279  ;;  %3291 = vrcp.f32 %v2452_v28  ;;  %v2455_v6 = vmax.f32 %v2439_v36, 1e-12 }
 0x321   : > { %v3282_v38 = vpop.eup %3281  ;;  %3293 = vrcp.f32 %v2451_v29 }
 0x322   : > { %v3284_v14 = vpop.eup %3283  ;;  %3295 = vrcp.f32 %v2455_v6 }
 0x323   : > { %v3286_v5 = vpop.eup %3285  ;;  %3297 = vrcp.f32 %v2454_v56 }
 0x324   : > { %v3288_v54 = vpop.eup %3287 }
 0x325   : > { %1994 = vperm.xlu2 %3222, %v3248_v42   ;;  %v3290_v33 = vpop.eup %3289 }
 0x326   : > { %1989 = vperm.xlu1 %3221, %v3250_v45   ;;  %v3292_v7 = vpop.eup %3291 }
 0x327   : > { %1984 = vperm.xlu0 %3220, %v3252_v60   ;;  %v3294_v42 = vpop.eup %3293 }
 0x328   : > { %v3296_v50 = vpop.eup %3295 }
 0x329   : > { %v3298_v25 = vpop.eup %3297 }
 0x32d   : > { %2185 = vperm.xlu2 %3222, %v3254_v15  }
 0x32e   : > { %2180 = vperm.xlu1 %3221, %v3256_v49  }
 0x32f   : > { %1999 = vperm.xlu0 %3220, %v3258_v23  }
 0x335   : > { %2200 = vperm.xlu2 %3222, %v3260_v58  }
 0x336   : > { %2195 = vperm.xlu1 %3221, %v3262_v8   ;;  %v1917_v8 = vld [vmem:[#allocation2 + $0x58] sm:$0xff] }
 0x337   : > { %2190 = vperm.xlu0 %3220, %v3264_v30  }
 0x33d   : > { %2215 = vperm.xlu2 %3222, %v3266_v62  }
 0x33e   : > { %2210 = vperm.xlu1 %3221, %v3268_v3  }
 0x33f   : > { %2205 = vperm.xlu0 %3220, %v3270_v61  }
 0x345   : > { %2230 = vperm.xlu2 %3222, %v3272_v18  }
 0x346   : > { %2225 = vperm.xlu1 %3221, %v3274_v0  }
 0x347   : > { %2220 = vperm.xlu0 %3220, %v3276_v47   ;;  %v1907_v47 = vld [vmem:[#allocation2 + $0x8] sm:$0xff] }
 0x34d   : > { %2245 = vperm.xlu2 %3222, %v3278_v41  }
 0x34e   : > { %2240 = vperm.xlu1 %3221, %v3280_v12  }
 0x34f   : > { %2235 = vperm.xlu0 %3220, %v3282_v38  }
 0x355   : > { %2511 = vperm.xlu2 %3222, %v3284_v14   ;;  %v2163_v14 = vld [vmem:[#allocation2 + $0x88] sm:$0xff] }
 0x356   : > { %2255 = vperm.xlu1 %3221, %v3286_v5   ;;  %v1913_v5 = vld [vmem:[#allocation2 + $0x38] sm:$0xff] }
 0x357   : > { %2250 = vperm.xlu0 %3220, %v3288_v54  }
 0x35d   : > { %2526 = vperm.xlu2 %3222, %v3290_v33  }
 0x35e   : > { %2506 = vperm.xlu1 %3221, %v3292_v7  }
 0x35f   : > { %2501 = vperm.xlu0 %3220, %v3294_v42   ;;  %v1945_v45 = vpop.permute.xlu2 %1944 }
 0x360   : > { %v2006_v60 = vmul.f32 %v1945_v45, %v1910_v27 }
 0x362   : > { %v2042_v34 = vmul.f32 1.442695, %v2006_v60  ;;  %vm2022_vm4 = vcmp.gt.f32.partialorder %v2006_v60, 0.0 }
 0x364   : > { %3299 = vpow2.f32 %v2042_v34 }
 0x366   : > { %2521 = vperm.xlu1 %3221, %v3296_v50  }
 0x367   : > { %2516 = vperm.xlu0 %3220, %v3298_v25   ;;  %v1950_v2 = vpop.permute.xlu2 %1949 }
 0x368   : > { %v2007_v15 = vmul.f32 %v1950_v2, %v1911_v40 }
 0x36a   : > { %v3300_v59 = vpop.eup %3299  ;;  %v2044_v49 = vmul.f32 1.442695, %v2007_v15  ;;  %vm2023_vm15 = vcmp.gt.f32.partialorder %v2007_v15, 0.0 }
 0x36b   : > { %v2963_v23 = vadd.f32 -1.0, %v3300_v59 }
 0x36c   : > { %3301 = vpow2.f32 %v2044_v49  ;;  %v2166_v49 = vld [vmem:[#allocation2 + $0xa0] sm:$0xff] }
 0x36d   : > { %v2086_v20 = vsel %vm2022_vm4, %v2006_v60, %v2963_v23  ;;  %vm5030_vm4 = vmmov %vm5024_vm1 }
 0x36e   : > { %2102 = vst.msk [vmem:[%s3585_s9 + $0x20] sm:$0xff] %vm5023_vm12, %v2086_v20  ;;  %vm5031_vm12 = vmmov %vm5024_vm1 }
 0x36f   : > { %v1965_v17 = vpop.permute.xlu2 %1964 }
 0x370   : > { %v2010_v22 = vmul.f32 %v1965_v17, %v1914_v11  ;;  %v1916_v11 = vld [vmem:[#allocation2 + $0x50] sm:$0xff] }
 0x372   : > { %v3302_v13 = vpop.eup %3301  ;;  %v2050_v58 = vmul.f32 1.442695, %v2010_v22  ;;  %vm2026_vm10 = vcmp.gt.f32.partialorder %v2010_v22, 0.0 }
 0x373   : > { %v2964_v21 = vadd.f32 -1.0, %v3302_v13 }
 0x374   : > { %3303 = vpow2.f32 %v2050_v58 }
 0x375   : > { %v2087_v30 = vsel %vm2023_vm15, %v2007_v15, %v2964_v21 }
 0x376   : > { %2103 = vst.msk [vmem:[%s3585_s9 + $0x28] sm:$0xff] %vm5024_vm1, %v2087_v30 }
 0x377   : > { %v1980_v55 = vpop.permute.xlu2 %1979 }
 0x378   : > { %v2013_v26 = vmul.f32 %v1980_v55, %v1917_v8  ;;  %v1935_v4 = vpop.permute.xlu1 %1934 }
 0x379   : > { %v2004_v62 = vmul.f32 %v1935_v4, %v1908_v46  ;;  %v1925_v39 = vpop.permute.xlu0 %1924 }
 0x37a   : > { %v3304_v3 = vpop.eup %3303  ;;  %v2056_v61 = vmul.f32 1.442695, %v2013_v26  ;;  %v2002_v35 = vmul.f32 %v1925_v39, %v1906_v43  ;;  %vm2029_vm5 = vcmp.gt.f32.partialorder %v2013_v26, 0.0 }
 0x37b   : > { %v2967_v24 = vadd.f32 -1.0, %v3304_v3  ;;  %v2038_v1 = vmul.f32 1.442695, %v2004_v62  ;;  %vm2020_vm11 = vcmp.gt.f32.partialorder %v2004_v62, 0.0 }
 0x37c   : > { %3305 = vpow2.f32 %v2056_v61  ;;  %v2034_v19 = vmul.f32 1.442695, %v2002_v35  ;;  %vm2018_vm0 = vcmp.gt.f32.partialorder %v2002_v35, 0.0 }
 0x37d   : > { %3307 = vpow2.f32 %v2038_v1  ;;  %v2090_v18 = vsel %vm2026_vm10, %v2010_v22, %v2967_v24  ;;  %v1915_v22 = vld [vmem:[#allocation2 + $0x48] sm:$0xff]  ;;  %v2169_v1 = vld [vmem:[#allocation2 + $0xb8] sm:$0xff] }
 0x37e   : > { %3309 = vpow2.f32 %v2034_v19  ;;  %2106 = vst.msk [vmem:[%s3585_s9 + $0x40] sm:$0xff] %vm5025_vm14, %v2090_v18  ;;  %v1919_v19 = vld [vmem:[#allocation2 + $0x68] sm:$0xff]  ;;  %vm5032_vm14 = vmmov %vm5027_vm2 }
 0x37f   : > { %v1995_v0 = vpop.permute.xlu2 %1994 }
 0x380   : > { %v2016_v44 = vmul.f32 %v1995_v0, %v1920_v51  ;;  %v1940_v16 = vpop.permute.xlu1 %1939 }
 0x381   : > { %v2005_v9 = vmul.f32 %v1940_v16, %v1909_v48  ;;  %v1930_v32 = vpop.permute.xlu0 %1929  ;;  %v1918_v48 = vld [vmem:[#allocation2 + $0x60] sm:$0xff] }
 0x382   : > { %v3306_v63 = vpop.eup %3305  ;;  %v2062_v41 = vmul.f32 1.442695, %v2016_v44  ;;  %v2003_v53 = vmul.f32 %v1930_v32, %v1907_v47  ;;  %vm2032_vm7 = vcmp.gt.f32.partialorder %v2016_v44, 0.0 }
 0x383   : > { %v3308_v12 = vpop.eup %3307  ;;  %v2970_v38 = vadd.f32 -1.0, %v3306_v63  ;;  %v2040_v37 = vmul.f32 1.442695, %v2005_v9  ;;  %vm2021_vm8 = vcmp.gt.f32.partialorder %v2005_v9, 0.0 }
 0x384   : > { %v3310_v57 = vpop.eup %3309  ;;  %v2961_v31 = vadd.f32 -1.0, %v3308_v12  ;;  %3311 = vpow2.f32 %v2062_v41  ;;  %v2036_v10 = vmul.f32 1.442695, %v2003_v53  ;;  %vm2019_vm3 = vcmp.gt.f32.partialorder %v2003_v53, 0.0 }
 0x385   : > { %v2959_v28 = vadd.f32 -1.0, %v3310_v57  ;;  %3313 = vpow2.f32 %v2040_v37  ;;  %v2093_v29 = vsel %vm2029_vm5, %v2013_v26, %v2970_v38  ;;  %vm5033_vm5 = vmmov %vm5027_vm2 }
 0x386   : > { %3315 = vpow2.f32 %v2036_v10  ;;  %v2084_v54 = vsel %vm2020_vm11, %v2004_v62, %v2961_v31  ;;  %2109 = vst.msk [vmem:[%s3585_s9 + $0x58] sm:$0xff] %vm5026_vm13, %v2093_v29  ;;  %v2162_v29 = vld [vmem:[#allocation2 + $0x80] sm:$0xff] }
 0x387   : > { %v2186_v36 = vpop.permute.xlu2 %2185  ;;  %v2082_v6 = vsel %vm2018_vm0, %v2002_v35, %v2959_v28  ;;  %2100 = vst.msk [vmem:[%s3585_s9 + $0x10] sm:$0xff] %vm5027_vm2, %v2084_v54 }
 0x388   : > { %v2259_v33 = vmul.f32 %v2186_v36, %v2163_v14  ;;  %v1960_v56 = vpop.permute.xlu1 %1959  ;;  %2098 = vst.msk [vmem:[%s3585_s9] sm:$0xff] %vm5028_vm6, %v2082_v6  ;;  %v2172_v14 = vld [vmem:[#allocation2 + $0xd0] sm:$0xff]  ;;  %v1921_v36 = vld [vmem:[#allocation2 + $0x78] sm:$0xff]  ;;  %vm5034_vm6 = vmmov %vm5027_vm2 }
 0x389   : > { %v2009_v7 = vmul.f32 %v1960_v56, %v1913_v5  ;;  %v1955_v42 = vpop.permute.xlu0 %1954 }
 0x38a   : > { %v3312_v27 = vpop.eup %3311  ;;  %v2292_v45 = vmul.f32 1.442695, %v2259_v33  ;;  %v2008_v60 = vmul.f32 %v1955_v42, %v1912_v52  ;;  %vm2275_vm15 = vcmp.gt.f32.partialorder %v2259_v33, 0.0 }
 0x38b   : > { %v3314_v34 = vpop.eup %3313  ;;  %v2973_v50 = vadd.f32 -1.0, %v3312_v27  ;;  %v2048_v25 = vmul.f32 1.442695, %v2009_v7  ;;  %vm2025_vm1 = vcmp.gt.f32.partialorder %v2009_v7, 0.0 }
 0x38c   : > { %v3316_v40 = vpop.eup %3315  ;;  %v2962_v2 = vadd.f32 -1.0, %v3314_v34  ;;  %3317 = vpow2.f32 %v2292_v45  ;;  %v2046_v15 = vmul.f32 1.442695, %v2008_v60  ;;  %vm2024_vm10 = vcmp.gt.f32.partialorder %v2008_v60, 0.0 }
 0x38d   : > { %v2960_v59 = vadd.f32 -1.0, %v3316_v40  ;;  %3319 = vpow2.f32 %v2048_v25  ;;  %v2096_v23 = vsel %vm2032_vm7, %v2016_v44, %v2973_v50 }
 0x38e   : > { %3321 = vpow2.f32 %v2046_v15  ;;  %v2085_v20 = vsel %vm2021_vm8, %v2005_v9, %v2962_v2  ;;  %2112 = vst.msk [vmem:[%s3585_s9 + $0x70] sm:$0xff] %vm5029_vm9, %v2096_v23  ;;  %v2165_v23 = vld [vmem:[#allocation2 + $0x98] sm:$0xff]  ;;  %vm5035_vm9 = vmmov %vm5027_vm2 }
 0x38f   : > { %v2201_v17 = vpop.permute.xlu2 %2200  ;;  %v2083_v13 = vsel %vm2019_vm3, %v2003_v53, %v2960_v59  ;;  %2101 = vst.msk [vmem:[%s3585_s9 + $0x18] sm:$0xff] %vm5030_vm4, %v2085_v20  ;;  %vm5036_vm4 = vmmov %vm5027_vm2 }
 0x390   : > { %v2262_v58 = vmul.f32 %v2201_v17, %v2166_v49  ;;  %v1975_v21 = vpop.permute.xlu1 %1974  ;;  %2099 = vst.msk [vmem:[%s3585_s9 + $0x8] sm:$0xff] %vm5031_vm12, %v2083_v13  ;;  %v2175_v49 = vld [vmem:[#allocation2 + $0xe8] sm:$0xff]  ;;  %v2164_v17 = vld [vmem:[#allocation2 + $0x90] sm:$0xff] }
 0x391   : > { %v2012_v8 = vmul.f32 %v1975_v21, %v1916_v11  ;;  %v1970_v30 = vpop.permute.xlu0 %1969 }
 0x392   : > { %v3318_v46 = vpop.eup %3317  ;;  %v2298_v55 = vmul.f32 1.442695, %v2262_v58  ;;  %v2011_v43 = vmul.f32 %v1970_v30, %v1915_v22  ;;  %vm2278_vm11 = vcmp.gt.f32.partialorder %v2262_v58, 0.0 }
 0x393   : > { %v3320_v26 = vpop.eup %3319  ;;  %v2054_v4 = vmul.f32 1.442695, %v2012_v8  ;;  %v2976_v62 = vadd.f32 -1.0, %v3318_v46  ;;  %vm2028_vm0 = vcmp.gt.f32.partialorder %v2012_v8, 0.0 }
 0x394   : > { %v3322_v39 = vpop.eup %3321  ;;  %v2966_v3 = vadd.f32 -1.0, %v3320_v26  ;;  %3323 = vpow2.f32 %v2298_v55  ;;  %v2052_v61 = vmul.f32 1.442695, %v2011_v43  ;;  %vm2027_vm13 = vcmp.gt.f32.partialorder %v2011_v43, 0.0 }
 0x395   : > { %v2965_v35 = vadd.f32 -1.0, %v3322_v39  ;;  %3325 = vpow2.f32 %v2054_v4  ;;  %v2339_v24 = vsel %vm2275_vm15, %v2259_v33, %v2976_v62 }
 0x396   : > { %3327 = vpow2.f32 %v2052_v61  ;;  %2372 = vrot.lane.b32.xlu0 %v2339_v24, %s3478_s17  ;;  %v2089_v51 = vsel %vm2025_vm1, %v2009_v7, %v2966_v3  ;;  %v2441_v24 = vld [vmem:[#allocation3 + $0x130] sm:$0xff] }
 0x397   : > { %v2216_v18 = vpop.permute.xlu2 %2215  ;;  %v2088_v0 = vsel %vm2024_vm10, %v2008_v60, %v2965_v35  ;;  %2105 = vst.msk [vmem:[%s3585_s9 + $0x38] sm:$0xff] %vm5032_vm14, %v2089_v51  ;;  %v2167_v51 = vld [vmem:[#allocation2 + $0xa8] sm:$0xff]  ;;  %vm5037_vm10 = vmmov %vm5027_vm2 }
 0x398   : > { %v2265_v47 = vmul.f32 %v2216_v18, %v2169_v1  ;;  %v1990_v44 = vpop.permute.xlu1 %1989  ;;  %2104 = vst.msk [vmem:[%s3585_s9 + $0x30] sm:$0xff] %vm5033_vm5, %v2088_v0  ;;  %v2457_v0 = vmax.f32 %v2441_v24, 1e-12 }
 0x399   : > { %v2015_v16 = vmul.f32 %v1990_v44, %v1919_v19  ;;  %v1985_v9 = vpop.permute.xlu0 %1984  ;;  %v2168_v19 = vld [vmem:[#allocation2 + $0xb0] sm:$0xff] }
 0x39a   : > { %v3324_v32 = vpop.eup %3323  ;;  %v2304_v63 = vmul.f32 1.442695, %v2265_v47  ;;  %v2014_v41 = vmul.f32 %v1985_v9, %v1918_v48  ;;  %vm2281_vm7 = vcmp.gt.f32.partialorder %v2265_v47, 0.0 }
 0x39b   : > { %v3326_v53 = vpop.eup %3325  ;;  %v2060_v12 = vmul.f32 1.442695, %v2015_v16  ;;  %v2979_v38 = vadd.f32 -1.0, %v3324_v32  ;;  %vm2031_vm8 = vcmp.gt.f32.partialorder %v2015_v16, 0.0 }
 0x39c   : > { %v3328_v37 = vpop.eup %3327  ;;  %v2969_v57 = vadd.f32 -1.0, %v3326_v53  ;;  %3329 = vpow2.f32 %v2304_v63  ;;  %v2058_v31 = vmul.f32 1.442695, %v2014_v41  ;;  %vm2030_vm3 = vcmp.gt.f32.partialorder %v2014_v41, 0.0 }
 0x39d   : > { %v2968_v10 = vadd.f32 -1.0, %v3328_v37  ;;  %3331 = vpow2.f32 %v2060_v12  ;;  %v2342_v28 = vsel %vm2278_vm11, %v2262_v58, %v2979_v38 }
 0x39e   : > { %3333 = vpow2.f32 %v2058_v31  ;;  %2378 = vrot.lane.b32.xlu0 %v2342_v28, %s3478_s17  ;;  %v2092_v5 = vsel %vm2028_vm0, %v2012_v8, %v2969_v57  ;;  %v2444_v31 = vld [vmem:[#allocation3 + $0x148] sm:$0xff] }
 0x39f   : > { %v2231_v54 = vpop.permute.xlu2 %2230  ;;  %v2091_v52 = vsel %vm2027_vm13, %v2011_v43, %v2968_v10  ;;  %2108 = vst.msk [vmem:[%s3585_s9 + $0x50] sm:$0xff] %vm5027_vm2, %v2092_v5  ;;  %v2171_v28 = vld [vmem:[#allocation2 + $0xc8] sm:$0xff] }
 0x3a0   : > { %v2268_v6 = vmul.f32 %v2231_v54, %v2172_v14  ;;  %v2181_v33 = vpop.permute.xlu1 %2180  ;;  %2107 = vst.msk [vmem:[%s3585_s9 + $0x48] sm:$0xff] %vm5034_vm6, %v2091_v52  ;;  %v2460_v54 = vmax.f32 %v2444_v31, 1e-12 }
 0x3a1   : > { %v2258_v56 = vmul.f32 %v2181_v33, %v2162_v29  ;;  %v2000_v7 = vpop.permute.xlu0 %1999  ;;  %v2170_v29 = vld [vmem:[#allocation2 + $0xc0] sm:$0xff] }
 0x3a2   : > { %v3330_v42 = vpop.eup %3329  ;;  %v2310_v27 = vmul.f32 1.442695, %v2268_v6  ;;  %v2017_v45 = vmul.f32 %v2000_v7, %v1921_v36  ;;  %vm2284_vm12 = vcmp.gt.f32.partialorder %v2268_v6, 0.0 }
 0x3a3   : > { %v3332_v60 = vpop.eup %3331  ;;  %v2290_v34 = vmul.f32 1.442695, %v2258_v56  ;;  %v2982_v50 = vadd.f32 -1.0, %v3330_v42  ;;  %vm2274_vm15 = vcmp.gt.f32.partialorder %v2258_v56, 0.0 }
 0x3a4   : > { %v3334_v25 = vpop.eup %3333  ;;  %v2972_v40 = vadd.f32 -1.0, %v3332_v60  ;;  %3335 = vpow2.f32 %v2310_v27  ;;  %v2064_v2 = vmul.f32 1.442695, %v2017_v45  ;;  %vm2033_vm1 = vcmp.gt.f32.partialorder %v2017_v45, 0.0 }
 0x3a5   : > { %v2971_v15 = vadd.f32 -1.0, %v3334_v25  ;;  %3337 = vpow2.f32 %v2290_v34  ;;  %v2345_v59 = vsel %vm2281_vm7, %v2265_v47, %v2982_v50  ;;  %v2447_v34 = vld [vmem:[#allocation3 + $0x160] sm:$0xff] }
 0x3a6   : > { %3339 = vpow2.f32 %v2064_v2  ;;  %2384 = vrot.lane.b32.xlu0 %v2345_v59, %s3478_s17  ;;  %v2095_v11 = vsel %vm2031_vm8, %v2015_v16, %v2972_v40  ;;  %v2174_v25 = vld [vmem:[#allocation2 + $0xe0] sm:$0xff]  ;;  %v2173_v2 = vld [vmem:[#allocation2 + $0xd8] sm:$0xff]  ;;  %v2463_v59 = vmax.f32 %v2447_v34, 1e-12 }
 0x3a7   : > { %v2246_v20 = vpop.permute.xlu2 %2245  ;;  %v2094_v22 = vsel %vm2030_vm3, %v2014_v41, %v2971_v15  ;;  %2111 = vst.msk [vmem:[%s3585_s9 + $0x68] sm:$0xff] %vm5035_vm9, %v2095_v11 }
 0x3a8   : > { %v2271_v13 = vmul.f32 %v2246_v20, %v2175_v49  ;;  %v2196_v58 = vpop.permute.xlu1 %2195  ;;  %2110 = vst.msk [vmem:[%s3585_s9 + $0x60] sm:$0xff] %vm5036_vm4, %v2094_v22 }
 0x3a9   : > { %v2261_v21 = vmul.f32 %v2196_v58, %v2165_v23  ;;  %v2191_v8 = vpop.permute.xlu0 %2190 }
 0x3aa   : > { %v3336_v30 = vpop.eup %3335  ;;  %v2316_v46 = vmul.f32 1.442695, %v2271_v13  ;;  %v2260_v55 = vmul.f32 %v2191_v8, %v2164_v17  ;;  %vm2287_vm14 = vcmp.gt.f32.partialorder %v2271_v13, 0.0 }
 0x3ab   : > { %v3338_v43 = vpop.eup %3337  ;;  %v2296_v26 = vmul.f32 1.442695, %v2261_v21  ;;  %v2985_v4 = vadd.f32 -1.0, %v3336_v30  ;;  %vm2277_vm5 = vcmp.gt.f32.partialorder %v2261_v21, 0.0  ;;  %v2485_v30 = vld [vmem:[#allocation2 + $0x110] sm:$0xff] }
 0x3ac   : > { %v3340_v62 = vpop.eup %3339  ;;  %3341 = vpow2.f32 %v2316_v46  ;;  %v2294_v39 = vmul.f32 1.442695, %v2260_v55  ;;  %v2975_v3 = vadd.f32 -1.0, %v3338_v43  ;;  %vm2276_vm11 = vcmp.gt.f32.partialorder %v2260_v55, 0.0 }
 0x3ad   : > { %v2974_v61 = vadd.f32 -1.0, %v3340_v62  ;;  %3343 = vpow2.f32 %v2296_v26  ;;  %v2348_v35 = vsel %vm2284_vm12, %v2268_v6, %v2985_v4  ;;  %v2177_v26 = vld [vmem:[#allocation2 + $0xf8] sm:$0xff]  ;;  %v2176_v62 = vld [vmem:[#allocation2 + $0xf0] sm:$0xff] }
 0x3ae   : > { %3345 = vpow2.f32 %v2294_v39  ;;  %v2338_v1 = vsel %vm2274_vm15, %v2258_v56, %v2975_v3  ;;  %2390 = vrot.lane.b32.xlu0 %v2348_v35, %s3478_s17 }
 0x3af   : > { %2370 = vrot.lane.b32.xlu2 %v2338_v1, %s3478_s17  ;;  %v2097_v18 = vsel %vm2033_vm1, %v2017_v45, %v2974_v61  ;;  %3347 = vrcp.f32 %v2457_v0  ;;  %v2512_v22 = vpop.permute.xlu2 %2511 }
 0x3b0   : > { %v2211_v48 = vpop.permute.xlu1 %2210  ;;  %2113 = vst.msk [vmem:[%s3585_s9 + $0x78] sm:$0xff] %vm5037_vm10, %v2097_v18  ;;  %v2581_v39 = vmul.f32 %v2512_v22, %v2485_v30  ;;  %v2487_v30 = vld [vmem:[#allocation2 + $0x120] sm:$0xff] }
 0x3b1   : > { %v2264_v47 = vmul.f32 %v2211_v48, %v2168_v19  ;;  %v2206_v44 = vpop.permute.xlu0 %2205 }
 0x3b2   : > { %v3342_v16 = vpop.eup %3341  ;;  %v2263_v9 = vmul.f32 %v2206_v44, %v2167_v51  ;;  %v2615_v0 = vmul.f32 1.442695, %v2581_v39  ;;  %vm2597_vm4 = vcmp.gt.f32.partialorder %v2581_v39, 0.0 }
 0x3b3   : > { %v3344_v32 = vpop.eup %3343  ;;  %v2302_v63 = vmul.f32 1.442695, %v2264_v47  ;;  %v2988_v41 = vadd.f32 -1.0, %v3342_v16  ;;  %vm2280_vm0 = vcmp.gt.f32.partialorder %v2264_v47, 0.0  ;;  %v2488_v16 = vld [vmem:[#allocation2 + $0x128] sm:$0xff] }
 0x3b4   : > { %v3346_v53 = vpop.eup %3345  ;;  %v2300_v12 = vmul.f32 1.442695, %v2263_v9  ;;  %v2978_v38 = vadd.f32 -1.0, %v3344_v32  ;;  %vm2279_vm13 = vcmp.gt.f32.partialorder %v2263_v9, 0.0 }
 0x3b5   : > { %3349 = vpow2.f32 %v2302_v63  ;;  %v2351_v37 = vsel %vm2287_vm14, %v2271_v13, %v2988_v41  ;;  %v2977_v57 = vadd.f32 -1.0, %v3346_v53  ;;  %v3348_v6 = vpop.eup %3347  ;;  %v2443_v53 = vld [vmem:[#allocation3 + $0x140] sm:$0xff] }
 0x3b6   : > { %3351 = vpow2.f32 %v2300_v12  ;;  %v2341_v10 = vsel %vm2277_vm5, %v2261_v21, %v2978_v38  ;;  %2396 = vrot.lane.b32.xlu0 %v2351_v37, %s3478_s17  ;;  %v2442_v38 = vld [vmem:[#allocation3 + $0x138] sm:$0xff]  ;;  %vm2418_vm5 = vcmask 261248  }
 0x3b7   : > { %2376 = vrot.lane.b32.xlu2 %v2341_v10, %s3478_s17  ;;  %v2340_v14 = vsel %vm2276_vm11, %v2260_v55, %v2977_v57  ;;  %3353 = vrcp.f32 %v2460_v54  ;;  %v2450_v55 = vld [vmem:[#allocation3 + $0x178] sm:$0xff]  ;;  %v2459_v57 = vmax.f32 %v2443_v53, 1e-12  ;;  %v2458_v10 = vmax.f32 %v2442_v38, 1e-12 }
 0x3b8   : > { %2374 = vrot.lane.b32.xlu1 %v2340_v14, %s3478_s17  ;;  %v2226_v5 = vpop.permute.xlu1 %2225  ;;  %v2466_v61 = vmax.f32 %v2450_v55, 1e-12  ;;  %v2486_v55 = vld [vmem:[#allocation2 + $0x118] sm:$0xff] }
 0x3b9   : > { %v2267_v36 = vmul.f32 %v2226_v5, %v2171_v28  ;;  %v2221_v52 = vpop.permute.xlu0 %2220 }
 0x3ba   : > { %v2266_v33 = vmul.f32 %v2221_v52, %v2170_v29 }
 0x3bb   : > { %v3350_v56 = vpop.eup %3349  ;;  %v2308_v7 = vmul.f32 1.442695, %v2267_v36  ;;  %vm2283_vm2 = vcmp.gt.f32.partialorder %v2267_v36, 0.0 }
 0x3bc   : > { %v3352_v42 = vpop.eup %3351  ;;  %v2306_v27 = vmul.f32 1.442695, %v2266_v33  ;;  %v2981_v45 = vadd.f32 -1.0, %v3350_v56  ;;  %vm2282_vm6 = vcmp.gt.f32.partialorder %v2266_v33, 0.0 }
 0x3bd   : > { %3355 = vpow2.f32 %v2308_v7  ;;  %v2980_v60 = vadd.f32 -1.0, %v3352_v42  ;;  %v3354_v11 = vpop.eup %3353 }
 0x3be   : > { %3357 = vpow2.f32 %v2306_v27  ;;  %v2344_v50 = vsel %vm2280_vm0, %v2264_v47, %v2981_v45  ;;  %2531 = vperm.xlu0 %3220, %v3348_v6   ;;  %v2446_v6 = vld [vmem:[#allocation3 + $0x158] sm:$0xff] }
 0x3bf   : > { %2382 = vrot.lane.b32.xlu2 %v2344_v50, %s3478_s17  ;;  %v2343_v40 = vsel %vm2279_vm13, %v2263_v9, %v2980_v60  ;;  %3359 = vrcp.f32 %v2463_v59  ;;  %v2527_v9 = vpop.permute.xlu2 %2526  ;;  %v2462_v7 = vmax.f32 %v2446_v6, 1e-12  ;;  %v2448_v59 = vld [vmem:[#allocation3 + $0x168] sm:$0xff] }
 0x3c0   : > { %2380 = vrot.lane.b32.xlu1 %v2343_v40, %s3478_s17  ;;  %v2241_v15 = vpop.permute.xlu1 %2240  ;;  %v2584_v12 = vmul.f32 %v2527_v9, %v2488_v16  ;;  %v2484_v40 = vld [vmem:[#allocation2 + $0x108] sm:$0xff] }
 0x3c1   : > { %v2270_v49 = vmul.f32 %v2241_v15, %v2174_v25  ;;  %v2236_v23 = vpop.permute.xlu0 %2235  ;;  %v2449_v15 = vld [vmem:[#allocation3 + $0x170] sm:$0xff]  ;;  %v2492_v6 = vld [vmem:[#allocation2 + $0x148] sm:$0xff] }
 0x3c2   : > { %v2269_v20 = vmul.f32 %v2236_v23, %v2173_v2  ;;  %v2621_v14 = vmul.f32 1.442695, %v2584_v12  ;;  %v2483_v2 = vld [vmem:[#allocation2 + $0x100] sm:$0xff]  ;;  %vm2600_vm12 = vcmp.gt.f32.partialorder %v2584_v12, 0.0 }
 0x3c3   : > { %v3356_v17 = vpop.eup %3355  ;;  %v2314_v13 = vmul.f32 1.442695, %v2270_v49  ;;  %vm2286_vm7 = vcmp.gt.f32.partialorder %v2270_v49, 0.0 }
 0x3c4   : > { %v3358_v58 = vpop.eup %3357  ;;  %v2312_v21 = vmul.f32 1.442695, %v2269_v20  ;;  %v2984_v8 = vadd.f32 -1.0, %v3356_v17  ;;  %vm2285_vm8 = vcmp.gt.f32.partialorder %v2269_v20, 0.0  ;;  %v2464_v17 = vmax.f32 %v2448_v59, 1e-12 }
 0x3c5   : > { %3361 = vpow2.f32 %v2314_v13  ;;  %v2983_v46 = vadd.f32 -1.0, %v3358_v58  ;;  %v3360_v1 = vpop.eup %3359 }
 0x3c6   : > { %3363 = vpow2.f32 %v2312_v21  ;;  %v2347_v43 = vsel %vm2283_vm2, %v2267_v36, %v2984_v8  ;;  %2546 = vperm.xlu0 %3220, %v3354_v11  }
 0x3c7   : > { %2388 = vrot.lane.b32.xlu2 %v2347_v43, %s3478_s17  ;;  %v2346_v4 = vsel %vm2282_vm6, %v2266_v33, %v2983_v46  ;;  %3365 = vrcp.f32 %v2466_v61  ;;  %v2445_v33 = vld [vmem:[#allocation3 + $0x150] sm:$0xff] }
 0x3c8   : > { %2386 = vrot.lane.b32.xlu1 %v2346_v4, %s3478_s17  ;;  %v2256_v3 = vpop.permute.xlu1 %2255  ;;  %v2461_v42 = vmax.f32 %v2445_v33, 1e-12  ;;  %v2491_v33 = vld [vmem:[#allocation2 + $0x140] sm:$0xff] }
 0x3c9   : > { %v2273_v35 = vmul.f32 %v2256_v3, %v2177_v26  ;;  %v2251_v24 = vpop.permute.xlu0 %2250 }
 0x3ca   : > { %v2272_v19 = vmul.f32 %v2251_v24, %v2176_v62 }
 0x3cb   : > { %v3362_v51 = vpop.eup %3361  ;;  %v2320_v18 = vmul.f32 1.442695, %v2273_v35  ;;  %vm2289_vm3 = vcmp.gt.f32.partialorder %v2273_v35, 0.0 }
 0x3cc   : > { %v3364_v48 = vpop.eup %3363  ;;  %v2318_v47 = vmul.f32 1.442695, %v2272_v19  ;;  %v2987_v44 = vadd.f32 -1.0, %v3362_v51  ;;  %vm2288_vm9 = vcmp.gt.f32.partialorder %v2272_v19, 0.0 }
 0x3cd   : > { %3367 = vpow2.f32 %v2320_v18  ;;  %v2986_v32 = vadd.f32 -1.0, %v3364_v48  ;;  %v3366_v37 = vpop.eup %3365 }
 0x3ce   : > { %3369 = vpow2.f32 %v2318_v47  ;;  %v2350_v63 = vsel %vm2286_vm7, %v2270_v49, %v2987_v44  ;;  %2561 = vperm.xlu0 %3220, %v3360_v1   ;;  %vm2739_vm7 = vcmask 392448  }
 0x3cf   : > { %2394 = vrot.lane.b32.xlu2 %v2350_v63, %s3478_s17  ;;  %v2349_v41 = vsel %vm2285_vm8, %v2269_v20, %v2986_v32  ;;  %3371 = vpow2.f32 %v2615_v0  ;;  %v2465_v20 = vmax.f32 %v2449_v15, 1e-12  ;;  %v2494_v15 = vld [vmem:[#allocation2 + $0x158] sm:$0xff] }
 0x3d0   : > { %2392 = vrot.lane.b32.xlu1 %v2349_v41, %s3478_s17  ;;  %3373 = vrcp.f32 %v2459_v57  ;;  %v2507_v45 = vpop.permute.xlu1 %2506 }
 0x3d1   : > { %3375 = vrcp.f32 %v2458_v10  ;;  %v2502_v34 = vpop.permute.xlu0 %2501  ;;  %v2580_v49 = vmul.f32 %v2507_v45, %v2484_v40 }
 0x3d2   : > { %3377 = vpow2.f32 %v2621_v14  ;;  %v2579_v11 = vmul.f32 %v2502_v34, %v2483_v2  ;;  %v2489_v14 = vld [vmem:[#allocation2 + $0x130] sm:$0xff]  ;;  %v2495_v2 = vld [vmem:[#allocation2 + $0x160] sm:$0xff] }
 0x3d3   : > { %v3368_v31 = vpop.eup %3367  ;;  %3379 = vrcp.f32 %v2462_v7  ;;  %v2613_v58 = vmul.f32 1.442695, %v2580_v49  ;;  %vm2596_vm15 = vcmp.gt.f32.partialorder %v2580_v49, 0.0 }
 0x3d4   : > { %v3370_v28 = vpop.eup %3369  ;;  %v2990_v29 = vadd.f32 -1.0, %v3368_v31  ;;  %3381 = vrcp.f32 %v2461_v42  ;;  %v2611_v8 = vmul.f32 1.442695, %v2579_v11  ;;  %vm2595_vm1 = vcmp.gt.f32.partialorder %v2579_v11, 0.0 }
 0x3d5   : > { %v2989_v5 = vadd.f32 -1.0, %v3370_v28  ;;  %v3372_v54 = vpop.eup %3371  ;;  %3383 = vrcp.f32 %v2465_v20 }
 0x3d6   : > { %v2353_v36 = vsel %vm2289_vm3, %v2273_v35, %v2990_v29  ;;  %2576 = vperm.xlu0 %3220, %v3366_v37   ;;  %v2993_v56 = vadd.f32 -1.0, %v3372_v54  ;;  %v3374_v27 = vpop.eup %3373  ;;  %3385 = vrcp.f32 %v2464_v17 }
 0x3d7   : > { %2400 = vrot.lane.b32.xlu2 %v2353_v36, %s3478_s17  ;;  %v2352_v52 = vsel %vm2288_vm9, %v2272_v19, %v2989_v5  ;;  %v3376_v60 = vpop.eup %3375  ;;  %3387 = vpow2.f32 %v2613_v58 }
 0x3d8   : > { %2398 = vrot.lane.b32.xlu1 %v2352_v52, %s3478_s17  ;;  %v2661_v50 = vsel %vm2597_vm4, %v2581_v39, %v2993_v56  ;;  %v3378_v25 = vpop.eup %3377  ;;  %v2522_v46 = vpop.permute.xlu1 %2521  ;;  %3389 = vpow2.f32 %v2611_v8 }
 0x3d9   : > { %v2996_v23 = vadd.f32 -1.0, %v3378_v25  ;;  %v3380_v22 = vpop.eup %3379  ;;  %v2517_v43 = vpop.permute.xlu0 %2516  ;;  %v2583_v26 = vmul.f32 %v2522_v46, %v2487_v30  ;;  %v2498_v46 = vld [vmem:[#allocation2 + $0x178] sm:$0xff] }
 0x3da   : > { %v3382_v13 = vpop.eup %3381  ;;  %v2582_v4 = vmul.f32 %v2517_v43, %v2486_v55  ;;  %v2497_v43 = vld [vmem:[#allocation2 + $0x170] sm:$0xff] }
 0x3db   : > { %v2664_v21 = vsel %vm2600_vm12, %v2584_v12, %v2996_v23  ;;  %v3384_v62 = vpop.eup %3383  ;;  %v2619_v3 = vmul.f32 1.442695, %v2583_v26  ;;  %vm2599_vm10 = vcmp.gt.f32.partialorder %v2583_v26, 0.0 }
 0x3dc   : > { %v3386_v39 = vpop.eup %3385  ;;  %v2617_v61 = vmul.f32 1.442695, %v2582_v4  ;;  %vm2598_vm14 = vcmp.gt.f32.partialorder %v2582_v4, 0.0 }
 0x3dd   : > { %v3388_v35 = vpop.eup %3387  ;;  %3391 = vpow2.f32 %v2619_v3 }
 0x3de   : > { %2695 = vrot.lane.b32.xlu0 %v2661_v50, %s3479_s25  ;;  %v3390_v24 = vpop.eup %3389  ;;  %3393 = vpow2.f32 %v2617_v61  ;;  %v2992_v1 = vadd.f32 -1.0, %v3388_v35 }
 0x3df   : > { %2541 = vperm.xlu2 %3222, %v3374_v27   ;;  %v2991_v19 = vadd.f32 -1.0, %v3390_v24 }
 0x3e0   : > { %2536 = vperm.xlu1 %3221, %v3376_v60   ;;  %v2660_v51 = vsel %vm2596_vm15, %v2580_v49, %v2992_v1 }
 0x3e1   : > { %v2659_v48 = vsel %vm2595_vm1, %v2579_v11, %v2991_v19 }
 0x3e3   : > { %v3392_v18 = vpop.eup %3391 }
 0x3e4   : > { %v3394_v0 = vpop.eup %3393  ;;  %v2995_v47 = vadd.f32 -1.0, %v3392_v18 }
 0x3e5   : > { %v2994_v44 = vadd.f32 -1.0, %v3394_v0  ;;  %v2490_v0 = vld [vmem:[#allocation2 + $0x138] sm:$0xff] }
 0x3e6   : > { %2701 = vrot.lane.b32.xlu0 %v2664_v21, %s3479_s25  ;;  %v2663_v16 = vsel %vm2599_vm10, %v2583_v26, %v2995_v47 }
 0x3e7   : > { %2556 = vperm.xlu2 %3222, %v3380_v22   ;;  %v2662_v9 = vsel %vm2598_vm14, %v2582_v4, %v2994_v44 }
 0x3e8   : > { %2551 = vperm.xlu1 %3221, %v3382_v13  }
 0x3ef   : > { %2571 = vperm.xlu2 %3222, %v3384_v62  }
 0x3f0   : > { %2566 = vperm.xlu1 %3221, %v3386_v39  }
 0x3f7   : > { %2693 = vrot.lane.b32.xlu2 %v2660_v51, %s3479_s25 }
 0x3f8   : > { %2691 = vrot.lane.b32.xlu1 %v2659_v48, %s3479_s25 }
 0x3ff   : > { %2699 = vrot.lane.b32.xlu2 %v2663_v16, %s3479_s25 }
 0x400   : > { %2697 = vrot.lane.b32.xlu1 %v2662_v9, %s3479_s25 }
 0x408   : > { %v2373_v32 = vpop.permute.xlu0 %2372 }
 0x409   : > { %v2371_v63 = vpop.permute.xlu2 %2370  ;;  %2420 = vst.msk [vmem:[%s3585_s9 + $0x8] sm:$0xff] %vm2418_vm5, %v2373_v32 }
 0x40a   : > { %2419 = vst.msk [vmem:[%s3585_s9] sm:$0xff] %vm2418_vm5, %v2371_v63 }
 0x410   : > { %v2379_v41 = vpop.permute.xlu0 %2378 }
 0x411   : > { %v2377_v53 = vpop.permute.xlu2 %2376  ;;  %2423 = vst.msk [vmem:[%s3585_s9 + $0x20] sm:$0xff] %vm2418_vm5, %v2379_v41 }
 0x412   : > { %2422 = vst.msk [vmem:[%s3585_s9 + $0x18] sm:$0xff] %vm2418_vm5, %v2377_v53 }
 0x418   : > { %v2385_v12 = vpop.permute.xlu0 %2384 }
 0x419   : > { %v2383_v38 = vpop.permute.xlu2 %2382  ;;  %2426 = vst.msk [vmem:[%s3585_s9 + $0x38] sm:$0xff] %vm2418_vm5, %v2385_v12 }
 0x41a   : > { %2425 = vst.msk [vmem:[%s3585_s9 + $0x30] sm:$0xff] %vm2418_vm5, %v2383_v38 }
 0x420   : > { %v2391_v37 = vpop.permute.xlu0 %2390 }
 0x421   : > { %v2389_v57 = vpop.permute.xlu2 %2388  ;;  %2429 = vst.msk [vmem:[%s3585_s9 + $0x50] sm:$0xff] %vm2418_vm5, %v2391_v37 }
 0x422   : > { %2428 = vst.msk [vmem:[%s3585_s9 + $0x48] sm:$0xff] %vm2418_vm5, %v2389_v57  ;;  %v2493_v57 = vld [vmem:[#allocation2 + $0x150] sm:$0xff] }
 0x428   : > { %v2397_v31 = vpop.permute.xlu0 %2396 }
 0x429   : > { %v2395_v10 = vpop.permute.xlu2 %2394  ;;  %2432 = vst.msk [vmem:[%s3585_s9 + $0x68] sm:$0xff] %vm2418_vm5, %v2397_v31 }
 0x42a   : > { %2431 = vst.msk [vmem:[%s3585_s9 + $0x60] sm:$0xff] %vm2418_vm5, %v2395_v10  ;;  %v2375_v28 = vpop.permute.xlu1 %2374 }
 0x42b   : > { %2421 = vst.msk [vmem:[%s3585_s9 + $0x10] sm:$0xff] %vm2418_vm5, %v2375_v28 }
 0x430   : > { %v2532_v29 = vpop.permute.xlu0 %2531 }
 0x431   : > { %v2401_v5 = vpop.permute.xlu2 %2400  ;;  %v2585_v54 = vmul.f32 %v2532_v29, %v2489_v14 }
 0x432   : > { %2434 = vst.msk [vmem:[%s3585_s9 + $0x78] sm:$0xff] %vm2418_vm5, %v2401_v5  ;;  %v2381_v36 = vpop.permute.xlu1 %2380 }
 0x433   : > { %2424 = vst.msk [vmem:[%s3585_s9 + $0x28] sm:$0xff] %vm2418_vm5, %v2381_v36  ;;  %v2623_v52 = vmul.f32 1.442695, %v2585_v54  ;;  %vm2601_vm11 = vcmp.gt.f32.partialorder %v2585_v54, 0.0 }
 0x435   : > { %3395 = vpow2.f32 %v2623_v52  ;;  %v2496_v52 = vld [vmem:[#allocation2 + $0x168] sm:$0xff] }
 0x438   : > { %v2547_v56 = vpop.permute.xlu0 %2546 }
 0x439   : > { %v2542_v7 = vpop.permute.xlu2 %2541  ;;  %v2588_v42 = vmul.f32 %v2547_v56, %v2492_v6 }
 0x43a   : > { %v2587_v27 = vmul.f32 %v2542_v7, %v2491_v33  ;;  %v2387_v45 = vpop.permute.xlu1 %2386 }
 0x43b   : > { %v3396_v60 = vpop.eup %3395  ;;  %2427 = vst.msk [vmem:[%s3585_s9 + $0x40] sm:$0xff] %vm2418_vm5, %v2387_v45  ;;  %v2629_v34 = vmul.f32 1.442695, %v2588_v42  ;;  %vm2604_vm0 = vcmp.gt.f32.partialorder %v2588_v42, 0.0 }
 0x43c   : > { %v2627_v50 = vmul.f32 1.442695, %v2587_v27  ;;  %v2997_v25 = vadd.f32 -1.0, %v3396_v60  ;;  %vm2603_vm13 = vcmp.gt.f32.partialorder %v2587_v27, 0.0 }
 0x43d   : > { %3397 = vpow2.f32 %v2629_v34 }
 0x43e   : > { %3399 = vpow2.f32 %v2627_v50  ;;  %v2665_v40 = vsel %vm2601_vm11, %v2585_v54, %v2997_v25 }
 0x43f   : > { %2703 = vrot.lane.b32.xlu1 %v2665_v40, %s3479_s25 }
 0x440   : > { %v2562_v59 = vpop.permute.xlu0 %2561 }
 0x441   : > { %v2557_v49 = vpop.permute.xlu2 %2556  ;;  %v2591_v23 = vmul.f32 %v2562_v59, %v2495_v2 }
 0x442   : > { %v2590_v11 = vmul.f32 %v2557_v49, %v2494_v15  ;;  %v2393_v20 = vpop.permute.xlu1 %2392 }
 0x443   : > { %v3398_v17 = vpop.eup %3397  ;;  %2430 = vst.msk [vmem:[%s3585_s9 + $0x58] sm:$0xff] %vm2418_vm5, %v2393_v20  ;;  %v2635_v22 = vmul.f32 1.442695, %v2591_v23  ;;  %vm2607_vm2 = vcmp.gt.f32.partialorder %v2591_v23, 0.0 }
 0x444   : > { %v3400_v13 = vpop.eup %3399  ;;  %v2633_v58 = vmul.f32 1.442695, %v2590_v11  ;;  %v3000_v21 = vadd.f32 -1.0, %v3398_v17  ;;  %vm2606_vm6 = vcmp.gt.f32.partialorder %v2590_v11, 0.0 }
 0x445   : > { %3401 = vpow2.f32 %v2635_v22  ;;  %v2999_v8 = vadd.f32 -1.0, %v3400_v13 }
 0x446   : > { %3403 = vpow2.f32 %v2633_v58  ;;  %v2668_v30 = vsel %vm2604_vm0, %v2588_v42, %v3000_v21 }
 0x447   : > { %v2667_v55 = vsel %vm2603_vm13, %v2587_v27, %v2999_v8  ;;  %2709 = vrot.lane.b32.xlu1 %v2668_v30, %s3479_s25 }
 0x448   : > { %2707 = vrot.lane.b32.xlu0 %v2667_v55, %s3479_s25  ;;  %v2577_v26 = vpop.permute.xlu0 %2576 }
 0x449   : > { %v2572_v4 = vpop.permute.xlu2 %2571  ;;  %v2594_v62 = vmul.f32 %v2577_v26, %v2498_v46 }
 0x44a   : > { %v2593_v39 = vmul.f32 %v2572_v4, %v2497_v43  ;;  %v2399_v3 = vpop.permute.xlu1 %2398 }
 0x44b   : > { %v3402_v61 = vpop.eup %3401  ;;  %2433 = vst.msk [vmem:[%s3585_s9 + $0x70] sm:$0xff] %vm2418_vm5, %v2399_v3  ;;  %v2641_v35 = vmul.f32 1.442695, %v2594_v62  ;;  %vm2610_vm8 = vcmp.gt.f32.partialorder %v2594_v62, 0.0 }
 0x44c   : > { %v3404_v24 = vpop.eup %3403  ;;  %v2639_v1 = vmul.f32 1.442695, %v2593_v39  ;;  %v3003_v19 = vadd.f32 -1.0, %v3402_v61  ;;  %vm2609_vm3 = vcmp.gt.f32.partialorder %v2593_v39, 0.0 }
 0x44d   : > { %3405 = vpow2.f32 %v2641_v35  ;;  %v3002_v51 = vadd.f32 -1.0, %v3404_v24 }
 0x44e   : > { %3407 = vpow2.f32 %v2639_v1  ;;  %v2671_v18 = vsel %vm2607_vm2, %v2591_v23, %v3003_v19 }
 0x44f   : > { %v2670_v48 = vsel %vm2606_vm6, %v2590_v11, %v3002_v51  ;;  %2715 = vrot.lane.b32.xlu1 %v2671_v18, %s3479_s25 }
 0x450   : > { %2713 = vrot.lane.b32.xlu0 %v2670_v48, %s3479_s25  ;;  %v2696_v47 = vpop.permute.xlu0 %2695 }
 0x451   : > { %v2694_v44 = vpop.permute.xlu2 %2693  ;;  %2742 = vst.msk [vmem:[%s3585_s9 + $0x10] sm:$0xff] %vm2739_vm7, %v2696_v47 }
 0x452   : > { %2741 = vst.msk [vmem:[%s3585_s9 + $0x8] sm:$0xff] %vm2739_vm7, %v2694_v44  ;;  %v2537_v16 = vpop.permute.xlu1 %2536 }
 0x453   : > { %v3406_v9 = vpop.eup %3405  ;;  %v2586_v32 = vmul.f32 %v2537_v16, %v2490_v0 }
 0x454   : > { %v3408_v63 = vpop.eup %3407  ;;  %v3006_v41 = vadd.f32 -1.0, %v3406_v9 }
 0x455   : > { %v2625_v53 = vmul.f32 1.442695, %v2586_v32  ;;  %v3005_v12 = vadd.f32 -1.0, %v3408_v63  ;;  %vm2602_vm9 = vcmp.gt.f32.partialorder %v2586_v32, 0.0 }
 0x456   : > { %v2674_v38 = vsel %vm2610_vm8, %v2594_v62, %v3006_v41 }
 0x457   : > { %3409 = vpow2.f32 %v2625_v53  ;;  %v2673_v37 = vsel %vm2609_vm3, %v2593_v39, %v3005_v12  ;;  %2721 = vrot.lane.b32.xlu1 %v2674_v38, %s3479_s25 }
 0x458   : > { %2719 = vrot.lane.b32.xlu0 %v2673_v37, %s3479_s25  ;;  %v2702_v31 = vpop.permute.xlu0 %2701 }
 0x459   : > { %v2700_v10 = vpop.permute.xlu2 %2699  ;;  %2745 = vst.msk [vmem:[%s3585_s9 + $0x28] sm:$0xff] %vm2739_vm7, %v2702_v31 }
 0x45a   : > { %2744 = vst.msk [vmem:[%s3585_s9 + $0x20] sm:$0xff] %vm2739_vm7, %v2700_v10  ;;  %v2552_v28 = vpop.permute.xlu1 %2551 }
 0x45b   : > { %v2589_v14 = vmul.f32 %v2552_v28, %v2493_v57 }
 0x45d   : > { %v3410_v29 = vpop.eup %3409  ;;  %v2631_v5 = vmul.f32 1.442695, %v2589_v14  ;;  %vm2605_vm4 = vcmp.gt.f32.partialorder %v2589_v14, 0.0 }
 0x45e   : > { %v2998_v54 = vadd.f32 -1.0, %v3410_v29 }
 0x45f   : > { %3411 = vpow2.f32 %v2631_v5 }
 0x460   : > { %v2666_v36 = vsel %vm2602_vm9, %v2586_v32, %v2998_v54 }
 0x461   : > { %2705 = vrot.lane.b32.xlu2 %v2666_v36, %s3479_s25 }
 0x462   : > { %v2567_v6 = vpop.permute.xlu1 %2566 }
 0x463   : > { %v2592_v33 = vmul.f32 %v2567_v6, %v2496_v52 }
 0x465   : > { %v3412_v56 = vpop.eup %3411  ;;  %v2637_v7 = vmul.f32 1.442695, %v2592_v33  ;;  %vm2608_vm12 = vcmp.gt.f32.partialorder %v2592_v33, 0.0 }
 0x466   : > { %v3001_v42 = vadd.f32 -1.0, %v3412_v56 }
 0x467   : > { %3413 = vpow2.f32 %v2637_v7 }
 0x468   : > { %v2669_v27 = vsel %vm2605_vm4, %v2589_v14, %v3001_v42 }
 0x469   : > { %2711 = vrot.lane.b32.xlu2 %v2669_v27, %s3479_s25 }
 0x46a   : > { %v2692_v45 = vpop.permute.xlu1 %2691 }
 0x46b   : > { %2740 = vst.msk [vmem:[%s3585_s9] sm:$0xff] %vm2739_vm7, %v2692_v45 }
 0x46d   : > { %v3414_v60 = vpop.eup %3413 }
 0x46e   : > { %v3004_v34 = vadd.f32 -1.0, %v3414_v60 }
 0x470   : > { %v2672_v50 = vsel %vm2608_vm12, %v2592_v33, %v3004_v34 }
 0x471   : > { %2717 = vrot.lane.b32.xlu2 %v2672_v50, %s3479_s25 }
 0x472   : > { %v2698_v25 = vpop.permute.xlu1 %2697 }
 0x473   : > { %2743 = vst.msk [vmem:[%s3585_s9 + $0x18] sm:$0xff] %vm2739_vm7, %v2698_v25 }
 0x4b1   : > { %v2704_v40 = vpop.permute.xlu1 %2703 }
 0x4b2   : > { %2746 = vst.msk [vmem:[%s3585_s9 + $0x30] sm:$0xff] %vm2739_vm7, %v2704_v40 }
 0x4b9   : > { %v2710_v2 = vpop.permute.xlu1 %2709 }
 0x4ba   : > { %2749 = vst.msk [vmem:[%s3585_s9 + $0x48] sm:$0xff] %vm2739_vm7, %v2710_v2  ;;  %v2708_v15 = vpop.permute.xlu0 %2707 }
 0x4bb   : > { %v2706_v59 = vpop.permute.xlu2 %2705  ;;  %2748 = vst.msk [vmem:[%s3585_s9 + $0x40] sm:$0xff] %vm2739_vm7, %v2708_v15 }
 0x4bc   : > { %2747 = vst.msk [vmem:[%s3585_s9 + $0x38] sm:$0xff] %vm2739_vm7, %v2706_v59 }
 0x4c1   : > { %v2716_v49 = vpop.permute.xlu1 %2715 }
 0x4c2   : > { %2752 = vst.msk [vmem:[%s3585_s9 + $0x60] sm:$0xff] %vm2739_vm7, %v2716_v49  ;;  %v2714_v23 = vpop.permute.xlu0 %2713 }
 0x4c3   : > { %v2712_v11 = vpop.permute.xlu2 %2711  ;;  %2751 = vst.msk [vmem:[%s3585_s9 + $0x58] sm:$0xff] %vm2739_vm7, %v2714_v23 }
 0x4c4   : > { %2750 = vst.msk [vmem:[%s3585_s9 + $0x50] sm:$0xff] %vm2739_vm7, %v2712_v11 }
 0x4c9   : > { %v2722_v20 = vpop.permute.xlu1 %2721 }
 0x4ca   : > { %2755 = vst.msk [vmem:[%s3585_s9 + $0x78] sm:$0xff] %vm2739_vm7, %v2722_v20  ;;  %v2720_v17 = vpop.permute.xlu0 %2719 }
 0x4cb   : > { %v2718_v22 = vpop.permute.xlu2 %2717  ;;  %2754 = vst.msk [vmem:[%s3585_s9 + $0x70] sm:$0xff] %vm2739_vm7, %v2720_v17 }
 0x4cc   : > { %2753 = vst.msk [vmem:[%s3585_s9 + $0x68] sm:$0xff] %vm2739_vm7, %v2718_v22 }
 0x4cd PF: > { %s14_s21 = sadd.s32 1, %s3469_s21   ;;  %s5038_s15 = smov %s3449_s16 }
 0x4ce   : > { %p11_p1 = scmp.ge.s32.totalorder %s14_s21, 6   ;;  %s5039_s16 = smov %s3556_s28 }
 0x4cf   : > { %s5040_s17 = smov %s3461_s19  ;;  %s5041_s18 = smov %s3465_s20 }
 0x4d0   : > { %s5042_s19 = smov %s5045_s22  ;;  %s5043_s20 = smov %s5049_s23 }
 0x4d1   :  { %13 = sbr.rel (!%p11_p1) target bundleno = 4 (0x4), region = 130 }

</bundles_post_ra>
